<compile_context>
chip_gen: v5e
topology: v5e:2x2
jax: 0.10.0
libtpu: 0.0.40
codegen_flags: <defaults>
</compile_context>

<pallas_src>
import jax
import jax.numpy as jnp
from jax.experimental import pallas as pl
from jax.experimental.pallas import tpu as pltpu

EMB = 64        # UpsamplerStrong(n_output=64): true embedding channels
EMB_PAD = 128   # lane-dense channel padding carried through the head (zeros)


# ---------------------------------------------------------------------------
# Kernel 1: fused conv matmul  out = relu(A @ B + bias), bf16 in, f32 accumulate
# ---------------------------------------------------------------------------
def _conv_mm_kernel(a_ref, b_ref, bias_ref, o_ref):
    acc = jnp.dot(a_ref[...], b_ref[...], preferred_element_type=jnp.float32)
    acc = jnp.maximum(acc + bias_ref[...], 0.0)
    o_ref[...] = acc.astype(o_ref.dtype)


def conv_mm(patches, w, b):
    """relu(patches @ w + b); patches [M,K] bf16, w [K,N] bf16, b [N] f32 -> [M,N] bf16."""
    M, K = patches.shape
    _, N = w.shape
    # whole-M blocks (M <= 2048 here); split only when large enough to feed 2 TCs
    tm = M if M <= 1024 else 1024
    grid = (pl.cdiv(M, tm),)
    bias2d = b.reshape(1, N).astype(jnp.float32)
    return pl.pallas_call(
        _conv_mm_kernel,
        out_shape=jax.ShapeDtypeStruct((M, N), jnp.bfloat16),
        grid_spec=pltpu.PrefetchScalarGridSpec(
            num_scalar_prefetch=0,
            grid=grid,
            in_specs=[
                pl.BlockSpec((tm, K), lambda i: (i, 0)),
                pl.BlockSpec((K, N), lambda i: (0, 0)),
                pl.BlockSpec((1, N), lambda i: (0, 0)),
            ],
            out_specs=pl.BlockSpec((tm, N), lambda i: (i, 0)),
        ),
        compiler_params=pltpu.CompilerParams(dimension_semantics=("parallel",)),
    )(patches, w, bias2d)


# ---------------------------------------------------------------------------
# Kernel 2: fully fused FCN pyramid head (1x1 score convs + x2 bilinear skips)
# ---------------------------------------------------------------------------
def _head_pyramid_kernel(x32_ref, x16_ref, x8_ref, x4_ref,
                         w32_ref, b32_ref, w16_ref, b16_ref,
                         w8_ref, b8_ref, w4_ref, b4_ref,
                         u16_ref, u8_ref, u4_ref, o_ref):
    def bdot(a, b):
        return jnp.dot(a.astype(jnp.bfloat16), b.astype(jnp.bfloat16),
                       preferred_element_type=jnp.float32)

    t32 = bdot(x32_ref[...], w32_ref[...]) + b32_ref[...]
    t16 = bdot(x16_ref[...], w16_ref[...]) + b16_ref[...] + bdot(u16_ref[...], t32)
    t8 = bdot(x8_ref[...], w8_ref[...]) + b8_ref[...] + bdot(u8_ref[...], t16)
    t4 = bdot(x4_ref[...], w4_ref[...]) + b4_ref[...] + bdot(u4_ref[...], t8)
    # store the 1/4-scale embedding transposed (C, h4*w4) so the final x4
    # upsample can emit NCHW directly with a lane-dense (H*W) minor dimension.
    o_ref[...] = t4.T[:EMB, :].astype(o_ref.dtype)


def head_pyramid(x32f, x16f, x8f, x4f, params, consts):
    n_batch = x32f.shape[0]
    p32, c32 = x32f.shape[1:]
    p16, c16 = x16f.shape[1:]
    p8, c8 = x8f.shape[1:]
    p4, c4 = x4f.shape[1:]

    def feat_spec(p, c):
        return pl.BlockSpec((None, p, c), lambda n: (n, 0, 0))

    def full_spec(arr):
        r, c = arr.shape
        return pl.BlockSpec((r, c), lambda n: (0, 0))

    inputs = [x32f, x16f, x8f, x4f,
              params["s32_w"], params["s32_b"], params["s16_w"], params["s16_b"],
              params["s8_w"], params["s8_b"], params["s4_w"], params["s4_b"],
              consts["u16"], consts["u8"], consts["u4"]]
    in_specs = [feat_spec(p32, c32), feat_spec(p16, c16),
                feat_spec(p8, c8), feat_spec(p4, c4)] + \
               [full_spec(a) for a in inputs[4:]]

    return pl.pallas_call(
        _head_pyramid_kernel,
        out_shape=jax.ShapeDtypeStruct((n_batch, EMB, p4), jnp.bfloat16),
        grid_spec=pltpu.PrefetchScalarGridSpec(
            num_scalar_prefetch=0,
            grid=(n_batch,),
            in_specs=in_specs,
            out_specs=pl.BlockSpec((None, EMB, p4), lambda n: (n, 0, 0)),
        ),
        compiler_params=pltpu.CompilerParams(dimension_semantics=("parallel",)),
    )(*inputs)


# ---------------------------------------------------------------------------
# Kernel 3: final x4 bilinear upsample; emits (N, 64, H*W) = NCHW-flat directly
# ---------------------------------------------------------------------------
def _final_up_kernel(l4t_ref, u_ref, o_ref):
    o_ref[...] = jnp.dot(l4t_ref[...], u_ref[...],
                         preferred_element_type=jnp.float32)


def final_upsample(l4t, u_out_t, hw):
    n_batch, _, p4 = l4t.shape
    col_tile = 1024 if hw % 1024 == 0 else hw
    n_cols = hw // col_tile
    return pl.pallas_call(
        _final_up_kernel,
        out_shape=jax.ShapeDtypeStruct((n_batch, EMB, hw), jnp.float32),
        grid_spec=pltpu.PrefetchScalarGridSpec(
            num_scalar_prefetch=0,
            grid=(n_cols, n_batch),          # batch innermost: U block stays resident
            in_specs=[
                pl.BlockSpec((None, EMB, p4), lambda c, n: (n, 0, 0)),
                pl.BlockSpec((p4, col_tile), lambda c, n: (0, c)),
            ],
            out_specs=pl.BlockSpec((None, EMB, col_tile), lambda c, n: (n, 0, c)),
        ),
        compiler_params=pltpu.CompilerParams(
            dimension_semantics=("parallel", "parallel")),
    )(l4t, u_out_t)


# ---------------------------------------------------------------------------
# JAX glue: im2col (XLA layout plumbing) and bilinear interpolation matrices
# ---------------------------------------------------------------------------
def im2col(x, k=3, stride=2, pad=1):
    """x: [N,H,W,C] NHWC -> patches [N*Ho*Wo, k*k*C] (fused XLA gather, bf16)."""
    n, h, w, c = x.shape
    ho = (h + 2 * pad - k) // stride + 1
    wo = (w + 2 * pad - k) // stride + 1
    xp = jnp.pad(x, ((0, 0), (pad, pad), (pad, pad), (0, 0)))
    cols = []
    for dy in range(k):
        for dx in range(k):
            cols.append(xp[:, dy:dy + stride * ho:stride,
                           dx:dx + stride * wo:stride, :])
    patches = jnp.concatenate(cols, axis=-1)
    return patches.reshape(n * ho * wo, k * k * c), (n, ho, wo)


def bilinear_matrix(n_in, n_out):
    """Row-interp matrix matching F.interpolate(mode='bilinear', align_corners=False)."""
    scale = n_in / n_out
    dst = jnp.arange(n_out, dtype=jnp.float32)
    src = jnp.maximum((dst + 0.5) * scale - 0.5, 0.0)
    i0 = jnp.minimum(jnp.floor(src).astype(jnp.int32), n_in - 1)
    i1 = jnp.minimum(i0 + 1, n_in - 1)
    w1 = src - i0.astype(jnp.float32)
    w0 = 1.0 - w1
    m = jnp.zeros((n_out, n_in), jnp.float32)
    m = m.at[jnp.arange(n_out), i0].add(w0)
    m = m.at[jnp.arange(n_out), i1].add(w1)
    return m


def upsample_matrix(h_in, w_in, h_out, w_out):
    """Flat-pixel (row-major y*W+x) bilinear upsample: out_flat = U @ in_flat."""
    return jnp.kron(bilinear_matrix(h_in, h_out), bilinear_matrix(w_in, w_out))


def make_head_consts(H, W):
    h32, w32 = H // 32, W // 32
    h16, w16 = H // 16, W // 16
    h8, w8 = H // 8, W // 8
    h4, w4 = H // 4, W // 4
    return {
        "u16": upsample_matrix(h32, w32, h16, w16).astype(jnp.bfloat16),
        "u8": upsample_matrix(h16, w16, h8, w8).astype(jnp.bfloat16),
        "u4": upsample_matrix(h8, w8, h4, w4).astype(jnp.bfloat16),
        # transposed so the final kernel writes (C, H*W) == NCHW-flat directly
        "u_out_t": upsample_matrix(h4, w4, H, W).T.astype(jnp.bfloat16),
    }


def init_params(key, in_ch=3, widths=(16, 32, 64, 128, 256)):
    """Deterministic synthetic parameters.  widths = (c_2s, c_4s, c_8s, c_16s, c_32s)."""
    params = {}
    keys = jax.random.split(key, 16)
    chans = (in_ch,) + tuple(widths)
    for i in range(5):   # 5 stride-2 conv stages -> /2, /4, /8, /16, /32
        fan_in = 9 * chans[i]
        w = jax.random.normal(keys[i], (fan_in, chans[i + 1]), jnp.float32)
        params[f"c{i+1}_w"] = (w * jnp.sqrt(2.0 / fan_in)).astype(jnp.bfloat16)
        params[f"c{i+1}_b"] = jnp.zeros((chans[i + 1],), jnp.float32)
    # 1x1 score convs of the UpsamplerStrong head, zero-padded 64 -> 128 channels
    # (padded channels stay exactly zero through the whole skip chain).
    score_in = (("s4", widths[1]), ("s8", widths[2]),
                ("s16", widths[3]), ("s32", widths[4]))
    for j, (name, cin) in enumerate(score_in):
        w = jax.random.normal(keys[5 + j], (cin, EMB), jnp.float32) * jnp.sqrt(2.0 / cin)
        b = jax.random.normal(keys[9 + j], (EMB,), jnp.float32) * 0.01
        params[f"{name}_w"] = jnp.pad(w, ((0, 0), (0, EMB_PAD - EMB))).astype(jnp.bfloat16)
        params[f"{name}_b"] = jnp.pad(b, (0, EMB_PAD - EMB)).reshape(1, EMB_PAD)
    return params


# ---------------------------------------------------------------------------
# OneHeadStrong forward
# ---------------------------------------------------------------------------
@jax.jit
def one_head_strong_forward(params, consts, x_nchw):
    # NCHW (PyTorch) in -> NHWC / flat-pixel compute -> NCHW out.
    x = jnp.transpose(x_nchw, (0, 2, 3, 1)).astype(jnp.bfloat16)
    n, H, W, _ = x.shape

    # --- feature_extracter.extract_features (synthetic strided conv pyramid) ---
    feats = []
    cur = x
    for i in range(5):
        patches, (nb, ho, wo) = im2col(cur, k=3, stride=2, pad=1)
        y = conv_mm(patches, params[f"c{i+1}_w"], params[f"c{i+1}_b"])
        cur = y.reshape(nb, ho, wo, -1)
        feats.append(cur)
    _, x_4s, x_8s, x_16s, x_32s = feats

    # --- embedding_head.upsample (FCN skip fusion, 2 fused kernels) -----------
    def flat(t):
        nb, h_, w_, c_ = t.shape
        return t.reshape(nb, h_ * w_, c_)

    l4t = head_pyramid(flat(x_32s), flat(x_16s), flat(x_8s), flat(x_4s),
                       params, consts)                        # (N, 64, (H/4)*(W/4))
    emb_flat = final_upsample(l4t, consts["u_out_t"], H * W)  # (N, 64, H*W) f32
    embedding_mask = emb_flat.reshape(n, EMB, H, W)           # NCHW, no transpose
    return {"embedding_mask": embedding_mask}


if __name__ == "__main__":
    key = jax.random.PRNGKey(0)
    k_param, k_x = jax.random.split(key)

    N, H, W = 2, 64, 64
    params = init_params(k_param)
    consts = make_head_consts(H, W)
    x_input = jax.random.normal(k_x, (N, 3, H, W), jnp.float32)

    out = one_head_strong_forward(params, consts, x_input)
    emb = jax.block_until_ready(out["embedding_mask"])

    assert emb.shape == (N, EMB, H, W), emb.shape
    # ms.assert_no_nans(embedding_mask)
    assert not bool(jnp.isnan(emb).any())
    print("KERNEL_OK")
</pallas_src>

<mosaic_0001>
module attributes {stable_mosaic.version = 11 : i64} {
  func.func @_conv_mm_kernel(%arg0: i32, %arg1: memref<1024x27xbf16, #tpu.memory_space<vmem>>, %arg2: memref<27x16xbf16, #tpu.memory_space<vmem>>, %arg3: memref<1x16xf32, #tpu.memory_space<vmem>>, %arg4: memref<1024x16xbf16, #tpu.memory_space<vmem>>) attributes {dimension_semantics = [#tpu.dimension_semantics<parallel>], iteration_bounds = array<i64: 2>, scalar_prefetch = 0 : i64, scratch_operands = 0 : i64, tpu.core_type = #tpu.core_type<tc>, window_params = [{transform_indices = @transform_0, window_bounds = array<i64: 1024, 27>}, {pipeline_mode = #tpu.pipeline_mode<synchronous>, transform_indices = @transform_1, window_bounds = array<i64: 27, 16>}, {pipeline_mode = #tpu.pipeline_mode<synchronous>, transform_indices = @transform_2, window_bounds = array<i64: 1, 16>}, {transform_indices = @transform_3, window_bounds = array<i64: 1024, 16>}]} {
    %c0 = arith.constant 0 : index
    %c0_0 = arith.constant 0 : index
    %0 = vector.load %arg1[%c0, %c0_0] : memref<1024x27xbf16, #tpu.memory_space<vmem>>, vector<1024x27xbf16>
    %c0_1 = arith.constant 0 : index
    %c0_2 = arith.constant 0 : index
    %1 = vector.load %arg2[%c0_1, %c0_2] : memref<27x16xbf16, #tpu.memory_space<vmem>>, vector<27x16xbf16>
    %cst = arith.constant dense<0.000000e+00> : vector<1024x16xf32>
    %2 = tpu.matmul %0, %1, %cst {dimension_numbers = #tpu.dot_dimension_numbers<[1], [0], [0], [1], [0, 0, 1, 1], [], []>} : vector<1024x27xbf16>, vector<27x16xbf16>, vector<1024x16xf32> -> vector<1024x16xf32>
    %c0_3 = arith.constant 0 : index
    %c0_4 = arith.constant 0 : index
    %3 = vector.load %arg3[%c0_3, %c0_4] : memref<1x16xf32, #tpu.memory_space<vmem>>, vector<1x16xf32>
    %4 = vector.broadcast %3 : vector<1x16xf32> to vector<1024x16xf32>
    %5 = arith.addf %2, %4 : vector<1024x16xf32>
    %cst_5 = arith.constant 0.000000e+00 : f32
    %6 = vector.broadcast %cst_5 : f32 to vector<1024x16xf32>
    %7 = arith.maximumf %5, %6 : vector<1024x16xf32>
    %8 = arith.truncf %7 : vector<1024x16xf32> to vector<1024x16xbf16>
    %c0_6 = arith.constant 0 : index
    %c0_7 = arith.constant 0 : index
    %9 = vector.load %arg4[%c0_6, %c0_7] : memref<1024x16xbf16, #tpu.memory_space<vmem>>, vector<1024x16xbf16>
    tpu.vector_store %arg4[%c0_6, %c0_7], %8 {strides = array<i32>} : memref<1024x16xbf16, #tpu.memory_space<vmem>>, vector<1024x16xbf16>,
    return
  }
  func.func @transform_0(%arg0: i32) -> (i32, i32) {
    %c0_i32 = arith.constant 0 : i32
    %c0_i32_0 = arith.constant 0 : i32
    return %arg0, %c0_i32 : i32, i32
  }
  func.func @transform_1(%arg0: i32) -> (i32, i32) {
    %c0_i32 = arith.constant 0 : i32
    %c0_i32_0 = arith.constant 0 : i32
    %c0_i32_1 = arith.constant 0 : i32
    return %c0_i32, %c0_i32_0 : i32, i32
  }
  func.func @transform_2(%arg0: i32) -> (i32, i32) {
    %c0_i32 = arith.constant 0 : i32
    %c0_i32_0 = arith.constant 0 : i32
    %c0_i32_1 = arith.constant 0 : i32
    return %c0_i32, %c0_i32_0 : i32, i32
  }
  func.func @transform_3(%arg0: i32) -> (i32, i32) {
    %c0_i32 = arith.constant 0 : i32
    %c0_i32_0 = arith.constant 0 : i32
    return %arg0, %c0_i32 : i32, i32
  }
}

module attributes {stable_mosaic.version = 11 : i64} {
  func.func @_conv_mm_kernel(%arg0: i32, %arg1: memref<512x144xbf16, #tpu.memory_space<vmem>>, %arg2: memref<144x32xbf16, #tpu.memory_space<vmem>>, %arg3: memref<1x32xf32, #tpu.memory_space<vmem>>, %arg4: memref<512x32xbf16, #tpu.memory_space<vmem>>) attributes {dimension_semantics = [#tpu.dimension_semantics<parallel>], iteration_bounds = array<i64: 1>, scalar_prefetch = 0 : i64, scratch_operands = 0 : i64, tpu.core_type = #tpu.core_type<tc>, window_params = [{transform_indices = @transform_0, window_bounds = array<i64: 512, 144>}, {pipeline_mode = #tpu.pipeline_mode<synchronous>, transform_indices = @transform_1, window_bounds = array<i64: 144, 32>}, {pipeline_mode = #tpu.pipeline_mode<synchronous>, transform_indices = @transform_2, window_bounds = array<i64: 1, 32>}, {transform_indices = @transform_3, window_bounds = array<i64: 512, 32>}]} {
    %c0 = arith.constant 0 : index
    %c0_0 = arith.constant 0 : index
    %0 = vector.load %arg1[%c0, %c0_0] : memref<512x144xbf16, #tpu.memory_space<vmem>>, vector<512x144xbf16>
    %c0_1 = arith.constant 0 : index
    %c0_2 = arith.constant 0 : index
    %1 = vector.load %arg2[%c0_1, %c0_2] : memref<144x32xbf16, #tpu.memory_space<vmem>>, vector<144x32xbf16>
    %cst = arith.constant dense<0.000000e+00> : vector<512x32xf32>
    %2 = tpu.matmul %0, %1, %cst {dimension_numbers = #tpu.dot_dimension_numbers<[1], [0], [0], [1], [0, 0, 1, 1], [], []>} : vector<512x144xbf16>, vector<144x32xbf16>, vector<512x32xf32> -> vector<512x32xf32>
    %c0_3 = arith.constant 0 : index
    %c0_4 = arith.constant 0 : index
    %3 = vector.load %arg3[%c0_3, %c0_4] : memref<1x32xf32, #tpu.memory_space<vmem>>, vector<1x32xf32>
    %4 = vector.broadcast %3 : vector<1x32xf32> to vector<512x32xf32>
    %5 = arith.addf %2, %4 : vector<512x32xf32>
    %cst_5 = arith.constant 0.000000e+00 : f32
    %6 = vector.broadcast %cst_5 : f32 to vector<512x32xf32>
    %7 = arith.maximumf %5, %6 : vector<512x32xf32>
    %8 = arith.truncf %7 : vector<512x32xf32> to vector<512x32xbf16>
    %c0_6 = arith.constant 0 : index
    %c0_7 = arith.constant 0 : index
    %9 = vector.load %arg4[%c0_6, %c0_7] : memref<512x32xbf16, #tpu.memory_space<vmem>>, vector<512x32xbf16>
    tpu.vector_store %arg4[%c0_6, %c0_7], %8 {strides = array<i32>} : memref<512x32xbf16, #tpu.memory_space<vmem>>, vector<512x32xbf16>,
    return
  }
  func.func @transform_0(%arg0: i32) -> (i32, i32) {
    %c0_i32 = arith.constant 0 : i32
    %c0_i32_0 = arith.constant 0 : i32
    return %arg0, %c0_i32 : i32, i32
  }
  func.func @transform_1(%arg0: i32) -> (i32, i32) {
    %c0_i32 = arith.constant 0 : i32
    %c0_i32_0 = arith.constant 0 : i32
    %c0_i32_1 = arith.constant 0 : i32
    return %c0_i32, %c0_i32_0 : i32, i32
  }
  func.func @transform_2(%arg0: i32) -> (i32, i32) {
    %c0_i32 = arith.constant 0 : i32
    %c0_i32_0 = arith.constant 0 : i32
    %c0_i32_1 = arith.constant 0 : i32
    return %c0_i32, %c0_i32_0 : i32, i32
  }
  func.func @transform_3(%arg0: i32) -> (i32, i32) {
    %c0_i32 = arith.constant 0 : i32
    %c0_i32_0 = arith.constant 0 : i32
    return %arg0, %c0_i32 : i32, i32
  }
}

module attributes {stable_mosaic.version = 11 : i64} {
  func.func @_conv_mm_kernel(%arg0: i32, %arg1: memref<128x288xbf16, #tpu.memory_space<vmem>>, %arg2: memref<288x64xbf16, #tpu.memory_space<vmem>>, %arg3: memref<1x64xf32, #tpu.memory_space<vmem>>, %arg4: memref<128x64xbf16, #tpu.memory_space<vmem>>) attributes {dimension_semantics = [#tpu.dimension_semantics<parallel>], iteration_bounds = array<i64: 1>, scalar_prefetch = 0 : i64, scratch_operands = 0 : i64, tpu.core_type = #tpu.core_type<tc>, window_params = [{transform_indices = @transform_0, window_bounds = array<i64: 128, 288>}, {pipeline_mode = #tpu.pipeline_mode<synchronous>, transform_indices = @transform_1, window_bounds = array<i64: 288, 64>}, {pipeline_mode = #tpu.pipeline_mode<synchronous>, transform_indices = @transform_2, window_bounds = array<i64: 1, 64>}, {transform_indices = @transform_3, window_bounds = array<i64: 128, 64>}]} {
    %c0 = arith.constant 0 : index
    %c0_0 = arith.constant 0 : index
    %0 = vector.load %arg1[%c0, %c0_0] : memref<128x288xbf16, #tpu.memory_space<vmem>>, vector<128x288xbf16>
    %c0_1 = arith.constant 0 : index
    %c0_2 = arith.constant 0 : index
    %1 = vector.load %arg2[%c0_1, %c0_2] : memref<288x64xbf16, #tpu.memory_space<vmem>>, vector<288x64xbf16>
    %cst = arith.constant dense<0.000000e+00> : vector<128x64xf32>
    %2 = tpu.matmul %0, %1, %cst {dimension_numbers = #tpu.dot_dimension_numbers<[1], [0], [0], [1], [0, 0, 1, 1], [], []>} : vector<128x288xbf16>, vector<288x64xbf16>, vector<128x64xf32> -> vector<128x64xf32>
    %c0_3 = arith.constant 0 : index
    %c0_4 = arith.constant 0 : index
    %3 = vector.load %arg3[%c0_3, %c0_4] : memref<1x64xf32, #tpu.memory_space<vmem>>, vector<1x64xf32>
    %4 = vector.broadcast %3 : vector<1x64xf32> to vector<128x64xf32>
    %5 = arith.addf %2, %4 : vector<128x64xf32>
    %cst_5 = arith.constant 0.000000e+00 : f32
    %6 = vector.broadcast %cst_5 : f32 to vector<128x64xf32>
    %7 = arith.maximumf %5, %6 : vector<128x64xf32>
    %8 = arith.truncf %7 : vector<128x64xf32> to vector<128x64xbf16>
    %c0_6 = arith.constant 0 : index
    %c0_7 = arith.constant 0 : index
    %9 = vector.load %arg4[%c0_6, %c0_7] : memref<128x64xbf16, #tpu.memory_space<vmem>>, vector<128x64xbf16>
    tpu.vector_store %arg4[%c0_6, %c0_7], %8 {strides = array<i32>} : memref<128x64xbf16, #tpu.memory_space<vmem>>, vector<128x64xbf16>,
    return
  }
  func.func @transform_0(%arg0: i32) -> (i32, i32) {
    %c0_i32 = arith.constant 0 : i32
    %c0_i32_0 = arith.constant 0 : i32
    return %arg0, %c0_i32 : i32, i32
  }
  func.func @transform_1(%arg0: i32) -> (i32, i32) {
    %c0_i32 = arith.constant 0 : i32
    %c0_i32_0 = arith.constant 0 : i32
    %c0_i32_1 = arith.constant 0 : i32
    return %c0_i32, %c0_i32_0 : i32, i32
  }
  func.func @transform_2(%arg0: i32) -> (i32, i32) {
    %c0_i32 = arith.constant 0 : i32
    %c0_i32_0 = arith.constant 0 : i32
    %c0_i32_1 = arith.constant 0 : i32
    return %c0_i32, %c0_i32_0 : i32, i32
  }
  func.func @transform_3(%arg0: i32) -> (i32, i32) {
    %c0_i32 = arith.constant 0 : i32
    %c0_i32_0 = arith.constant 0 : i32
    return %arg0, %c0_i32 : i32, i32
  }
}

module attributes {stable_mosaic.version = 11 : i64} {
  func.func @_conv_mm_kernel(%arg0: i32, %arg1: memref<32x576xbf16, #tpu.memory_space<vmem>>, %arg2: memref<576x128xbf16, #tpu.memory_space<vmem>>, %arg3: memref<1x128xf32, #tpu.memory_space<vmem>>, %arg4: memref<32x128xbf16, #tpu.memory_space<vmem>>) attributes {dimension_semantics = [#tpu.dimension_semantics<parallel>], iteration_bounds = array<i64: 1>, scalar_prefetch = 0 : i64, scratch_operands = 0 : i64, tpu.core_type = #tpu.core_type<tc>, window_params = [{transform_indices = @transform_0, window_bounds = array<i64: 32, 576>}, {pipeline_mode = #tpu.pipeline_mode<synchronous>, transform_indices = @transform_1, window_bounds = array<i64: 576, 128>}, {pipeline_mode = #tpu.pipeline_mode<synchronous>, transform_indices = @transform_2, window_bounds = array<i64: 1, 128>}, {transform_indices = @transform_3, window_bounds = array<i64: 32, 128>}]} {
    %c0 = arith.constant 0 : index
    %c0_0 = arith.constant 0 : index
    %0 = vector.load %arg1[%c0, %c0_0] : memref<32x576xbf16, #tpu.memory_space<vmem>>, vector<32x576xbf16>
    %c0_1 = arith.constant 0 : index
    %c0_2 = arith.constant 0 : index
    %1 = vector.load %arg2[%c0_1, %c0_2] : memref<576x128xbf16, #tpu.memory_space<vmem>>, vector<576x128xbf16>
    %cst = arith.constant dense<0.000000e+00> : vector<32x128xf32>
    %2 = tpu.matmul %0, %1, %cst {dimension_numbers = #tpu.dot_dimension_numbers<[1], [0], [0], [1], [0, 0, 1, 1], [], []>} : vector<32x576xbf16>, vector<576x128xbf16>, vector<32x128xf32> -> vector<32x128xf32>
    %c0_3 = arith.constant 0 : index
    %c0_4 = arith.constant 0 : index
    %3 = vector.load %arg3[%c0_3, %c0_4] : memref<1x128xf32, #tpu.memory_space<vmem>>, vector<1x128xf32>
    %4 = vector.broadcast %3 : vector<1x128xf32> to vector<32x128xf32>
    %5 = arith.addf %2, %4 : vector<32x128xf32>
    %cst_5 = arith.constant 0.000000e+00 : f32
    %6 = vector.broadcast %cst_5 : f32 to vector<32x128xf32>
    %7 = arith.maximumf %5, %6 : vector<32x128xf32>
    %8 = arith.truncf %7 : vector<32x128xf32> to vector<32x128xbf16>
    %c0_6 = arith.constant 0 : index
    %c0_7 = arith.constant 0 : index
    %9 = vector.load %arg4[%c0_6, %c0_7] : memref<32x128xbf16, #tpu.memory_space<vmem>>, vector<32x128xbf16>
    tpu.vector_store %arg4[%c0_6, %c0_7], %8 {strides = array<i32>} : memref<32x128xbf16, #tpu.memory_space<vmem>>, vector<32x128xbf16>,
    return
  }
  func.func @transform_0(%arg0: i32) -> (i32, i32) {
    %c0_i32 = arith.constant 0 : i32
    %c0_i32_0 = arith.constant 0 : i32
    return %arg0, %c0_i32 : i32, i32
  }
  func.func @transform_1(%arg0: i32) -> (i32, i32) {
    %c0_i32 = arith.constant 0 : i32
    %c0_i32_0 = arith.constant 0 : i32
    %c0_i32_1 = arith.constant 0 : i32
    return %c0_i32, %c0_i32_0 : i32, i32
  }
  func.func @transform_2(%arg0: i32) -> (i32, i32) {
    %c0_i32 = arith.constant 0 : i32
    %c0_i32_0 = arith.constant 0 : i32
    %c0_i32_1 = arith.constant 0 : i32
    return %c0_i32, %c0_i32_0 : i32, i32
  }
  func.func @transform_3(%arg0: i32) -> (i32, i32) {
    %c0_i32 = arith.constant 0 : i32
    %c0_i32_0 = arith.constant 0 : i32
    return %arg0, %c0_i32 : i32, i32
  }
}

module attributes {stable_mosaic.version = 11 : i64} {
  func.func @_conv_mm_kernel(%arg0: i32, %arg1: memref<8x1152xbf16, #tpu.memory_space<vmem>>, %arg2: memref<1152x256xbf16, #tpu.memory_space<vmem>>, %arg3: memref<1x256xf32, #tpu.memory_space<vmem>>, %arg4: memref<8x256xbf16, #tpu.memory_space<vmem>>) attributes {dimension_semantics = [#tpu.dimension_semantics<parallel>], iteration_bounds = array<i64: 1>, scalar_prefetch = 0 : i64, scratch_operands = 0 : i64, tpu.core_type = #tpu.core_type<tc>, window_params = [{transform_indices = @transform_0, window_bounds = array<i64: 8, 1152>}, {pipeline_mode = #tpu.pipeline_mode<synchronous>, transform_indices = @transform_1, window_bounds = array<i64: 1152, 256>}, {pipeline_mode = #tpu.pipeline_mode<synchronous>, transform_indices = @transform_2, window_bounds = array<i64: 1, 256>}, {transform_indices = @transform_3, window_bounds = array<i64: 8, 256>}]} {
    %c0 = arith.constant 0 : index
    %c0_0 = arith.constant 0 : index
    %0 = vector.load %arg1[%c0, %c0_0] : memref<8x1152xbf16, #tpu.memory_space<vmem>>, vector<8x1152xbf16>
    %c0_1 = arith.constant 0 : index
    %c0_2 = arith.constant 0 : index
    %1 = vector.load %arg2[%c0_1, %c0_2] : memref<1152x256xbf16, #tpu.memory_space<vmem>>, vector<1152x256xbf16>
    %cst = arith.constant dense<0.000000e+00> : vector<8x256xf32>
    %2 = tpu.matmul %0, %1, %cst {dimension_numbers = #tpu.dot_dimension_numbers<[1], [0], [0], [1], [0, 0, 1, 1], [], []>} : vector<8x1152xbf16>, vector<1152x256xbf16>, vector<8x256xf32> -> vector<8x256xf32>
    %c0_3 = arith.constant 0 : index
    %c0_4 = arith.constant 0 : index
    %3 = vector.load %arg3[%c0_3, %c0_4] : memref<1x256xf32, #tpu.memory_space<vmem>>, vector<1x256xf32>
    %4 = vector.broadcast %3 : vector<1x256xf32> to vector<8x256xf32>
    %5 = arith.addf %2, %4 : vector<8x256xf32>
    %cst_5 = arith.constant 0.000000e+00 : f32
    %6 = vector.broadcast %cst_5 : f32 to vector<8x256xf32>
    %7 = arith.maximumf %5, %6 : vector<8x256xf32>
    %8 = arith.truncf %7 : vector<8x256xf32> to vector<8x256xbf16>
    %c0_6 = arith.constant 0 : index
    %c0_7 = arith.constant 0 : index
    %9 = vector.load %arg4[%c0_6, %c0_7] : memref<8x256xbf16, #tpu.memory_space<vmem>>, vector<8x256xbf16>
    tpu.vector_store %arg4[%c0_6, %c0_7], %8 {strides = array<i32>} : memref<8x256xbf16, #tpu.memory_space<vmem>>, vector<8x256xbf16>,
    return
  }
  func.func @transform_0(%arg0: i32) -> (i32, i32) {
    %c0_i32 = arith.constant 0 : i32
    %c0_i32_0 = arith.constant 0 : i32
    return %arg0, %c0_i32 : i32, i32
  }
  func.func @transform_1(%arg0: i32) -> (i32, i32) {
    %c0_i32 = arith.constant 0 : i32
    %c0_i32_0 = arith.constant 0 : i32
    %c0_i32_1 = arith.constant 0 : i32
    return %c0_i32, %c0_i32_0 : i32, i32
  }
  func.func @transform_2(%arg0: i32) -> (i32, i32) {
    %c0_i32 = arith.constant 0 : i32
    %c0_i32_0 = arith.constant 0 : i32
    %c0_i32_1 = arith.constant 0 : i32
    return %c0_i32, %c0_i32_0 : i32, i32
  }
  func.func @transform_3(%arg0: i32) -> (i32, i32) {
    %c0_i32 = arith.constant 0 : i32
    %c0_i32_0 = arith.constant 0 : i32
    return %arg0, %c0_i32 : i32, i32
  }
}

module attributes {stable_mosaic.version = 11 : i64} {
  func.func @_final_up_kernel(%arg0: i32, %arg1: i32, %arg2: memref<1x64x256xbf16, #tpu.memory_space<vmem>>, %arg3: memref<256x1024xbf16, #tpu.memory_space<vmem>>, %arg4: memref<1x64x1024xf32, #tpu.memory_space<vmem>>) attributes {dimension_semantics = [#tpu.dimension_semantics<parallel>, #tpu.dimension_semantics<parallel>], iteration_bounds = array<i64: 4, 2>, scalar_prefetch = 0 : i64, scratch_operands = 0 : i64, tpu.core_type = #tpu.core_type<tc>, window_params = [{transform_indices = @transform_0, window_bounds = array<i64: 1, 64, 256>}, {transform_indices = @transform_1, window_bounds = array<i64: 256, 1024>}, {transform_indices = @transform_2, window_bounds = array<i64: 1, 64, 1024>}]} {
    %c0 = arith.constant 0 : index
    %c0_0 = arith.constant 0 : index
    %c0_1 = arith.constant 0 : index
    %0 = vector.load %arg2[%c0, %c0_0, %c0_1] : memref<1x64x256xbf16, #tpu.memory_space<vmem>>, vector<1x64x256xbf16>
    %1 = vector.shape_cast %0 : vector<1x64x256xbf16> to vector<64x256xbf16>
    %c0_2 = arith.constant 0 : index
    %c0_3 = arith.constant 0 : index
    %2 = vector.load %arg3[%c0_2, %c0_3] : memref<256x1024xbf16, #tpu.memory_space<vmem>>, vector<256x1024xbf16>
    %cst = arith.constant dense<0.000000e+00> : vector<64x1024xf32>
    %3 = tpu.matmul %1, %2, %cst {dimension_numbers = #tpu.dot_dimension_numbers<[1], [0], [0], [1], [0, 0, 1, 1], [], []>} : vector<64x256xbf16>, vector<256x1024xbf16>, vector<64x1024xf32> -> vector<64x1024xf32>
    %c0_4 = arith.constant 0 : index
    %c0_5 = arith.constant 0 : index
    %c0_6 = arith.constant 0 : index
    %4 = vector.load %arg4[%c0_4, %c0_5, %c0_6] : memref<1x64x1024xf32, #tpu.memory_space<vmem>>, vector<1x64x1024xf32>
    %5 = vector.shape_cast %4 : vector<1x64x1024xf32> to vector<64x1024xf32>
    %6 = vector.shape_cast %3 : vector<64x1024xf32> to vector<1x64x1024xf32>
    tpu.vector_store %arg4[%c0_4, %c0_5, %c0_6], %6 {strides = array<i32>} : memref<1x64x1024xf32, #tpu.memory_space<vmem>>, vector<1x64x1024xf32>,
    return
  }
  func.func @transform_0(%arg0: i32, %arg1: i32) -> (i32, i32, i32) {
    %c0_i32 = arith.constant 0 : i32
    %c0_i32_0 = arith.constant 0 : i32
    %c0_i32_1 = arith.constant 0 : i32
    return %arg1, %c0_i32, %c0_i32_0 : i32, i32, i32
  }
  func.func @transform_1(%arg0: i32, %arg1: i32) -> (i32, i32) {
    %c0_i32 = arith.constant 0 : i32
    %c0_i32_0 = arith.constant 0 : i32
    return %c0_i32, %arg0 : i32, i32
  }
  func.func @transform_2(%arg0: i32, %arg1: i32) -> (i32, i32, i32) {
    %c0_i32 = arith.constant 0 : i32
    %c0_i32_0 = arith.constant 0 : i32
    return %arg1, %c0_i32, %arg0 : i32, i32, i32
  }
}

module attributes {stable_mosaic.version = 11 : i64} {
  func.func @_head_pyramid_kernel(%arg0: i32, %arg1: memref<1x4x256xbf16, #tpu.memory_space<vmem>>, %arg2: memref<1x16x128xbf16, #tpu.memory_space<vmem>>, %arg3: memref<1x64x64xbf16, #tpu.memory_space<vmem>>, %arg4: memref<1x256x32xbf16, #tpu.memory_space<vmem>>, %arg5: memref<256x128xbf16, #tpu.memory_space<vmem>>, %arg6: memref<1x128xf32, #tpu.memory_space<vmem>>, %arg7: memref<128x128xbf16, #tpu.memory_space<vmem>>, %arg8: memref<1x128xf32, #tpu.memory_space<vmem>>, %arg9: memref<64x128xbf16, #tpu.memory_space<vmem>>, %arg10: memref<1x128xf32, #tpu.memory_space<vmem>>, %arg11: memref<32x128xbf16, #tpu.memory_space<vmem>>, %arg12: memref<1x128xf32, #tpu.memory_space<vmem>>, %arg13: memref<16x4xbf16, #tpu.memory_space<vmem>>, %arg14: memref<64x16xbf16, #tpu.memory_space<vmem>>, %arg15: memref<256x64xbf16, #tpu.memory_space<vmem>>, %arg16: memref<1x64x256xbf16, #tpu.memory_space<vmem>>) attributes {dimension_semantics = [#tpu.dimension_semantics<parallel>], iteration_bounds = array<i64: 2>, scalar_prefetch = 0 : i64, scratch_operands = 0 : i64, tpu.core_type = #tpu.core_type<tc>, window_params = [{transform_indices = @transform_0, window_bounds = array<i64: 1, 4, 256>}, {transform_indices = @transform_1, window_bounds = array<i64: 1, 16, 128>}, {transform_indices = @transform_2, window_bounds = array<i64: 1, 64, 64>}, {transform_indices = @transform_3, window_bounds = array<i64: 1, 256, 32>}, {pipeline_mode = #tpu.pipeline_mode<synchronous>, transform_indices = @transform_4, window_bounds = array<i64: 256, 128>}, {pipeline_mode = #tpu.pipeline_mode<synchronous>, transform_indices = @transform_5, window_bounds = array<i64: 1, 128>}, {pipeline_mode = #tpu.pipeline_mode<synchronous>, transform_indices = @transform_6, window_bounds = array<i64: 128, 128>}, {pipeline_mode = #tpu.pipeline_mode<synchronous>, transform_indices = @transform_7, window_bounds = array<i64: 1, 128>}, {pipeline_mode = #tpu.pipeline_mode<synchronous>, transform_indices = @transform_8, window_bounds = array<i64: 64, 128>}, {pipeline_mode = #tpu.pipeline_mode<synchronous>, transform_indices = @transform_9, window_bounds = array<i64: 1, 128>}, {pipeline_mode = #tpu.pipeline_mode<synchronous>, transform_indices = @transform_10, window_bounds = array<i64: 32, 128>}, {pipeline_mode = #tpu.pipeline_mode<synchronous>, transform_indices = @transform_11, window_bounds = array<i64: 1, 128>}, {pipeline_mode = #tpu.pipeline_mode<synchronous>, transform_indices = @transform_12, window_bounds = array<i64: 16, 4>}, {pipeline_mode = #tpu.pipeline_mode<synchronous>, transform_indices = @transform_13, window_bounds = array<i64: 64, 16>}, {pipeline_mode = #tpu.pipeline_mode<synchronous>, transform_indices = @transform_14, window_bounds = array<i64: 256, 64>}, {transform_indices = @transform_15, window_bounds = array<i64: 1, 64, 256>}]} {
    %c0 = arith.constant 0 : index
    %c0_0 = arith.constant 0 : index
    %c0_1 = arith.constant 0 : index
    %0 = vector.load %arg1[%c0, %c0_0, %c0_1] : memref<1x4x256xbf16, #tpu.memory_space<vmem>>, vector<1x4x256xbf16>
    %1 = vector.shape_cast %0 : vector<1x4x256xbf16> to vector<4x256xbf16>
    %c0_2 = arith.constant 0 : index
    %c0_3 = arith.constant 0 : index
    %2 = vector.load %arg5[%c0_2, %c0_3] : memref<256x128xbf16, #tpu.memory_space<vmem>>, vector<256x128xbf16>
    %cst = arith.constant dense<0.000000e+00> : vector<4x128xf32>
    %3 = tpu.matmul %1, %2, %cst {dimension_numbers = #tpu.dot_dimension_numbers<[1], [0], [0], [1], [0, 0, 1, 1], [], []>} : vector<4x256xbf16>, vector<256x128xbf16>, vector<4x128xf32> -> vector<4x128xf32>
    %c0_4 = arith.constant 0 : index
    %c0_5 = arith.constant 0 : index
    %4 = vector.load %arg6[%c0_4, %c0_5] : memref<1x128xf32, #tpu.memory_space<vmem>>, vector<1x128xf32>
    %5 = vector.broadcast %4 : vector<1x128xf32> to vector<4x128xf32>
    %6 = arith.addf %3, %5 : vector<4x128xf32>
    %c0_6 = arith.constant 0 : index
    %c0_7 = arith.constant 0 : index
    %c0_8 = arith.constant 0 : index
    %7 = vector.load %arg2[%c0_6, %c0_7, %c0_8] : memref<1x16x128xbf16, #tpu.memory_space<vmem>>, vector<1x16x128xbf16>
    %8 = vector.shape_cast %7 : vector<1x16x128xbf16> to vector<16x128xbf16>
    %c0_9 = arith.constant 0 : index
    %c0_10 = arith.constant 0 : index
    %9 = vector.load %arg7[%c0_9, %c0_10] : memref<128x128xbf16, #tpu.memory_space<vmem>>, vector<128x128xbf16>
    %cst_11 = arith.constant dense<0.000000e+00> : vector<16x128xf32>
    %10 = tpu.matmul %8, %9, %cst_11 {dimension_numbers = #tpu.dot_dimension_numbers<[1], [0], [0], [1], [0, 0, 1, 1], [], []>} : vector<16x128xbf16>, vector<128x128xbf16>, vector<16x128xf32> -> vector<16x128xf32>
    %c0_12 = arith.constant 0 : index
    %c0_13 = arith.constant 0 : index
    %11 = vector.load %arg8[%c0_12, %c0_13] : memref<1x128xf32, #tpu.memory_space<vmem>>, vector<1x128xf32>
    %12 = vector.broadcast %11 : vector<1x128xf32> to vector<16x128xf32>
    %13 = arith.addf %10, %12 : vector<16x128xf32>
    %c0_14 = arith.constant 0 : index
    %c0_15 = arith.constant 0 : index
    %14 = vector.load %arg13[%c0_14, %c0_15] : memref<16x4xbf16, #tpu.memory_space<vmem>>, vector<16x4xbf16>
    %15 = arith.truncf %6 : vector<4x128xf32> to vector<4x128xbf16>
    %cst_16 = arith.constant dense<0.000000e+00> : vector<16x128xf32>
    %16 = tpu.matmul %14, %15, %cst_16 {dimension_numbers = #tpu.dot_dimension_numbers<[1], [0], [0], [1], [0, 0, 1, 1], [], []>} : vector<16x4xbf16>, vector<4x128xbf16>, vector<16x128xf32> -> vector<16x128xf32>
    %17 = arith.addf %13, %16 : vector<16x128xf32>
    %c0_17 = arith.constant 0 : index
    %c0_18 = arith.constant 0 : index
    %c0_19 = arith.constant 0 : index
    %18 = vector.load %arg3[%c0_17, %c0_18, %c0_19] : memref<1x64x64xbf16, #tpu.memory_space<vmem>>, vector<1x64x64xbf16>
    %19 = vector.shape_cast %18 : vector<1x64x64xbf16> to vector<64x64xbf16>
    %c0_20 = arith.constant 0 : index
    %c0_21 = arith.constant 0 : index
    %20 = vector.load %arg9[%c0_20, %c0_21] : memref<64x128xbf16, #tpu.memory_space<vmem>>, vector<64x128xbf16>
    %cst_22 = arith.constant dense<0.000000e+00> : vector<64x128xf32>
    %21 = tpu.matmul %19, %20, %cst_22 {dimension_numbers = #tpu.dot_dimension_numbers<[1], [0], [0], [1], [0, 0, 1, 1], [], []>} : vector<64x64xbf16>, vector<64x128xbf16>, vector<64x128xf32> -> vector<64x128xf32>
    %c0_23 = arith.constant 0 : index
    %c0_24 = arith.constant 0 : index
    %22 = vector.load %arg10[%c0_23, %c0_24] : memref<1x128xf32, #tpu.memory_space<vmem>>, vector<1x128xf32>
    %23 = vector.broadcast %22 : vector<1x128xf32> to vector<64x128xf32>
    %24 = arith.addf %21, %23 : vector<64x128xf32>
    %c0_25 = arith.constant 0 : index
    %c0_26 = arith.constant 0 : index
    %25 = vector.load %arg14[%c0_25, %c0_26] : memref<64x16xbf16, #tpu.memory_space<vmem>>, vector<64x16xbf16>
    %26 = arith.truncf %17 : vector<16x128xf32> to vector<16x128xbf16>
    %cst_27 = arith.constant dense<0.000000e+00> : vector<64x128xf32>
    %27 = tpu.matmul %25, %26, %cst_27 {dimension_numbers = #tpu.dot_dimension_numbers<[1], [0], [0], [1], [0, 0, 1, 1], [], []>} : vector<64x16xbf16>, vector<16x128xbf16>, vector<64x128xf32> -> vector<64x128xf32>
    %28 = arith.addf %24, %27 : vector<64x128xf32>
    %c0_28 = arith.constant 0 : index
    %c0_29 = arith.constant 0 : index
    %c0_30 = arith.constant 0 : index
    %29 = vector.load %arg4[%c0_28, %c0_29, %c0_30] : memref<1x256x32xbf16, #tpu.memory_space<vmem>>, vector<1x256x32xbf16>
    %30 = vector.shape_cast %29 : vector<1x256x32xbf16> to vector<256x32xbf16>
    %c0_31 = arith.constant 0 : index
    %c0_32 = arith.constant 0 : index
    %31 = vector.load %arg11[%c0_31, %c0_32] : memref<32x128xbf16, #tpu.memory_space<vmem>>, vector<32x128xbf16>
    %cst_33 = arith.constant dense<0.000000e+00> : vector<256x128xf32>
    %32 = tpu.matmul %30, %31, %cst_33 {dimension_numbers = #tpu.dot_dimension_numbers<[1], [0], [0], [1], [0, 0, 1, 1], [], []>} : vector<256x32xbf16>, vector<32x128xbf16>, vector<256x128xf32> -> vector<256x128xf32>
    %c0_34 = arith.constant 0 : index
    %c0_35 = arith.constant 0 : index
    %33 = vector.load %arg12[%c0_34, %c0_35] : memref<1x128xf32, #tpu.memory_space<vmem>>, vector<1x128xf32>
    %34 = vector.broadcast %33 : vector<1x128xf32> to vector<256x128xf32>
    %35 = arith.addf %32, %34 : vector<256x128xf32>
    %c0_36 = arith.constant 0 : index
    %c0_37 = arith.constant 0 : index
    %36 = vector.load %arg15[%c0_36, %c0_37] : memref<256x64xbf16, #tpu.memory_space<vmem>>, vector<256x64xbf16>
    %37 = arith.truncf %28 : vector<64x128xf32> to vector<64x128xbf16>
    %cst_38 = arith.constant dense<0.000000e+00> : vector<256x128xf32>
    %38 = tpu.matmul %36, %37, %cst_38 {dimension_numbers = #tpu.dot_dimension_numbers<[1], [0], [0], [1], [0, 0, 1, 1], [], []>} : vector<256x64xbf16>, vector<64x128xbf16>, vector<256x128xf32> -> vector<256x128xf32>
    %39 = arith.addf %35, %38 : vector<256x128xf32>
    %40 = tpu.transpose %39, [1, 0] : vector<256x128xf32> -> vector<128x256xf32>
    %41 = vector.extract_strided_slice %40 {offsets = [0, 0], sizes = [64, 256], strides = [1, 1]} : vector<128x256xf32> to vector<64x256xf32>
    %42 = arith.truncf %41 : vector<64x256xf32> to vector<64x256xbf16>
    %c0_39 = arith.constant 0 : index
    %c0_40 = arith.constant 0 : index
    %c0_41 = arith.constant 0 : index
    %43 = vector.load %arg16[%c0_39, %c0_40, %c0_41] : memref<1x64x256xbf16, #tpu.memory_space<vmem>>, vector<1x64x256xbf16>
    %44 = vector.shape_cast %43 : vector<1x64x256xbf16> to vector<64x256xbf16>
    %45 = vector.shape_cast %42 : vector<64x256xbf16> to vector<1x64x256xbf16>
    tpu.vector_store %arg16[%c0_39, %c0_40, %c0_41], %45 {strides = array<i32>} : memref<1x64x256xbf16, #tpu.memory_space<vmem>>, vector<1x64x256xbf16>,
    return
  }
  func.func @transform_0(%arg0: i32) -> (i32, i32, i32) {
    %c0_i32 = arith.constant 0 : i32
    %c0_i32_0 = arith.constant 0 : i32
    %c0_i32_1 = arith.constant 0 : i32
    return %arg0, %c0_i32, %c0_i32_0 : i32, i32, i32
  }
  func.func @transform_1(%arg0: i32) -> (i32, i32, i32) {
    %c0_i32 = arith.constant 0 : i32
    %c0_i32_0 = arith.constant 0 : i32
    %c0_i32_1 = arith.constant 0 : i32
    return %arg0, %c0_i32, %c0_i32_0 : i32, i32, i32
  }
  func.func @transform_2(%arg0: i32) -> (i32, i32, i32) {
    %c0_i32 = arith.constant 0 : i32
    %c0_i32_0 = arith.constant 0 : i32
    %c0_i32_1 = arith.constant 0 : i32
    return %arg0, %c0_i32, %c0_i32_0 : i32, i32, i32
  }
  func.func @transform_3(%arg0: i32) -> (i32, i32, i32) {
    %c0_i32 = arith.constant 0 : i32
    %c0_i32_0 = arith.constant 0 : i32
    %c0_i32_1 = arith.constant 0 : i32
    return %arg0, %c0_i32, %c0_i32_0 : i32, i32, i32
  }
  func.func @transform_4(%arg0: i32) -> (i32, i32) {
    %c0_i32 = arith.constant 0 : i32
    %c0_i32_0 = arith.constant 0 : i32
    %c0_i32_1 = arith.constant 0 : i32
    return %c0_i32, %c0_i32_0 : i32, i32
  }
  func.func @transform_5(%arg0: i32) -> (i32, i32) {
    %c0_i32 = arith.constant 0 : i32
    %c0_i32_0 = arith.constant 0 : i32
    %c0_i32_1 = arith.constant 0 : i32
    return %c0_i32, %c0_i32_0 : i32, i32
  }
  func.func @transform_6(%arg0: i32) -> (i32, i32) {
    %c0_i32 = arith.constant 0 : i32
    %c0_i32_0 = arith.constant 0 : i32
    %c0_i32_1 = arith.constant 0 : i32
    return %c0_i32, %c0_i32_0 : i32, i32
  }
  func.func @transform_7(%arg0: i32) -> (i32, i32) {
    %c0_i32 = arith.constant 0 : i32
    %c0_i32_0 = arith.constant 0 : i32
    %c0_i32_1 = arith.constant 0 : i32
    return %c0_i32, %c0_i32_0 : i32, i32
  }
  func.func @transform_8(%arg0: i32) -> (i32, i32) {
    %c0_i32 = arith.constant 0 : i32
    %c0_i32_0 = arith.constant 0 : i32
    %c0_i32_1 = arith.constant 0 : i32
    return %c0_i32, %c0_i32_0 : i32, i32
  }
  func.func @transform_9(%arg0: i32) -> (i32, i32) {
    %c0_i32 = arith.constant 0 : i32
    %c0_i32_0 = arith.constant 0 : i32
    %c0_i32_1 = arith.constant 0 : i32
    return %c0_i32, %c0_i32_0 : i32, i32
  }
  func.func @transform_10(%arg0: i32) -> (i32, i32) {
    %c0_i32 = arith.constant 0 : i32
    %c0_i32_0 = arith.constant 0 : i32
    %c0_i32_1 = arith.constant 0 : i32
    return %c0_i32, %c0_i32_0 : i32, i32
  }
  func.func @transform_11(%arg0: i32) -> (i32, i32) {
    %c0_i32 = arith.constant 0 : i32
    %c0_i32_0 = arith.constant 0 : i32
    %c0_i32_1 = arith.constant 0 : i32
    return %c0_i32, %c0_i32_0 : i32, i32
  }
  func.func @transform_12(%arg0: i32) -> (i32, i32) {
    %c0_i32 = arith.constant 0 : i32
    %c0_i32_0 = arith.constant 0 : i32
    %c0_i32_1 = arith.constant 0 : i32
    return %c0_i32, %c0_i32_0 : i32, i32
  }
  func.func @transform_13(%arg0: i32) -> (i32, i32) {
    %c0_i32 = arith.constant 0 : i32
    %c0_i32_0 = arith.constant 0 : i32
    %c0_i32_1 = arith.constant 0 : i32
    return %c0_i32, %c0_i32_0 : i32, i32
  }
  func.func @transform_14(%arg0: i32) -> (i32, i32) {
    %c0_i32 = arith.constant 0 : i32
    %c0_i32_0 = arith.constant 0 : i32
    %c0_i32_1 = arith.constant 0 : i32
    return %c0_i32, %c0_i32_0 : i32, i32
  }
  func.func @transform_15(%arg0: i32) -> (i32, i32, i32) {
    %c0_i32 = arith.constant 0 : i32
    %c0_i32_0 = arith.constant 0 : i32
    %c0_i32_1 = arith.constant 0 : i32
    return %arg0, %c0_i32, %c0_i32_0 : i32, i32, i32
  }
}

</mosaic_0001>

<bundles_post_ra>
// kernel: one_head_strong_forward.7
= control target key start
LH: loop header
LB: loop body
LE: loop exit
PB: predicated region body
PF: predicated region fallthrough
CT: control target
= control target key end

     0   :  { %s2063_s12 = smov 0   ;;  %s2622_s0 = inlined_call_operand.vmem [shape: bf16[2048,27], index: 0, kind: input, shape index: {}]   ;;  %s2623_s1 = inlined_call_operand.vmem [shape: bf16[27,16], index: 1, kind: input, shape index: {}]   ;;  %s2624_s2 = inlined_call_operand.vmem [shape: f32[1,16], index: 2, kind: input, shape index: {}]   ;;  %s2625_s3 = inlined_call_operand.vmem [shape: bf16[2048,16], index: 3, kind: output, shape index: {}]  }
   0x1 LB: > { %s1612_s13 = sadd.s32 4294967295, %s2040_s12   ;;  %p1616_p0 = scmp.ge.s32.totalorder %s2040_s12, 1  ;;  %s2040_s12 = sphi %s2063_s12, %s13_s12  }
   0x2   : > { %p138_p1 = scmp.lt.s32.totalorder %s2040_s12, 3 }
   0x4   : > { %p139_p2 = pnand %p1616_p0, %p138_p1 }
   0x5   : > { %s1617_s18 = sshll.u32 (!%p139_p2), %s1612_s13, 7 }
   0x6   : > { %142 = sbr.rel (%p139_p2) target bundleno = 413 (0x19d), region = 32  ;;  %p163_p3 = scmp.lt.s32.totalorder (!%p139_p2), %s1617_s18, 255 }
   0xb   : > { %v1883_v0 = vld [vmem:[%s2623_s1 + $0x8] sm:$0xf]  ;;  %v2016_v1 = vld [vmem:[%s2623_s1 + $0x8] sm:$0x30]  ;;  %vm835_vm0 = vcmask 1044480   ;;  %vm836_vm1 = vcmask 1045504  }
   0xc   : > { %v1884_v2 = vor.u32 %v2016_v1, %v1883_v0  ;;  %v2042_v3 = vmov 65535   ;;  %s2627_s18 = smov (!%p163_p3, %s1617_s18), 255  ;;  %v2015_v7 = vld [vmem:[%s2623_s1] sm:$0xff]  ;;  %vm642_vm2 = vcmask 220160   ;;  %vm1427_vm3 = vcmask 125952  }
   0xd   : > { %v837_v4 = vsel %vm835_vm0, 4294967295, %v2042_v3  ;;  %s1618_s21 = sshll.u32 %s2627_s18, 2  ;;  %v2157_v40 = vld [vmem:[%s2624_s2] ss:$0 sm:$0xff] }
   0xe   : > { %v838_v5 = vsel %vm836_vm1, %v837_v4, 0  ;;  %s2088_s24 = scalar_lea.vmem %s2622_s0, %s1618_s21  ;;  %s2172_s29 = scalar_lea.vmem %s2625_s3, %s1618_s21 }
   0xf   : > { %v840_v6 = vand.u32 %v1884_v2, %v838_v5  ;;  %v1951_v8 = vld [vmem:[%s2088_s24] sm:$0xff]  ;;  %v1952_v12 = vld [vmem:[%s2088_s24 + $0x8] sm:$0xff]  ;;  %v1953_v16 = vld [vmem:[%s2088_s24 + $0x10] sm:$0xff] }
  0x10   : > { %v1967_v9 = vld [vmem:[%s2088_s24 + $0x80] sm:$0xff]  ;;  %v1968_v13 = vld [vmem:[%s2088_s24 + $0x88] sm:$0xff]  ;;  %v1969_v17 = vld [vmem:[%s2088_s24 + $0x90] sm:$0xff] }
  0x11   : > { %848 = vmatpush.bf16.msra.mxu0 %v840_v6  ;;  %2017 = vmatpush.bf16.msra.mxu1 %v840_v6  ;;  %v1983_v10 = vld [vmem:[%s2088_s24 + $0x100] sm:$0xff]  ;;  %v1984_v14 = vld [vmem:[%s2088_s24 + $0x108] sm:$0xff]  ;;  %v1985_v18 = vld [vmem:[%s2088_s24 + $0x110] sm:$0xff] }
  0x12   : > { %2018 = vmatpush.bf16.msra.mxu2 %v840_v6  ;;  %2019 = vmatpush.bf16.msra.mxu3 %v840_v6  ;;  %v1999_v11 = vld [vmem:[%s2088_s24 + $0x180] sm:$0xff]  ;;  %v2000_v15 = vld [vmem:[%s2088_s24 + $0x188] sm:$0xff]  ;;  %v2001_v19 = vld [vmem:[%s2088_s24 + $0x190] sm:$0xff] }
  0x13   : > { %v1954_v20 = vld [vmem:[%s2088_s24 + $0x18] sm:$0xff]  ;;  %v1955_v24 = vld [vmem:[%s2088_s24 + $0x20] sm:$0xff]  ;;  %v1956_v28 = vld [vmem:[%s2088_s24 + $0x28] sm:$0xff] }
  0x14   : > { %v1970_v21 = vld [vmem:[%s2088_s24 + $0x98] sm:$0xff]  ;;  %v1971_v25 = vld [vmem:[%s2088_s24 + $0xa0] sm:$0xff]  ;;  %v1972_v29 = vld [vmem:[%s2088_s24 + $0xa8] sm:$0xff] }
  0x15   : > { %849 = vmatpush.bf16.msra.mxu0 %v2015_v7  ;;  %2020 = vmatpush.bf16.msra.mxu1 %v2015_v7  ;;  %v1986_v22 = vld [vmem:[%s2088_s24 + $0x118] sm:$0xff]  ;;  %v1987_v26 = vld [vmem:[%s2088_s24 + $0x120] sm:$0xff]  ;;  %v1988_v30 = vld [vmem:[%s2088_s24 + $0x128] sm:$0xff] }
  0x16   : > { %2021 = vmatpush.bf16.msra.mxu2 %v2015_v7  ;;  %2022 = vmatpush.bf16.msra.mxu3 %v2015_v7  ;;  %v2002_v23 = vld [vmem:[%s2088_s24 + $0x198] sm:$0xff]  ;;  %v2003_v27 = vld [vmem:[%s2088_s24 + $0x1a0] sm:$0xff]  ;;  %v2004_v31 = vld [vmem:[%s2088_s24 + $0x1a8] sm:$0xff] }
  0x17   : > { %v1957_v32 = vld [vmem:[%s2088_s24 + $0x30] sm:$0xff]  ;;  %v1958_v36 = vld [vmem:[%s2088_s24 + $0x38] sm:$0xff]  ;;  %v1959_v41 = vld [vmem:[%s2088_s24 + $0x40] sm:$0xff] }
  0x18   : > { %1885 = vmatmul.msk.bf16.vlgmr.msra.gmra.mxu0 %vm642_vm2, %v1951_v8  ;;  %1901 = vmatmul.msk.bf16.vlgmr.msra.gmra.mxu1 %vm642_vm2, %v1967_v9  ;;  %v1973_v33 = vld [vmem:[%s2088_s24 + $0xb0] sm:$0xff]  ;;  %v1974_v37 = vld [vmem:[%s2088_s24 + $0xb8] sm:$0xff]  ;;  %v1975_v42 = vld [vmem:[%s2088_s24 + $0xc0] sm:$0xff] }
  0x19   : > { %1917 = vmatmul.msk.bf16.vlgmr.msra.gmra.mxu2 %vm642_vm2, %v1983_v10  ;;  %1933 = vmatmul.msk.bf16.vlgmr.msra.gmra.mxu3 %vm642_vm2, %v1999_v11  ;;  %v1989_v34 = vld [vmem:[%s2088_s24 + $0x130] sm:$0xff]  ;;  %v1990_v38 = vld [vmem:[%s2088_s24 + $0x138] sm:$0xff]  ;;  %v1991_v45 = vld [vmem:[%s2088_s24 + $0x140] sm:$0xff] }
  0x1a   : > { %v2005_v35 = vld [vmem:[%s2088_s24 + $0x1b0] sm:$0xff]  ;;  %v2006_v39 = vld [vmem:[%s2088_s24 + $0x1b8] sm:$0xff]  ;;  %v2007_v46 = vld [vmem:[%s2088_s24 + $0x1c0] sm:$0xff] }
  0x1b   : > { %v1960_v7 = vld [vmem:[%s2088_s24 + $0x48] sm:$0xff] }
  0x1c   : > { %v1976_v8 = vld [vmem:[%s2088_s24 + $0xc8] sm:$0xff] }
  0x28   : > { %1886 = vmatmul.msk.bf16.gmra.mxu0 %vm642_vm2, %v1952_v12  ;;  %1902 = vmatmul.msk.bf16.gmra.mxu1 %vm642_vm2, %v1968_v13  ;;  %v1992_v13 = vld [vmem:[%s2088_s24 + $0x148] sm:$0xff] }
  0x29   : > { %1918 = vmatmul.msk.bf16.gmra.mxu2 %vm642_vm2, %v1984_v14  ;;  %1934 = vmatmul.msk.bf16.gmra.mxu3 %vm642_vm2, %v2000_v15  ;;  %v2008_v14 = vld [vmem:[%s2088_s24 + $0x1c8] sm:$0xff] }
  0x38   : > { %1887 = vmatmul.msk.bf16.gmra.mxu0 %vm642_vm2, %v1953_v16  ;;  %1903 = vmatmul.msk.bf16.gmra.mxu1 %vm642_vm2, %v1969_v17 }
  0x39   : > { %1919 = vmatmul.msk.bf16.gmra.mxu2 %vm642_vm2, %v1985_v18  ;;  %1935 = vmatmul.msk.bf16.gmra.mxu3 %vm642_vm2, %v2001_v19 }
  0x48   : > { %1888 = vmatmul.msk.bf16.gmra.mxu0 %vm642_vm2, %v1954_v20  ;;  %1904 = vmatmul.msk.bf16.gmra.mxu1 %vm642_vm2, %v1970_v21 }
  0x49   : > { %1920 = vmatmul.msk.bf16.gmra.mxu2 %vm642_vm2, %v1986_v22  ;;  %1936 = vmatmul.msk.bf16.gmra.mxu3 %vm642_vm2, %v2002_v23 }
  0x58   : > { %1889 = vmatmul.msk.bf16.gmra.mxu0 %vm642_vm2, %v1955_v24  ;;  %1905 = vmatmul.msk.bf16.gmra.mxu1 %vm642_vm2, %v1971_v25 }
  0x59   : > { %1921 = vmatmul.msk.bf16.gmra.mxu2 %vm642_vm2, %v1987_v26  ;;  %1937 = vmatmul.msk.bf16.gmra.mxu3 %vm642_vm2, %v2003_v27 }
  0x68   : > { %1890 = vmatmul.msk.bf16.gmra.mxu0 %vm642_vm2, %v1956_v28  ;;  %1906 = vmatmul.msk.bf16.gmra.mxu1 %vm642_vm2, %v1972_v29 }
  0x69   : > { %1922 = vmatmul.msk.bf16.gmra.mxu2 %vm642_vm2, %v1988_v30  ;;  %1938 = vmatmul.msk.bf16.gmra.mxu3 %vm642_vm2, %v2004_v31 }
  0x78   : > { %1891 = vmatmul.msk.bf16.gmra.mxu0 %vm642_vm2, %v1957_v32  ;;  %1907 = vmatmul.msk.bf16.gmra.mxu1 %vm642_vm2, %v1973_v33 }
  0x79   : > { %1923 = vmatmul.msk.bf16.gmra.mxu2 %vm642_vm2, %v1989_v34  ;;  %1939 = vmatmul.msk.bf16.gmra.mxu3 %vm642_vm2, %v2005_v35 }
  0x88   : > { %1892 = vmatmul.msk.bf16.gmra.mxu0 %vm642_vm2, %v1958_v36  ;;  %1908 = vmatmul.msk.bf16.gmra.mxu1 %vm642_vm2, %v1974_v37 }
  0x89   : > { %1924 = vmatmul.msk.bf16.gmra.mxu2 %vm642_vm2, %v1990_v38  ;;  %1940 = vmatmul.msk.bf16.gmra.mxu3 %vm642_vm2, %v2006_v39 }
  0x95   : > { %v851_v43 = vpop.f32.mrf.mxu0  ;;  %v931_v44 = vpop.f32.mrf.mxu1 }
  0x96   : > { %v852_v47 = vadd.f32 %v2157_v40, %v851_v43  ;;  %v932_v48 = vadd.f32 %v2157_v40, %v931_v44  ;;  %v1961_v44 = vld [vmem:[%s2088_s24 + $0x50] sm:$0xff] }
  0x98   : > { %v1171_v49 = vmax.f32 %v852_v47, 0.0  ;;  %v1203_v50 = vmax.f32 %v932_v48, 0.0  ;;  %1893 = vmatmul.msk.bf16.gmra.mxu0 %vm642_vm2, %v1959_v41  ;;  %1909 = vmatmul.msk.bf16.gmra.mxu1 %vm642_vm2, %v1975_v42 }
  0x99   : > { %1925 = vmatmul.msk.bf16.gmra.mxu2 %vm642_vm2, %v1991_v45  ;;  %1941 = vmatmul.msk.bf16.gmra.mxu3 %vm642_vm2, %v2007_v46  ;;  %v1977_v45 = vld [vmem:[%s2088_s24 + $0xd0] sm:$0xff] }
  0x9a   : > { %v1299_v51 = vpack.c.bf16 %v1171_v49, %v1171_v49  ;;  %v1331_v52 = vpack.c.bf16 %v1203_v50, %v1203_v50  ;;  %v1993_v50 = vld [vmem:[%s2088_s24 + $0x150] sm:$0xff] }
  0x9c   : > { %1428 = vst.msk [vmem:[%s2172_s29] sm:$0xf] %vm1427_vm3, %v1299_v51  ;;  %v1011_v53 = vpop.f32.mrf.mxu2  ;;  %v1091_v54 = vpop.f32.mrf.mxu3  ;;  %v2009_v51 = vld [vmem:[%s2088_s24 + $0x1d0] sm:$0xff] }
  0x9d   : > { %1460 = vst.msk [vmem:[%s2172_s29 + $0x80] sm:$0xf] %vm1427_vm3, %v1331_v52  ;;  %v1012_v55 = vadd.f32 %v2157_v40, %v1011_v53  ;;  %v1092_v56 = vadd.f32 %v2157_v40, %v1091_v54  ;;  %v853_v57 = vpop.f32.mrf.mxu0  ;;  %v933_v58 = vpop.f32.mrf.mxu1 }
  0x9e   : > { %v854_v59 = vadd.f32 %v2157_v40, %v853_v57  ;;  %v934_v60 = vadd.f32 %v2157_v40, %v933_v58 }
  0x9f   : > { %v1235_v61 = vmax.f32 %v1012_v55, 0.0  ;;  %v1267_v62 = vmax.f32 %v1092_v56, 0.0 }
  0xa0   : > { %v1172_v63 = vmax.f32 %v854_v59, 0.0  ;;  %v1204_v0 = vmax.f32 %v934_v60, 0.0 }
  0xa1   : > { %v1363_v1 = vpack.c.bf16 %v1235_v61, %v1235_v61  ;;  %v1395_v2 = vpack.c.bf16 %v1267_v62, %v1267_v62 }
  0xa2   : > { %v1300_v3 = vpack.c.bf16 %v1172_v63, %v1172_v63  ;;  %v1332_v4 = vpack.c.bf16 %v1204_v0, %v1204_v0 }
  0xa3   : > { %1492 = vst.msk [vmem:[%s2172_s29 + $0x100] sm:$0xf] %vm1427_vm3, %v1363_v1 }
  0xa4   : > { %1524 = vst.msk [vmem:[%s2172_s29 + $0x180] sm:$0xf] %vm1427_vm3, %v1395_v2  ;;  %v1013_v5 = vpop.f32.mrf.mxu2  ;;  %v1093_v6 = vpop.f32.mrf.mxu3 }
  0xa5   : > { %1429 = vst.msk [vmem:[%s2172_s29 + $0x4] sm:$0xf] %vm1427_vm3, %v1300_v3  ;;  %v1014_v9 = vadd.f32 %v2157_v40, %v1013_v5  ;;  %v1094_v10 = vadd.f32 %v2157_v40, %v1093_v6  ;;  %v856_v11 = vpop.f32.mrf.mxu0  ;;  %v936_v12 = vpop.f32.mrf.mxu1 }
  0xa6   : > { %1461 = vst.msk [vmem:[%s2172_s29 + $0x84] sm:$0xf] %vm1427_vm3, %v1332_v4  ;;  %v857_v15 = vadd.f32 %v2157_v40, %v856_v11  ;;  %v937_v16 = vadd.f32 %v2157_v40, %v936_v12 }
  0xa7   : > { %v1236_v17 = vmax.f32 %v1014_v9, 0.0  ;;  %v1268_v18 = vmax.f32 %v1094_v10, 0.0 }
  0xa8   : > { %v1173_v19 = vmax.f32 %v857_v15, 0.0  ;;  %v1205_v20 = vmax.f32 %v937_v16, 0.0  ;;  %1894 = vmatmul.msk.bf16.gmra.mxu0 %vm642_vm2, %v1960_v7  ;;  %1910 = vmatmul.msk.bf16.gmra.mxu1 %vm642_vm2, %v1976_v8  ;;  %v1962_v16 = vld [vmem:[%s2088_s24 + $0x58] sm:$0xff] }
  0xa9   : > { %v1364_v21 = vpack.c.bf16 %v1236_v17, %v1236_v17  ;;  %v1396_v22 = vpack.c.bf16 %v1268_v18, %v1268_v18  ;;  %1926 = vmatmul.msk.bf16.gmra.mxu2 %vm642_vm2, %v1992_v13  ;;  %1942 = vmatmul.msk.bf16.gmra.mxu3 %vm642_vm2, %v2008_v14  ;;  %v1978_v17 = vld [vmem:[%s2088_s24 + $0xd8] sm:$0xff] }
  0xaa   : > { %v1301_v23 = vpack.c.bf16 %v1173_v19, %v1173_v19  ;;  %v1333_v24 = vpack.c.bf16 %v1205_v20, %v1205_v20 }
  0xab   : > { %1493 = vst.msk [vmem:[%s2172_s29 + $0x104] sm:$0xf] %vm1427_vm3, %v1364_v21 }
  0xac   : > { %1525 = vst.msk [vmem:[%s2172_s29 + $0x184] sm:$0xf] %vm1427_vm3, %v1396_v22  ;;  %v1016_v25 = vpop.f32.mrf.mxu2  ;;  %v1096_v26 = vpop.f32.mrf.mxu3  ;;  %v1994_v22 = vld [vmem:[%s2088_s24 + $0x158] sm:$0xff] }
  0xad   : > { %1430 = vst.msk [vmem:[%s2172_s29 + $0x8] sm:$0xf] %vm1427_vm3, %v1301_v23  ;;  %v1017_v27 = vadd.f32 %v2157_v40, %v1016_v25  ;;  %v1097_v28 = vadd.f32 %v2157_v40, %v1096_v26  ;;  %v858_v29 = vpop.f32.mrf.mxu0  ;;  %v938_v30 = vpop.f32.mrf.mxu1  ;;  %v2010_v23 = vld [vmem:[%s2088_s24 + $0x1d8] sm:$0xff] }
  0xae   : > { %1462 = vst.msk [vmem:[%s2172_s29 + $0x88] sm:$0xf] %vm1427_vm3, %v1333_v24  ;;  %v859_v31 = vadd.f32 %v2157_v40, %v858_v29  ;;  %v939_v32 = vadd.f32 %v2157_v40, %v938_v30 }
  0xaf   : > { %v1237_v33 = vmax.f32 %v1017_v27, 0.0  ;;  %v1269_v34 = vmax.f32 %v1097_v28, 0.0 }
  0xb0   : > { %v1174_v35 = vmax.f32 %v859_v31, 0.0  ;;  %v1206_v36 = vmax.f32 %v939_v32, 0.0 }
  0xb1   : > { %v1365_v37 = vpack.c.bf16 %v1237_v33, %v1237_v33  ;;  %v1397_v38 = vpack.c.bf16 %v1269_v34, %v1269_v34 }
  0xb2   : > { %v1302_v39 = vpack.c.bf16 %v1174_v35, %v1174_v35  ;;  %v1334_v41 = vpack.c.bf16 %v1206_v36, %v1206_v36 }
  0xb3   : > { %1494 = vst.msk [vmem:[%s2172_s29 + $0x108] sm:$0xf] %vm1427_vm3, %v1365_v37 }
  0xb4   : > { %1526 = vst.msk [vmem:[%s2172_s29 + $0x188] sm:$0xf] %vm1427_vm3, %v1397_v38  ;;  %v1018_v42 = vpop.f32.mrf.mxu2  ;;  %v1098_v43 = vpop.f32.mrf.mxu3 }
  0xb5   : > { %1431 = vst.msk [vmem:[%s2172_s29 + $0xc] sm:$0xf] %vm1427_vm3, %v1302_v39  ;;  %v1019_v46 = vadd.f32 %v2157_v40, %v1018_v42  ;;  %v1099_v47 = vadd.f32 %v2157_v40, %v1098_v43  ;;  %v861_v48 = vpop.f32.mrf.mxu0  ;;  %v941_v49 = vpop.f32.mrf.mxu1 }
  0xb6   : > { %1463 = vst.msk [vmem:[%s2172_s29 + $0x8c] sm:$0xf] %vm1427_vm3, %v1334_v41  ;;  %v862_v52 = vadd.f32 %v2157_v40, %v861_v48  ;;  %v942_v53 = vadd.f32 %v2157_v40, %v941_v49 }
  0xb7   : > { %v1238_v54 = vmax.f32 %v1019_v46, 0.0  ;;  %v1270_v55 = vmax.f32 %v1099_v47, 0.0 }
  0xb8   : > { %v1175_v56 = vmax.f32 %v862_v52, 0.0  ;;  %v1207_v57 = vmax.f32 %v942_v53, 0.0  ;;  %1895 = vmatmul.msk.bf16.gmra.mxu0 %vm642_vm2, %v1961_v44  ;;  %1911 = vmatmul.msk.bf16.gmra.mxu1 %vm642_vm2, %v1977_v45  ;;  %v1963_v53 = vld [vmem:[%s2088_s24 + $0x60] sm:$0xff] }
  0xb9   : > { %v1366_v58 = vpack.c.bf16 %v1238_v54, %v1238_v54  ;;  %v1398_v59 = vpack.c.bf16 %v1270_v55, %v1270_v55  ;;  %1927 = vmatmul.msk.bf16.gmra.mxu2 %vm642_vm2, %v1993_v50  ;;  %1943 = vmatmul.msk.bf16.gmra.mxu3 %vm642_vm2, %v2009_v51  ;;  %v1979_v54 = vld [vmem:[%s2088_s24 + $0xe0] sm:$0xff] }
  0xba   : > { %v1303_v60 = vpack.c.bf16 %v1175_v56, %v1175_v56  ;;  %v1335_v61 = vpack.c.bf16 %v1207_v57, %v1207_v57 }
  0xbb   : > { %1495 = vst.msk [vmem:[%s2172_s29 + $0x10c] sm:$0xf] %vm1427_vm3, %v1366_v58 }
  0xbc   : > { %1527 = vst.msk [vmem:[%s2172_s29 + $0x18c] sm:$0xf] %vm1427_vm3, %v1398_v59  ;;  %v1021_v62 = vpop.f32.mrf.mxu2  ;;  %v1101_v63 = vpop.f32.mrf.mxu3  ;;  %v1995_v59 = vld [vmem:[%s2088_s24 + $0x160] sm:$0xff] }
  0xbd   : > { %1432 = vst.msk [vmem:[%s2172_s29 + $0x10] sm:$0xf] %vm1427_vm3, %v1303_v60  ;;  %v1022_v0 = vadd.f32 %v2157_v40, %v1021_v62  ;;  %v1102_v1 = vadd.f32 %v2157_v40, %v1101_v63  ;;  %v863_v2 = vpop.f32.mrf.mxu0  ;;  %v943_v3 = vpop.f32.mrf.mxu1  ;;  %v2011_v60 = vld [vmem:[%s2088_s24 + $0x1e0] sm:$0xff] }
  0xbe   : > { %1464 = vst.msk [vmem:[%s2172_s29 + $0x90] sm:$0xf] %vm1427_vm3, %v1335_v61  ;;  %v864_v4 = vadd.f32 %v2157_v40, %v863_v2  ;;  %v944_v5 = vadd.f32 %v2157_v40, %v943_v3 }
  0xbf   : > { %v1239_v6 = vmax.f32 %v1022_v0, 0.0  ;;  %v1271_v7 = vmax.f32 %v1102_v1, 0.0 }
  0xc0   : > { %v1176_v8 = vmax.f32 %v864_v4, 0.0  ;;  %v1208_v9 = vmax.f32 %v944_v5, 0.0 }
  0xc1   : > { %v1367_v10 = vpack.c.bf16 %v1239_v6, %v1239_v6  ;;  %v1399_v11 = vpack.c.bf16 %v1271_v7, %v1271_v7 }
  0xc2   : > { %v1304_v12 = vpack.c.bf16 %v1176_v8, %v1176_v8  ;;  %v1336_v13 = vpack.c.bf16 %v1208_v9, %v1208_v9 }
  0xc3   : > { %1496 = vst.msk [vmem:[%s2172_s29 + $0x110] sm:$0xf] %vm1427_vm3, %v1367_v10 }
  0xc4   : > { %1528 = vst.msk [vmem:[%s2172_s29 + $0x190] sm:$0xf] %vm1427_vm3, %v1399_v11  ;;  %v1023_v14 = vpop.f32.mrf.mxu2  ;;  %v1103_v15 = vpop.f32.mrf.mxu3 }
  0xc5   : > { %1433 = vst.msk [vmem:[%s2172_s29 + $0x14] sm:$0xf] %vm1427_vm3, %v1304_v12  ;;  %v1024_v18 = vadd.f32 %v2157_v40, %v1023_v14  ;;  %v1104_v19 = vadd.f32 %v2157_v40, %v1103_v15  ;;  %v866_v20 = vpop.f32.mrf.mxu0  ;;  %v946_v21 = vpop.f32.mrf.mxu1 }
  0xc6   : > { %1465 = vst.msk [vmem:[%s2172_s29 + $0x94] sm:$0xf] %vm1427_vm3, %v1336_v13  ;;  %v867_v24 = vadd.f32 %v2157_v40, %v866_v20  ;;  %v947_v25 = vadd.f32 %v2157_v40, %v946_v21 }
  0xc7   : > { %v1240_v26 = vmax.f32 %v1024_v18, 0.0  ;;  %v1272_v27 = vmax.f32 %v1104_v19, 0.0 }
  0xc8   : > { %v1177_v28 = vmax.f32 %v867_v24, 0.0  ;;  %v1209_v29 = vmax.f32 %v947_v25, 0.0  ;;  %1896 = vmatmul.msk.bf16.gmra.mxu0 %vm642_vm2, %v1962_v16  ;;  %1912 = vmatmul.msk.bf16.gmra.mxu1 %vm642_vm2, %v1978_v17  ;;  %v1964_v25 = vld [vmem:[%s2088_s24 + $0x68] sm:$0xff] }
  0xc9   : > { %v1368_v30 = vpack.c.bf16 %v1240_v26, %v1240_v26  ;;  %v1400_v31 = vpack.c.bf16 %v1272_v27, %v1272_v27  ;;  %1928 = vmatmul.msk.bf16.gmra.mxu2 %vm642_vm2, %v1994_v22  ;;  %1944 = vmatmul.msk.bf16.gmra.mxu3 %vm642_vm2, %v2010_v23  ;;  %v1980_v26 = vld [vmem:[%s2088_s24 + $0xe8] sm:$0xff] }
  0xca   : > { %v1305_v32 = vpack.c.bf16 %v1177_v28, %v1177_v28  ;;  %v1337_v33 = vpack.c.bf16 %v1209_v29, %v1209_v29 }
  0xcb   : > { %1497 = vst.msk [vmem:[%s2172_s29 + $0x114] sm:$0xf] %vm1427_vm3, %v1368_v30 }
  0xcc   : > { %1529 = vst.msk [vmem:[%s2172_s29 + $0x194] sm:$0xf] %vm1427_vm3, %v1400_v31  ;;  %v1026_v34 = vpop.f32.mrf.mxu2  ;;  %v1106_v35 = vpop.f32.mrf.mxu3  ;;  %v1996_v31 = vld [vmem:[%s2088_s24 + $0x168] sm:$0xff] }
  0xcd   : > { %1434 = vst.msk [vmem:[%s2172_s29 + $0x18] sm:$0xf] %vm1427_vm3, %v1305_v32  ;;  %v1027_v36 = vadd.f32 %v2157_v40, %v1026_v34  ;;  %v1107_v37 = vadd.f32 %v2157_v40, %v1106_v35  ;;  %v868_v38 = vpop.f32.mrf.mxu0  ;;  %v948_v39 = vpop.f32.mrf.mxu1  ;;  %v2012_v32 = vld [vmem:[%s2088_s24 + $0x1e8] sm:$0xff] }
  0xce   : > { %1466 = vst.msk [vmem:[%s2172_s29 + $0x98] sm:$0xf] %vm1427_vm3, %v1337_v33  ;;  %v869_v41 = vadd.f32 %v2157_v40, %v868_v38  ;;  %v949_v42 = vadd.f32 %v2157_v40, %v948_v39 }
  0xcf   : > { %v1241_v43 = vmax.f32 %v1027_v36, 0.0  ;;  %v1273_v44 = vmax.f32 %v1107_v37, 0.0 }
  0xd0   : > { %v1178_v45 = vmax.f32 %v869_v41, 0.0  ;;  %v1210_v46 = vmax.f32 %v949_v42, 0.0 }
  0xd1   : > { %v1369_v47 = vpack.c.bf16 %v1241_v43, %v1241_v43  ;;  %v1401_v48 = vpack.c.bf16 %v1273_v44, %v1273_v44 }
  0xd2   : > { %v1306_v49 = vpack.c.bf16 %v1178_v45, %v1178_v45  ;;  %v1338_v50 = vpack.c.bf16 %v1210_v46, %v1210_v46 }
  0xd3   : > { %1498 = vst.msk [vmem:[%s2172_s29 + $0x118] sm:$0xf] %vm1427_vm3, %v1369_v47 }
  0xd4   : > { %1530 = vst.msk [vmem:[%s2172_s29 + $0x198] sm:$0xf] %vm1427_vm3, %v1401_v48  ;;  %v1028_v51 = vpop.f32.mrf.mxu2  ;;  %v1108_v52 = vpop.f32.mrf.mxu3 }
  0xd5   : > { %1435 = vst.msk [vmem:[%s2172_s29 + $0x1c] sm:$0xf] %vm1427_vm3, %v1306_v49  ;;  %v1029_v55 = vadd.f32 %v2157_v40, %v1028_v51  ;;  %v1109_v56 = vadd.f32 %v2157_v40, %v1108_v52  ;;  %v871_v57 = vpop.f32.mrf.mxu0  ;;  %v951_v58 = vpop.f32.mrf.mxu1 }
  0xd6   : > { %1467 = vst.msk [vmem:[%s2172_s29 + $0x9c] sm:$0xf] %vm1427_vm3, %v1338_v50  ;;  %v872_v61 = vadd.f32 %v2157_v40, %v871_v57  ;;  %v952_v62 = vadd.f32 %v2157_v40, %v951_v58 }
  0xd7   : > { %v1242_v63 = vmax.f32 %v1029_v55, 0.0  ;;  %v1274_v0 = vmax.f32 %v1109_v56, 0.0 }
  0xd8   : > { %v1179_v1 = vmax.f32 %v872_v61, 0.0  ;;  %v1211_v2 = vmax.f32 %v952_v62, 0.0  ;;  %1897 = vmatmul.msk.bf16.gmra.mxu0 %vm642_vm2, %v1963_v53  ;;  %1913 = vmatmul.msk.bf16.gmra.mxu1 %vm642_vm2, %v1979_v54  ;;  %v1965_v62 = vld [vmem:[%s2088_s24 + $0x70] sm:$0xff] }
  0xd9   : > { %v1370_v3 = vpack.c.bf16 %v1242_v63, %v1242_v63  ;;  %v1402_v4 = vpack.c.bf16 %v1274_v0, %v1274_v0  ;;  %1929 = vmatmul.msk.bf16.gmra.mxu2 %vm642_vm2, %v1995_v59  ;;  %1945 = vmatmul.msk.bf16.gmra.mxu3 %vm642_vm2, %v2011_v60  ;;  %v1981_v63 = vld [vmem:[%s2088_s24 + $0xf0] sm:$0xff] }
  0xda   : > { %v1307_v5 = vpack.c.bf16 %v1179_v1, %v1179_v1  ;;  %v1339_v6 = vpack.c.bf16 %v1211_v2, %v1211_v2 }
  0xdb   : > { %1499 = vst.msk [vmem:[%s2172_s29 + $0x11c] sm:$0xf] %vm1427_vm3, %v1370_v3 }
  0xdc   : > { %1531 = vst.msk [vmem:[%s2172_s29 + $0x19c] sm:$0xf] %vm1427_vm3, %v1402_v4  ;;  %v1031_v7 = vpop.f32.mrf.mxu2  ;;  %v1111_v8 = vpop.f32.mrf.mxu3  ;;  %v1997_v4 = vld [vmem:[%s2088_s24 + $0x170] sm:$0xff] }
  0xdd   : > { %1436 = vst.msk [vmem:[%s2172_s29 + $0x20] sm:$0xf] %vm1427_vm3, %v1307_v5  ;;  %v1032_v9 = vadd.f32 %v2157_v40, %v1031_v7  ;;  %v1112_v10 = vadd.f32 %v2157_v40, %v1111_v8  ;;  %v873_v11 = vpop.f32.mrf.mxu0  ;;  %v953_v12 = vpop.f32.mrf.mxu1  ;;  %v2013_v5 = vld [vmem:[%s2088_s24 + $0x1f0] sm:$0xff] }
  0xde   : > { %1468 = vst.msk [vmem:[%s2172_s29 + $0xa0] sm:$0xf] %vm1427_vm3, %v1339_v6  ;;  %v874_v13 = vadd.f32 %v2157_v40, %v873_v11  ;;  %v954_v14 = vadd.f32 %v2157_v40, %v953_v12 }
  0xdf   : > { %v1243_v15 = vmax.f32 %v1032_v9, 0.0  ;;  %v1275_v16 = vmax.f32 %v1112_v10, 0.0 }
  0xe0   : > { %v1180_v17 = vmax.f32 %v874_v13, 0.0  ;;  %v1212_v18 = vmax.f32 %v954_v14, 0.0 }
  0xe1   : > { %v1371_v19 = vpack.c.bf16 %v1243_v15, %v1243_v15  ;;  %v1403_v20 = vpack.c.bf16 %v1275_v16, %v1275_v16 }
  0xe2   : > { %v1308_v21 = vpack.c.bf16 %v1180_v17, %v1180_v17  ;;  %v1340_v22 = vpack.c.bf16 %v1212_v18, %v1212_v18 }
  0xe3   : > { %1500 = vst.msk [vmem:[%s2172_s29 + $0x120] sm:$0xf] %vm1427_vm3, %v1371_v19 }
  0xe4   : > { %1532 = vst.msk [vmem:[%s2172_s29 + $0x1a0] sm:$0xf] %vm1427_vm3, %v1403_v20  ;;  %v1033_v23 = vpop.f32.mrf.mxu2  ;;  %v1113_v24 = vpop.f32.mrf.mxu3 }
  0xe5   : > { %1437 = vst.msk [vmem:[%s2172_s29 + $0x24] sm:$0xf] %vm1427_vm3, %v1308_v21  ;;  %v1034_v27 = vadd.f32 %v2157_v40, %v1033_v23  ;;  %v1114_v28 = vadd.f32 %v2157_v40, %v1113_v24  ;;  %v876_v29 = vpop.f32.mrf.mxu0  ;;  %v956_v30 = vpop.f32.mrf.mxu1 }
  0xe6   : > { %1469 = vst.msk [vmem:[%s2172_s29 + $0xa4] sm:$0xf] %vm1427_vm3, %v1340_v22  ;;  %v877_v33 = vadd.f32 %v2157_v40, %v876_v29  ;;  %v957_v34 = vadd.f32 %v2157_v40, %v956_v30 }
  0xe7   : > { %v1244_v35 = vmax.f32 %v1034_v27, 0.0  ;;  %v1276_v36 = vmax.f32 %v1114_v28, 0.0 }
  0xe8   : > { %v1181_v37 = vmax.f32 %v877_v33, 0.0  ;;  %v1213_v38 = vmax.f32 %v957_v34, 0.0  ;;  %1898 = vmatmul.msk.bf16.gmra.mxu0 %vm642_vm2, %v1964_v25  ;;  %1914 = vmatmul.msk.bf16.gmra.mxu1 %vm642_vm2, %v1980_v26  ;;  %v1966_v34 = vld [vmem:[%s2088_s24 + $0x78] sm:$0xff] }
  0xe9   : > { %v1372_v39 = vpack.c.bf16 %v1244_v35, %v1244_v35  ;;  %v1404_v41 = vpack.c.bf16 %v1276_v36, %v1276_v36  ;;  %1930 = vmatmul.msk.bf16.gmra.mxu2 %vm642_vm2, %v1996_v31  ;;  %1946 = vmatmul.msk.bf16.gmra.mxu3 %vm642_vm2, %v2012_v32  ;;  %v1982_v35 = vld [vmem:[%s2088_s24 + $0xf8] sm:$0xff] }
  0xea   : > { %v1309_v42 = vpack.c.bf16 %v1181_v37, %v1181_v37  ;;  %v1341_v43 = vpack.c.bf16 %v1213_v38, %v1213_v38 }
  0xeb   : > { %1501 = vst.msk [vmem:[%s2172_s29 + $0x124] sm:$0xf] %vm1427_vm3, %v1372_v39 }
  0xec   : > { %1533 = vst.msk [vmem:[%s2172_s29 + $0x1a4] sm:$0xf] %vm1427_vm3, %v1404_v41  ;;  %v1036_v44 = vpop.f32.mrf.mxu2  ;;  %v1116_v45 = vpop.f32.mrf.mxu3  ;;  %v1998_v41 = vld [vmem:[%s2088_s24 + $0x178] sm:$0xff] }
  0xed   : > { %1438 = vst.msk [vmem:[%s2172_s29 + $0x28] sm:$0xf] %vm1427_vm3, %v1309_v42  ;;  %v1037_v46 = vadd.f32 %v2157_v40, %v1036_v44  ;;  %v1117_v47 = vadd.f32 %v2157_v40, %v1116_v45  ;;  %v878_v48 = vpop.f32.mrf.mxu0  ;;  %v958_v49 = vpop.f32.mrf.mxu1  ;;  %v2014_v42 = vld [vmem:[%s2088_s24 + $0x1f8] sm:$0xff] }
  0xee   : > { %1470 = vst.msk [vmem:[%s2172_s29 + $0xa8] sm:$0xf] %vm1427_vm3, %v1341_v43  ;;  %v879_v50 = vadd.f32 %v2157_v40, %v878_v48  ;;  %v959_v51 = vadd.f32 %v2157_v40, %v958_v49 }
  0xef   : > { %v1245_v52 = vmax.f32 %v1037_v46, 0.0  ;;  %v1277_v53 = vmax.f32 %v1117_v47, 0.0 }
  0xf0   : > { %v1182_v54 = vmax.f32 %v879_v50, 0.0  ;;  %v1214_v55 = vmax.f32 %v959_v51, 0.0 }
  0xf1   : > { %v1373_v56 = vpack.c.bf16 %v1245_v52, %v1245_v52  ;;  %v1405_v57 = vpack.c.bf16 %v1277_v53, %v1277_v53 }
  0xf2   : > { %v1310_v58 = vpack.c.bf16 %v1182_v54, %v1182_v54  ;;  %v1342_v59 = vpack.c.bf16 %v1214_v55, %v1214_v55 }
  0xf3   : > { %1502 = vst.msk [vmem:[%s2172_s29 + $0x128] sm:$0xf] %vm1427_vm3, %v1373_v56 }
  0xf4   : > { %1534 = vst.msk [vmem:[%s2172_s29 + $0x1a8] sm:$0xf] %vm1427_vm3, %v1405_v57  ;;  %v1038_v60 = vpop.f32.mrf.mxu2  ;;  %v1118_v61 = vpop.f32.mrf.mxu3 }
  0xf5   : > { %1439 = vst.msk [vmem:[%s2172_s29 + $0x2c] sm:$0xf] %vm1427_vm3, %v1310_v58  ;;  %v1039_v0 = vadd.f32 %v2157_v40, %v1038_v60  ;;  %v1119_v1 = vadd.f32 %v2157_v40, %v1118_v61  ;;  %v881_v2 = vpop.f32.mrf.mxu0  ;;  %v961_v3 = vpop.f32.mrf.mxu1 }
  0xf6   : > { %1471 = vst.msk [vmem:[%s2172_s29 + $0xac] sm:$0xf] %vm1427_vm3, %v1342_v59  ;;  %v882_v6 = vadd.f32 %v2157_v40, %v881_v2  ;;  %v962_v7 = vadd.f32 %v2157_v40, %v961_v3 }
  0xf7   : > { %v1246_v8 = vmax.f32 %v1039_v0, 0.0  ;;  %v1278_v9 = vmax.f32 %v1119_v1, 0.0 }
  0xf8   : > { %v1183_v10 = vmax.f32 %v882_v6, 0.0  ;;  %v1215_v11 = vmax.f32 %v962_v7, 0.0  ;;  %1899 = vmatmul.msk.bf16.gmra.mxu0 %vm642_vm2, %v1965_v62  ;;  %1915 = vmatmul.msk.bf16.gmra.mxu1 %vm642_vm2, %v1981_v63 }
  0xf9   : > { %v1374_v12 = vpack.c.bf16 %v1246_v8, %v1246_v8  ;;  %v1406_v13 = vpack.c.bf16 %v1278_v9, %v1278_v9  ;;  %1931 = vmatmul.msk.bf16.gmra.mxu2 %vm642_vm2, %v1997_v4  ;;  %1947 = vmatmul.msk.bf16.gmra.mxu3 %vm642_vm2, %v2013_v5 }
  0xfa   : > { %v1311_v14 = vpack.c.bf16 %v1183_v10, %v1183_v10  ;;  %v1343_v15 = vpack.c.bf16 %v1215_v11, %v1215_v11 }
  0xfb   : > { %1503 = vst.msk [vmem:[%s2172_s29 + $0x12c] sm:$0xf] %vm1427_vm3, %v1374_v12 }
  0xfc   : > { %1535 = vst.msk [vmem:[%s2172_s29 + $0x1ac] sm:$0xf] %vm1427_vm3, %v1406_v13  ;;  %v1041_v16 = vpop.f32.mrf.mxu2  ;;  %v1121_v17 = vpop.f32.mrf.mxu3 }
  0xfd   : > { %1440 = vst.msk [vmem:[%s2172_s29 + $0x30] sm:$0xf] %vm1427_vm3, %v1311_v14  ;;  %v1042_v18 = vadd.f32 %v2157_v40, %v1041_v16  ;;  %v1122_v19 = vadd.f32 %v2157_v40, %v1121_v17  ;;  %v883_v20 = vpop.f32.mrf.mxu0  ;;  %v963_v21 = vpop.f32.mrf.mxu1 }
  0xfe   : > { %1472 = vst.msk [vmem:[%s2172_s29 + $0xb0] sm:$0xf] %vm1427_vm3, %v1343_v15  ;;  %v884_v22 = vadd.f32 %v2157_v40, %v883_v20  ;;  %v964_v23 = vadd.f32 %v2157_v40, %v963_v21 }
  0xff   : > { %v1247_v24 = vmax.f32 %v1042_v18, 0.0  ;;  %v1279_v25 = vmax.f32 %v1122_v19, 0.0 }
 0x100   : > { %v1184_v26 = vmax.f32 %v884_v22, 0.0  ;;  %v1216_v27 = vmax.f32 %v964_v23, 0.0 }
 0x101   : > { %v1375_v28 = vpack.c.bf16 %v1247_v24, %v1247_v24  ;;  %v1407_v29 = vpack.c.bf16 %v1279_v25, %v1279_v25 }
 0x102   : > { %v1312_v30 = vpack.c.bf16 %v1184_v26, %v1184_v26  ;;  %v1344_v31 = vpack.c.bf16 %v1216_v27, %v1216_v27 }
 0x103   : > { %1504 = vst.msk [vmem:[%s2172_s29 + $0x130] sm:$0xf] %vm1427_vm3, %v1375_v28 }
 0x104   : > { %1536 = vst.msk [vmem:[%s2172_s29 + $0x1b0] sm:$0xf] %vm1427_vm3, %v1407_v29  ;;  %v1043_v32 = vpop.f32.mrf.mxu2  ;;  %v1123_v33 = vpop.f32.mrf.mxu3 }
 0x105   : > { %1441 = vst.msk [vmem:[%s2172_s29 + $0x34] sm:$0xf] %vm1427_vm3, %v1312_v30  ;;  %v1044_v36 = vadd.f32 %v2157_v40, %v1043_v32  ;;  %v1124_v37 = vadd.f32 %v2157_v40, %v1123_v33  ;;  %v886_v38 = vpop.f32.mrf.mxu0  ;;  %v966_v39 = vpop.f32.mrf.mxu1 }
 0x106   : > { %1473 = vst.msk [vmem:[%s2172_s29 + $0xb4] sm:$0xf] %vm1427_vm3, %v1344_v31  ;;  %v887_v43 = vadd.f32 %v2157_v40, %v886_v38  ;;  %v967_v44 = vadd.f32 %v2157_v40, %v966_v39 }
 0x107   : > { %v1248_v45 = vmax.f32 %v1044_v36, 0.0  ;;  %v1280_v46 = vmax.f32 %v1124_v37, 0.0 }
 0x108   : > { %v1185_v47 = vmax.f32 %v887_v43, 0.0  ;;  %v1217_v48 = vmax.f32 %v967_v44, 0.0  ;;  %1900 = vmatmul.msk.bf16.gmra.mxu0 %vm642_vm2, %v1966_v34  ;;  %1916 = vmatmul.msk.bf16.gmra.mxu1 %vm642_vm2, %v1982_v35 }
 0x109   : > { %v1376_v49 = vpack.c.bf16 %v1248_v45, %v1248_v45  ;;  %v1408_v50 = vpack.c.bf16 %v1280_v46, %v1280_v46  ;;  %1932 = vmatmul.msk.bf16.gmra.mxu2 %vm642_vm2, %v1998_v41  ;;  %1948 = vmatmul.msk.bf16.gmra.mxu3 %vm642_vm2, %v2014_v42 }
 0x10a   : > { %v1313_v51 = vpack.c.bf16 %v1185_v47, %v1185_v47  ;;  %v1345_v52 = vpack.c.bf16 %v1217_v48, %v1217_v48 }
 0x10b   : > { %1505 = vst.msk [vmem:[%s2172_s29 + $0x134] sm:$0xf] %vm1427_vm3, %v1376_v49 }
 0x10c   : > { %1537 = vst.msk [vmem:[%s2172_s29 + $0x1b4] sm:$0xf] %vm1427_vm3, %v1408_v50  ;;  %v1046_v53 = vpop.f32.mrf.mxu2  ;;  %v1126_v54 = vpop.f32.mrf.mxu3 }
 0x10d   : > { %1442 = vst.msk [vmem:[%s2172_s29 + $0x38] sm:$0xf] %vm1427_vm3, %v1313_v51  ;;  %v1047_v55 = vadd.f32 %v2157_v40, %v1046_v53  ;;  %v1127_v56 = vadd.f32 %v2157_v40, %v1126_v54  ;;  %v888_v57 = vpop.f32.mrf.mxu0  ;;  %v968_v58 = vpop.f32.mrf.mxu1 }
 0x10e   : > { %1474 = vst.msk [vmem:[%s2172_s29 + $0xb8] sm:$0xf] %vm1427_vm3, %v1345_v52  ;;  %v889_v59 = vadd.f32 %v2157_v40, %v888_v57  ;;  %v969_v60 = vadd.f32 %v2157_v40, %v968_v58 }
 0x10f   : > { %v1249_v61 = vmax.f32 %v1047_v55, 0.0  ;;  %v1281_v62 = vmax.f32 %v1127_v56, 0.0 }
 0x110   : > { %v1186_v63 = vmax.f32 %v889_v59, 0.0  ;;  %v1218_v0 = vmax.f32 %v969_v60, 0.0 }
 0x111   : > { %v1377_v1 = vpack.c.bf16 %v1249_v61, %v1249_v61  ;;  %v1409_v2 = vpack.c.bf16 %v1281_v62, %v1281_v62 }
 0x112   : > { %v1314_v3 = vpack.c.bf16 %v1186_v63, %v1186_v63  ;;  %v1346_v4 = vpack.c.bf16 %v1218_v0, %v1218_v0 }
 0x113   : > { %1506 = vst.msk [vmem:[%s2172_s29 + $0x138] sm:$0xf] %vm1427_vm3, %v1377_v1 }
 0x114   : > { %1538 = vst.msk [vmem:[%s2172_s29 + $0x1b8] sm:$0xf] %vm1427_vm3, %v1409_v2  ;;  %v1048_v5 = vpop.f32.mrf.mxu2  ;;  %v1128_v6 = vpop.f32.mrf.mxu3 }
 0x115   : > { %1443 = vst.msk [vmem:[%s2172_s29 + $0x3c] sm:$0xf] %vm1427_vm3, %v1314_v3  ;;  %v1049_v7 = vadd.f32 %v2157_v40, %v1048_v5  ;;  %v1129_v8 = vadd.f32 %v2157_v40, %v1128_v6  ;;  %v891_v9 = vpop.f32.mrf.mxu0  ;;  %v971_v10 = vpop.f32.mrf.mxu1 }
 0x116   : > { %1475 = vst.msk [vmem:[%s2172_s29 + $0xbc] sm:$0xf] %vm1427_vm3, %v1346_v4  ;;  %v892_v11 = vadd.f32 %v2157_v40, %v891_v9  ;;  %v972_v12 = vadd.f32 %v2157_v40, %v971_v10 }
 0x117   : > { %v1250_v13 = vmax.f32 %v1049_v7, 0.0  ;;  %v1282_v14 = vmax.f32 %v1129_v8, 0.0 }
 0x118   : > { %v1187_v15 = vmax.f32 %v892_v11, 0.0  ;;  %v1219_v16 = vmax.f32 %v972_v12, 0.0 }
 0x119   : > { %v1378_v17 = vpack.c.bf16 %v1250_v13, %v1250_v13  ;;  %v1410_v18 = vpack.c.bf16 %v1282_v14, %v1282_v14 }
 0x11a   : > { %v1315_v19 = vpack.c.bf16 %v1187_v15, %v1187_v15  ;;  %v1347_v20 = vpack.c.bf16 %v1219_v16, %v1219_v16 }
 0x11b   : > { %1507 = vst.msk [vmem:[%s2172_s29 + $0x13c] sm:$0xf] %vm1427_vm3, %v1378_v17 }
 0x11c   : > { %1539 = vst.msk [vmem:[%s2172_s29 + $0x1bc] sm:$0xf] %vm1427_vm3, %v1410_v18  ;;  %v1051_v21 = vpop.f32.mrf.mxu2  ;;  %v1131_v22 = vpop.f32.mrf.mxu3 }
 0x11d   : > { %1444 = vst.msk [vmem:[%s2172_s29 + $0x40] sm:$0xf] %vm1427_vm3, %v1315_v19  ;;  %v1052_v23 = vadd.f32 %v2157_v40, %v1051_v21  ;;  %v1132_v24 = vadd.f32 %v2157_v40, %v1131_v22  ;;  %v893_v25 = vpop.f32.mrf.mxu0  ;;  %v973_v26 = vpop.f32.mrf.mxu1 }
 0x11e   : > { %1476 = vst.msk [vmem:[%s2172_s29 + $0xc0] sm:$0xf] %vm1427_vm3, %v1347_v20  ;;  %v894_v27 = vadd.f32 %v2157_v40, %v893_v25  ;;  %v974_v28 = vadd.f32 %v2157_v40, %v973_v26 }
 0x11f   : > { %v1251_v29 = vmax.f32 %v1052_v23, 0.0  ;;  %v1283_v30 = vmax.f32 %v1132_v24, 0.0 }
 0x120   : > { %v1188_v31 = vmax.f32 %v894_v27, 0.0  ;;  %v1220_v32 = vmax.f32 %v974_v28, 0.0 }
 0x121   : > { %v1379_v33 = vpack.c.bf16 %v1251_v29, %v1251_v29  ;;  %v1411_v34 = vpack.c.bf16 %v1283_v30, %v1283_v30 }
 0x122   : > { %v1316_v35 = vpack.c.bf16 %v1188_v31, %v1188_v31  ;;  %v1348_v36 = vpack.c.bf16 %v1220_v32, %v1220_v32 }
 0x123   : > { %1508 = vst.msk [vmem:[%s2172_s29 + $0x140] sm:$0xf] %vm1427_vm3, %v1379_v33 }
 0x124   : > { %1540 = vst.msk [vmem:[%s2172_s29 + $0x1c0] sm:$0xf] %vm1427_vm3, %v1411_v34  ;;  %v1053_v37 = vpop.f32.mrf.mxu2  ;;  %v1133_v38 = vpop.f32.mrf.mxu3 }
 0x125   : > { %1445 = vst.msk [vmem:[%s2172_s29 + $0x44] sm:$0xf] %vm1427_vm3, %v1316_v35  ;;  %v1054_v39 = vadd.f32 %v2157_v40, %v1053_v37  ;;  %v1134_v41 = vadd.f32 %v2157_v40, %v1133_v38  ;;  %v896_v42 = vpop.f32.mrf.mxu0  ;;  %v976_v43 = vpop.f32.mrf.mxu1 }
 0x126   : > { %1477 = vst.msk [vmem:[%s2172_s29 + $0xc4] sm:$0xf] %vm1427_vm3, %v1348_v36  ;;  %v897_v44 = vadd.f32 %v2157_v40, %v896_v42  ;;  %v977_v45 = vadd.f32 %v2157_v40, %v976_v43 }
 0x127   : > { %v1252_v46 = vmax.f32 %v1054_v39, 0.0  ;;  %v1284_v47 = vmax.f32 %v1134_v41, 0.0 }
 0x128   : > { %v1189_v48 = vmax.f32 %v897_v44, 0.0  ;;  %v1221_v49 = vmax.f32 %v977_v45, 0.0 }
 0x129   : > { %v1380_v50 = vpack.c.bf16 %v1252_v46, %v1252_v46  ;;  %v1412_v51 = vpack.c.bf16 %v1284_v47, %v1284_v47 }
 0x12a   : > { %v1317_v52 = vpack.c.bf16 %v1189_v48, %v1189_v48  ;;  %v1349_v53 = vpack.c.bf16 %v1221_v49, %v1221_v49 }
 0x12b   : > { %1509 = vst.msk [vmem:[%s2172_s29 + $0x144] sm:$0xf] %vm1427_vm3, %v1380_v50 }
 0x12c   : > { %1541 = vst.msk [vmem:[%s2172_s29 + $0x1c4] sm:$0xf] %vm1427_vm3, %v1412_v51  ;;  %v1056_v54 = vpop.f32.mrf.mxu2  ;;  %v1136_v55 = vpop.f32.mrf.mxu3 }
 0x12d   : > { %1446 = vst.msk [vmem:[%s2172_s29 + $0x48] sm:$0xf] %vm1427_vm3, %v1317_v52  ;;  %v1057_v56 = vadd.f32 %v2157_v40, %v1056_v54  ;;  %v1137_v57 = vadd.f32 %v2157_v40, %v1136_v55  ;;  %v898_v58 = vpop.f32.mrf.mxu0  ;;  %v978_v59 = vpop.f32.mrf.mxu1 }
 0x12e   : > { %1478 = vst.msk [vmem:[%s2172_s29 + $0xc8] sm:$0xf] %vm1427_vm3, %v1349_v53  ;;  %v899_v60 = vadd.f32 %v2157_v40, %v898_v58  ;;  %v979_v61 = vadd.f32 %v2157_v40, %v978_v59 }
 0x12f   : > { %v1253_v62 = vmax.f32 %v1057_v56, 0.0  ;;  %v1285_v63 = vmax.f32 %v1137_v57, 0.0 }
 0x130   : > { %v1190_v0 = vmax.f32 %v899_v60, 0.0  ;;  %v1222_v1 = vmax.f32 %v979_v61, 0.0 }
 0x131   : > { %v1381_v2 = vpack.c.bf16 %v1253_v62, %v1253_v62  ;;  %v1413_v3 = vpack.c.bf16 %v1285_v63, %v1285_v63 }
 0x132   : > { %v1318_v4 = vpack.c.bf16 %v1190_v0, %v1190_v0  ;;  %v1350_v5 = vpack.c.bf16 %v1222_v1, %v1222_v1 }
 0x133   : > { %1510 = vst.msk [vmem:[%s2172_s29 + $0x148] sm:$0xf] %vm1427_vm3, %v1381_v2 }
 0x134   : > { %1542 = vst.msk [vmem:[%s2172_s29 + $0x1c8] sm:$0xf] %vm1427_vm3, %v1413_v3  ;;  %v1058_v6 = vpop.f32.mrf.mxu2  ;;  %v1138_v7 = vpop.f32.mrf.mxu3 }
 0x135   : > { %1447 = vst.msk [vmem:[%s2172_s29 + $0x4c] sm:$0xf] %vm1427_vm3, %v1318_v4  ;;  %v1059_v8 = vadd.f32 %v2157_v40, %v1058_v6  ;;  %v1139_v9 = vadd.f32 %v2157_v40, %v1138_v7  ;;  %v901_v10 = vpop.f32.mrf.mxu0  ;;  %v981_v11 = vpop.f32.mrf.mxu1 }
 0x136   : > { %1479 = vst.msk [vmem:[%s2172_s29 + $0xcc] sm:$0xf] %vm1427_vm3, %v1350_v5  ;;  %v902_v12 = vadd.f32 %v2157_v40, %v901_v10  ;;  %v982_v13 = vadd.f32 %v2157_v40, %v981_v11 }
 0x137   : > { %v1254_v14 = vmax.f32 %v1059_v8, 0.0  ;;  %v1286_v15 = vmax.f32 %v1139_v9, 0.0 }
 0x138   : > { %v1191_v16 = vmax.f32 %v902_v12, 0.0  ;;  %v1223_v17 = vmax.f32 %v982_v13, 0.0 }
 0x139   : > { %v1382_v18 = vpack.c.bf16 %v1254_v14, %v1254_v14  ;;  %v1414_v19 = vpack.c.bf16 %v1286_v15, %v1286_v15 }
 0x13a   : > { %v1319_v20 = vpack.c.bf16 %v1191_v16, %v1191_v16  ;;  %v1351_v21 = vpack.c.bf16 %v1223_v17, %v1223_v17 }
 0x13b   : > { %1511 = vst.msk [vmem:[%s2172_s29 + $0x14c] sm:$0xf] %vm1427_vm3, %v1382_v18 }
 0x13c   : > { %1543 = vst.msk [vmem:[%s2172_s29 + $0x1cc] sm:$0xf] %vm1427_vm3, %v1414_v19  ;;  %v1061_v22 = vpop.f32.mrf.mxu2  ;;  %v1141_v23 = vpop.f32.mrf.mxu3 }
 0x13d   : > { %1448 = vst.msk [vmem:[%s2172_s29 + $0x50] sm:$0xf] %vm1427_vm3, %v1319_v20  ;;  %v1062_v24 = vadd.f32 %v2157_v40, %v1061_v22  ;;  %v1142_v25 = vadd.f32 %v2157_v40, %v1141_v23  ;;  %v903_v26 = vpop.f32.mrf.mxu0  ;;  %v983_v27 = vpop.f32.mrf.mxu1 }
 0x13e   : > { %1480 = vst.msk [vmem:[%s2172_s29 + $0xd0] sm:$0xf] %vm1427_vm3, %v1351_v21  ;;  %v904_v28 = vadd.f32 %v2157_v40, %v903_v26  ;;  %v984_v29 = vadd.f32 %v2157_v40, %v983_v27 }
 0x13f   : > { %v1255_v30 = vmax.f32 %v1062_v24, 0.0  ;;  %v1287_v31 = vmax.f32 %v1142_v25, 0.0 }
 0x140   : > { %v1192_v32 = vmax.f32 %v904_v28, 0.0  ;;  %v1224_v33 = vmax.f32 %v984_v29, 0.0 }
 0x141   : > { %v1383_v34 = vpack.c.bf16 %v1255_v30, %v1255_v30  ;;  %v1415_v35 = vpack.c.bf16 %v1287_v31, %v1287_v31 }
 0x142   : > { %v1320_v36 = vpack.c.bf16 %v1192_v32, %v1192_v32  ;;  %v1352_v37 = vpack.c.bf16 %v1224_v33, %v1224_v33 }
 0x143   : > { %1512 = vst.msk [vmem:[%s2172_s29 + $0x150] sm:$0xf] %vm1427_vm3, %v1383_v34 }
 0x144   : > { %1544 = vst.msk [vmem:[%s2172_s29 + $0x1d0] sm:$0xf] %vm1427_vm3, %v1415_v35  ;;  %v1063_v38 = vpop.f32.mrf.mxu2  ;;  %v1143_v39 = vpop.f32.mrf.mxu3 }
 0x145   : > { %1449 = vst.msk [vmem:[%s2172_s29 + $0x54] sm:$0xf] %vm1427_vm3, %v1320_v36  ;;  %v1064_v41 = vadd.f32 %v2157_v40, %v1063_v38  ;;  %v1144_v42 = vadd.f32 %v2157_v40, %v1143_v39  ;;  %v906_v43 = vpop.f32.mrf.mxu0  ;;  %v986_v44 = vpop.f32.mrf.mxu1 }
 0x146   : > { %1481 = vst.msk [vmem:[%s2172_s29 + $0xd4] sm:$0xf] %vm1427_vm3, %v1352_v37  ;;  %v907_v45 = vadd.f32 %v2157_v40, %v906_v43  ;;  %v987_v46 = vadd.f32 %v2157_v40, %v986_v44  ;;  %v2501_v40 = vld [vmem:[%s2624_s2] ss:$0 sm:$0xff] }
 0x147   : > { %v1256_v47 = vmax.f32 %v1064_v41, 0.0  ;;  %v1288_v48 = vmax.f32 %v1144_v42, 0.0 }
 0x148   : > { %v1193_v49 = vmax.f32 %v907_v45, 0.0  ;;  %v1225_v50 = vmax.f32 %v987_v46, 0.0 }
 0x149   : > { %v1384_v51 = vpack.c.bf16 %v1256_v47, %v1256_v47  ;;  %v1416_v52 = vpack.c.bf16 %v1288_v48, %v1288_v48 }
 0x14a   : > { %v1321_v53 = vpack.c.bf16 %v1193_v49, %v1193_v49  ;;  %v1353_v54 = vpack.c.bf16 %v1225_v50, %v1225_v50 }
 0x14b   : > { %1513 = vst.msk [vmem:[%s2172_s29 + $0x154] sm:$0xf] %vm1427_vm3, %v1384_v51 }
 0x14c   : > { %1545 = vst.msk [vmem:[%s2172_s29 + $0x1d4] sm:$0xf] %vm1427_vm3, %v1416_v52  ;;  %v1066_v55 = vpop.f32.mrf.mxu2  ;;  %v1146_v56 = vpop.f32.mrf.mxu3 }
 0x14d   : > { %1450 = vst.msk [vmem:[%s2172_s29 + $0x58] sm:$0xf] %vm1427_vm3, %v1321_v53  ;;  %v1067_v57 = vadd.f32 %v2501_v40, %v1066_v55  ;;  %v1147_v58 = vadd.f32 %v2501_v40, %v1146_v56  ;;  %v908_v59 = vpop.f32.mrf.mxu0  ;;  %v988_v60 = vpop.f32.mrf.mxu1 }
 0x14e   : > { %1482 = vst.msk [vmem:[%s2172_s29 + $0xd8] sm:$0xf] %vm1427_vm3, %v1353_v54  ;;  %v909_v61 = vadd.f32 %v2501_v40, %v908_v59  ;;  %v989_v62 = vadd.f32 %v2501_v40, %v988_v60 }
 0x14f   : > { %v1257_v63 = vmax.f32 %v1067_v57, 0.0  ;;  %v1289_v0 = vmax.f32 %v1147_v58, 0.0 }
 0x150   : > { %v1194_v1 = vmax.f32 %v909_v61, 0.0  ;;  %v1226_v2 = vmax.f32 %v989_v62, 0.0 }
 0x151   : > { %v1385_v3 = vpack.c.bf16 %v1257_v63, %v1257_v63  ;;  %v1417_v4 = vpack.c.bf16 %v1289_v0, %v1289_v0 }
 0x152   : > { %v1322_v5 = vpack.c.bf16 %v1194_v1, %v1194_v1  ;;  %v1354_v6 = vpack.c.bf16 %v1226_v2, %v1226_v2 }
 0x153   : > { %1514 = vst.msk [vmem:[%s2172_s29 + $0x158] sm:$0xf] %vm1427_vm3, %v1385_v3 }
 0x154   : > { %1546 = vst.msk [vmem:[%s2172_s29 + $0x1d8] sm:$0xf] %vm1427_vm3, %v1417_v4  ;;  %v1068_v7 = vpop.f32.mrf.mxu2  ;;  %v1148_v8 = vpop.f32.mrf.mxu3 }
 0x155   : > { %1451 = vst.msk [vmem:[%s2172_s29 + $0x5c] sm:$0xf] %vm1427_vm3, %v1322_v5  ;;  %v1069_v9 = vadd.f32 %v2501_v40, %v1068_v7  ;;  %v1149_v10 = vadd.f32 %v2501_v40, %v1148_v8  ;;  %v911_v11 = vpop.f32.mrf.mxu0  ;;  %v991_v12 = vpop.f32.mrf.mxu1 }
 0x156   : > { %1483 = vst.msk [vmem:[%s2172_s29 + $0xdc] sm:$0xf] %vm1427_vm3, %v1354_v6  ;;  %v912_v13 = vadd.f32 %v2501_v40, %v911_v11  ;;  %v992_v14 = vadd.f32 %v2501_v40, %v991_v12 }
 0x157   : > { %v1258_v15 = vmax.f32 %v1069_v9, 0.0  ;;  %v1290_v16 = vmax.f32 %v1149_v10, 0.0 }
 0x158   : > { %v1195_v17 = vmax.f32 %v912_v13, 0.0  ;;  %v1227_v18 = vmax.f32 %v992_v14, 0.0 }
 0x159   : > { %v1386_v19 = vpack.c.bf16 %v1258_v15, %v1258_v15  ;;  %v1418_v20 = vpack.c.bf16 %v1290_v16, %v1290_v16 }
 0x15a   : > { %v1323_v21 = vpack.c.bf16 %v1195_v17, %v1195_v17  ;;  %v1355_v22 = vpack.c.bf16 %v1227_v18, %v1227_v18 }
 0x15b   : > { %1515 = vst.msk [vmem:[%s2172_s29 + $0x15c] sm:$0xf] %vm1427_vm3, %v1386_v19 }
 0x15c   : > { %1547 = vst.msk [vmem:[%s2172_s29 + $0x1dc] sm:$0xf] %vm1427_vm3, %v1418_v20  ;;  %v1071_v23 = vpop.f32.mrf.mxu2  ;;  %v1151_v24 = vpop.f32.mrf.mxu3 }
 0x15d   : > { %1452 = vst.msk [vmem:[%s2172_s29 + $0x60] sm:$0xf] %vm1427_vm3, %v1323_v21  ;;  %v1072_v25 = vadd.f32 %v2501_v40, %v1071_v23  ;;  %v1152_v26 = vadd.f32 %v2501_v40, %v1151_v24  ;;  %v913_v27 = vpop.f32.mrf.mxu0  ;;  %v993_v28 = vpop.f32.mrf.mxu1 }
 0x15e   : > { %1484 = vst.msk [vmem:[%s2172_s29 + $0xe0] sm:$0xf] %vm1427_vm3, %v1355_v22  ;;  %v914_v29 = vadd.f32 %v2501_v40, %v913_v27  ;;  %v994_v30 = vadd.f32 %v2501_v40, %v993_v28 }
 0x15f   : > { %v1259_v31 = vmax.f32 %v1072_v25, 0.0  ;;  %v1291_v32 = vmax.f32 %v1152_v26, 0.0 }
 0x160   : > { %v1196_v33 = vmax.f32 %v914_v29, 0.0  ;;  %v1228_v34 = vmax.f32 %v994_v30, 0.0 }
 0x161   : > { %v1387_v35 = vpack.c.bf16 %v1259_v31, %v1259_v31  ;;  %v1419_v36 = vpack.c.bf16 %v1291_v32, %v1291_v32 }
 0x162   : > { %v1324_v37 = vpack.c.bf16 %v1196_v33, %v1196_v33  ;;  %v1356_v38 = vpack.c.bf16 %v1228_v34, %v1228_v34 }
 0x163   : > { %1516 = vst.msk [vmem:[%s2172_s29 + $0x160] sm:$0xf] %vm1427_vm3, %v1387_v35 }
 0x164   : > { %1548 = vst.msk [vmem:[%s2172_s29 + $0x1e0] sm:$0xf] %vm1427_vm3, %v1419_v36  ;;  %v1073_v39 = vpop.f32.mrf.mxu2  ;;  %v1153_v41 = vpop.f32.mrf.mxu3 }
 0x165   : > { %1453 = vst.msk [vmem:[%s2172_s29 + $0x64] sm:$0xf] %vm1427_vm3, %v1324_v37  ;;  %v1074_v42 = vadd.f32 %v2501_v40, %v1073_v39  ;;  %v1154_v43 = vadd.f32 %v2501_v40, %v1153_v41  ;;  %v916_v44 = vpop.f32.mrf.mxu0  ;;  %v996_v45 = vpop.f32.mrf.mxu1 }
 0x166   : > { %1485 = vst.msk [vmem:[%s2172_s29 + $0xe4] sm:$0xf] %vm1427_vm3, %v1356_v38  ;;  %v917_v46 = vadd.f32 %v2501_v40, %v916_v44  ;;  %v997_v47 = vadd.f32 %v2501_v40, %v996_v45 }
 0x167   : > { %v1260_v48 = vmax.f32 %v1074_v42, 0.0  ;;  %v1292_v49 = vmax.f32 %v1154_v43, 0.0 }
 0x168   : > { %v1197_v50 = vmax.f32 %v917_v46, 0.0  ;;  %v1229_v51 = vmax.f32 %v997_v47, 0.0 }
 0x169   : > { %v1388_v52 = vpack.c.bf16 %v1260_v48, %v1260_v48  ;;  %v1420_v53 = vpack.c.bf16 %v1292_v49, %v1292_v49 }
 0x16a   : > { %v1325_v54 = vpack.c.bf16 %v1197_v50, %v1197_v50  ;;  %v1357_v55 = vpack.c.bf16 %v1229_v51, %v1229_v51 }
 0x16b   : > { %1517 = vst.msk [vmem:[%s2172_s29 + $0x164] sm:$0xf] %vm1427_vm3, %v1388_v52 }
 0x16c   : > { %1549 = vst.msk [vmem:[%s2172_s29 + $0x1e4] sm:$0xf] %vm1427_vm3, %v1420_v53  ;;  %v1076_v56 = vpop.f32.mrf.mxu2  ;;  %v1156_v57 = vpop.f32.mrf.mxu3 }
 0x16d   : > { %1454 = vst.msk [vmem:[%s2172_s29 + $0x68] sm:$0xf] %vm1427_vm3, %v1325_v54  ;;  %v1077_v58 = vadd.f32 %v2501_v40, %v1076_v56  ;;  %v1157_v59 = vadd.f32 %v2501_v40, %v1156_v57  ;;  %v918_v60 = vpop.f32.mrf.mxu0  ;;  %v998_v61 = vpop.f32.mrf.mxu1 }
 0x16e   : > { %1486 = vst.msk [vmem:[%s2172_s29 + $0xe8] sm:$0xf] %vm1427_vm3, %v1357_v55  ;;  %v919_v62 = vadd.f32 %v2501_v40, %v918_v60  ;;  %v999_v63 = vadd.f32 %v2501_v40, %v998_v61 }
 0x16f   : > { %v1261_v0 = vmax.f32 %v1077_v58, 0.0  ;;  %v1293_v1 = vmax.f32 %v1157_v59, 0.0 }
 0x170   : > { %v1198_v2 = vmax.f32 %v919_v62, 0.0  ;;  %v1230_v3 = vmax.f32 %v999_v63, 0.0 }
 0x171   : > { %v1389_v4 = vpack.c.bf16 %v1261_v0, %v1261_v0  ;;  %v1421_v5 = vpack.c.bf16 %v1293_v1, %v1293_v1 }
 0x172   : > { %v1326_v6 = vpack.c.bf16 %v1198_v2, %v1198_v2  ;;  %v1358_v7 = vpack.c.bf16 %v1230_v3, %v1230_v3 }
 0x173   : > { %1518 = vst.msk [vmem:[%s2172_s29 + $0x168] sm:$0xf] %vm1427_vm3, %v1389_v4 }
 0x174   : > { %1550 = vst.msk [vmem:[%s2172_s29 + $0x1e8] sm:$0xf] %vm1427_vm3, %v1421_v5  ;;  %v1078_v8 = vpop.f32.mrf.mxu2  ;;  %v1158_v9 = vpop.f32.mrf.mxu3 }
 0x175   : > { %1455 = vst.msk [vmem:[%s2172_s29 + $0x6c] sm:$0xf] %vm1427_vm3, %v1326_v6  ;;  %v1079_v10 = vadd.f32 %v2501_v40, %v1078_v8  ;;  %v1159_v11 = vadd.f32 %v2501_v40, %v1158_v9  ;;  %v921_v12 = vpop.f32.mrf.mxu0  ;;  %v1001_v13 = vpop.f32.mrf.mxu1 }
 0x176   : > { %1487 = vst.msk [vmem:[%s2172_s29 + $0xec] sm:$0xf] %vm1427_vm3, %v1358_v7  ;;  %v922_v14 = vadd.f32 %v2501_v40, %v921_v12  ;;  %v1002_v15 = vadd.f32 %v2501_v40, %v1001_v13 }
 0x177   : > { %v1262_v16 = vmax.f32 %v1079_v10, 0.0  ;;  %v1294_v17 = vmax.f32 %v1159_v11, 0.0 }
 0x178   : > { %v1199_v18 = vmax.f32 %v922_v14, 0.0  ;;  %v1231_v19 = vmax.f32 %v1002_v15, 0.0 }
 0x179   : > { %v1390_v20 = vpack.c.bf16 %v1262_v16, %v1262_v16  ;;  %v1422_v21 = vpack.c.bf16 %v1294_v17, %v1294_v17 }
 0x17a   : > { %v1327_v22 = vpack.c.bf16 %v1199_v18, %v1199_v18  ;;  %v1359_v23 = vpack.c.bf16 %v1231_v19, %v1231_v19 }
 0x17b   : > { %1519 = vst.msk [vmem:[%s2172_s29 + $0x16c] sm:$0xf] %vm1427_vm3, %v1390_v20 }
 0x17c   : > { %1551 = vst.msk [vmem:[%s2172_s29 + $0x1ec] sm:$0xf] %vm1427_vm3, %v1422_v21  ;;  %v1081_v24 = vpop.f32.mrf.mxu2  ;;  %v1161_v25 = vpop.f32.mrf.mxu3 }
 0x17d   : > { %1456 = vst.msk [vmem:[%s2172_s29 + $0x70] sm:$0xf] %vm1427_vm3, %v1327_v22  ;;  %v1082_v26 = vadd.f32 %v2501_v40, %v1081_v24  ;;  %v1162_v27 = vadd.f32 %v2501_v40, %v1161_v25  ;;  %v923_v28 = vpop.f32.mrf.mxu0  ;;  %v1003_v29 = vpop.f32.mrf.mxu1 }
 0x17e   : > { %1488 = vst.msk [vmem:[%s2172_s29 + $0xf0] sm:$0xf] %vm1427_vm3, %v1359_v23  ;;  %v924_v30 = vadd.f32 %v2501_v40, %v923_v28  ;;  %v1004_v31 = vadd.f32 %v2501_v40, %v1003_v29 }
 0x17f   : > { %v1263_v32 = vmax.f32 %v1082_v26, 0.0  ;;  %v1295_v33 = vmax.f32 %v1162_v27, 0.0 }
 0x180   : > { %v1200_v34 = vmax.f32 %v924_v30, 0.0  ;;  %v1232_v35 = vmax.f32 %v1004_v31, 0.0 }
 0x181   : > { %v1391_v36 = vpack.c.bf16 %v1263_v32, %v1263_v32  ;;  %v1423_v37 = vpack.c.bf16 %v1295_v33, %v1295_v33 }
 0x182   : > { %v1328_v38 = vpack.c.bf16 %v1200_v34, %v1200_v34  ;;  %v1360_v39 = vpack.c.bf16 %v1232_v35, %v1232_v35 }
 0x183   : > { %1520 = vst.msk [vmem:[%s2172_s29 + $0x170] sm:$0xf] %vm1427_vm3, %v1391_v36 }
 0x184   : > { %1552 = vst.msk [vmem:[%s2172_s29 + $0x1f0] sm:$0xf] %vm1427_vm3, %v1423_v37  ;;  %v1083_v41 = vpop.f32.mrf.mxu2  ;;  %v1163_v42 = vpop.f32.mrf.mxu3 }
 0x185   : > { %1457 = vst.msk [vmem:[%s2172_s29 + $0x74] sm:$0xf] %vm1427_vm3, %v1328_v38  ;;  %v1084_v43 = vadd.f32 %v2501_v40, %v1083_v41  ;;  %v1164_v44 = vadd.f32 %v2501_v40, %v1163_v42  ;;  %v926_v45 = vpop.f32.mrf.mxu0  ;;  %v1006_v46 = vpop.f32.mrf.mxu1 }
 0x186   : > { %1489 = vst.msk [vmem:[%s2172_s29 + $0xf4] sm:$0xf] %vm1427_vm3, %v1360_v39  ;;  %v927_v47 = vadd.f32 %v2501_v40, %v926_v45  ;;  %v1007_v48 = vadd.f32 %v2501_v40, %v1006_v46 }
 0x187   : > { %v1264_v49 = vmax.f32 %v1084_v43, 0.0  ;;  %v1296_v50 = vmax.f32 %v1164_v44, 0.0 }
 0x188   : > { %v1201_v51 = vmax.f32 %v927_v47, 0.0  ;;  %v1233_v52 = vmax.f32 %v1007_v48, 0.0 }
 0x189   : > { %v1392_v53 = vpack.c.bf16 %v1264_v49, %v1264_v49  ;;  %v1424_v54 = vpack.c.bf16 %v1296_v50, %v1296_v50 }
 0x18a   : > { %v1329_v55 = vpack.c.bf16 %v1201_v51, %v1201_v51  ;;  %v1361_v56 = vpack.c.bf16 %v1233_v52, %v1233_v52 }
 0x18b   : > { %1521 = vst.msk [vmem:[%s2172_s29 + $0x174] sm:$0xf] %vm1427_vm3, %v1392_v53 }
 0x18c   : > { %1553 = vst.msk [vmem:[%s2172_s29 + $0x1f4] sm:$0xf] %vm1427_vm3, %v1424_v54  ;;  %v1086_v57 = vpop.f32.mrf.mxu2  ;;  %v1166_v58 = vpop.f32.mrf.mxu3 }
 0x18d   : > { %1458 = vst.msk [vmem:[%s2172_s29 + $0x78] sm:$0xf] %vm1427_vm3, %v1329_v55  ;;  %v1087_v59 = vadd.f32 %v2501_v40, %v1086_v57  ;;  %v1167_v60 = vadd.f32 %v2501_v40, %v1166_v58  ;;  %v928_v61 = vpop.f32.mrf.mxu0  ;;  %v1008_v62 = vpop.f32.mrf.mxu1 }
 0x18e   : > { %1490 = vst.msk [vmem:[%s2172_s29 + $0xf8] sm:$0xf] %vm1427_vm3, %v1361_v56  ;;  %v929_v63 = vadd.f32 %v2501_v40, %v928_v61  ;;  %v1009_v0 = vadd.f32 %v2501_v40, %v1008_v62 }
 0x18f   : > { %v1265_v1 = vmax.f32 %v1087_v59, 0.0  ;;  %v1297_v2 = vmax.f32 %v1167_v60, 0.0 }
 0x190   : > { %v1202_v3 = vmax.f32 %v929_v63, 0.0  ;;  %v1234_v4 = vmax.f32 %v1009_v0, 0.0 }
 0x191   : > { %v1393_v5 = vpack.c.bf16 %v1265_v1, %v1265_v1  ;;  %v1425_v6 = vpack.c.bf16 %v1297_v2, %v1297_v2 }
 0x192   : > { %v1330_v7 = vpack.c.bf16 %v1202_v3, %v1202_v3  ;;  %v1362_v8 = vpack.c.bf16 %v1234_v4, %v1234_v4 }
 0x193   : > { %1522 = vst.msk [vmem:[%s2172_s29 + $0x178] sm:$0xf] %vm1427_vm3, %v1393_v5 }
 0x194   : > { %1554 = vst.msk [vmem:[%s2172_s29 + $0x1f8] sm:$0xf] %vm1427_vm3, %v1425_v6  ;;  %v1088_v9 = vpop.f32.mrf.mxu2  ;;  %v1168_v10 = vpop.f32.mrf.mxu3 }
 0x195   : > { %1459 = vst.msk [vmem:[%s2172_s29 + $0x7c] sm:$0xf] %vm1427_vm3, %v1330_v7  ;;  %v1089_v11 = vadd.f32 %v2501_v40, %v1088_v9  ;;  %v1169_v12 = vadd.f32 %v2501_v40, %v1168_v10 }
 0x196   : > { %1491 = vst.msk [vmem:[%s2172_s29 + $0xfc] sm:$0xf] %vm1427_vm3, %v1362_v8 }
 0x197   : > { %v1266_v13 = vmax.f32 %v1089_v11, 0.0  ;;  %v1298_v14 = vmax.f32 %v1169_v12, 0.0 }
 0x199   : > { %v1394_v15 = vpack.c.bf16 %v1266_v13, %v1266_v13  ;;  %v1426_v16 = vpack.c.bf16 %v1298_v14, %v1298_v14 }
 0x19b   : > { %1523 = vst.msk [vmem:[%s2172_s29 + $0x17c] sm:$0xf] %vm1427_vm3, %v1394_v15 }
 0x19c   : > { %1555 = vst.msk [vmem:[%s2172_s29 + $0x1fc] sm:$0xf] %vm1427_vm3, %v1426_v16 }
 0x19d PF: > { %s13_s12 = sadd.s32 1, %s2040_s12  }
 0x19e   : > { %p10_p4 = scmp.ge.s32.totalorder %s13_s12, 4  }
 0x1a0   :  { %12 = sbr.rel (!%p10_p4) target bundleno = 1 (0x1), region = 62 }

// kernel: one_head_strong_forward.8
= control target key start
LH: loop header
LB: loop body
LE: loop exit
PB: predicated region body
PF: predicated region fallthrough
CT: control target
= control target key end

     0   :  { %vm443_vm0 = vcmask 130048   ;;  %vm1006_vm1 = vcmask 257024   ;;  %s2356_s1 = inlined_call_operand.vmem [shape: bf16[144,32], index: 1, kind: input, shape index: {}]   ;;  %s2357_s0 = inlined_call_operand.vmem [shape: bf16[512,144], index: 0, kind: input, shape index: {}]   ;;  %s2358_s2 = inlined_call_operand.vmem [shape: f32[1,32], index: 2, kind: input, shape index: {}]   ;;  %s2359_s3 = inlined_call_operand.vmem [shape: bf16[512,32], index: 3, kind: output, shape index: {}]  }
   0x1   :  { %v1470_v0 = vld [vmem:[%s2356_s1 + $0x38] sm:$0xff]  ;;  %v1471_v1 = vld [vmem:[%s2356_s1 + $0x40] sm:$0xff]  ;;  %v1079_v3 = vld [vmem:[%s2357_s0 + $0x8] sm:$0xf0] }
   0x2   :  { %v1399_v2 = vld [vmem:[%s2357_s0 + $0x4] sm:$0xf]  ;;  %540 = vmatpush.bf16.msra.mxu0 %v1470_v0  ;;  %1472 = vmatpush.bf16.msra.mxu2 %v1470_v0  ;;  %v1469_v5 = vld [vmem:[%s2356_s1 + $0x30] sm:$0xff]  ;;  %v1468_v6 = vld [vmem:[%s2356_s1 + $0x28] sm:$0xff] }
   0x3   :  { %v1082_v4 = vor.u32 %v1399_v2, %v1079_v3  ;;  %716 = vmatpush.bf16.msra.mxu1 %v1471_v1  ;;  %1480 = vmatpush.bf16.msra.mxu3 %v1471_v1  ;;  %v1433_v7 = vld [vmem:[%s2357_s0 + $0x114] sm:$0xf]  ;;  %v1215_v8 = vld [vmem:[%s2357_s0 + $0x118] sm:$0xf0]  ;;  %v1467_v10 = vld [vmem:[%s2356_s1 + $0x20] sm:$0xff] }
   0x4   :  { %v1218_v9 = vor.u32 %v1433_v7, %v1215_v8  ;;  %v1466_v11 = vld [vmem:[%s2356_s1 + $0x18] sm:$0xff]  ;;  %v1401_v12 = vld [vmem:[%s2357_s0 + $0x14] sm:$0xf]  ;;  %v1464_v16 = vld [vmem:[%s2356_s1 + $0x8] sm:$0xff] }
   0x5   :  { %v1087_v13 = vld [vmem:[%s2357_s0 + $0x18] sm:$0xf0]  ;;  %v1465_v15 = vld [vmem:[%s2356_s1 + $0x10] sm:$0xff]  ;;  %v1435_v17 = vld [vmem:[%s2357_s0 + $0x124] sm:$0xf] }
   0x6   :  { %1367 = vmatmul.msk.bf16.vlgmr.msra.gmra.mxu1 %vm443_vm0, %v1082_v4  ;;  %541 = vmatpush.bf16.msra.mxu0 %v1469_v5  ;;  %v1090_v14 = vor.u32 %v1401_v12, %v1087_v13  ;;  %v1223_v18 = vld [vmem:[%s2357_s0 + $0x128] sm:$0xf0]  ;;  %v1463_v20 = vld [vmem:[%s2356_s1] sm:$0xff]  ;;  %v1400_v22 = vld [vmem:[%s2357_s0 + $0x4] sm:$0xf0] }
   0x7   :  { %1473 = vmatpush.bf16.msra.mxu2 %v1469_v5  ;;  %1384 = vmatmul.msk.bf16.vlgmr.msra.gmra.mxu3 %vm443_vm0, %v1218_v9  ;;  %v1226_v19 = vor.u32 %v1435_v17, %v1223_v18  ;;  %v1077_v21 = vld [vmem:[%s2357_s0] sm:$0xf]  ;;  %v1432_v24 = vld [vmem:[%s2357_s0 + $0x104] sm:$0xf0]  ;;  %v1403_v27 = vld [vmem:[%s2357_s0 + $0x24] sm:$0xf] }
   0x8   :  { %v1205_v23 = vld [vmem:[%s2357_s0 + $0x100] sm:$0xf]  ;;  %v1078_v25 = vor.u32 %v1400_v22, %v1077_v21  ;;  %v1095_v28 = vld [vmem:[%s2357_s0 + $0x28] sm:$0xf0]  ;;  %v1437_v30 = vld [vmem:[%s2357_s0 + $0x134] sm:$0xf] }
   0x9   :  { %v1206_v26 = vor.u32 %v1432_v24, %v1205_v23  ;;  %v1098_v29 = vor.u32 %v1403_v27, %v1095_v28  ;;  %v1231_v31 = vld [vmem:[%s2357_s0 + $0x138] sm:$0xf0]  ;;  %v1085_v33 = vld [vmem:[%s2357_s0 + $0x10] sm:$0xf]  ;;  %v1402_v34 = vld [vmem:[%s2357_s0 + $0x14] sm:$0xf0] }
   0xa   :  { %542 = vmatpush.bf16.msra.mxu0 %v1468_v6  ;;  %v1234_v32 = vor.u32 %v1437_v30, %v1231_v31  ;;  %v1213_v35 = vld [vmem:[%s2357_s0 + $0x110] sm:$0xf]  ;;  %v1434_v36 = vld [vmem:[%s2357_s0 + $0x114] sm:$0xf0]  ;;  %v1086_v37 = vor.u32 %v1402_v34, %v1085_v33  ;;  %v1405_v39 = vld [vmem:[%s2357_s0 + $0x34] sm:$0xf] }
   0xb   :  { %1474 = vmatpush.bf16.msra.mxu2 %v1468_v6  ;;  %v1214_v38 = vor.u32 %v1434_v36, %v1213_v35  ;;  %v1103_v40 = vld [vmem:[%s2357_s0 + $0x38] sm:$0xf0]  ;;  %v1439_v42 = vld [vmem:[%s2357_s0 + $0x144] sm:$0xf]  ;;  %v1239_v43 = vld [vmem:[%s2357_s0 + $0x148] sm:$0xf0] }
   0xc   :  { %v1106_v41 = vor.u32 %v1405_v39, %v1103_v40  ;;  %v1242_v44 = vor.u32 %v1439_v42, %v1239_v43  ;;  %v1093_v45 = vld [vmem:[%s2357_s0 + $0x20] sm:$0xf]  ;;  %v1404_v46 = vld [vmem:[%s2357_s0 + $0x24] sm:$0xf0]  ;;  %v1407_v51 = vld [vmem:[%s2357_s0 + $0x44] sm:$0xf] }
   0xd   :  { %v1221_v47 = vld [vmem:[%s2357_s0 + $0x120] sm:$0xf]  ;;  %v1436_v48 = vld [vmem:[%s2357_s0 + $0x124] sm:$0xf0]  ;;  %v1094_v49 = vor.u32 %v1404_v46, %v1093_v45  ;;  %v1111_v52 = vld [vmem:[%s2357_s0 + $0x48] sm:$0xf0] }
   0xe   :  { %543 = vmatpush.bf16.msra.mxu0 %v1467_v10  ;;  %v1222_v50 = vor.u32 %v1436_v48, %v1221_v47  ;;  %v1114_v53 = vor.u32 %v1407_v51, %v1111_v52  ;;  %v1441_v54 = vld [vmem:[%s2357_s0 + $0x154] sm:$0xf]  ;;  %v1247_v55 = vld [vmem:[%s2357_s0 + $0x158] sm:$0xf0]  ;;  %v1101_v57 = vld [vmem:[%s2357_s0 + $0x30] sm:$0xf] }
   0xf   :  { %1475 = vmatpush.bf16.msra.mxu2 %v1467_v10  ;;  %v1250_v56 = vor.u32 %v1441_v54, %v1247_v55  ;;  %v1406_v58 = vld [vmem:[%s2357_s0 + $0x34] sm:$0xf0]  ;;  %v1229_v59 = vld [vmem:[%s2357_s0 + $0x130] sm:$0xf]  ;;  %v1409_v63 = vld [vmem:[%s2357_s0 + $0x54] sm:$0xf] }
  0x10   :  { %v1438_v60 = vld [vmem:[%s2357_s0 + $0x134] sm:$0xf0]  ;;  %v1102_v61 = vor.u32 %v1406_v58, %v1101_v57  ;;  %v1119_v0 = vld [vmem:[%s2357_s0 + $0x58] sm:$0xf0]  ;;  %v1443_v2 = vld [vmem:[%s2357_s0 + $0x164] sm:$0xf] }
  0x11   :  { %v1230_v62 = vor.u32 %v1438_v60, %v1229_v59  ;;  %v1122_v1 = vor.u32 %v1409_v63, %v1119_v0  ;;  %v1255_v3 = vld [vmem:[%s2357_s0 + $0x168] sm:$0xf0]  ;;  %v1109_v5 = vld [vmem:[%s2357_s0 + $0x40] sm:$0xf]  ;;  %v1408_v6 = vld [vmem:[%s2357_s0 + $0x44] sm:$0xf0] }
  0x12   :  { %544 = vmatpush.bf16.msra.mxu0 %v1466_v11  ;;  %v1258_v4 = vor.u32 %v1443_v2, %v1255_v3  ;;  %v1237_v7 = vld [vmem:[%s2357_s0 + $0x140] sm:$0xf]  ;;  %v1440_v8 = vld [vmem:[%s2357_s0 + $0x144] sm:$0xf0]  ;;  %v1110_v9 = vor.u32 %v1408_v6, %v1109_v5  ;;  %v1127_v12 = vld [vmem:[%s2357_s0 + $0x68] sm:$0xf0] }
  0x13   :  { %1476 = vmatpush.bf16.msra.mxu2 %v1466_v11  ;;  %v1238_v10 = vor.u32 %v1440_v8, %v1237_v7  ;;  %v1411_v11 = vld [vmem:[%s2357_s0 + $0x64] sm:$0xf]  ;;  %v1410_v17 = vld [vmem:[%s2357_s0 + $0x54] sm:$0xf0]  ;;  %v1413_v23 = vld [vmem:[%s2357_s0 + $0x74] sm:$0xf] }
  0x14   :  { %v1130_v13 = vor.u32 %v1411_v11, %v1127_v12  ;;  %v1135_v24 = vld [vmem:[%s2357_s0 + $0x78] sm:$0xf0]  ;;  %v1271_v27 = vld [vmem:[%s2357_s0 + $0x188] sm:$0xf0]  ;;  %v1125_v28 = vld [vmem:[%s2357_s0 + $0x60] sm:$0xf] }
  0x15   :  { %v1253_v31 = vld [vmem:[%s2357_s0 + $0x160] sm:$0xf]  ;;  %v1415_v35 = vld [vmem:[%s2357_s0 + $0x84] sm:$0xf]  ;;  %v1143_v36 = vld [vmem:[%s2357_s0 + $0x88] sm:$0xf0] }
  0x16   :  { %1368 = vmatmul.msk.bf16.gmra.mxu1 %vm443_vm0, %v1090_v14  ;;  %545 = vmatpush.bf16.msra.mxu0 %v1465_v15  ;;  %v1445_v14 = vld [vmem:[%s2357_s0 + $0x174] sm:$0xf]  ;;  %v1279_v40 = vld [vmem:[%s2357_s0 + $0x198] sm:$0xf0]  ;;  %v1414_v42 = vld [vmem:[%s2357_s0 + $0x74] sm:$0xf0] }
  0x17   :  { %1477 = vmatpush.bf16.msra.mxu2 %v1465_v15  ;;  %1385 = vmatmul.msk.bf16.gmra.mxu3 %vm443_vm0, %v1226_v19  ;;  %v1263_v15 = vld [vmem:[%s2357_s0 + $0x178] sm:$0xf0]  ;;  %v1245_v19 = vld [vmem:[%s2357_s0 + $0x150] sm:$0xf]  ;;  %v1449_v39 = vld [vmem:[%s2357_s0 + $0x194] sm:$0xf] }
  0x18   :  { %v1266_v18 = vor.u32 %v1445_v14, %v1263_v15  ;;  %v1282_v43 = vor.u32 %v1449_v39, %v1279_v40  ;;  %v1261_v45 = vld [vmem:[%s2357_s0 + $0x170] sm:$0xf]  ;;  %v1446_v46 = vld [vmem:[%s2357_s0 + $0x174] sm:$0xf0]  ;;  %v1451_v55 = vld [vmem:[%s2357_s0 + $0x1a4] sm:$0xf] }
  0x19   :  { %v1262_v48 = vor.u32 %v1446_v46, %v1261_v45  ;;  %v1141_v57 = vld [vmem:[%s2357_s0 + $0x80] sm:$0xf]  ;;  %v1416_v58 = vld [vmem:[%s2357_s0 + $0x84] sm:$0xf0]  ;;  %v1159_v5 = vld [vmem:[%s2357_s0 + $0xa8] sm:$0xf0] }
  0x1a   :  { %546 = vmatpush.bf16.msra.mxu0 %v1464_v16  ;;  %v1448_v63 = vld [vmem:[%s2357_s0 + $0x184] sm:$0xf0]  ;;  %v1142_v0 = vor.u32 %v1416_v58, %v1141_v57 }
  0x1b   :  { %1478 = vmatpush.bf16.msra.mxu2 %v1464_v16  ;;  %v1117_v16 = vld [vmem:[%s2357_s0 + $0x50] sm:$0xf]  ;;  %v1452_v57 = vld [vmem:[%s2357_s0 + $0x1a4] sm:$0xf0] }
  0x1c   :  { %v1118_v21 = vor.u32 %v1410_v17, %v1117_v16  ;;  %v1453_v17 = vld [vmem:[%s2357_s0 + $0x1b4] sm:$0xf] }
  0x1e   :  { %547 = vmatpush.bf16.msra.mxu0 %v1463_v20 }
  0x1f   :  { %1479 = vmatpush.bf16.msra.mxu2 %v1463_v20  ;;  %v1442_v20 = vld [vmem:[%s2357_s0 + $0x154] sm:$0xf0] }
  0x20   :  { %v1246_v22 = vor.u32 %v1442_v20, %v1245_v19  ;;  %v1149_v19 = vld [vmem:[%s2357_s0 + $0x90] sm:$0xf]  ;;  %v1418_v20 = vld [vmem:[%s2357_s0 + $0x94] sm:$0xf0] }
  0x21   :  { %548 = vmatmul.bf16.vlgmr.msra.gmra.mxu0 %v1078_v25  ;;  %v1138_v25 = vor.u32 %v1413_v23, %v1135_v24  ;;  %v1277_v24 = vld [vmem:[%s2357_s0 + $0x190] sm:$0xf] }
  0x22   :  { %628 = vmatmul.bf16.vlgmr.msra.gmra.mxu2 %v1206_v26  ;;  %v1447_v26 = vld [vmem:[%s2357_s0 + $0x184] sm:$0xf] }
  0x23   :  { %v1274_v30 = vor.u32 %v1447_v26, %v1271_v27 }
  0x26   :  { %1369 = vmatmul.msk.bf16.gmra.mxu1 %vm443_vm0, %v1098_v29  ;;  %v1412_v29 = vld [vmem:[%s2357_s0 + $0x64] sm:$0xf0] }
  0x27   :  { %1386 = vmatmul.msk.bf16.gmra.mxu3 %vm443_vm0, %v1234_v32  ;;  %v1444_v32 = vld [vmem:[%s2357_s0 + $0x164] sm:$0xf0]  ;;  %v1126_v33 = vor.u32 %v1412_v29, %v1125_v28  ;;  %v1150_v28 = vor.u32 %v1418_v20, %v1149_v19 }
  0x28   :  { %v1254_v34 = vor.u32 %v1444_v32, %v1253_v31  ;;  %v1421_v32 = vld [vmem:[%s2357_s0 + $0xb4] sm:$0xf] }
  0x31   :  { %553 = vmatmul.bf16.gmra.mxu0 %v1086_v37  ;;  %v1146_v37 = vor.u32 %v1415_v35, %v1143_v36 }
  0x32   :  { %633 = vmatmul.bf16.gmra.mxu2 %v1214_v38 }
  0x36   :  { %1370 = vmatmul.msk.bf16.gmra.mxu1 %vm443_vm0, %v1106_v41  ;;  %v1133_v41 = vld [vmem:[%s2357_s0 + $0x70] sm:$0xf] }
  0x37   :  { %1387 = vmatmul.msk.bf16.gmra.mxu3 %vm443_vm0, %v1242_v44  ;;  %v1134_v47 = vor.u32 %v1414_v42, %v1133_v41 }
  0x41   :  { %558 = vmatmul.bf16.gmra.mxu0 %v1094_v49  ;;  %v1417_v49 = vld [vmem:[%s2357_s0 + $0x94] sm:$0xf] }
  0x42   :  { %638 = vmatmul.bf16.gmra.mxu2 %v1222_v50  ;;  %v1151_v50 = vld [vmem:[%s2357_s0 + $0x98] sm:$0xf0] }
  0x43   :  { %v1154_v52 = vor.u32 %v1417_v49, %v1151_v50  ;;  %v1157_v50 = vld [vmem:[%s2357_s0 + $0xa0] sm:$0xf] }
  0x46   :  { %1371 = vmatmul.msk.bf16.gmra.mxu1 %vm443_vm0, %v1114_v53 }
  0x47   :  { %1388 = vmatmul.msk.bf16.gmra.mxu3 %vm443_vm0, %v1250_v56  ;;  %v1287_v56 = vld [vmem:[%s2357_s0 + $0x1a8] sm:$0xf0] }
  0x48   :  { %v1290_v59 = vor.u32 %v1451_v55, %v1287_v56  ;;  %v1285_v56 = vld [vmem:[%s2357_s0 + $0x1a0] sm:$0xf] }
  0x51   :  { %563 = vmatmul.bf16.gmra.mxu0 %v1102_v61  ;;  %v1780_v61 = vld [vmem:[%s2358_s2] ss:$0 sm:$0xff] }
  0x52   :  { %643 = vmatmul.bf16.gmra.mxu2 %v1230_v62  ;;  %v1269_v62 = vld [vmem:[%s2357_s0 + $0x180] sm:$0xf] }
  0x53   :  { %v1270_v2 = vor.u32 %v1448_v63, %v1269_v62 }
  0x56   :  { %1372 = vmatmul.msk.bf16.gmra.mxu1 %vm443_vm0, %v1122_v1 }
  0x57   :  { %1389 = vmatmul.msk.bf16.gmra.mxu3 %vm443_vm0, %v1258_v4  ;;  %v1419_v4 = vld [vmem:[%s2357_s0 + $0xa4] sm:$0xf] }
  0x58   :  { %v1162_v8 = vor.u32 %v1419_v4, %v1159_v5  ;;  %v1175_v4 = vld [vmem:[%s2357_s0 + $0xc8] sm:$0xf0] }
  0x61   :  { %568 = vmatmul.bf16.gmra.mxu0 %v1110_v9 }
  0x62   :  { %648 = vmatmul.bf16.gmra.mxu2 %v1238_v10 }
  0x66   :  { %1373 = vmatmul.msk.bf16.gmra.mxu1 %vm443_vm0, %v1130_v13 }
  0x67   :  { %1390 = vmatmul.msk.bf16.gmra.mxu3 %vm443_vm0, %v1266_v18  ;;  %v1295_v18 = vld [vmem:[%s2357_s0 + $0x1b8] sm:$0xf0] }
  0x71   :  { %573 = vmatmul.bf16.gmra.mxu0 %v1118_v21  ;;  %v1298_v21 = vor.u32 %v1453_v17, %v1295_v18 }
  0x72   :  { %653 = vmatmul.bf16.gmra.mxu2 %v1246_v22 }
  0x76   :  { %1374 = vmatmul.msk.bf16.gmra.mxu1 %vm443_vm0, %v1138_v25  ;;  %v1450_v25 = vld [vmem:[%s2357_s0 + $0x194] sm:$0xf0] }
  0x77   :  { %1391 = vmatmul.msk.bf16.gmra.mxu3 %vm443_vm0, %v1274_v30  ;;  %v1278_v30 = vor.u32 %v1450_v25, %v1277_v24  ;;  %v1457_v24 = vld [vmem:[%s2357_s0 + $0x1d4] sm:$0xf]  ;;  %v1311_v25 = vld [vmem:[%s2357_s0 + $0x1d8] sm:$0xf0] }
  0x81   :  { %578 = vmatmul.bf16.gmra.mxu0 %v1126_v33  ;;  %v1167_v33 = vld [vmem:[%s2357_s0 + $0xb8] sm:$0xf0] }
  0x82   :  { %658 = vmatmul.bf16.gmra.mxu2 %v1254_v34  ;;  %v1170_v36 = vor.u32 %v1421_v32, %v1167_v33  ;;  %v1454_v32 = vld [vmem:[%s2357_s0 + $0x1b4] sm:$0xf0] }
  0x83   :  { %v718_v38 = vpop.f32.mrf.mxu1 }
  0x86   :  { %1375 = vmatmul.msk.bf16.gmra.mxu1 %vm443_vm0, %v1146_v37 }
  0x87   :  { %1392 = vmatmul.msk.bf16.gmra.mxu3 %vm443_vm0, %v1282_v43 }
  0x8a   :  { %v1758_v51 = vpop.f32.mrf.mxu3 }
  0x8b   :  { %v720_v44 = vpop.f32.mrf.mxu1 }
  0x91   :  { %583 = vmatmul.bf16.gmra.mxu0 %v1134_v47  ;;  %v1455_v47 = vld [vmem:[%s2357_s0 + $0x1c4] sm:$0xf] }
  0x92   :  { %663 = vmatmul.bf16.gmra.mxu2 %v1262_v48  ;;  %v1761_v54 = vpop.f32.mrf.mxu3  ;;  %v1303_v48 = vld [vmem:[%s2357_s0 + $0x1c8] sm:$0xf0] }
  0x93   :  { %v723_v53 = vpop.f32.mrf.mxu1 }
  0x96   :  { %1376 = vmatmul.msk.bf16.gmra.mxu1 %vm443_vm0, %v1154_v52  ;;  %v1420_v52 = vld [vmem:[%s2357_s0 + $0xa4] sm:$0xf0] }
  0x97   :  { %1393 = vmatmul.msk.bf16.gmra.mxu3 %vm443_vm0, %v1290_v59  ;;  %v1158_v62 = vor.u32 %v1420_v52, %v1157_v50 }
  0x9a   :  { %v1796_v6 = vpop.f32.mrf.mxu3 }
  0x9b   :  { %v1775_v60 = vpop.f32.mrf.mxu1 }
  0x9e   :  { %v549_v1 = vpop.f32.mrf.mxu0 }
  0x9f   :  { %v550_v3 = vadd.f32 %v1780_v61, %v549_v1  ;;  %v1286_v1 = vor.u32 %v1452_v57, %v1285_v56 }
  0xa1   :  { %v719_v7 = vadd.f32 %v718_v38, %v550_v3  ;;  %588 = vmatmul.bf16.gmra.mxu0 %v1142_v0  ;;  %v1423_v3 = vld [vmem:[%s2357_s0 + $0xc4] sm:$0xf] }
  0xa2   :  { %668 = vmatmul.bf16.gmra.mxu2 %v1270_v2  ;;  %v1808_v15 = vpop.f32.mrf.mxu3 }
  0xa3   :  { %v878_v9 = vmax.f32 %v719_v7, 0.0  ;;  %v1798_v10 = vpop.f32.mrf.mxu1 }
  0xa5   :  { %v942_v11 = vpack.c.bf16 %v878_v9, %v878_v9  ;;  %v1800_v12 = vpop.f32.mrf.mxu2 }
  0xa6   :  { %1377 = vmatmul.msk.bf16.gmra.mxu1 %vm443_vm0, %v1162_v8  ;;  %v551_v13 = vpop.f32.mrf.mxu0 }
  0xa7   :  { %1007 = vst.msk [vmem:[%s2359_s3] sm:$0xf] %vm1006_vm1, %v942_v11  ;;  %v552_v14 = vadd.f32 %v1780_v61, %v551_v13  ;;  %1394 = vmatmul.msk.bf16.gmra.mxu3 %vm443_vm0, %v1298_v21  ;;  %v1178_v11 = vor.u32 %v1423_v3, %v1175_v4  ;;  %v1424_v3 = vld [vmem:[%s2357_s0 + $0xc4] sm:$0xf0] }
  0xa9   :  { %v721_v16 = vadd.f32 %v720_v44, %v552_v14 }
  0xaa   :  { %v1844_v34 = vpop.f32.mrf.mxu3 }
  0xab   :  { %v879_v22 = vmax.f32 %v721_v16, 0.0  ;;  %v1822_v23 = vpop.f32.mrf.mxu1 }
  0xad   :  { %v943_v26 = vpack.c.bf16 %v879_v22, %v879_v22  ;;  %v1831_v27 = vpop.f32.mrf.mxu2 }
  0xae   :  { %v554_v29 = vpop.f32.mrf.mxu0 }
  0xaf   :  { %1008 = vst.msk [vmem:[%s2359_s3 + $0x4] sm:$0xf] %vm1006_vm1, %v943_v26  ;;  %v555_v31 = vadd.f32 %v1780_v61, %v554_v29  ;;  %v1422_v29 = vld [vmem:[%s2357_s0 + $0xb4] sm:$0xf0] }
  0xb1   :  { %v724_v35 = vadd.f32 %v723_v53, %v555_v31  ;;  %593 = vmatmul.bf16.gmra.mxu0 %v1150_v28  ;;  %v1165_v28 = vld [vmem:[%s2357_s0 + $0xb0] sm:$0xf] }
  0xb2   :  { %673 = vmatmul.bf16.gmra.mxu2 %v1278_v30  ;;  %v1855_v44 = vpop.f32.mrf.mxu3  ;;  %v1293_v31 = vld [vmem:[%s2357_s0 + $0x1b0] sm:$0xf] }
  0xb3   :  { %v880_v37 = vmax.f32 %v724_v35, 0.0  ;;  %v1846_v38 = vpop.f32.mrf.mxu1 }
  0xb5   :  { %v944_v39 = vpack.c.bf16 %v880_v37, %v880_v37  ;;  %v634_v40 = vpop.f32.mrf.mxu2  ;;  %v1166_v37 = vor.u32 %v1422_v29, %v1165_v28 }
  0xb6   :  { %v635_v41 = vadd.f32 %v1780_v61, %v634_v40  ;;  %1378 = vmatmul.msk.bf16.gmra.mxu1 %vm443_vm0, %v1170_v36  ;;  %v556_v42 = vpop.f32.mrf.mxu0 }
  0xb7   :  { %1009 = vst.msk [vmem:[%s2359_s3 + $0x8] sm:$0xf] %vm1006_vm1, %v944_v39  ;;  %v557_v43 = vadd.f32 %v1780_v61, %v556_v42 }
  0xb8   :  { %v804_v45 = vadd.f32 %v1758_v51, %v635_v41  ;;  %v1306_v51 = vor.u32 %v1455_v47, %v1303_v48  ;;  %v1294_v41 = vor.u32 %v1454_v32, %v1293_v31 }
  0xb9   :  { %v726_v46 = vadd.f32 %v1775_v60, %v557_v43  ;;  %v1425_v43 = vld [vmem:[%s2357_s0 + $0xd4] sm:$0xf] }
  0xba   :  { %v912_v49 = vmax.f32 %v804_v45, 0.0  ;;  %1395 = vmatmul.msk.bf16.gmra.mxu3 %vm443_vm0, %v1306_v51  ;;  %v1896_v5 = vpop.f32.mrf.mxu3  ;;  %v1183_v45 = vld [vmem:[%s2357_s0 + $0xd8] sm:$0xf0] }
  0xbb   :  { %v881_v53 = vmax.f32 %v726_v46, 0.0  ;;  %v1871_v55 = vpop.f32.mrf.mxu1  ;;  %v1186_v50 = vor.u32 %v1425_v43, %v1183_v45  ;;  %v1309_v45 = vld [vmem:[%s2357_s0 + $0x1d0] sm:$0xf] }
  0xbc   :  { %v976_v58 = vpack.c.bf16 %v912_v49, %v912_v49 }
  0xbd   :  { %v945_v59 = vpack.c.bf16 %v881_v53, %v881_v53  ;;  %v636_v60 = vpop.f32.mrf.mxu2 }
  0xbe   :  { %1041 = vst.msk [vmem:[%s2359_s3 + $0x88] sm:$0xf] %vm1006_vm1, %v976_v58  ;;  %v637_v63 = vadd.f32 %v1780_v61, %v636_v60  ;;  %v559_v0 = vpop.f32.mrf.mxu0 }
  0xbf   :  { %1010 = vst.msk [vmem:[%s2359_s3 + $0xc] sm:$0xf] %vm1006_vm1, %v945_v59  ;;  %v560_v2 = vadd.f32 %v1780_v61, %v559_v0  ;;  %v1319_v0 = vld [vmem:[%s2357_s0 + $0x1e8] sm:$0xf0] }
  0xc0   :  { %v806_v7 = vadd.f32 %v1761_v54, %v637_v63  ;;  %v1459_v63 = vld [vmem:[%s2357_s0 + $0x1e4] sm:$0xf] }
  0xc1   :  { %v729_v8 = vadd.f32 %v1798_v10, %v560_v2  ;;  %598 = vmatmul.bf16.gmra.mxu0 %v1158_v62  ;;  %v1173_v2 = vld [vmem:[%s2357_s0 + $0xc0] sm:$0xf] }
  0xc2   :  { %v913_v9 = vmax.f32 %v806_v7, 0.0  ;;  %678 = vmatmul.bf16.gmra.mxu2 %v1286_v1  ;;  %v1913_v20 = vpop.f32.mrf.mxu3  ;;  %v1301_v7 = vld [vmem:[%s2357_s0 + $0x1c0] sm:$0xf] }
  0xc3   :  { %v882_v13 = vmax.f32 %v729_v8, 0.0  ;;  %v1900_v14 = vpop.f32.mrf.mxu1  ;;  %v1456_v8 = vld [vmem:[%s2357_s0 + $0x1c4] sm:$0xf0] }
  0xc4   :  { %v977_v16 = vpack.c.bf16 %v913_v9, %v913_v9 }
  0xc5   :  { %v946_v17 = vpack.c.bf16 %v882_v13, %v882_v13  ;;  %v639_v18 = vpop.f32.mrf.mxu2 }
  0xc6   :  { %1042 = vst.msk [vmem:[%s2359_s3 + $0x8c] sm:$0xf] %vm1006_vm1, %v977_v16  ;;  %v640_v19 = vadd.f32 %v1780_v61, %v639_v18  ;;  %1379 = vmatmul.msk.bf16.gmra.mxu1 %vm443_vm0, %v1178_v11  ;;  %v561_v54 = vpop.f32.mrf.mxu0  ;;  %v1174_v16 = vor.u32 %v1424_v3, %v1173_v2 }
  0xc7   :  { %1011 = vst.msk [vmem:[%s2359_s3 + $0x10] sm:$0xf] %vm1006_vm1, %v946_v17  ;;  %v562_v10 = vadd.f32 %v1780_v61, %v561_v54 }
  0xc8   :  { %v809_v21 = vadd.f32 %v1796_v6, %v640_v19  ;;  %v1314_v6 = vor.u32 %v1457_v24, %v1311_v25  ;;  %v1302_v19 = vor.u32 %v1456_v8, %v1301_v7 }
  0xc9   :  { %v731_v22 = vadd.f32 %v1822_v23, %v562_v10  ;;  %v1427_v10 = vld [vmem:[%s2357_s0 + $0xe4] sm:$0xf] }
  0xca   :  { %v914_v26 = vmax.f32 %v809_v21, 0.0  ;;  %1396 = vmatmul.msk.bf16.gmra.mxu3 %vm443_vm0, %v1314_v6  ;;  %v1954_v46 = vpop.f32.mrf.mxu3  ;;  %v1191_v21 = vld [vmem:[%s2357_s0 + $0xe8] sm:$0xf0] }
  0xcb   :  { %v883_v30 = vmax.f32 %v731_v22, 0.0  ;;  %v1929_v23 = vpop.f32.mrf.mxu1  ;;  %v1194_v28 = vor.u32 %v1427_v10, %v1191_v21  ;;  %v1317_v10 = vld [vmem:[%s2357_s0 + $0x1e0] sm:$0xf] }
  0xcc   :  { %v978_v33 = vpack.c.bf16 %v914_v26, %v914_v26 }
  0xcd   :  { %v947_v35 = vpack.c.bf16 %v883_v30, %v883_v30  ;;  %v641_v36 = vpop.f32.mrf.mxu2 }
  0xce   :  { %1043 = vst.msk [vmem:[%s2359_s3 + $0x90] sm:$0xf] %vm1006_vm1, %v978_v33  ;;  %v642_v39 = vadd.f32 %v1780_v61, %v641_v36  ;;  %v564_v40 = vpop.f32.mrf.mxu0 }
  0xcf   :  { %1012 = vst.msk [vmem:[%s2359_s3 + $0x14] sm:$0xf] %vm1006_vm1, %v947_v35  ;;  %v565_v42 = vadd.f32 %v1780_v61, %v564_v40 }
  0xd0   :  { %v811_v47 = vadd.f32 %v1808_v15, %v642_v39  ;;  %v1327_v39 = vld [vmem:[%s2357_s0 + $0x1f8] sm:$0xf0] }
  0xd1   :  { %v734_v48 = vadd.f32 %v1846_v38, %v565_v42  ;;  %603 = vmatmul.bf16.gmra.mxu0 %v1166_v37  ;;  %v1461_v37 = vld [vmem:[%s2357_s0 + $0x1f4] sm:$0xf]  ;;  %v1426_v42 = vld [vmem:[%s2357_s0 + $0xd4] sm:$0xf0] }
  0xd2   :  { %v915_v49 = vmax.f32 %v811_v47, 0.0  ;;  %683 = vmatmul.bf16.gmra.mxu2 %v1294_v41  ;;  %v1971_v59 = vpop.f32.mrf.mxu3  ;;  %v1181_v41 = vld [vmem:[%s2357_s0 + $0xd0] sm:$0xf]  ;;  %v1458_v47 = vld [vmem:[%s2357_s0 + $0x1d4] sm:$0xf0] }
  0xd3   :  { %v884_v52 = vmax.f32 %v734_v48, 0.0  ;;  %v1958_v51 = vpop.f32.mrf.mxu1 }
  0xd4   :  { %v979_v53 = vpack.c.bf16 %v915_v49, %v915_v49 }
  0xd5   :  { %v948_v56 = vpack.c.bf16 %v884_v52, %v884_v52  ;;  %v644_v57 = vpop.f32.mrf.mxu2 }
  0xd6   :  { %1044 = vst.msk [vmem:[%s2359_s3 + $0x94] sm:$0xf] %vm1006_vm1, %v979_v53  ;;  %v645_v58 = vadd.f32 %v1780_v61, %v644_v57  ;;  %1380 = vmatmul.msk.bf16.gmra.mxu1 %vm443_vm0, %v1186_v50  ;;  %v566_v15 = vpop.f32.mrf.mxu0  ;;  %v1182_v53 = vor.u32 %v1426_v42, %v1181_v41 }
  0xd7   :  { %1013 = vst.msk [vmem:[%s2359_s3 + $0x18] sm:$0xf] %vm1006_vm1, %v948_v56  ;;  %v567_v38 = vadd.f32 %v1780_v61, %v566_v15 }
  0xd8   :  { %v814_v60 = vadd.f32 %v1844_v34, %v645_v58  ;;  %v1322_v34 = vor.u32 %v1459_v63, %v1319_v0  ;;  %v1310_v58 = vor.u32 %v1458_v47, %v1309_v45 }
  0xd9   :  { %v736_v62 = vadd.f32 %v1871_v55, %v567_v38  ;;  %v1429_v38 = vld [vmem:[%s2357_s0 + $0xf4] sm:$0xf] }
  0xda   :  { %v916_v1 = vmax.f32 %v814_v60, 0.0  ;;  %1397 = vmatmul.msk.bf16.gmra.mxu3 %vm443_vm0, %v1322_v34  ;;  %v2014_v25 = vpop.f32.mrf.mxu3  ;;  %v1199_v60 = vld [vmem:[%s2357_s0 + $0xf8] sm:$0xf0] }
  0xdb   :  { %v885_v4 = vmax.f32 %v736_v62, 0.0  ;;  %v1987_v55 = vpop.f32.mrf.mxu1 }
  0xdc   :  { %v980_v9 = vpack.c.bf16 %v916_v1, %v916_v1  ;;  %v1202_v1 = vor.u32 %v1429_v38, %v1199_v60 }
  0xdd   :  { %v949_v11 = vpack.c.bf16 %v885_v4, %v885_v4  ;;  %v646_v13 = vpop.f32.mrf.mxu2 }
  0xde   :  { %1045 = vst.msk [vmem:[%s2359_s3 + $0x98] sm:$0xf] %vm1006_vm1, %v980_v9  ;;  %v647_v17 = vadd.f32 %v1780_v61, %v646_v13  ;;  %v569_v18 = vpop.f32.mrf.mxu0 }
  0xdf   :  { %1014 = vst.msk [vmem:[%s2359_s3 + $0x1c] sm:$0xf] %vm1006_vm1, %v949_v11  ;;  %v570_v54 = vadd.f32 %v1780_v61, %v569_v18  ;;  %v1428_v18 = vld [vmem:[%s2357_s0 + $0xe4] sm:$0xf0] }
  0xe0   :  { %v816_v22 = vadd.f32 %v1855_v44, %v647_v17  ;;  %v1189_v17 = vld [vmem:[%s2357_s0 + $0xe0] sm:$0xf] }
  0xe1   :  { %v739_v24 = vadd.f32 %v1900_v14, %v570_v54  ;;  %608 = vmatmul.bf16.gmra.mxu0 %v1174_v16 }
  0xe2   :  { %v917_v26 = vmax.f32 %v816_v22, 0.0  ;;  %688 = vmatmul.bf16.gmra.mxu2 %v1302_v19  ;;  %v2051_v48 = vpop.f32.mrf.mxu3 }
  0xe3   :  { %v886_v29 = vmax.f32 %v739_v24, 0.0  ;;  %v2016_v6 = vpop.f32.mrf.mxu1  ;;  %v1190_v24 = vor.u32 %v1428_v18, %v1189_v17 }
  0xe4   :  { %v981_v30 = vpack.c.bf16 %v917_v26, %v917_v26 }
  0xe5   :  { %v950_v31 = vpack.c.bf16 %v886_v29, %v886_v29  ;;  %v649_v32 = vpop.f32.mrf.mxu2 }
  0xe6   :  { %1046 = vst.msk [vmem:[%s2359_s3 + $0x9c] sm:$0xf] %vm1006_vm1, %v981_v30  ;;  %v650_v44 = vadd.f32 %v1780_v61, %v649_v32  ;;  %1381 = vmatmul.msk.bf16.gmra.mxu1 %vm443_vm0, %v1194_v28  ;;  %v571_v14 = vpop.f32.mrf.mxu0  ;;  %v1207_v32 = vld [vmem:[%s2357_s0 + $0x108] sm:$0xf0] }
  0xe7   :  { %1015 = vst.msk [vmem:[%s2359_s3 + $0x20] sm:$0xf] %vm1006_vm1, %v950_v31  ;;  %v572_v33 = vadd.f32 %v1780_v61, %v571_v14  ;;  %v1431_v31 = vld [vmem:[%s2357_s0 + $0x104] sm:$0xf] }
  0xe8   :  { %v819_v35 = vadd.f32 %v1896_v5, %v650_v44  ;;  %v1330_v5 = vor.u32 %v1461_v37, %v1327_v39 }
  0xe9   :  { %v741_v36 = vadd.f32 %v1929_v23, %v572_v33 }
  0xea   :  { %v918_v40 = vmax.f32 %v819_v35, 0.0  ;;  %1398 = vmatmul.msk.bf16.gmra.mxu3 %vm443_vm0, %v1330_v5  ;;  %v2074_v8 = vpop.f32.mrf.mxu3 }
  0xeb   :  { %v887_v43 = vmax.f32 %v741_v36, 0.0  ;;  %v2043_v23 = vpop.f32.mrf.mxu1  ;;  %v1210_v36 = vor.u32 %v1431_v31, %v1207_v32 }
  0xec   :  { %v982_v49 = vpack.c.bf16 %v918_v40, %v918_v40 }
  0xed   :  { %v951_v50 = vpack.c.bf16 %v887_v43, %v887_v43  ;;  %v651_v52 = vpop.f32.mrf.mxu2 }
  0xee   :  { %1047 = vst.msk [vmem:[%s2359_s3 + $0xa0] sm:$0xf] %vm1006_vm1, %v982_v49  ;;  %v652_v56 = vadd.f32 %v1780_v61, %v651_v52  ;;  %v574_v57 = vpop.f32.mrf.mxu0  ;;  %v1430_v52 = vld [vmem:[%s2357_s0 + $0xf4] sm:$0xf0] }
  0xef   :  { %1016 = vst.msk [vmem:[%s2359_s3 + $0x24] sm:$0xf] %vm1006_vm1, %v951_v50  ;;  %v575_v15 = vadd.f32 %v1780_v61, %v574_v57  ;;  %v1197_v50 = vld [vmem:[%s2357_s0 + $0xf0] sm:$0xf] }
  0xf0   :  { %v821_v62 = vadd.f32 %v1913_v20, %v652_v56  ;;  %v1325_v57 = vld [vmem:[%s2357_s0 + $0x1f0] sm:$0xf]  ;;  %v1198_v38 = vor.u32 %v1430_v52, %v1197_v50 }
  0xf1   :  { %v744_v63 = vadd.f32 %v1958_v51, %v575_v15  ;;  %613 = vmatmul.bf16.gmra.mxu0 %v1182_v53 }
  0xf2   :  { %v919_v0 = vmax.f32 %v821_v62, 0.0  ;;  %693 = vmatmul.bf16.gmra.mxu2 %v1310_v58  ;;  %v2119_v44 = vpop.f32.mrf.mxu3 }
  0xf3   :  { %v888_v2 = vmax.f32 %v744_v63, 0.0  ;;  %v2072_v3 = vpop.f32.mrf.mxu1 }
  0xf4   :  { %v983_v34 = vpack.c.bf16 %v919_v0, %v919_v0 }
  0xf5   :  { %v952_v4 = vpack.c.bf16 %v888_v2, %v888_v2  ;;  %v654_v7 = vpop.f32.mrf.mxu2 }
  0xf6   :  { %1048 = vst.msk [vmem:[%s2359_s3 + $0xa4] sm:$0xf] %vm1006_vm1, %v983_v34  ;;  %v655_v20 = vadd.f32 %v1780_v61, %v654_v7  ;;  %1382 = vmatmul.msk.bf16.gmra.mxu1 %vm443_vm0, %v1202_v1  ;;  %v576_v51 = vpop.f32.mrf.mxu0 }
  0xf7   :  { %1017 = vst.msk [vmem:[%s2359_s3 + $0x28] sm:$0xf] %vm1006_vm1, %v952_v4  ;;  %v577_v9 = vadd.f32 %v1780_v61, %v576_v51 }
  0xf8   :  { %v824_v11 = vadd.f32 %v1954_v46, %v655_v20  ;;  %v1460_v46 = vld [vmem:[%s2357_s0 + $0x1e4] sm:$0xf0] }
  0xf9   :  { %v746_v13 = vadd.f32 %v1987_v55, %v577_v9  ;;  %v1318_v29 = vor.u32 %v1460_v46, %v1317_v10 }
  0xfa   :  { %v920_v16 = vmax.f32 %v824_v11, 0.0  ;;  %v838_v47 = vpop.f32.mrf.mxu3 }
  0xfb   :  { %v889_v19 = vmax.f32 %v746_v13, 0.0  ;;  %v2095_v54 = vpop.f32.mrf.mxu1 }
  0xfc   :  { %v984_v55 = vpack.c.bf16 %v920_v16, %v920_v16 }
  0xfd   :  { %v953_v21 = vpack.c.bf16 %v889_v19, %v889_v19  ;;  %v656_v22 = vpop.f32.mrf.mxu2 }
  0xfe   :  { %1049 = vst.msk [vmem:[%s2359_s3 + $0xa8] sm:$0xf] %vm1006_vm1, %v984_v55  ;;  %v657_v26 = vadd.f32 %v1780_v61, %v656_v22  ;;  %v579_v28 = vpop.f32.mrf.mxu0 }
  0xff   :  { %1018 = vst.msk [vmem:[%s2359_s3 + $0x2c] sm:$0xf] %vm1006_vm1, %v953_v21  ;;  %v580_v30 = vadd.f32 %v1780_v61, %v579_v28 }
 0x100   :  { %v826_v14 = vadd.f32 %v1971_v59, %v657_v26 }
 0x101   :  { %v749_v33 = vadd.f32 %v2016_v6, %v580_v30  ;;  %618 = vmatmul.bf16.gmra.mxu0 %v1190_v24 }
 0x102   :  { %v921_v35 = vmax.f32 %v826_v14, 0.0  ;;  %698 = vmatmul.bf16.gmra.mxu2 %v1318_v29  ;;  %v840_v20 = vpop.f32.mrf.mxu3 }
 0x103   :  { %v890_v37 = vmax.f32 %v749_v33, 0.0  ;;  %v758_v39 = vpop.f32.mrf.mxu1 }
 0x104   :  { %v985_v40 = vpack.c.bf16 %v921_v35, %v921_v35 }
 0x105   :  { %v954_v41 = vpack.c.bf16 %v890_v37, %v890_v37  ;;  %v659_v42 = vpop.f32.mrf.mxu2 }
 0x106   :  { %1050 = vst.msk [vmem:[%s2359_s3 + $0xac] sm:$0xf] %vm1006_vm1, %v985_v40  ;;  %v660_v5 = vadd.f32 %v1780_v61, %v659_v42  ;;  %1383 = vmatmul.msk.bf16.gmra.mxu1 %vm443_vm0, %v1210_v36  ;;  %v581_v59 = vpop.f32.mrf.mxu0 }
 0x107   :  { %1019 = vst.msk [vmem:[%s2359_s3 + $0x30] sm:$0xf] %vm1006_vm1, %v954_v41  ;;  %v582_v6 = vadd.f32 %v1780_v61, %v581_v59 }
 0x108   :  { %v829_v43 = vadd.f32 %v2014_v25, %v660_v5  ;;  %v1462_v25 = vld [vmem:[%s2357_s0 + $0x1f4] sm:$0xf0] }
 0x109   :  { %v751_v45 = vadd.f32 %v2043_v23, %v582_v6  ;;  %v1326_v63 = vor.u32 %v1462_v25, %v1325_v57 }
 0x10a   :  { %v922_v49 = vmax.f32 %v829_v43, 0.0  ;;  %v843_v22 = vpop.f32.mrf.mxu3 }
 0x10b   :  { %v891_v53 = vmax.f32 %v751_v45, 0.0  ;;  %v760_v56 = vpop.f32.mrf.mxu1 }
 0x10c   :  { %v986_v23 = vpack.c.bf16 %v922_v49, %v922_v49 }
 0x10d   :  { %v955_v58 = vpack.c.bf16 %v891_v53, %v891_v53  ;;  %v661_v15 = vpop.f32.mrf.mxu2 }
 0x10e   :  { %1051 = vst.msk [vmem:[%s2359_s3 + $0xb0] sm:$0xf] %vm1006_vm1, %v986_v23  ;;  %v662_v60 = vadd.f32 %v1780_v61, %v661_v15  ;;  %v584_v62 = vpop.f32.mrf.mxu0 }
 0x10f   :  { %1020 = vst.msk [vmem:[%s2359_s3 + $0x34] sm:$0xf] %vm1006_vm1, %v955_v58  ;;  %v585_v0 = vadd.f32 %v1780_v61, %v584_v62 }
 0x110   :  { %v831_v1 = vadd.f32 %v2051_v48, %v662_v60 }
 0x111   :  { %v754_v2 = vadd.f32 %v2072_v3, %v585_v0  ;;  %623 = vmatmul.bf16.gmra.mxu0 %v1198_v38 }
 0x112   :  { %v923_v34 = vmax.f32 %v831_v1, 0.0  ;;  %703 = vmatmul.bf16.gmra.mxu2 %v1326_v63  ;;  %v845_v37 = vpop.f32.mrf.mxu3 }
 0x113   :  { %v892_v4 = vmax.f32 %v754_v2, 0.0  ;;  %v763_v7 = vpop.f32.mrf.mxu1 }
 0x114   :  { %v987_v51 = vpack.c.bf16 %v923_v34, %v923_v34 }
 0x115   :  { %v956_v9 = vpack.c.bf16 %v892_v4, %v892_v4  ;;  %v664_v11 = vpop.f32.mrf.mxu2 }
 0x116   :  { %1052 = vst.msk [vmem:[%s2359_s3 + $0xb4] sm:$0xf] %vm1006_vm1, %v987_v51  ;;  %v665_v13 = vadd.f32 %v1780_v61, %v664_v11  ;;  %v586_v16 = vpop.f32.mrf.mxu0 }
 0x117   :  { %1021 = vst.msk [vmem:[%s2359_s3 + $0x38] sm:$0xf] %vm1006_vm1, %v956_v9  ;;  %v587_v48 = vadd.f32 %v1780_v61, %v586_v16 }
 0x118   :  { %v834_v3 = vadd.f32 %v2074_v8, %v665_v13 }
 0x119   :  { %v756_v17 = vadd.f32 %v2095_v54, %v587_v48 }
 0x11a   :  { %v924_v18 = vmax.f32 %v834_v3, 0.0  ;;  %v848_v53 = vpop.f32.mrf.mxu3 }
 0x11b   :  { %v893_v19 = vmax.f32 %v756_v17, 0.0  ;;  %v765_v10 = vpop.f32.mrf.mxu1 }
 0x11c   :  { %v988_v46 = vpack.c.bf16 %v924_v18, %v924_v18 }
 0x11d   :  { %v957_v55 = vpack.c.bf16 %v893_v19, %v893_v19  ;;  %v666_v21 = vpop.f32.mrf.mxu2 }
 0x11e   :  { %1053 = vst.msk [vmem:[%s2359_s3 + $0xb8] sm:$0xf] %vm1006_vm1, %v988_v46  ;;  %v667_v24 = vadd.f32 %v1780_v61, %v666_v21  ;;  %v589_v26 = vpop.f32.mrf.mxu0 }
 0x11f   :  { %1022 = vst.msk [vmem:[%s2359_s3 + $0x3c] sm:$0xf] %vm1006_vm1, %v957_v55  ;;  %v590_v8 = vadd.f32 %v1780_v61, %v589_v26 }
 0x120   :  { %v836_v54 = vadd.f32 %v2119_v44, %v667_v24 }
 0x121   :  { %v759_v28 = vadd.f32 %v758_v39, %v590_v8 }
 0x122   :  { %v925_v29 = vmax.f32 %v836_v54, 0.0  ;;  %v850_v4 = vpop.f32.mrf.mxu3 }
 0x123   :  { %v894_v30 = vmax.f32 %v759_v28, 0.0  ;;  %v768_v31 = vpop.f32.mrf.mxu1 }
 0x124   :  { %v989_v32 = vpack.c.bf16 %v925_v29, %v925_v29 }
 0x125   :  { %v958_v14 = vpack.c.bf16 %v894_v30, %v894_v30  ;;  %v669_v33 = vpop.f32.mrf.mxu2 }
 0x126   :  { %1054 = vst.msk [vmem:[%s2359_s3 + $0xbc] sm:$0xf] %vm1006_vm1, %v989_v32  ;;  %v670_v35 = vadd.f32 %v1780_v61, %v669_v33  ;;  %v591_v36 = vpop.f32.mrf.mxu0 }
 0x127   :  { %1023 = vst.msk [vmem:[%s2359_s3 + $0x40] sm:$0xf] %vm1006_vm1, %v958_v14  ;;  %v592_v44 = vadd.f32 %v1780_v61, %v591_v36 }
 0x128   :  { %v839_v39 = vadd.f32 %v838_v47, %v670_v35 }
 0x129   :  { %v761_v40 = vadd.f32 %v760_v56, %v592_v44 }
 0x12a   :  { %v926_v41 = vmax.f32 %v839_v39, 0.0  ;;  %v853_v55 = vpop.f32.mrf.mxu3 }
 0x12b   :  { %v895_v42 = vmax.f32 %v761_v40, 0.0  ;;  %v770_v5 = vpop.f32.mrf.mxu1 }
 0x12c   :  { %v990_v59 = vpack.c.bf16 %v926_v41, %v926_v41 }
 0x12d   :  { %v959_v6 = vpack.c.bf16 %v895_v42, %v895_v42  ;;  %v671_v43 = vpop.f32.mrf.mxu2 }
 0x12e   :  { %1055 = vst.msk [vmem:[%s2359_s3 + $0xc0] sm:$0xf] %vm1006_vm1, %v990_v59  ;;  %v672_v45 = vadd.f32 %v1780_v61, %v671_v43  ;;  %v594_v49 = vpop.f32.mrf.mxu0 }
 0x12f   :  { %1024 = vst.msk [vmem:[%s2359_s3 + $0x44] sm:$0xf] %vm1006_vm1, %v959_v6  ;;  %v595_v47 = vadd.f32 %v1780_v61, %v594_v49 }
 0x130   :  { %v841_v50 = vadd.f32 %v840_v20, %v672_v45 }
 0x131   :  { %v764_v52 = vadd.f32 %v763_v7, %v595_v47 }
 0x132   :  { %v927_v56 = vmax.f32 %v841_v50, 0.0  ;;  %v855_v36 = vpop.f32.mrf.mxu3 }
 0x133   :  { %v896_v57 = vmax.f32 %v764_v52, 0.0  ;;  %v773_v25 = vpop.f32.mrf.mxu1 }
 0x134   :  { %v991_v23 = vpack.c.bf16 %v927_v56, %v927_v56 }
 0x135   :  { %v960_v58 = vpack.c.bf16 %v896_v57, %v896_v57  ;;  %v674_v15 = vpop.f32.mrf.mxu2 }
 0x136   :  { %1056 = vst.msk [vmem:[%s2359_s3 + $0xc4] sm:$0xf] %vm1006_vm1, %v991_v23  ;;  %v675_v38 = vadd.f32 %v1780_v61, %v674_v15  ;;  %v596_v60 = vpop.f32.mrf.mxu0 }
 0x137   :  { %1025 = vst.msk [vmem:[%s2359_s3 + $0x48] sm:$0xf] %vm1006_vm1, %v960_v58  ;;  %v597_v62 = vadd.f32 %v1780_v61, %v596_v60 }
 0x138   :  { %v844_v63 = vadd.f32 %v843_v22, %v675_v38 }
 0x139   :  { %v766_v0 = vadd.f32 %v765_v10, %v597_v62 }
 0x13a   :  { %v928_v1 = vmax.f32 %v844_v63, 0.0 }
 0x13b   :  { %v897_v2 = vmax.f32 %v766_v0, 0.0  ;;  %v775_v34 = vpop.f32.mrf.mxu1 }
 0x13c   :  { %v992_v7 = vpack.c.bf16 %v928_v1, %v928_v1 }
 0x13d   :  { %v961_v20 = vpack.c.bf16 %v897_v2, %v897_v2  ;;  %v676_v51 = vpop.f32.mrf.mxu2  ;;  %v858_v50 = vpop.f32.mrf.mxu3 }
 0x13e   :  { %1057 = vst.msk [vmem:[%s2359_s3 + $0xc8] sm:$0xf] %vm1006_vm1, %v992_v7  ;;  %v677_v9 = vadd.f32 %v1780_v61, %v676_v51  ;;  %v599_v11 = vpop.f32.mrf.mxu0 }
 0x13f   :  { %1026 = vst.msk [vmem:[%s2359_s3 + $0x4c] sm:$0xf] %vm1006_vm1, %v961_v20  ;;  %v600_v13 = vadd.f32 %v1780_v61, %v599_v11 }
 0x140   :  { %v846_v16 = vadd.f32 %v845_v37, %v677_v9 }
 0x141   :  { %v769_v48 = vadd.f32 %v768_v31, %v600_v13 }
 0x142   :  { %v929_v3 = vmax.f32 %v846_v16, 0.0 }
 0x143   :  { %v898_v17 = vmax.f32 %v769_v48, 0.0  ;;  %v778_v18 = vpop.f32.mrf.mxu1 }
 0x144   :  { %v993_v19 = vpack.c.bf16 %v929_v3, %v929_v3 }
 0x145   :  { %v962_v10 = vpack.c.bf16 %v898_v17, %v898_v17  ;;  %v679_v46 = vpop.f32.mrf.mxu2  ;;  %v860_v2 = vpop.f32.mrf.mxu3 }
 0x146   :  { %1058 = vst.msk [vmem:[%s2359_s3 + $0xcc] sm:$0xf] %vm1006_vm1, %v993_v19  ;;  %v680_v21 = vadd.f32 %v1780_v61, %v679_v46  ;;  %v601_v22 = vpop.f32.mrf.mxu0 }
 0x147   :  { %1027 = vst.msk [vmem:[%s2359_s3 + $0x50] sm:$0xf] %vm1006_vm1, %v962_v10  ;;  %v602_v24 = vadd.f32 %v1780_v61, %v601_v22 }
 0x148   :  { %v849_v26 = vadd.f32 %v848_v53, %v680_v21 }
 0x149   :  { %v771_v8 = vadd.f32 %v770_v5, %v602_v24 }
 0x14a   :  { %v930_v54 = vmax.f32 %v849_v26, 0.0 }
 0x14b   :  { %v899_v28 = vmax.f32 %v771_v8, 0.0  ;;  %v780_v29 = vpop.f32.mrf.mxu1 }
 0x14c   :  { %v994_v30 = vpack.c.bf16 %v930_v54, %v930_v54 }
 0x14d   :  { %v963_v31 = vpack.c.bf16 %v899_v28, %v899_v28  ;;  %v681_v32 = vpop.f32.mrf.mxu2  ;;  %v863_v10 = vpop.f32.mrf.mxu3 }
 0x14e   :  { %1059 = vst.msk [vmem:[%s2359_s3 + $0xd0] sm:$0xf] %vm1006_vm1, %v994_v30  ;;  %v682_v14 = vadd.f32 %v1780_v61, %v681_v32  ;;  %v604_v33 = vpop.f32.mrf.mxu0 }
 0x14f   :  { %1028 = vst.msk [vmem:[%s2359_s3 + $0x54] sm:$0xf] %vm1006_vm1, %v963_v31  ;;  %v605_v35 = vadd.f32 %v1780_v61, %v604_v33 }
 0x150   :  { %v851_v44 = vadd.f32 %v850_v4, %v682_v14 }
 0x151   :  { %v774_v37 = vadd.f32 %v773_v25, %v605_v35 }
 0x152   :  { %v931_v39 = vmax.f32 %v851_v44, 0.0 }
 0x153   :  { %v900_v40 = vmax.f32 %v774_v37, 0.0  ;;  %v783_v41 = vpop.f32.mrf.mxu1 }
 0x154   :  { %v995_v42 = vpack.c.bf16 %v931_v39, %v931_v39 }
 0x155   :  { %v964_v5 = vpack.c.bf16 %v900_v40, %v900_v40  ;;  %v684_v59 = vpop.f32.mrf.mxu2  ;;  %v865_v33 = vpop.f32.mrf.mxu3 }
 0x156   :  { %1060 = vst.msk [vmem:[%s2359_s3 + $0xd4] sm:$0xf] %vm1006_vm1, %v995_v42  ;;  %v685_v6 = vadd.f32 %v1780_v61, %v684_v59  ;;  %v606_v43 = vpop.f32.mrf.mxu0 }
 0x157   :  { %1029 = vst.msk [vmem:[%s2359_s3 + $0x58] sm:$0xf] %vm1006_vm1, %v964_v5  ;;  %v607_v45 = vadd.f32 %v1780_v61, %v606_v43 }
 0x158   :  { %v854_v49 = vadd.f32 %v853_v55, %v685_v6 }
 0x159   :  { %v776_v47 = vadd.f32 %v775_v34, %v607_v45 }
 0x15a   :  { %v932_v52 = vmax.f32 %v854_v49, 0.0 }
 0x15b   :  { %v901_v53 = vmax.f32 %v776_v47, 0.0  ;;  %v785_v56 = vpop.f32.mrf.mxu1  ;;  %v630_v47 = vadd.f32 %v1780_v61, %v1800_v12 }
 0x15c   :  { %v996_v57 = vpack.c.bf16 %v932_v52, %v932_v52 }
 0x15d   :  { %v965_v25 = vpack.c.bf16 %v901_v53, %v901_v53  ;;  %v686_v23 = vpop.f32.mrf.mxu2  ;;  %v868_v49 = vpop.f32.mrf.mxu3 }
 0x15e   :  { %1061 = vst.msk [vmem:[%s2359_s3 + $0xd8] sm:$0xf] %vm1006_vm1, %v996_v57  ;;  %v687_v58 = vadd.f32 %v1780_v61, %v686_v23  ;;  %v609_v15 = vpop.f32.mrf.mxu0 }
 0x15f   :  { %1030 = vst.msk [vmem:[%s2359_s3 + $0x5c] sm:$0xf] %vm1006_vm1, %v965_v25  ;;  %v610_v38 = vadd.f32 %v1780_v61, %v609_v15 }
 0x160   :  { %v856_v60 = vadd.f32 %v855_v36, %v687_v58 }
 0x161   :  { %v779_v62 = vadd.f32 %v778_v18, %v610_v38 }
 0x162   :  { %v933_v63 = vmax.f32 %v856_v60, 0.0 }
 0x163   :  { %v902_v0 = vmax.f32 %v779_v62, 0.0  ;;  %v788_v1 = vpop.f32.mrf.mxu1 }
 0x164   :  { %v997_v34 = vpack.c.bf16 %v933_v63, %v933_v63 }
 0x165   :  { %v966_v4 = vpack.c.bf16 %v902_v0, %v902_v0  ;;  %v689_v7 = vpop.f32.mrf.mxu2  ;;  %v632_v0 = vadd.f32 %v1780_v61, %v1831_v27 }
 0x166   :  { %1062 = vst.msk [vmem:[%s2359_s3 + $0xdc] sm:$0xf] %vm1006_vm1, %v997_v34  ;;  %v690_v20 = vadd.f32 %v1780_v61, %v689_v7  ;;  %v611_v51 = vpop.f32.mrf.mxu0  ;;  %v870_v34 = vpop.f32.mrf.mxu3 }
 0x167   :  { %1031 = vst.msk [vmem:[%s2359_s3 + $0x60] sm:$0xf] %vm1006_vm1, %v966_v4  ;;  %v612_v9 = vadd.f32 %v1780_v61, %v611_v51 }
 0x168   :  { %v859_v11 = vadd.f32 %v858_v50, %v690_v20 }
 0x169   :  { %v781_v13 = vadd.f32 %v780_v29, %v612_v9 }
 0x16a   :  { %v934_v16 = vmax.f32 %v859_v11, 0.0 }
 0x16b   :  { %v903_v48 = vmax.f32 %v781_v13, 0.0  ;;  %v790_v3 = vpop.f32.mrf.mxu1 }
 0x16c   :  { %v998_v17 = vpack.c.bf16 %v934_v16, %v934_v16 }
 0x16d   :  { %v967_v18 = vpack.c.bf16 %v903_v48, %v903_v48  ;;  %v691_v19 = vpop.f32.mrf.mxu2 }
 0x16e   :  { %1063 = vst.msk [vmem:[%s2359_s3 + $0xe0] sm:$0xf] %vm1006_vm1, %v998_v17  ;;  %v692_v46 = vadd.f32 %v1780_v61, %v691_v19  ;;  %v614_v55 = vpop.f32.mrf.mxu0 }
 0x16f   :  { %1032 = vst.msk [vmem:[%s2359_s3 + $0x64] sm:$0xf] %vm1006_vm1, %v967_v18  ;;  %v615_v21 = vadd.f32 %v1780_v61, %v614_v55  ;;  %v873_v55 = vpop.f32.mrf.mxu3 }
 0x170   :  { %v861_v22 = vadd.f32 %v860_v2, %v692_v46 }
 0x171   :  { %v784_v24 = vadd.f32 %v783_v41, %v615_v21 }
 0x172   :  { %v935_v26 = vmax.f32 %v861_v22, 0.0 }
 0x173   :  { %v904_v8 = vmax.f32 %v784_v24, 0.0  ;;  %v793_v54 = vpop.f32.mrf.mxu1 }
 0x174   :  { %v999_v28 = vpack.c.bf16 %v935_v26, %v935_v26 }
 0x175   :  { %v968_v29 = vpack.c.bf16 %v904_v8, %v904_v8  ;;  %v694_v30 = vpop.f32.mrf.mxu2 }
 0x176   :  { %1064 = vst.msk [vmem:[%s2359_s3 + $0xe4] sm:$0xf] %vm1006_vm1, %v999_v28  ;;  %v695_v31 = vadd.f32 %v1780_v61, %v694_v30  ;;  %v616_v32 = vpop.f32.mrf.mxu0 }
 0x177   :  { %1033 = vst.msk [vmem:[%s2359_s3 + $0x68] sm:$0xf] %vm1006_vm1, %v968_v29  ;;  %v617_v14 = vadd.f32 %v1780_v61, %v616_v32 }
 0x178   :  { %v864_v35 = vadd.f32 %v863_v10, %v695_v31 }
 0x179   :  { %v786_v36 = vadd.f32 %v785_v56, %v617_v14 }
 0x17a   :  { %v936_v44 = vmax.f32 %v864_v35, 0.0 }
 0x17b   :  { %v905_v37 = vmax.f32 %v786_v36, 0.0  ;;  %v795_v39 = vpop.f32.mrf.mxu1 }
 0x17c   :  { %v1000_v40 = vpack.c.bf16 %v936_v44, %v936_v44 }
 0x17d   :  { %v969_v41 = vpack.c.bf16 %v905_v37, %v905_v37  ;;  %v696_v42 = vpop.f32.mrf.mxu2 }
 0x17e   :  { %1065 = vst.msk [vmem:[%s2359_s3 + $0xe8] sm:$0xf] %vm1006_vm1, %v1000_v40  ;;  %v697_v5 = vadd.f32 %v1780_v61, %v696_v42  ;;  %v619_v59 = vpop.f32.mrf.mxu0 }
 0x17f   :  { %1034 = vst.msk [vmem:[%s2359_s3 + $0x6c] sm:$0xf] %vm1006_vm1, %v969_v41  ;;  %v620_v6 = vadd.f32 %v1780_v61, %v619_v59 }
 0x180   :  { %v866_v43 = vadd.f32 %v865_v33, %v697_v5  ;;  %v875_v33 = vpop.f32.mrf.mxu3 }
 0x181   :  { %v789_v45 = vadd.f32 %v788_v1, %v620_v6 }
 0x182   :  { %v937_v50 = vmax.f32 %v866_v43, 0.0 }
 0x183   :  { %v906_v52 = vmax.f32 %v789_v45, 0.0  ;;  %v798_v53 = vpop.f32.mrf.mxu1 }
 0x184   :  { %v1001_v56 = vpack.c.bf16 %v937_v50, %v937_v50  ;;  %v799_v57 = vadd.f32 %v798_v53, %v630_v47 }
 0x185   :  { %v970_v25 = vpack.c.bf16 %v906_v52, %v906_v52  ;;  %v699_v23 = vpop.f32.mrf.mxu2 }
 0x186   :  { %1066 = vst.msk [vmem:[%s2359_s3 + $0xec] sm:$0xf] %vm1006_vm1, %v1001_v56  ;;  %v910_v58 = vmax.f32 %v799_v57, 0.0  ;;  %v700_v15 = vadd.f32 %v1780_v61, %v699_v23  ;;  %v621_v38 = vpop.f32.mrf.mxu0 }
 0x187   :  { %1035 = vst.msk [vmem:[%s2359_s3 + $0x70] sm:$0xf] %vm1006_vm1, %v970_v25  ;;  %v622_v12 = vadd.f32 %v1780_v61, %v621_v38  ;;  %v1482_v61 = vld [vmem:[%s2358_s2] ss:$0 sm:$0xff] }
 0x188   :  { %v974_v60 = vpack.c.bf16 %v910_v58, %v910_v58  ;;  %v869_v62 = vadd.f32 %v868_v49, %v700_v15 }
 0x189   :  { %v791_v63 = vadd.f32 %v790_v3, %v622_v12 }
 0x18a   :  { %1039 = vst.msk [vmem:[%s2359_s3 + $0x80] sm:$0xf] %vm1006_vm1, %v974_v60  ;;  %v938_v1 = vmax.f32 %v869_v62, 0.0 }
 0x18b   :  { %v907_v2 = vmax.f32 %v791_v63, 0.0  ;;  %v800_v4 = vpop.f32.mrf.mxu1 }
 0x18c   :  { %v1002_v7 = vpack.c.bf16 %v938_v1, %v938_v1  ;;  %v801_v20 = vadd.f32 %v800_v4, %v632_v0 }
 0x18d   :  { %v971_v51 = vpack.c.bf16 %v907_v2, %v907_v2  ;;  %v701_v9 = vpop.f32.mrf.mxu2 }
 0x18e   :  { %1067 = vst.msk [vmem:[%s2359_s3 + $0xf0] sm:$0xf] %vm1006_vm1, %v1002_v7  ;;  %v911_v11 = vmax.f32 %v801_v20, 0.0  ;;  %v702_v27 = vadd.f32 %v1482_v61, %v701_v9  ;;  %v624_v13 = vpop.f32.mrf.mxu0 }
 0x18f   :  { %1036 = vst.msk [vmem:[%s2359_s3 + $0x74] sm:$0xf] %vm1006_vm1, %v971_v51  ;;  %v625_v16 = vadd.f32 %v1482_v61, %v624_v13 }
 0x190   :  { %v975_v48 = vpack.c.bf16 %v911_v11, %v911_v11  ;;  %v871_v3 = vadd.f32 %v870_v34, %v702_v27 }
 0x191   :  { %v794_v17 = vadd.f32 %v793_v54, %v625_v16 }
 0x192   :  { %1040 = vst.msk [vmem:[%s2359_s3 + $0x84] sm:$0xf] %vm1006_vm1, %v975_v48  ;;  %v939_v18 = vmax.f32 %v871_v3, 0.0 }
 0x193   :  { %v908_v19 = vmax.f32 %v794_v17, 0.0 }
 0x194   :  { %v1003_v10 = vpack.c.bf16 %v939_v18, %v939_v18 }
 0x195   :  { %v972_v46 = vpack.c.bf16 %v908_v19, %v908_v19  ;;  %v704_v21 = vpop.f32.mrf.mxu2 }
 0x196   :  { %1068 = vst.msk [vmem:[%s2359_s3 + $0xf4] sm:$0xf] %vm1006_vm1, %v1003_v10  ;;  %v705_v22 = vadd.f32 %v1482_v61, %v704_v21  ;;  %v626_v24 = vpop.f32.mrf.mxu0 }
 0x197   :  { %1037 = vst.msk [vmem:[%s2359_s3 + $0x78] sm:$0xf] %vm1006_vm1, %v972_v46  ;;  %v627_v26 = vadd.f32 %v1482_v61, %v626_v24 }
 0x198   :  { %v874_v8 = vadd.f32 %v873_v55, %v705_v22 }
 0x199   :  { %v796_v54 = vadd.f32 %v795_v39, %v627_v26 }
 0x19a   :  { %v940_v28 = vmax.f32 %v874_v8, 0.0 }
 0x19b   :  { %v909_v29 = vmax.f32 %v796_v54, 0.0 }
 0x19c   :  { %v1004_v30 = vpack.c.bf16 %v940_v28, %v940_v28 }
 0x19d   :  { %v973_v31 = vpack.c.bf16 %v909_v29, %v909_v29  ;;  %v706_v32 = vpop.f32.mrf.mxu2 }
 0x19e   :  { %1069 = vst.msk [vmem:[%s2359_s3 + $0xf8] sm:$0xf] %vm1006_vm1, %v1004_v30  ;;  %v707_v14 = vadd.f32 %v1482_v61, %v706_v32 }
 0x19f   :  { %1038 = vst.msk [vmem:[%s2359_s3 + $0x7c] sm:$0xf] %vm1006_vm1, %v973_v31 }
 0x1a0   :  { %v876_v35 = vadd.f32 %v875_v33, %v707_v14 }
 0x1a2   :  { %v941_v36 = vmax.f32 %v876_v35, 0.0 }
 0x1a4   :  { %v1005_v44 = vpack.c.bf16 %v941_v36, %v941_v36 }
 0x1a6   :  { %1070 = vst.msk [vmem:[%s2359_s3 + $0xfc] sm:$0xf] %vm1006_vm1, %v1005_v44 }

// kernel: one_head_strong_forward.9
= control target key start
LH: loop header
LB: loop body
LE: loop exit
PB: predicated region body
PF: predicated region fallthrough
CT: control target
= control target key end

     0   :  { %vm315_vm0 = vcmask 261120   ;;  %vm519_vm1 = vcmask 519168   ;;  %s1086_s1 = inlined_call_operand.vmem [shape: bf16[288,64], index: 1, kind: input, shape index: {}]   ;;  %s1087_s0 = inlined_call_operand.vmem [shape: bf16[128,288], index: 0, kind: input, shape index: {}]   ;;  %s1088_s2 = inlined_call_operand.vmem [shape: f32[1,64], index: 2, kind: input, shape index: {}]   ;;  %s1089_s3 = inlined_call_operand.vmem [shape: bf16[128,64], index: 3, kind: output, shape index: {}]  }
   0x1   :  { %v747_v0 = vld [vmem:[%s1086_s1 + $0x38] sm:$0xff]  ;;  %v757_v1 = vld [vmem:[%s1086_s1 + $0x88] sm:$0xff]  ;;  %v746_v3 = vld [vmem:[%s1086_s1 + $0x30] sm:$0xff] }
   0x2   :  { %v755_v2 = vld [vmem:[%s1086_s1 + $0x78] sm:$0xff]  ;;  %340 = vmatpush.bf16.msra.mxu0 %v747_v0  ;;  %758 = vmatpush.bf16.msra.mxu3 %v747_v0  ;;  %v756_v4 = vld [vmem:[%s1086_s1 + $0x80] sm:$0xff]  ;;  %v754_v5 = vld [vmem:[%s1086_s1 + $0x70] sm:$0xff] }
   0x3   :  { %444 = vmatpush.bf16.msra.mxu2 %v757_v1  ;;  %389 = vmatpush.bf16.msra.mxu1 %v755_v2  ;;  %v550_v6 = vld [vmem:[%s1087_s0 + $0x8] sm:$0xf]  ;;  %v718_v7 = vld [vmem:[%s1087_s0 + $0x10] sm:$0xf0]  ;;  %v744_v11 = vld [vmem:[%s1086_s1 + $0x20] sm:$0xff] }
   0x4   :  { %v551_v8 = vor.u32 %v718_v7, %v550_v6  ;;  %v745_v9 = vld [vmem:[%s1086_s1 + $0x28] sm:$0xff]  ;;  %v752_v12 = vld [vmem:[%s1086_s1 + $0x60] sm:$0xff]  ;;  %v743_v13 = vld [vmem:[%s1086_s1 + $0x18] sm:$0xff] }
   0x5   :  { %v753_v10 = vld [vmem:[%s1086_s1 + $0x68] sm:$0xff]  ;;  %v751_v14 = vld [vmem:[%s1086_s1 + $0x58] sm:$0xff]  ;;  %v742_v15 = vld [vmem:[%s1086_s1 + $0x10] sm:$0xff] }
   0x6   :  { %341 = vmatpush.bf16.msra.mxu0 %v746_v3  ;;  %759 = vmatpush.bf16.msra.mxu3 %v746_v3  ;;  %v750_v16 = vld [vmem:[%s1086_s1 + $0x50] sm:$0xff]  ;;  %v562_v17 = vld [vmem:[%s1087_s0 + $0x20] sm:$0xf]  ;;  %v721_v18 = vld [vmem:[%s1087_s0 + $0x28] sm:$0xf0] }
   0x7   :  { %445 = vmatpush.bf16.msra.mxu2 %v756_v4  ;;  %390 = vmatpush.bf16.msra.mxu1 %v754_v5  ;;  %v563_v19 = vor.u32 %v721_v18, %v562_v17  ;;  %v741_v20 = vld [vmem:[%s1086_s1 + $0x8] sm:$0xff]  ;;  %v740_v22 = vld [vmem:[%s1086_s1] sm:$0xff]  ;;  %v614_v26 = vld [vmem:[%s1087_s0 + $0x90] sm:$0xf] }
   0x8   :  { %v749_v21 = vld [vmem:[%s1086_s1 + $0x48] sm:$0xff]  ;;  %v748_v23 = vld [vmem:[%s1086_s1 + $0x40] sm:$0xff]  ;;  %v735_v27 = vld [vmem:[%s1087_s0 + $0x98] sm:$0xf0] }
   0x9   :  { %v542_v24 = vld [vmem:[%s1087_s0] sm:$0xf]  ;;  %v717_v25 = vld [vmem:[%s1087_s0 + $0x8] sm:$0xf0]  ;;  %v716_v28 = vld [vmem:[%s1087_s0 + $0x4] sm:$0xf]  ;;  %v615_v31 = vor.u32 %v735_v27, %v614_v26 }
   0xa   :  { %708 = vmatmul.msk.bf16.vlgmr.msra.gmra.mxu2 %vm315_vm0, %v551_v8  ;;  %342 = vmatpush.bf16.msra.mxu0 %v745_v9  ;;  %v544_v29 = vld [vmem:[%s1087_s0 + $0xc] sm:$0xf0]  ;;  %v543_v30 = vor.u32 %v717_v25, %v542_v24  ;;  %v574_v33 = vld [vmem:[%s1087_s0 + $0x38] sm:$0xf]  ;;  %v724_v34 = vld [vmem:[%s1087_s0 + $0x40] sm:$0xf0] }
   0xb   :  { %760 = vmatpush.bf16.msra.mxu3 %v745_v9  ;;  %391 = vmatpush.bf16.msra.mxu1 %v753_v10  ;;  %v547_v32 = vor.u32 %v716_v28, %v544_v29  ;;  %v575_v35 = vor.u32 %v724_v34, %v574_v33  ;;  %v554_v36 = vld [vmem:[%s1087_s0 + $0x18] sm:$0xf]  ;;  %v720_v37 = vld [vmem:[%s1087_s0 + $0x20] sm:$0xf0]  ;;  %v626_v38 = vld [vmem:[%s1087_s0 + $0xa8] sm:$0xf] }
   0xc   :  { %v738_v39 = vld [vmem:[%s1087_s0 + $0xb0] sm:$0xf0]  ;;  %v719_v40 = vld [vmem:[%s1087_s0 + $0x1c] sm:$0xf]  ;;  %v556_v41 = vld [vmem:[%s1087_s0 + $0x24] sm:$0xf0]  ;;  %v555_v42 = vor.u32 %v720_v37, %v554_v36 }
   0xd   :  { %v627_v43 = vor.u32 %v738_v39, %v626_v38  ;;  %v559_v44 = vor.u32 %v719_v40, %v556_v41  ;;  %v586_v45 = vld [vmem:[%s1087_s0 + $0x50] sm:$0xf]  ;;  %v727_v46 = vld [vmem:[%s1087_s0 + $0x58] sm:$0xf0]  ;;  %v734_v50 = vld [vmem:[%s1087_s0 + $0x94] sm:$0xf] }
   0xe   :  { %343 = vmatpush.bf16.msra.mxu0 %v744_v11  ;;  %v587_v47 = vor.u32 %v727_v46, %v586_v45  ;;  %v566_v48 = vld [vmem:[%s1087_s0 + $0x30] sm:$0xf]  ;;  %v723_v49 = vld [vmem:[%s1087_s0 + $0x38] sm:$0xf0]  ;;  %v616_v51 = vld [vmem:[%s1087_s0 + $0x9c] sm:$0xf0] }
   0xf   :  { %761 = vmatpush.bf16.msra.mxu3 %v744_v11  ;;  %392 = vmatpush.bf16.msra.mxu1 %v752_v12  ;;  %v722_v52 = vld [vmem:[%s1087_s0 + $0x34] sm:$0xf]  ;;  %v568_v53 = vld [vmem:[%s1087_s0 + $0x3c] sm:$0xf0]  ;;  %v567_v54 = vor.u32 %v723_v49, %v566_v48  ;;  %v619_v55 = vor.u32 %v734_v50, %v616_v51  ;;  %v598_v57 = vld [vmem:[%s1087_s0 + $0x68] sm:$0xf] }
  0x10   :  { %v571_v56 = vor.u32 %v722_v52, %v568_v53  ;;  %v730_v58 = vld [vmem:[%s1087_s0 + $0x70] sm:$0xf0]  ;;  %v578_v60 = vld [vmem:[%s1087_s0 + $0x48] sm:$0xf]  ;;  %v737_v62 = vld [vmem:[%s1087_s0 + $0xac] sm:$0xf] }
  0x11   :  { %v599_v59 = vor.u32 %v730_v58, %v598_v57  ;;  %v726_v61 = vld [vmem:[%s1087_s0 + $0x50] sm:$0xf0]  ;;  %v628_v63 = vld [vmem:[%s1087_s0 + $0xb4] sm:$0xf0]  ;;  %v725_v0 = vld [vmem:[%s1087_s0 + $0x4c] sm:$0xf] }
  0x12   :  { %344 = vmatpush.bf16.msra.mxu0 %v743_v13  ;;  %v580_v1 = vld [vmem:[%s1087_s0 + $0x54] sm:$0xf0]  ;;  %v631_v3 = vor.u32 %v737_v62, %v628_v63  ;;  %v733_v6 = vld [vmem:[%s1087_s0 + $0x88] sm:$0xf0]  ;;  %v590_v8 = vld [vmem:[%s1087_s0 + $0x60] sm:$0xf] }
  0x13   :  { %762 = vmatpush.bf16.msra.mxu3 %v743_v13  ;;  %393 = vmatpush.bf16.msra.mxu1 %v751_v14  ;;  %v583_v4 = vor.u32 %v725_v0, %v580_v1  ;;  %v729_v9 = vld [vmem:[%s1087_s0 + $0x68] sm:$0xf0]  ;;  %v592_v11 = vld [vmem:[%s1087_s0 + $0x6c] sm:$0xf0]  ;;  %v602_v17 = vld [vmem:[%s1087_s0 + $0x78] sm:$0xf] }
  0x14   :  { %v732_v18 = vld [vmem:[%s1087_s0 + $0x80] sm:$0xf0]  ;;  %v739_v24 = vld [vmem:[%s1087_s0 + $0xb8] sm:$0xf0]  ;;  %v1004_v28 = vld [vmem:[%s1088_s2] ss:$0 sm:$0xff] }
  0x16   :  { %345 = vmatpush.bf16.msra.mxu0 %v742_v15 }
  0x17   :  { %763 = vmatpush.bf16.msra.mxu3 %v742_v15  ;;  %394 = vmatpush.bf16.msra.mxu1 %v750_v16  ;;  %v736_v15 = vld [vmem:[%s1087_s0 + $0xa0] sm:$0xf0] }
  0x1a   :  { %709 = vmatmul.msk.bf16.gmra.mxu2 %vm315_vm0, %v563_v19  ;;  %346 = vmatpush.bf16.msra.mxu0 %v741_v20  ;;  %v731_v19 = vld [vmem:[%s1087_s0 + $0x7c] sm:$0xf] }
  0x1b   :  { %764 = vmatpush.bf16.msra.mxu3 %v741_v20  ;;  %395 = vmatpush.bf16.msra.mxu1 %v749_v21  ;;  %v604_v20 = vld [vmem:[%s1087_s0 + $0x84] sm:$0xf0] }
  0x1e   :  { %347 = vmatpush.bf16.msra.mxu0 %v740_v22 }
  0x1f   :  { %765 = vmatpush.bf16.msra.mxu3 %v740_v22  ;;  %396 = vmatpush.bf16.msra.mxu1 %v748_v23  ;;  %v607_v22 = vor.u32 %v731_v19, %v604_v20 }
  0x21   :  { %348 = vmatmul.bf16.vlgmr.msra.gmra.mxu0 %v543_v30 }
  0x22   :  { %378 = vmatmul.bf16.vlgmr.msra.gmra.mxu3 %v615_v31  ;;  %397 = vmatmul.bf16.vlgmr.msra.gmra.mxu1 %v547_v32 }
  0x23   :  { %766 = vmatpush.bf16.msrb.mxu3 %v755_v2  ;;  %v579_v2 = vor.u32 %v726_v61, %v578_v60 }
  0x27   :  { %767 = vmatpush.bf16.msrb.mxu3 %v754_v5  ;;  %v610_v5 = vld [vmem:[%s1087_s0 + $0x80] sm:$0xf] }
  0x28   :  { %v611_v7 = vor.u32 %v733_v6, %v610_v5 }
  0x2a   :  { %710 = vmatmul.msk.bf16.gmra.mxu2 %vm315_vm0, %v575_v35 }
  0x2b   :  { %768 = vmatpush.bf16.msrb.mxu3 %v753_v10  ;;  %v728_v10 = vld [vmem:[%s1087_s0 + $0x64] sm:$0xf] }
  0x2c   :  { %v595_v13 = vor.u32 %v728_v10, %v592_v11 }
  0x2f   :  { %769 = vmatpush.bf16.msrb.mxu3 %v752_v12  ;;  %v591_v12 = vor.u32 %v729_v9, %v590_v8 }
  0x31   :  { %353 = vmatmul.bf16.gmra.mxu0 %v555_v42 }
  0x32   :  { %383 = vmatmul.bf16.gmra.mxu3 %v627_v43  ;;  %402 = vmatmul.bf16.gmra.mxu1 %v559_v44 }
  0x33   :  { %770 = vmatpush.bf16.msrb.mxu3 %v751_v14  ;;  %v622_v14 = vld [vmem:[%s1087_s0 + $0x98] sm:$0xf] }
  0x37   :  { %771 = vmatpush.bf16.msrb.mxu3 %v750_v16  ;;  %v623_v16 = vor.u32 %v736_v15, %v622_v14 }
  0x3a   :  { %711 = vmatmul.msk.bf16.gmra.mxu2 %vm315_vm0, %v587_v47 }
  0x3b   :  { %772 = vmatpush.bf16.msrb.mxu3 %v749_v21  ;;  %v603_v21 = vor.u32 %v732_v18, %v602_v17 }
  0x3f   :  { %773 = vmatpush.bf16.msrb.mxu3 %v748_v23  ;;  %v634_v23 = vld [vmem:[%s1087_s0 + $0xb0] sm:$0xf] }
  0x40   :  { %v635_v25 = vor.u32 %v739_v24, %v634_v23 }
  0x41   :  { %358 = vmatmul.bf16.gmra.mxu0 %v567_v54 }
  0x42   :  { %427 = vmatmul.bf16.vlgmr.msrb.gmra.mxu3 %v619_v55  ;;  %407 = vmatmul.bf16.gmra.mxu1 %v571_v56 }
  0x4a   :  { %712 = vmatmul.msk.bf16.gmra.mxu2 %vm315_vm0, %v599_v59 }
  0x51   :  { %363 = vmatmul.bf16.gmra.mxu0 %v579_v2 }
  0x52   :  { %432 = vmatmul.bf16.gmra.mxu3 %v631_v3  ;;  %412 = vmatmul.bf16.gmra.mxu1 %v583_v4 }
  0x5a   :  { %713 = vmatmul.msk.bf16.gmra.mxu2 %vm315_vm0, %v611_v7 }
  0x61   :  { %368 = vmatmul.bf16.gmra.mxu0 %v591_v12 }
  0x62   :  { %417 = vmatmul.bf16.gmra.mxu1 %v595_v13 }
  0x6a   :  { %714 = vmatmul.msk.bf16.gmra.mxu2 %vm315_vm0, %v623_v16 }
  0x71   :  { %373 = vmatmul.bf16.gmra.mxu0 %v603_v21 }
  0x72   :  { %422 = vmatmul.bf16.gmra.mxu1 %v607_v22 }
  0x7a   :  { %715 = vmatmul.msk.bf16.gmra.mxu2 %vm315_vm0, %v635_v25 }
  0x8d   :  { %v447_v26 = vpop.f32.mrf.mxu2 }
  0x95   :  { %v449_v27 = vpop.f32.mrf.mxu2 }
  0x9d   :  { %v452_v29 = vpop.f32.mrf.mxu2 }
  0x9e   :  { %v349_v30 = vpop.f32.mrf.mxu0 }
  0x9f   :  { %v350_v31 = vadd.f32 %v1004_v28, %v349_v30  ;;  %v398_v32 = vpop.f32.mrf.mxu1 }
  0xa1   :  { %v399_v33 = vadd.f32 %v398_v32, %v350_v31 }
  0xa3   :  { %v448_v34 = vadd.f32 %v447_v26, %v399_v33 }
  0xa5   :  { %v487_v35 = vmax.f32 %v448_v34, 0.0  ;;  %v454_v36 = vpop.f32.mrf.mxu2  ;;  %v379_v58 = vpop.f32.mrf.mxu3 }
  0xa6   :  { %v351_v37 = vpop.f32.mrf.mxu0 }
  0xa7   :  { %v503_v38 = vpack.c.bf16 %v487_v35, %v487_v35  ;;  %v352_v39 = vadd.f32 %v1004_v28, %v351_v37  ;;  %v400_v40 = vpop.f32.mrf.mxu1 }
  0xa9   :  { %520 = vst.msk [vmem:[%s1089_s3] sm:$0xf] %vm519_vm1, %v503_v38  ;;  %v401_v41 = vadd.f32 %v400_v40, %v352_v39 }
  0xab   :  { %v450_v42 = vadd.f32 %v449_v27, %v401_v41 }
  0xad   :  { %v488_v43 = vmax.f32 %v450_v42, 0.0  ;;  %v457_v44 = vpop.f32.mrf.mxu2  ;;  %v381_v4 = vpop.f32.mrf.mxu3 }
  0xae   :  { %v354_v45 = vpop.f32.mrf.mxu0 }
  0xaf   :  { %v504_v46 = vpack.c.bf16 %v488_v43, %v488_v43  ;;  %v355_v47 = vadd.f32 %v1004_v28, %v354_v45  ;;  %v403_v48 = vpop.f32.mrf.mxu1 }
  0xb1   :  { %521 = vst.msk [vmem:[%s1089_s3 + $0x4] sm:$0xf] %vm519_vm1, %v504_v46  ;;  %v404_v49 = vadd.f32 %v403_v48, %v355_v47  ;;  %v380_v47 = vadd.f32 %v1004_v28, %v379_v58 }
  0xb3   :  { %v453_v50 = vadd.f32 %v452_v29, %v404_v49 }
  0xb5   :  { %v489_v51 = vmax.f32 %v453_v50, 0.0  ;;  %v459_v52 = vpop.f32.mrf.mxu2  ;;  %v384_v16 = vpop.f32.mrf.mxu3 }
  0xb6   :  { %v356_v53 = vpop.f32.mrf.mxu0 }
  0xb7   :  { %v505_v54 = vpack.c.bf16 %v489_v51, %v489_v51  ;;  %v357_v55 = vadd.f32 %v1004_v28, %v356_v53  ;;  %v405_v56 = vpop.f32.mrf.mxu1 }
  0xb9   :  { %522 = vst.msk [vmem:[%s1089_s3 + $0x8] sm:$0xf] %vm519_vm1, %v505_v54  ;;  %v406_v57 = vadd.f32 %v405_v56, %v357_v55 }
  0xbb   :  { %v455_v59 = vadd.f32 %v454_v36, %v406_v57 }
  0xbd   :  { %v490_v60 = vmax.f32 %v455_v59, 0.0  ;;  %v462_v61 = vpop.f32.mrf.mxu2  ;;  %v386_v29 = vpop.f32.mrf.mxu3 }
  0xbe   :  { %v359_v62 = vpop.f32.mrf.mxu0 }
  0xbf   :  { %v506_v63 = vpack.c.bf16 %v490_v60, %v490_v60  ;;  %v360_v0 = vadd.f32 %v1004_v28, %v359_v62  ;;  %v408_v1 = vpop.f32.mrf.mxu1  ;;  %v382_v60 = vadd.f32 %v1004_v28, %v381_v4 }
  0xc1   :  { %523 = vst.msk [vmem:[%s1089_s3 + $0xc] sm:$0xf] %vm519_vm1, %v506_v63  ;;  %v409_v2 = vadd.f32 %v408_v1, %v360_v0 }
  0xc3   :  { %v458_v3 = vadd.f32 %v457_v44, %v409_v2 }
  0xc5   :  { %v491_v5 = vmax.f32 %v458_v3, 0.0  ;;  %v464_v6 = vpop.f32.mrf.mxu2  ;;  %v428_v39 = vpop.f32.mrf.mxu3 }
  0xc6   :  { %v361_v7 = vpop.f32.mrf.mxu0  ;;  %v429_v50 = vadd.f32 %v428_v39, %v380_v47 }
  0xc7   :  { %v507_v8 = vpack.c.bf16 %v491_v5, %v491_v5  ;;  %v362_v9 = vadd.f32 %v1004_v28, %v361_v7  ;;  %v410_v10 = vpop.f32.mrf.mxu1 }
  0xc9   :  { %524 = vst.msk [vmem:[%s1089_s3 + $0x10] sm:$0xf] %vm519_vm1, %v507_v8  ;;  %v411_v11 = vadd.f32 %v410_v10, %v362_v9  ;;  %v385_v9 = vadd.f32 %v1004_v28, %v384_v16  ;;  %v387_v16 = vadd.f32 %v1004_v28, %v386_v29 }
  0xcb   :  { %v460_v12 = vadd.f32 %v459_v52, %v411_v11 }
  0xcd   :  { %v492_v13 = vmax.f32 %v460_v12, 0.0  ;;  %v467_v14 = vpop.f32.mrf.mxu2  ;;  %v430_v51 = vpop.f32.mrf.mxu3 }
  0xce   :  { %v364_v15 = vpop.f32.mrf.mxu0  ;;  %v431_v0 = vadd.f32 %v430_v51, %v382_v60 }
  0xcf   :  { %v508_v17 = vpack.c.bf16 %v492_v13, %v492_v13  ;;  %v365_v18 = vadd.f32 %v1004_v28, %v364_v15  ;;  %v413_v19 = vpop.f32.mrf.mxu1 }
  0xd1   :  { %525 = vst.msk [vmem:[%s1089_s3 + $0x14] sm:$0xf] %vm519_vm1, %v508_v17  ;;  %v414_v20 = vadd.f32 %v413_v19, %v365_v18 }
  0xd3   :  { %v463_v21 = vadd.f32 %v462_v61, %v414_v20 }
  0xd5   :  { %v493_v22 = vmax.f32 %v463_v21, 0.0  ;;  %v469_v23 = vpop.f32.mrf.mxu2  ;;  %v433_v4 = vpop.f32.mrf.mxu3 }
  0xd6   :  { %v366_v24 = vpop.f32.mrf.mxu0 }
  0xd7   :  { %v509_v25 = vpack.c.bf16 %v493_v22, %v493_v22  ;;  %v367_v26 = vadd.f32 %v1004_v28, %v366_v24  ;;  %v415_v27 = vpop.f32.mrf.mxu1 }
  0xd9   :  { %526 = vst.msk [vmem:[%s1089_s3 + $0x18] sm:$0xf] %vm519_vm1, %v509_v25  ;;  %v416_v30 = vadd.f32 %v415_v27, %v367_v26 }
  0xdb   :  { %v465_v31 = vadd.f32 %v464_v6, %v416_v30 }
  0xdd   :  { %v494_v32 = vmax.f32 %v465_v31, 0.0  ;;  %v472_v33 = vpop.f32.mrf.mxu2  ;;  %v435_v21 = vpop.f32.mrf.mxu3 }
  0xde   :  { %v369_v34 = vpop.f32.mrf.mxu0 }
  0xdf   :  { %v510_v35 = vpack.c.bf16 %v494_v32, %v494_v32  ;;  %v370_v36 = vadd.f32 %v1004_v28, %v369_v34  ;;  %v418_v37 = vpop.f32.mrf.mxu1 }
  0xe1   :  { %527 = vst.msk [vmem:[%s1089_s3 + $0x1c] sm:$0xf] %vm519_vm1, %v510_v35  ;;  %v419_v38 = vadd.f32 %v418_v37, %v370_v36 }
  0xe3   :  { %v468_v40 = vadd.f32 %v467_v14, %v419_v38  ;;  %v434_v14 = vadd.f32 %v433_v4, %v385_v9 }
  0xe5   :  { %v495_v41 = vmax.f32 %v468_v40, 0.0  ;;  %v474_v42 = vpop.f32.mrf.mxu2 }
  0xe6   :  { %v371_v43 = vpop.f32.mrf.mxu0 }
  0xe7   :  { %v511_v44 = vpack.c.bf16 %v495_v41, %v495_v41  ;;  %v372_v45 = vadd.f32 %v1004_v28, %v371_v43  ;;  %v420_v46 = vpop.f32.mrf.mxu1 }
  0xe9   :  { %528 = vst.msk [vmem:[%s1089_s3 + $0x20] sm:$0xf] %vm519_vm1, %v511_v44  ;;  %v421_v48 = vadd.f32 %v420_v46, %v372_v45 }
  0xeb   :  { %v470_v49 = vadd.f32 %v469_v23, %v421_v48  ;;  %v436_v23 = vadd.f32 %v435_v21, %v387_v16 }
  0xed   :  { %v496_v52 = vmax.f32 %v470_v49, 0.0  ;;  %v477_v53 = vpop.f32.mrf.mxu2 }
  0xee   :  { %v478_v54 = vadd.f32 %v477_v53, %v429_v50  ;;  %v374_v55 = vpop.f32.mrf.mxu0 }
  0xef   :  { %v512_v56 = vpack.c.bf16 %v496_v52, %v496_v52  ;;  %v375_v57 = vadd.f32 %v1004_v28, %v374_v55  ;;  %v423_v59 = vpop.f32.mrf.mxu1 }
  0xf0   :  { %v499_v58 = vmax.f32 %v478_v54, 0.0 }
  0xf1   :  { %529 = vst.msk [vmem:[%s1089_s3 + $0x24] sm:$0xf] %vm519_vm1, %v512_v56  ;;  %v424_v61 = vadd.f32 %v423_v59, %v375_v57 }
  0xf2   :  { %v515_v62 = vpack.c.bf16 %v499_v58, %v499_v58 }
  0xf3   :  { %v473_v63 = vadd.f32 %v472_v33, %v424_v61 }
  0xf4   :  { %532 = vst.msk [vmem:[%s1089_s3 + $0x30] sm:$0xf] %vm519_vm1, %v515_v62 }
  0xf5   :  { %v497_v1 = vmax.f32 %v473_v63, 0.0  ;;  %v479_v2 = vpop.f32.mrf.mxu2 }
  0xf6   :  { %v480_v3 = vadd.f32 %v479_v2, %v431_v0  ;;  %v376_v5 = vpop.f32.mrf.mxu0 }
  0xf7   :  { %v513_v6 = vpack.c.bf16 %v497_v1, %v497_v1  ;;  %v377_v7 = vadd.f32 %v1004_v28, %v376_v5  ;;  %v425_v8 = vpop.f32.mrf.mxu1 }
  0xf8   :  { %v500_v10 = vmax.f32 %v480_v3, 0.0 }
  0xf9   :  { %530 = vst.msk [vmem:[%s1089_s3 + $0x28] sm:$0xf] %vm519_vm1, %v513_v6  ;;  %v426_v11 = vadd.f32 %v425_v8, %v377_v7 }
  0xfa   :  { %v516_v12 = vpack.c.bf16 %v500_v10, %v500_v10 }
  0xfb   :  { %v475_v13 = vadd.f32 %v474_v42, %v426_v11 }
  0xfc   :  { %533 = vst.msk [vmem:[%s1089_s3 + $0x34] sm:$0xf] %vm519_vm1, %v516_v12 }
  0xfd   :  { %v498_v15 = vmax.f32 %v475_v13, 0.0  ;;  %v482_v17 = vpop.f32.mrf.mxu2 }
  0xfe   :  { %v483_v18 = vadd.f32 %v482_v17, %v434_v14 }
  0xff   :  { %v514_v19 = vpack.c.bf16 %v498_v15, %v498_v15 }
 0x100   :  { %v501_v20 = vmax.f32 %v483_v18, 0.0 }
 0x101   :  { %531 = vst.msk [vmem:[%s1089_s3 + $0x2c] sm:$0xf] %vm519_vm1, %v514_v19 }
 0x102   :  { %v517_v22 = vpack.c.bf16 %v501_v20, %v501_v20 }
 0x104   :  { %534 = vst.msk [vmem:[%s1089_s3 + $0x38] sm:$0xf] %vm519_vm1, %v517_v22 }
 0x105   :  { %v484_v24 = vpop.f32.mrf.mxu2 }
 0x106   :  { %v485_v25 = vadd.f32 %v484_v24, %v436_v23 }
 0x108   :  { %v502_v26 = vmax.f32 %v485_v25, 0.0 }
 0x10a   :  { %v518_v27 = vpack.c.bf16 %v502_v26, %v502_v26 }
 0x10c   :  { %535 = vst.msk [vmem:[%s1089_s3 + $0x3c] sm:$0xf] %vm519_vm1, %v518_v27 }

// kernel: one_head_strong_forward.10
= control target key start
LH: loop header
LB: loop body
LE: loop exit
PB: predicated region body
PF: predicated region fallthrough
CT: control target
= control target key end

     0   :  { %vm369_vm0 = vcmask 523264   ;;  %s932_s1 = inlined_call_operand.vmem [shape: bf16[576,128], index: 1, kind: input, shape index: {}]   ;;  %s933_s2 = inlined_call_operand.vmem [shape: f32[1,128], index: 2, kind: input, shape index: {}]   ;;  %s934_s0 = inlined_call_operand.vmem [shape: bf16[32,576], index: 0, kind: input, shape index: {}]   ;;  %s935_s3 = inlined_call_operand.vmem [shape: bf16[32,128], index: 3, kind: output, shape index: {}]  }
   0x1   :  { %v690_v0 = vld [vmem:[%s932_s1 + $0x38] sm:$0xff]  ;;  %v689_v4 = vld [vmem:[%s932_s1 + $0x30] sm:$0xff]  ;;  %v688_v8 = vld [vmem:[%s932_s1 + $0x28] sm:$0xff] }
   0x2   :  { %v698_v1 = vld [vmem:[%s932_s1 + $0x78] sm:$0xff]  ;;  %376 = vmatpush.bf16.msra.mxu0 %v690_v0  ;;  %v697_v5 = vld [vmem:[%s932_s1 + $0x70] sm:$0xff]  ;;  %v696_v9 = vld [vmem:[%s932_s1 + $0x68] sm:$0xff] }
   0x3   :  { %v706_v2 = vld [vmem:[%s932_s1 + $0xb8] sm:$0xff]  ;;  %395 = vmatpush.bf16.msra.mxu1 %v698_v1  ;;  %v705_v6 = vld [vmem:[%s932_s1 + $0xb0] sm:$0xff]  ;;  %v704_v10 = vld [vmem:[%s932_s1 + $0xa8] sm:$0xff] }
   0x4   :  { %v714_v3 = vld [vmem:[%s932_s1 + $0xf8] sm:$0xff]  ;;  %414 = vmatpush.bf16.msra.mxu2 %v706_v2  ;;  %v713_v7 = vld [vmem:[%s932_s1 + $0xf0] sm:$0xff]  ;;  %v712_v11 = vld [vmem:[%s932_s1 + $0xe8] sm:$0xff] }
   0x5   :  { %433 = vmatpush.bf16.msra.mxu3 %v714_v3  ;;  %v687_v12 = vld [vmem:[%s932_s1 + $0x20] sm:$0xff]  ;;  %v686_v16 = vld [vmem:[%s932_s1 + $0x18] sm:$0xff]  ;;  %v685_v20 = vld [vmem:[%s932_s1 + $0x10] sm:$0xff] }
   0x6   :  { %377 = vmatpush.bf16.msra.mxu0 %v689_v4  ;;  %v695_v13 = vld [vmem:[%s932_s1 + $0x60] sm:$0xff]  ;;  %v694_v17 = vld [vmem:[%s932_s1 + $0x58] sm:$0xff]  ;;  %v693_v21 = vld [vmem:[%s932_s1 + $0x50] sm:$0xff] }
   0x7   :  { %396 = vmatpush.bf16.msra.mxu1 %v697_v5  ;;  %v703_v14 = vld [vmem:[%s932_s1 + $0xa0] sm:$0xff]  ;;  %v702_v18 = vld [vmem:[%s932_s1 + $0x98] sm:$0xff]  ;;  %v701_v22 = vld [vmem:[%s932_s1 + $0x90] sm:$0xff] }
   0x8   :  { %415 = vmatpush.bf16.msra.mxu2 %v705_v6  ;;  %v711_v15 = vld [vmem:[%s932_s1 + $0xe0] sm:$0xff]  ;;  %v710_v19 = vld [vmem:[%s932_s1 + $0xd8] sm:$0xff]  ;;  %v709_v23 = vld [vmem:[%s932_s1 + $0xd0] sm:$0xff] }
   0x9   :  { %434 = vmatpush.bf16.msra.mxu3 %v713_v7  ;;  %v684_v24 = vld [vmem:[%s932_s1 + $0x8] sm:$0xff]  ;;  %v683_v28 = vld [vmem:[%s932_s1] sm:$0xff]  ;;  %v675_v33 = vld [vmem:[%s934_s0 + $0x10] sm:$0xf0] }
   0xa   :  { %378 = vmatpush.bf16.msra.mxu0 %v688_v8  ;;  %v692_v25 = vld [vmem:[%s932_s1 + $0x48] sm:$0xff]  ;;  %v691_v29 = vld [vmem:[%s932_s1 + $0x40] sm:$0xff]  ;;  %v491_v35 = vld [vmem:[%s934_s0 + $0x14] sm:$0xf0] }
   0xb   :  { %397 = vmatpush.bf16.msra.mxu1 %v696_v9  ;;  %v700_v26 = vld [vmem:[%s932_s1 + $0x88] sm:$0xff]  ;;  %v699_v30 = vld [vmem:[%s932_s1 + $0x80] sm:$0xff]  ;;  %v676_v37 = vld [vmem:[%s934_s0 + $0x18] sm:$0xf0] }
   0xc   :  { %416 = vmatpush.bf16.msra.mxu2 %v704_v10  ;;  %v708_v27 = vld [vmem:[%s932_s1 + $0xc8] sm:$0xff]  ;;  %v707_v31 = vld [vmem:[%s932_s1 + $0xc0] sm:$0xff]  ;;  %v718_v40 = vld [vmem:[%s932_s1 + $0x118] sm:$0xff] }
   0xd   :  { %435 = vmatpush.bf16.msra.mxu3 %v712_v11  ;;  %v489_v32 = vld [vmem:[%s934_s0] sm:$0xf]  ;;  %v673_v34 = vld [vmem:[%s934_s0 + $0x4] sm:$0xf]  ;;  %v497_v36 = vld [vmem:[%s934_s0 + $0x8] sm:$0xf] }
   0xe   :  { %379 = vmatpush.bf16.msra.mxu0 %v687_v12  ;;  %v674_v38 = vld [vmem:[%s934_s0 + $0xc] sm:$0xf]  ;;  %v499_v39 = vld [vmem:[%s934_s0 + $0x1c] sm:$0xf0]  ;;  %v490_v41 = vor.u32 %v675_v33, %v489_v32  ;;  %v494_v42 = vor.u32 %v673_v34, %v491_v35  ;;  %v498_v43 = vor.u32 %v676_v37, %v497_v36  ;;  %v717_v45 = vld [vmem:[%s932_s1 + $0x110] sm:$0xff] }
   0xf   :  { %398 = vmatpush.bf16.msra.mxu1 %v695_v13  ;;  %v502_v44 = vor.u32 %v674_v38, %v499_v39  ;;  %v716_v46 = vld [vmem:[%s932_s1 + $0x108] sm:$0xff]  ;;  %v715_v47 = vld [vmem:[%s932_s1 + $0x100] sm:$0xff]  ;;  %v680_v49 = vld [vmem:[%s934_s0 + $0x38] sm:$0xf0] }
  0x10   :  { %417 = vmatpush.bf16.msra.mxu2 %v703_v14  ;;  %v509_v48 = vld [vmem:[%s934_s0 + $0x28] sm:$0xf]  ;;  %v678_v50 = vld [vmem:[%s934_s0 + $0x2c] sm:$0xf]  ;;  %v511_v51 = vld [vmem:[%s934_s0 + $0x3c] sm:$0xf0] }
  0x11   :  { %436 = vmatpush.bf16.msra.mxu3 %v711_v15  ;;  %v517_v52 = vld [vmem:[%s934_s0 + $0x30] sm:$0xf]  ;;  %v681_v53 = vld [vmem:[%s934_s0 + $0x40] sm:$0xf0]  ;;  %v679_v54 = vld [vmem:[%s934_s0 + $0x34] sm:$0xf]  ;;  %v510_v56 = vor.u32 %v680_v49, %v509_v48  ;;  %v514_v57 = vor.u32 %v678_v50, %v511_v51 }
  0x12   :  { %380 = vmatpush.bf16.msra.mxu0 %v686_v16  ;;  %v519_v55 = vld [vmem:[%s934_s0 + $0x44] sm:$0xf0]  ;;  %v518_v58 = vor.u32 %v681_v53, %v517_v52  ;;  %v505_v60 = vld [vmem:[%s934_s0 + $0x10] sm:$0xf]  ;;  %v677_v61 = vld [vmem:[%s934_s0 + $0x20] sm:$0xf0] }
  0x13   :  { %399 = vmatpush.bf16.msra.mxu1 %v694_v17  ;;  %v522_v59 = vor.u32 %v679_v54, %v519_v55  ;;  %v525_v62 = vld [vmem:[%s934_s0 + $0x38] sm:$0xf]  ;;  %v682_v63 = vld [vmem:[%s934_s0 + $0x48] sm:$0xf0]  ;;  %v506_v0 = vor.u32 %v677_v61, %v505_v60  ;;  %v734_v12 = vld [vmem:[%s933_s2] ss:$0 sm:$0xff] }
  0x14   :  { %418 = vmatpush.bf16.msra.mxu2 %v702_v18  ;;  %v526_v1 = vor.u32 %v682_v63, %v525_v62 }
  0x15   :  { %437 = vmatpush.bf16.msra.mxu3 %v710_v19 }
  0x16   :  { %381 = vmatpush.bf16.msra.mxu0 %v685_v20 }
  0x17   :  { %400 = vmatpush.bf16.msra.mxu1 %v693_v21 }
  0x18   :  { %419 = vmatpush.bf16.msra.mxu2 %v701_v22 }
  0x19   :  { %438 = vmatpush.bf16.msra.mxu3 %v709_v23 }
  0x1a   :  { %382 = vmatpush.bf16.msra.mxu0 %v684_v24 }
  0x1b   :  { %401 = vmatpush.bf16.msra.mxu1 %v692_v25 }
  0x1c   :  { %420 = vmatpush.bf16.msra.mxu2 %v700_v26 }
  0x1d   :  { %439 = vmatpush.bf16.msra.mxu3 %v708_v27 }
  0x1e   :  { %383 = vmatpush.bf16.msra.mxu0 %v683_v28 }
  0x1f   :  { %402 = vmatpush.bf16.msra.mxu1 %v691_v29 }
  0x20   :  { %421 = vmatpush.bf16.msra.mxu2 %v699_v30 }
  0x21   :  { %440 = vmatpush.bf16.msra.mxu3 %v707_v31  ;;  %384 = vmatmul.bf16.vlgmr.msra.gmra.mxu0 %v490_v41 }
  0x22   :  { %456 = vmatpush.bf16.msrb.mxu0 %v718_v40  ;;  %403 = vmatmul.bf16.vlgmr.msra.gmra.mxu1 %v494_v42 }
  0x23   :  { %730 = vmatpush.bf16.msrb.mxu1 %v718_v40  ;;  %422 = vmatmul.bf16.vlgmr.msra.gmra.mxu2 %v498_v43 }
  0x24   :  { %441 = vmatmul.bf16.vlgmr.msra.gmra.mxu3 %v502_v44 }
  0x26   :  { %457 = vmatpush.bf16.msrb.mxu0 %v717_v45 }
  0x27   :  { %731 = vmatpush.bf16.msrb.mxu1 %v717_v45 }
  0x2a   :  { %458 = vmatpush.bf16.msrb.mxu0 %v716_v46 }
  0x2b   :  { %732 = vmatpush.bf16.msrb.mxu1 %v716_v46 }
  0x2e   :  { %459 = vmatpush.bf16.msrb.mxu0 %v715_v47 }
  0x2f   :  { %733 = vmatpush.bf16.msrb.mxu1 %v715_v47 }
  0x31   :  { %389 = vmatmul.bf16.gmra.mxu0 %v510_v56 }
  0x32   :  { %408 = vmatmul.bf16.gmra.mxu1 %v514_v57 }
  0x33   :  { %427 = vmatmul.bf16.gmra.mxu2 %v518_v58 }
  0x34   :  { %446 = vmatmul.bf16.gmra.mxu3 %v522_v59 }
  0x41   :  { %671 = vmatmul.msk.bf16.vlgmr.msrb.gmra.mxu0 %vm369_vm0, %v506_v0 }
  0x42   :  { %672 = vmatmul.msk.bf16.vlgmr.msrb.gmra.mxu1 %vm369_vm0, %v526_v1 }
  0x9e   :  { %v385_v2 = vpop.f32.mrf.mxu0 }
  0x9f   :  { %v404_v3 = vpop.f32.mrf.mxu1  ;;  %v386_v16 = vadd.f32 %v734_v12, %v385_v2 }
  0xa1   :  { %v405_v21 = vadd.f32 %v404_v3, %v386_v16 }
  0xa6   :  { %v423_v4 = vpop.f32.mrf.mxu2  ;;  %v387_v6 = vpop.f32.mrf.mxu0 }
  0xa7   :  { %v442_v5 = vpop.f32.mrf.mxu3  ;;  %v406_v7 = vpop.f32.mrf.mxu1  ;;  %v388_v19 = vadd.f32 %v734_v12, %v387_v6  ;;  %v424_v26 = vadd.f32 %v423_v4, %v405_v21 }
  0xa9   :  { %v407_v27 = vadd.f32 %v406_v7, %v388_v19  ;;  %v443_v32 = vadd.f32 %v442_v5, %v424_v26 }
  0xae   :  { %v425_v8 = vpop.f32.mrf.mxu2  ;;  %v390_v9 = vpop.f32.mrf.mxu0 }
  0xaf   :  { %v409_v10 = vpop.f32.mrf.mxu1  ;;  %v444_v11 = vpop.f32.mrf.mxu3  ;;  %v391_v17 = vadd.f32 %v734_v12, %v390_v9  ;;  %v426_v30 = vadd.f32 %v425_v8, %v407_v27 }
  0xb1   :  { %v410_v22 = vadd.f32 %v409_v10, %v391_v17  ;;  %v445_v35 = vadd.f32 %v444_v11, %v426_v30 }
  0xb6   :  { %v428_v13 = vpop.f32.mrf.mxu2  ;;  %v392_v14 = vpop.f32.mrf.mxu0 }
  0xb7   :  { %v411_v15 = vpop.f32.mrf.mxu1  ;;  %v447_v18 = vpop.f32.mrf.mxu3  ;;  %v393_v20 = vadd.f32 %v734_v12, %v392_v14  ;;  %v429_v28 = vadd.f32 %v428_v13, %v410_v22 }
  0xb9   :  { %v412_v29 = vadd.f32 %v411_v15, %v393_v20  ;;  %v448_v33 = vadd.f32 %v447_v18, %v429_v28 }
  0xbe   :  { %v430_v23 = vpop.f32.mrf.mxu2  ;;  %v461_v24 = vpop.f32.mrf.mxu0 }
  0xbf   :  { %v466_v25 = vpop.f32.mrf.mxu1  ;;  %v431_v31 = vadd.f32 %v430_v23, %v412_v29  ;;  %v449_v34 = vpop.f32.mrf.mxu3  ;;  %v462_v37 = vadd.f32 %v461_v24, %v443_v32 }
  0xc0   :  { %v467_v38 = vadd.f32 %v466_v25, %v448_v33 }
  0xc1   :  { %v450_v36 = vadd.f32 %v449_v34, %v431_v31  ;;  %v471_v43 = vmax.f32 %v462_v37, 0.0 }
  0xc2   :  { %v473_v44 = vmax.f32 %v467_v38, 0.0 }
  0xc6   :  { %v463_v39 = vpop.f32.mrf.mxu0 }
  0xc7   :  { %v468_v40 = vpop.f32.mrf.mxu1  ;;  %v464_v41 = vadd.f32 %v463_v39, %v445_v35 }
  0xc8   :  { %v469_v42 = vadd.f32 %v468_v40, %v450_v36 }
  0xc9   :  { %v472_v45 = vmax.f32 %v464_v41, 0.0 }
  0xca   :  { %v474_v46 = vmax.f32 %v469_v42, 0.0 }
  0xcb   :  { %v722_v47 = vpack.c.bf16 %v472_v45, %v471_v43 }
  0xcc   :  { %v727_v48 = vpack.c.bf16 %v474_v46, %v473_v44 }
  0xcd   :  { %723 = vst [vmem:[%s935_s3] sm:$0xff] %v722_v47  }
  0xce   :  { %729 = vst [vmem:[%s935_s3 + $0x8] sm:$0xff] %v727_v48  }

// kernel: one_head_strong_forward.11
= control target key start
LH: loop header
LB: loop body
LE: loop exit
PB: predicated region body
PF: predicated region fallthrough
CT: control target
= control target key end

     0   :  { %s2824_s1 = inlined_call_operand.vmem [shape: bf16[1152,256], index: 1, kind: input, shape index: {}]   ;;  %s2825_s0 = inlined_call_operand.vmem [shape: bf16[8,1152], index: 0, kind: input, shape index: {}]   ;;  %s2826_s2 = inlined_call_operand.vmem [shape: f32[1,256], index: 2, kind: input, shape index: {}]   ;;  %s2827_s3 = inlined_call_operand.vmem [shape: bf16[8,256], index: 3, kind: output, shape index: {}]  }
   0x1   :  { %v1221_v0 = vld [vmem:[%s2824_s1 + $0x70] sm:$0xf]  ;;  %v1754_v1 = vld [vmem:[%s2824_s1 + $0x74] sm:$0xf0]  ;;  %v1213_v9 = vld [vmem:[%s2824_s1 + $0x60] sm:$0xf] }
   0x2   :  { %v1285_v2 = vld [vmem:[%s2824_s1 + $0xf0] sm:$0xf]  ;;  %v1222_v3 = vor.u32 %v1754_v1, %v1221_v0  ;;  %v1770_v4 = vld [vmem:[%s2824_s1 + $0xf4] sm:$0xf0]  ;;  %v1752_v10 = vld [vmem:[%s2824_s1 + $0x64] sm:$0xf0] }
   0x3   :  { %v1349_v5 = vld [vmem:[%s2824_s1 + $0x170] sm:$0xf]  ;;  %v1786_v6 = vld [vmem:[%s2824_s1 + $0x174] sm:$0xf0]  ;;  %v1286_v7 = vor.u32 %v1770_v4, %v1285_v2  ;;  %v1277_v11 = vld [vmem:[%s2824_s1 + $0xe0] sm:$0xf]  ;;  %v1214_v12 = vor.u32 %v1752_v10, %v1213_v9 }
   0x4   :  { %v1350_v8 = vor.u32 %v1786_v6, %v1349_v5  ;;  %921 = vmatpush.bf16.msra.mxu0 %v1222_v3  ;;  %v1768_v13 = vld [vmem:[%s2824_s1 + $0xe4] sm:$0xf0]  ;;  %v1413_v14 = vld [vmem:[%s2824_s1 + $0x1f0] sm:$0xf]  ;;  %v1802_v15 = vld [vmem:[%s2824_s1 + $0x1f4] sm:$0xf0] }
   0x5   :  { %934 = vmatpush.bf16.msra.mxu1 %v1286_v7  ;;  %v1278_v16 = vor.u32 %v1768_v13, %v1277_v11  ;;  %v1414_v17 = vor.u32 %v1802_v15, %v1413_v14  ;;  %v1341_v18 = vld [vmem:[%s2824_s1 + $0x160] sm:$0xf]  ;;  %v1784_v19 = vld [vmem:[%s2824_s1 + $0x164] sm:$0xf0]  ;;  %v1205_v20 = vld [vmem:[%s2824_s1 + $0x50] sm:$0xf] }
   0x6   :  { %947 = vmatpush.bf16.msra.mxu2 %v1350_v8  ;;  %v1342_v21 = vor.u32 %v1784_v19, %v1341_v18  ;;  %v1750_v22 = vld [vmem:[%s2824_s1 + $0x54] sm:$0xf0]  ;;  %v1269_v23 = vld [vmem:[%s2824_s1 + $0xd0] sm:$0xf]  ;;  %v1405_v25 = vld [vmem:[%s2824_s1 + $0x1e0] sm:$0xf] }
   0x7   :  { %v1766_v24 = vld [vmem:[%s2824_s1 + $0xd4] sm:$0xf0]  ;;  %960 = vmatpush.bf16.msra.mxu3 %v1414_v17  ;;  %v1800_v26 = vld [vmem:[%s2824_s1 + $0x1e4] sm:$0xf0]  ;;  %v1333_v27 = vld [vmem:[%s2824_s1 + $0x150] sm:$0xf]  ;;  %v1206_v28 = vor.u32 %v1750_v22, %v1205_v20 }
   0x8   :  { %922 = vmatpush.bf16.msra.mxu0 %v1214_v12  ;;  %v1406_v29 = vor.u32 %v1800_v26, %v1405_v25  ;;  %v1782_v30 = vld [vmem:[%s2824_s1 + $0x154] sm:$0xf0]  ;;  %v1197_v31 = vld [vmem:[%s2824_s1 + $0x40] sm:$0xf]  ;;  %v1748_v32 = vld [vmem:[%s2824_s1 + $0x44] sm:$0xf0]  ;;  %v1270_v33 = vor.u32 %v1766_v24, %v1269_v23 }
   0x9   :  { %935 = vmatpush.bf16.msra.mxu1 %v1278_v16  ;;  %v1334_v34 = vor.u32 %v1782_v30, %v1333_v27  ;;  %v1261_v35 = vld [vmem:[%s2824_s1 + $0xc0] sm:$0xf]  ;;  %v1764_v36 = vld [vmem:[%s2824_s1 + $0xc4] sm:$0xf0]  ;;  %v1397_v37 = vld [vmem:[%s2824_s1 + $0x1d0] sm:$0xf]  ;;  %v1198_v42 = vor.u32 %v1748_v32, %v1197_v31 }
   0xa   :  { %948 = vmatpush.bf16.msra.mxu2 %v1342_v21  ;;  %v1798_v38 = vld [vmem:[%s2824_s1 + $0x1d4] sm:$0xf0]  ;;  %v1325_v39 = vld [vmem:[%s2824_s1 + $0x140] sm:$0xf]  ;;  %v1780_v40 = vld [vmem:[%s2824_s1 + $0x144] sm:$0xf0]  ;;  %v1262_v45 = vor.u32 %v1764_v36, %v1261_v35 }
   0xb   :  { %961 = vmatpush.bf16.msra.mxu3 %v1406_v29  ;;  %v1398_v41 = vor.u32 %v1798_v38, %v1397_v37  ;;  %v1389_v43 = vld [vmem:[%s2824_s1 + $0x1c0] sm:$0xf]  ;;  %v1796_v44 = vld [vmem:[%s2824_s1 + $0x1c4] sm:$0xf0]  ;;  %v1326_v46 = vor.u32 %v1780_v40, %v1325_v39  ;;  %v1189_v47 = vld [vmem:[%s2824_s1 + $0x30] sm:$0xf] }
   0xc   :  { %923 = vmatpush.bf16.msra.mxu0 %v1206_v28  ;;  %v1746_v48 = vld [vmem:[%s2824_s1 + $0x34] sm:$0xf0]  ;;  %v1253_v49 = vld [vmem:[%s2824_s1 + $0xb0] sm:$0xf]  ;;  %v1390_v53 = vor.u32 %v1796_v44, %v1389_v43  ;;  %v1181_v59 = vld [vmem:[%s2824_s1 + $0x20] sm:$0xf] }
   0xd   :  { %936 = vmatpush.bf16.msra.mxu1 %v1270_v33  ;;  %v1762_v50 = vld [vmem:[%s2824_s1 + $0xb4] sm:$0xf0]  ;;  %v1317_v51 = vld [vmem:[%s2824_s1 + $0x130] sm:$0xf]  ;;  %v1190_v54 = vor.u32 %v1746_v48, %v1189_v47  ;;  %v1744_v60 = vld [vmem:[%s2824_s1 + $0x24] sm:$0xf0] }
   0xe   :  { %949 = vmatpush.bf16.msra.mxu2 %v1334_v34  ;;  %v1778_v52 = vld [vmem:[%s2824_s1 + $0x134] sm:$0xf0]  ;;  %v1381_v55 = vld [vmem:[%s2824_s1 + $0x1b0] sm:$0xf]  ;;  %v1254_v57 = vor.u32 %v1762_v50, %v1253_v49  ;;  %v1245_v61 = vld [vmem:[%s2824_s1 + $0xa0] sm:$0xf]  ;;  %v1182_v2 = vor.u32 %v1744_v60, %v1181_v59 }
   0xf   :  { %962 = vmatpush.bf16.msra.mxu3 %v1398_v41  ;;  %v1794_v56 = vld [vmem:[%s2824_s1 + $0x1b4] sm:$0xf0]  ;;  %v1318_v58 = vor.u32 %v1778_v52, %v1317_v51  ;;  %v1760_v62 = vld [vmem:[%s2824_s1 + $0xa4] sm:$0xf0]  ;;  %v1309_v63 = vld [vmem:[%s2824_s1 + $0x120] sm:$0xf] }
  0x10   :  { %924 = vmatpush.bf16.msra.mxu0 %v1198_v42  ;;  %v1776_v0 = vld [vmem:[%s2824_s1 + $0x124] sm:$0xf0]  ;;  %v1382_v1 = vor.u32 %v1794_v56, %v1381_v55  ;;  %v1373_v3 = vld [vmem:[%s2824_s1 + $0x1a0] sm:$0xf]  ;;  %v1246_v5 = vor.u32 %v1760_v62, %v1245_v61  ;;  %v1173_v7 = vld [vmem:[%s2824_s1 + $0x10] sm:$0xf] }
  0x11   :  { %937 = vmatpush.bf16.msra.mxu1 %v1262_v45  ;;  %v1792_v4 = vld [vmem:[%s2824_s1 + $0x1a4] sm:$0xf0]  ;;  %v1310_v6 = vor.u32 %v1776_v0, %v1309_v63  ;;  %v1742_v8 = vld [vmem:[%s2824_s1 + $0x14] sm:$0xf0]  ;;  %v1237_v9 = vld [vmem:[%s2824_s1 + $0x90] sm:$0xf] }
  0x12   :  { %950 = vmatpush.bf16.msra.mxu2 %v1326_v46  ;;  %v1758_v10 = vld [vmem:[%s2824_s1 + $0x94] sm:$0xf0]  ;;  %v1301_v11 = vld [vmem:[%s2824_s1 + $0x110] sm:$0xf]  ;;  %v1374_v13 = vor.u32 %v1792_v4, %v1373_v3  ;;  %v1165_v14 = vld [vmem:[%s2824_s1] sm:$0xf]  ;;  %v1174_v15 = vor.u32 %v1742_v8, %v1173_v7 }
  0x13   :  { %963 = vmatpush.bf16.msra.mxu3 %v1390_v53  ;;  %v1774_v12 = vld [vmem:[%s2824_s1 + $0x114] sm:$0xf0]  ;;  %v1740_v16 = vld [vmem:[%s2824_s1 + $0x4] sm:$0xf0]  ;;  %v1365_v17 = vld [vmem:[%s2824_s1 + $0x190] sm:$0xf]  ;;  %v1238_v19 = vor.u32 %v1758_v10, %v1237_v9 }
  0x14   :  { %925 = vmatpush.bf16.msra.mxu0 %v1190_v54  ;;  %v1790_v18 = vld [vmem:[%s2824_s1 + $0x194] sm:$0xf0]  ;;  %v1302_v20 = vor.u32 %v1774_v12, %v1301_v11  ;;  %v1229_v21 = vld [vmem:[%s2824_s1 + $0x80] sm:$0xf]  ;;  %v1756_v22 = vld [vmem:[%s2824_s1 + $0x84] sm:$0xf0]  ;;  %v1166_v31 = vor.u32 %v1740_v16, %v1165_v14 }
  0x15   :  { %938 = vmatpush.bf16.msra.mxu1 %v1254_v57  ;;  %v1477_v23 = vld [vmem:[%s2824_s1 + $0x270] sm:$0xf]  ;;  %v1818_v24 = vld [vmem:[%s2824_s1 + $0x274] sm:$0xf0]  ;;  %v1366_v27 = vor.u32 %v1790_v18, %v1365_v17  ;;  %v1293_v28 = vld [vmem:[%s2824_s1 + $0x100] sm:$0xf]  ;;  %v1230_v35 = vor.u32 %v1756_v22, %v1229_v21 }
  0x16   :  { %951 = vmatpush.bf16.msra.mxu2 %v1318_v58  ;;  %v1541_v25 = vld [vmem:[%s2824_s1 + $0x2f0] sm:$0xf]  ;;  %v1834_v26 = vld [vmem:[%s2824_s1 + $0x2f4] sm:$0xf0]  ;;  %v1772_v29 = vld [vmem:[%s2824_s1 + $0x104] sm:$0xf0]  ;;  %v1478_v36 = vor.u32 %v1818_v24, %v1477_v23 }
  0x17   :  { %964 = vmatpush.bf16.msra.mxu3 %v1382_v1  ;;  %v1605_v30 = vld [vmem:[%s2824_s1 + $0x370] sm:$0xf]  ;;  %v1850_v32 = vld [vmem:[%s2824_s1 + $0x374] sm:$0xf0]  ;;  %v1357_v33 = vld [vmem:[%s2824_s1 + $0x180] sm:$0xf]  ;;  %v1542_v39 = vor.u32 %v1834_v26, %v1541_v25  ;;  %v1294_v40 = vor.u32 %v1772_v29, %v1293_v28 }
  0x18   :  { %926 = vmatpush.bf16.msra.mxu0 %v1182_v2  ;;  %v1788_v34 = vld [vmem:[%s2824_s1 + $0x184] sm:$0xf0]  ;;  %v1669_v37 = vld [vmem:[%s2824_s1 + $0x3f0] sm:$0xf]  ;;  %v1866_v38 = vld [vmem:[%s2824_s1 + $0x3f4] sm:$0xf0]  ;;  %v1606_v43 = vor.u32 %v1850_v32, %v1605_v30 }
  0x19   :  { %939 = vmatpush.bf16.msra.mxu1 %v1246_v5  ;;  %v1469_v41 = vld [vmem:[%s2824_s1 + $0x260] sm:$0xf]  ;;  %v1816_v42 = vld [vmem:[%s2824_s1 + $0x264] sm:$0xf0]  ;;  %v1358_v44 = vor.u32 %v1788_v34, %v1357_v33  ;;  %v1670_v47 = vor.u32 %v1866_v38, %v1669_v37  ;;  %v1461_v54 = vld [vmem:[%s2824_s1 + $0x250] sm:$0xf] }
  0x1a   :  { %952 = vmatpush.bf16.msra.mxu2 %v1310_v6  ;;  %v1533_v45 = vld [vmem:[%s2824_s1 + $0x2e0] sm:$0xf]  ;;  %v1832_v46 = vld [vmem:[%s2824_s1 + $0x2e4] sm:$0xf0]  ;;  %v1470_v50 = vor.u32 %v1816_v42, %v1469_v41  ;;  %v1814_v55 = vld [vmem:[%s2824_s1 + $0x254] sm:$0xf0] }
  0x1b   :  { %965 = vmatpush.bf16.msra.mxu3 %v1374_v13  ;;  %v1597_v48 = vld [vmem:[%s2824_s1 + $0x360] sm:$0xf]  ;;  %v1848_v49 = vld [vmem:[%s2824_s1 + $0x364] sm:$0xf0]  ;;  %v1534_v53 = vor.u32 %v1832_v46, %v1533_v45  ;;  %v1525_v58 = vld [vmem:[%s2824_s1 + $0x2d0] sm:$0xf]  ;;  %v1462_v4 = vor.u32 %v1814_v55, %v1461_v54 }
  0x1c   :  { %927 = vmatpush.bf16.msra.mxu0 %v1174_v15  ;;  %v1661_v51 = vld [vmem:[%s2824_s1 + $0x3e0] sm:$0xf]  ;;  %v1864_v52 = vld [vmem:[%s2824_s1 + $0x3e4] sm:$0xf0]  ;;  %v1598_v57 = vor.u32 %v1848_v49, %v1597_v48  ;;  %v1830_v59 = vld [vmem:[%s2824_s1 + $0x2d4] sm:$0xf0] }
  0x1d   :  { %940 = vmatpush.bf16.msra.mxu1 %v1238_v19  ;;  %v15_v56 = vld [vmem:[%s2825_s0 + $0x8] sm:$0xff]  ;;  %v14_v61 = vld [vmem:[%s2825_s0] sm:$0xff]  ;;  %v1662_v63 = vor.u32 %v1864_v52, %v1661_v51  ;;  %v1589_v0 = vld [vmem:[%s2824_s1 + $0x350] sm:$0xf]  ;;  %v1526_v9 = vor.u32 %v1830_v59, %v1525_v58 }
  0x1e   :  { %953 = vmatpush.bf16.msra.mxu2 %v1302_v20  ;;  %v176_v60 = vunpack.c.l.b16 %v15_v56  ;;  %v177_v62 = vunpack.c.h.b16 %v15_v56  ;;  %v1846_v1 = vld [vmem:[%s2824_s1 + $0x354] sm:$0xf0]  ;;  %v174_v2 = vunpack.c.l.b16 %v14_v61  ;;  %v175_v3 = vunpack.c.h.b16 %v14_v61  ;;  %v1653_v5 = vld [vmem:[%s2824_s1 + $0x3d0] sm:$0xf]  ;;  %v1453_v10 = vld [vmem:[%s2824_s1 + $0x240] sm:$0xf] }
  0x1f   :  { %966 = vmatpush.bf16.msra.mxu3 %v1366_v27  ;;  %v1862_v6 = vld [vmem:[%s2824_s1 + $0x3d4] sm:$0xf0]  ;;  %v1812_v11 = vld [vmem:[%s2824_s1 + $0x244] sm:$0xf0]  ;;  %v1590_v14 = vor.u32 %v1846_v1, %v1589_v0  ;;  %v1517_v15 = vld [vmem:[%s2824_s1 + $0x2c0] sm:$0xf] }
  0x20   :  { %928 = vmatpush.bf16.msra.mxu0 %v1166_v31  ;;  %v2173_v7 = vpack.c.b16 %v176_v60, %v176_v60  ;;  %v2175_v8 = vpack.c.b16 %v177_v62, %v177_v62  ;;  %v2183_v12 = vpack.c.b16 %v174_v2, %v174_v2  ;;  %v2185_v13 = vpack.c.b16 %v175_v3, %v175_v3  ;;  %v1828_v16 = vld [vmem:[%s2824_s1 + $0x2c4] sm:$0xf0]  ;;  %v1581_v18 = vld [vmem:[%s2824_s1 + $0x340] sm:$0xf]  ;;  %v1445_v24 = vld [vmem:[%s2824_s1 + $0x230] sm:$0xf] }
  0x21   :  { %941 = vmatpush.bf16.msra.mxu1 %v1230_v35  ;;  %v1654_v17 = vor.u32 %v1862_v6, %v1653_v5  ;;  %v1844_v19 = vld [vmem:[%s2824_s1 + $0x344] sm:$0xf0]  ;;  %v1454_v20 = vor.u32 %v1812_v11, %v1453_v10  ;;  %v1645_v21 = vld [vmem:[%s2824_s1 + $0x3c0] sm:$0xf]  ;;  %v1518_v23 = vor.u32 %v1828_v16, %v1517_v15  ;;  %v1810_v25 = vld [vmem:[%s2824_s1 + $0x234] sm:$0xf0] }
  0x22   :  { %954 = vmatpush.bf16.msra.mxu2 %v1294_v40  ;;  %v1860_v22 = vld [vmem:[%s2824_s1 + $0x3c4] sm:$0xf0]  ;;  %v1582_v26 = vor.u32 %v1844_v19, %v1581_v18  ;;  %v1509_v27 = vld [vmem:[%s2824_s1 + $0x2b0] sm:$0xf]  ;;  %v1826_v28 = vld [vmem:[%s2824_s1 + $0x2b4] sm:$0xf0]  ;;  %v1446_v32 = vor.u32 %v1810_v25, %v1445_v24 }
  0x23   :  { %967 = vmatpush.bf16.msra.mxu3 %v1358_v44  ;;  %929 = vmatmul.bf16.vlgmr.msra.gmra.mxu0 %v2183_v12  ;;  %v1646_v29 = vor.u32 %v1860_v22, %v1645_v21  ;;  %v1573_v30 = vld [vmem:[%s2824_s1 + $0x330] sm:$0xf]  ;;  %v1842_v31 = vld [vmem:[%s2824_s1 + $0x334] sm:$0xf0]  ;;  %v1510_v35 = vor.u32 %v1826_v28, %v1509_v27  ;;  %v1808_v37 = vld [vmem:[%s2824_s1 + $0x224] sm:$0xf0] }
  0x24   :  { %973 = vmatpush.bf16.msrb.mxu0 %v1478_v36  ;;  %942 = vmatmul.bf16.vlgmr.msra.gmra.mxu1 %v2185_v13  ;;  %v1637_v33 = vld [vmem:[%s2824_s1 + $0x3b0] sm:$0xf]  ;;  %v1858_v34 = vld [vmem:[%s2824_s1 + $0x3b4] sm:$0xf0]  ;;  %v1437_v36 = vld [vmem:[%s2824_s1 + $0x220] sm:$0xf]  ;;  %v1574_v38 = vor.u32 %v1842_v31, %v1573_v30 }
  0x25   :  { %986 = vmatpush.bf16.msrb.mxu1 %v1542_v39  ;;  %955 = vmatmul.bf16.vlgmr.msra.gmra.mxu2 %v2173_v7  ;;  %v1501_v39 = vld [vmem:[%s2824_s1 + $0x2a0] sm:$0xf]  ;;  %v1824_v40 = vld [vmem:[%s2824_s1 + $0x2a4] sm:$0xf0]  ;;  %v1638_v41 = vor.u32 %v1858_v34, %v1637_v33  ;;  %v1438_v44 = vor.u32 %v1808_v37, %v1437_v36  ;;  %v1429_v48 = vld [vmem:[%s2824_s1 + $0x210] sm:$0xf] }
  0x26   :  { %999 = vmatpush.bf16.msrb.mxu2 %v1606_v43  ;;  %968 = vmatmul.bf16.vlgmr.msra.gmra.mxu3 %v2175_v8  ;;  %v1565_v42 = vld [vmem:[%s2824_s1 + $0x320] sm:$0xf]  ;;  %v1840_v43 = vld [vmem:[%s2824_s1 + $0x324] sm:$0xf0]  ;;  %v1806_v49 = vld [vmem:[%s2824_s1 + $0x214] sm:$0xf0] }
  0x27   :  { %1012 = vmatpush.bf16.msrb.mxu3 %v1670_v47  ;;  %v1629_v45 = vld [vmem:[%s2824_s1 + $0x3a0] sm:$0xf]  ;;  %v1856_v46 = vld [vmem:[%s2824_s1 + $0x3a4] sm:$0xf0]  ;;  %v1502_v47 = vor.u32 %v1824_v40, %v1501_v39  ;;  %v1493_v51 = vld [vmem:[%s2824_s1 + $0x290] sm:$0xf]  ;;  %v1430_v58 = vor.u32 %v1806_v49, %v1429_v48 }
  0x28   :  { %974 = vmatpush.bf16.msrb.mxu0 %v1470_v50  ;;  %v1566_v50 = vor.u32 %v1840_v43, %v1565_v42  ;;  %v1822_v52 = vld [vmem:[%s2824_s1 + $0x294] sm:$0xf0]  ;;  %v1630_v54 = vor.u32 %v1856_v46, %v1629_v45  ;;  %v1421_v56 = vld [vmem:[%s2824_s1 + $0x200] sm:$0xf]  ;;  %v1820_v60 = vld [vmem:[%s2824_s1 + $0x284] sm:$0xf0] }
  0x29   :  { %987 = vmatpush.bf16.msrb.mxu1 %v1534_v53  ;;  %v1557_v53 = vld [vmem:[%s2824_s1 + $0x310] sm:$0xf]  ;;  %v1838_v55 = vld [vmem:[%s2824_s1 + $0x314] sm:$0xf0]  ;;  %v1485_v59 = vld [vmem:[%s2824_s1 + $0x280] sm:$0xf] }
  0x2a   :  { %1000 = vmatpush.bf16.msrb.mxu2 %v1598_v57  ;;  %v1804_v57 = vld [vmem:[%s2824_s1 + $0x204] sm:$0xf0]  ;;  %v1621_v61 = vld [vmem:[%s2824_s1 + $0x390] sm:$0xf]  ;;  %v1854_v62 = vld [vmem:[%s2824_s1 + $0x394] sm:$0xf0]  ;;  %v1558_v3 = vor.u32 %v1838_v55, %v1557_v53 }
  0x2b   :  { %1013 = vmatpush.bf16.msrb.mxu3 %v1662_v63  ;;  %v1494_v63 = vor.u32 %v1822_v52, %v1493_v51  ;;  %v1733_v0 = vld [vmem:[%s2824_s1 + $0x470] sm:$0xf]  ;;  %v1882_v1 = vld [vmem:[%s2824_s1 + $0x474] sm:$0xf0]  ;;  %v1223_v5 = vld [vmem:[%s2824_s1 + $0x78] sm:$0xf0]  ;;  %v1422_v15 = vor.u32 %v1804_v57, %v1421_v56 }
  0x2c   :  { %975 = vmatpush.bf16.msrb.mxu0 %v1462_v4  ;;  %v16_v2 = vld [vmem:[%s2825_s0 + $0x10] sm:$0xff]  ;;  %v17_v6 = vld [vmem:[%s2825_s0 + $0x18] sm:$0xff]  ;;  %v1549_v10 = vld [vmem:[%s2824_s1 + $0x300] sm:$0xf]  ;;  %v1734_v21 = vor.u32 %v1882_v1, %v1733_v0 }
  0x2d   :  { %988 = vmatpush.bf16.msrb.mxu1 %v1526_v9  ;;  %v1753_v4 = vld [vmem:[%s2824_s1 + $0x74] sm:$0xf]  ;;  %v1622_v9 = vor.u32 %v1854_v62, %v1621_v61  ;;  %v1836_v11 = vld [vmem:[%s2824_s1 + $0x304] sm:$0xf0]  ;;  %v1287_v16 = vld [vmem:[%s2824_s1 + $0xf8] sm:$0xf0]  ;;  %v178_v19 = vunpack.c.l.b16 %v16_v2  ;;  %v180_v24 = vunpack.c.l.b16 %v17_v6  ;;  %v179_v34 = vunpack.c.h.b16 %v16_v2 }
  0x2e   :  { %1001 = vmatpush.bf16.msrb.mxu2 %v1590_v14  ;;  %v1769_v14 = vld [vmem:[%s2824_s1 + $0xf4] sm:$0xf]  ;;  %v1852_v18 = vld [vmem:[%s2824_s1 + $0x384] sm:$0xf0]  ;;  %v1226_v25 = vor.u32 %v1753_v4, %v1223_v5  ;;  %v1725_v27 = vld [vmem:[%s2824_s1 + $0x460] sm:$0xf] }
  0x2f   :  { %1014 = vmatpush.bf16.msrb.mxu3 %v1654_v17  ;;  %v1613_v17 = vld [vmem:[%s2824_s1 + $0x380] sm:$0xf]  ;;  %v1785_v22 = vld [vmem:[%s2824_s1 + $0x174] sm:$0xf]  ;;  %v1880_v28 = vld [vmem:[%s2824_s1 + $0x464] sm:$0xf0]  ;;  %v1290_v30 = vor.u32 %v1769_v14, %v1287_v16  ;;  %v2355_v40 = vpack.c.b16 %v180_v24, %v180_v24 }
  0x30   :  { %976 = vmatpush.bf16.msrb.mxu0 %v1454_v20  ;;  %v1486_v20 = vor.u32 %v1820_v60, %v1485_v59  ;;  %v1614_v31 = vor.u32 %v1852_v18, %v1613_v17  ;;  %v1215_v33 = vld [vmem:[%s2824_s1 + $0x68] sm:$0xf0]  ;;  %v1767_v36 = vld [vmem:[%s2824_s1 + $0xe4] sm:$0xf]  ;;  %v1726_v39 = vor.u32 %v1880_v28, %v1725_v27  ;;  %v1717_v45 = vld [vmem:[%s2824_s1 + $0x450] sm:$0xf] }
  0x31   :  { %989 = vmatpush.bf16.msrb.mxu1 %v1518_v23  ;;  %v1351_v23 = vld [vmem:[%s2824_s1 + $0x178] sm:$0xf0]  ;;  %v1279_v37 = vld [vmem:[%s2824_s1 + $0xe8] sm:$0xf0]  ;;  %v1878_v46 = vld [vmem:[%s2824_s1 + $0x454] sm:$0xf0] }
  0x32   :  { %1002 = vmatpush.bf16.msrb.mxu2 %v1582_v26  ;;  %v1550_v26 = vor.u32 %v1836_v11, %v1549_v10  ;;  %v1343_v42 = vld [vmem:[%s2824_s1 + $0x168] sm:$0xf0]  ;;  %v1749_v48 = vld [vmem:[%s2824_s1 + $0x54] sm:$0xf]  ;;  %v1207_v49 = vld [vmem:[%s2824_s1 + $0x58] sm:$0xf0] }
  0x33   :  { %1015 = vmatpush.bf16.msrb.mxu3 %v1646_v29  ;;  %v181_v29 = vunpack.c.h.b16 %v17_v6  ;;  %v1765_v52 = vld [vmem:[%s2824_s1 + $0xd4] sm:$0xf]  ;;  %v1271_v53 = vld [vmem:[%s2824_s1 + $0xd8] sm:$0xf0]  ;;  %v1210_v57 = vor.u32 %v1749_v48, %v1207_v49  ;;  %v1876_v59 = vld [vmem:[%s2824_s1 + $0x444] sm:$0xf0] }
  0x34   :  { %977 = vmatpush.bf16.msrb.mxu0 %v1446_v32  ;;  %v1751_v32 = vld [vmem:[%s2824_s1 + $0x64] sm:$0xf]  ;;  %v1781_v55 = vld [vmem:[%s2824_s1 + $0x154] sm:$0xf]  ;;  %v1335_v56 = vld [vmem:[%s2824_s1 + $0x158] sm:$0xf0]  ;;  %v1274_v60 = vor.u32 %v1765_v52, %v1271_v53 }
  0x35   :  { %990 = vmatpush.bf16.msrb.mxu1 %v1510_v35  ;;  %v1354_v35 = vor.u32 %v1785_v22, %v1351_v23  ;;  %v1218_v43 = vor.u32 %v1751_v32, %v1215_v33  ;;  %v1747_v61 = vld [vmem:[%s2824_s1 + $0x44] sm:$0xf]  ;;  %v1199_v62 = vld [vmem:[%s2824_s1 + $0x48] sm:$0xf0]  ;;  %v1701_v6 = vld [vmem:[%s2824_s1 + $0x430] sm:$0xf] }
  0x36   :  { %1003 = vmatpush.bf16.msrb.mxu2 %v1574_v38  ;;  %v2353_v38 = vpack.c.b16 %v178_v19, %v178_v19  ;;  %v1763_v0 = vld [vmem:[%s2824_s1 + $0xc4] sm:$0xf]  ;;  %v1263_v1 = vld [vmem:[%s2824_s1 + $0xc8] sm:$0xf0]  ;;  %v1202_v5 = vor.u32 %v1747_v61, %v1199_v62  ;;  %v1745_v11 = vld [vmem:[%s2824_s1 + $0x34] sm:$0xf] }
  0x37   :  { %1016 = vmatpush.bf16.msrb.mxu3 %v1638_v41  ;;  %v1783_v41 = vld [vmem:[%s2824_s1 + $0x164] sm:$0xf]  ;;  %v1327_v4 = vld [vmem:[%s2824_s1 + $0x148] sm:$0xf0]  ;;  %v1266_v10 = vor.u32 %v1763_v0, %v1263_v1  ;;  %v1191_v14 = vld [vmem:[%s2824_s1 + $0x38] sm:$0xf0] }
  0x38   :  { %978 = vmatpush.bf16.msrb.mxu0 %v1438_v44  ;;  %v2363_v44 = vpack.c.b16 %v181_v29, %v181_v29  ;;  %v1346_v51 = vor.u32 %v1783_v41, %v1343_v42  ;;  %v1761_v16 = vld [vmem:[%s2824_s1 + $0xb4] sm:$0xf]  ;;  %v1255_v17 = vld [vmem:[%s2824_s1 + $0xb8] sm:$0xf0]  ;;  %v1693_v22 = vld [vmem:[%s2824_s1 + $0x420] sm:$0xf] }
  0x39   :  { %991 = vmatpush.bf16.msrb.mxu1 %v1502_v47  ;;  %v1282_v47 = vor.u32 %v1767_v36, %v1279_v37  ;;  %v1777_v19 = vld [vmem:[%s2824_s1 + $0x134] sm:$0xf]  ;;  %v1872_v23 = vld [vmem:[%s2824_s1 + $0x424] sm:$0xf0]  ;;  %v1258_v24 = vor.u32 %v1761_v16, %v1255_v17  ;;  %v1759_v28 = vld [vmem:[%s2824_s1 + $0xa4] sm:$0xf] }
  0x3a   :  { %1004 = vmatpush.bf16.msrb.mxu2 %v1566_v50  ;;  %v2377_v50 = vpack.c.b16 %v179_v34, %v179_v34  ;;  %v1247_v29 = vld [vmem:[%s2824_s1 + $0xa8] sm:$0xf0]  ;;  %v1685_v34 = vld [vmem:[%s2824_s1 + $0x410] sm:$0xf]  ;;  %v1741_v37 = vld [vmem:[%s2824_s1 + $0x14] sm:$0xf] }
  0x3b   :  { %1017 = vmatpush.bf16.msrb.mxu3 %v1630_v54  ;;  %v1718_v54 = vor.u32 %v1878_v46, %v1717_v45  ;;  %v1311_v32 = vld [vmem:[%s2824_s1 + $0x128] sm:$0xf0]  ;;  %v1250_v36 = vor.u32 %v1759_v28, %v1247_v29  ;;  %v1757_v42 = vld [vmem:[%s2824_s1 + $0x94] sm:$0xf]  ;;  %v1677_v45 = vld [vmem:[%s2824_s1 + $0x400] sm:$0xf] }
  0x3c   :  { %979 = vmatpush.bf16.msrb.mxu0 %v1430_v58  ;;  %v1709_v58 = vld [vmem:[%s2824_s1 + $0x440] sm:$0xf]  ;;  %v1303_v48 = vld [vmem:[%s2824_s1 + $0x118] sm:$0xf0]  ;;  %v1868_v52 = vld [vmem:[%s2824_s1 + $0x404] sm:$0xf0] }
  0x3d   :  { %992 = vmatpush.bf16.msrb.mxu1 %v1494_v63  ;;  %v1338_v63 = vor.u32 %v1781_v55, %v1335_v56  ;;  %v1710_v2 = vor.u32 %v1876_v59, %v1709_v58  ;;  %v18_v49 = vld [vmem:[%s2825_s0 + $0x20] sm:$0xf]  ;;  %v1739_v53 = vld [vmem:[%s2824_s1 + $0x4] sm:$0xf]  ;;  %v1801_v56 = vld [vmem:[%s2824_s1 + $0x1f4] sm:$0xf]  ;;  %v1678_v0 = vor.u32 %v1868_v52, %v1677_v45 }
  0x3e   :  { %1005 = vmatpush.bf16.msrb.mxu2 %v1558_v3  ;;  %v1779_v3 = vld [vmem:[%s2824_s1 + $0x144] sm:$0xf]  ;;  %v1817_v58 = vld [vmem:[%s2824_s1 + $0x274] sm:$0xf]  ;;  %v1231_v62 = vld [vmem:[%s2824_s1 + $0x88] sm:$0xf0] }
  0x3f   :  { %1018 = vmatpush.bf16.msrb.mxu3 %v1622_v9  ;;  %v1874_v9 = vld [vmem:[%s2824_s1 + $0x434] sm:$0xf0]  ;;  %v1755_v61 = vld [vmem:[%s2824_s1 + $0x84] sm:$0xf]  ;;  %v1833_v1 = vld [vmem:[%s2824_s1 + $0x2f4] sm:$0xf] }
  0x40   :  { %980 = vmatpush.bf16.msrb.mxu0 %v1422_v15  ;;  %v1330_v15 = vor.u32 %v1779_v3, %v1327_v4  ;;  %v1702_v18 = vor.u32 %v1874_v9, %v1701_v6  ;;  %v1295_v6 = vld [vmem:[%s2824_s1 + $0x108] sm:$0xf0]  ;;  %v1799_v9 = vld [vmem:[%s2824_s1 + $0x1e4] sm:$0xf]  ;;  %v1607_v16 = vld [vmem:[%s2824_s1 + $0x378] sm:$0xf0] }
  0x41   :  { %993 = vmatpush.bf16.msrb.mxu1 %v1486_v20  ;;  %v1319_v20 = vld [vmem:[%s2824_s1 + $0x138] sm:$0xf0]  ;;  %v1847_v29 = vld [vmem:[%s2824_s1 + $0x364] sm:$0xf]  ;;  %v1793_v52 = vld [vmem:[%s2824_s1 + $0x1b4] sm:$0xf] }
  0x42   :  { %1006 = vmatpush.bf16.msrb.mxu2 %v1550_v26  ;;  %v1183_v26 = vld [vmem:[%s2824_s1 + $0x28] sm:$0xf0]  ;;  %v1322_v27 = vor.u32 %v1777_v19, %v1319_v20  ;;  %v1815_v19 = vld [vmem:[%s2824_s1 + $0x264] sm:$0xf]  ;;  %v1399_v28 = vld [vmem:[%s2824_s1 + $0x1d8] sm:$0xf0] }
  0x43   :  { %1019 = vmatpush.bf16.msrb.mxu3 %v1614_v31  ;;  %981 = vmatmul.bf16.vlgmr.msrb.gmra.mxu0 %v2353_v38  ;;  %v1775_v31 = vld [vmem:[%s2824_s1 + $0x124] sm:$0xf]  ;;  %v1471_v20 = vld [vmem:[%s2824_s1 + $0x268] sm:$0xf0] }
  0x44   :  { %1025 = vmatpush.bf16.msra.mxu0 %v1734_v21  ;;  %994 = vmatmul.bf16.vlgmr.msrb.gmra.mxu1 %v2377_v50  ;;  %v1194_v21 = vor.u32 %v1745_v11, %v1191_v14  ;;  %v1314_v41 = vor.u32 %v1775_v31, %v1311_v32  ;;  %v1234_v11 = vor.u32 %v1755_v61, %v1231_v62  ;;  %v1407_v14 = vld [vmem:[%s2824_s1 + $0x1e8] sm:$0xf0]  ;;  %v1813_v32 = vld [vmem:[%s2824_s1 + $0x254] sm:$0xf] }
  0x45   :  { %1038 = vmatpush.bf16.msra.mxu1 %v1226_v25  ;;  %1007 = vmatmul.bf16.vlgmr.msrb.gmra.mxu2 %v2355_v40  ;;  %v1743_v25 = vld [vmem:[%s2824_s1 + $0x24] sm:$0xf] }
  0x46   :  { %1051 = vmatpush.bf16.msra.mxu2 %v1290_v30  ;;  %1020 = vmatmul.bf16.vlgmr.msrb.gmra.mxu3 %v2363_v44  ;;  %v1694_v30 = vor.u32 %v1872_v23, %v1693_v22  ;;  %v1186_v33 = vor.u32 %v1743_v25, %v1183_v26  ;;  %v1831_v22 = vld [vmem:[%s2824_s1 + $0x2e4] sm:$0xf]  ;;  %v1535_v23 = vld [vmem:[%s2824_s1 + $0x2e8] sm:$0xf0]  ;;  %v1797_v26 = vld [vmem:[%s2824_s1 + $0x1d4] sm:$0xf] }
  0x47   :  { %1064 = vmatpush.bf16.msra.mxu3 %v1354_v35  ;;  %v1870_v35 = vld [vmem:[%s2824_s1 + $0x414] sm:$0xf0]  ;;  %v1538_v31 = vor.u32 %v1831_v22, %v1535_v23  ;;  %v1805_v22 = vld [vmem:[%s2824_s1 + $0x214] sm:$0xf]  ;;  %v1431_v23 = vld [vmem:[%s2824_s1 + $0x218] sm:$0xf0] }
  0x48   :  { %1026 = vmatpush.bf16.msra.mxu0 %v1726_v39  ;;  %v1175_v39 = vld [vmem:[%s2824_s1 + $0x18] sm:$0xf0]  ;;  %v1686_v46 = vor.u32 %v1870_v35, %v1685_v34  ;;  %v1829_v34 = vld [vmem:[%s2824_s1 + $0x2d4] sm:$0xf] }
  0x49   :  { %1039 = vmatpush.bf16.msra.mxu1 %v1218_v43  ;;  %v1239_v43 = vld [vmem:[%s2824_s1 + $0x98] sm:$0xf0] }
  0x4a   :  { %1052 = vmatpush.bf16.msra.mxu2 %v1282_v47  ;;  %v1773_v47 = vld [vmem:[%s2824_s1 + $0x114] sm:$0xf]  ;;  %v1242_v55 = vor.u32 %v1757_v42, %v1239_v43  ;;  %v1527_v35 = vld [vmem:[%s2824_s1 + $0x2d8] sm:$0xf0]  ;;  %v1391_v42 = vld [vmem:[%s2824_s1 + $0x1c8] sm:$0xf0] }
  0x4b   :  { %1065 = vmatpush.bf16.msra.mxu3 %v1346_v51  ;;  %v1178_v51 = vor.u32 %v1741_v37, %v1175_v39  ;;  %v1306_v59 = vor.u32 %v1773_v47, %v1303_v48  ;;  %v1795_v39 = vld [vmem:[%s2824_s1 + $0x1c4] sm:$0xf]  ;;  %v1845_v43 = vld [vmem:[%s2824_s1 + $0x354] sm:$0xf]  ;;  %v1530_v45 = vor.u32 %v1829_v34, %v1527_v35  ;;  %v1455_v47 = vld [vmem:[%s2824_s1 + $0x248] sm:$0xf0] }
  0x4c   :  { %1027 = vmatpush.bf16.msra.mxu0 %v1718_v54  ;;  %v1167_v54 = vld [vmem:[%s2824_s1 + $0x8] sm:$0xf0]  ;;  %v1827_v48 = vld [vmem:[%s2824_s1 + $0x2c4] sm:$0xf]  ;;  %v1559_v34 = vld [vmem:[%s2824_s1 + $0x318] sm:$0xf0] }
  0x4d   :  { %1040 = vmatpush.bf16.msra.mxu1 %v1210_v57  ;;  %v1415_v57 = vld [vmem:[%s2824_s1 + $0x1f8] sm:$0xf0]  ;;  %v1170_v3 = vor.u32 %v1739_v53, %v1167_v54  ;;  %v1843_v54 = vld [vmem:[%s2824_s1 + $0x344] sm:$0xf] }
  0x4e   :  { %1053 = vmatpush.bf16.msra.mxu2 %v1274_v60  ;;  %v1479_v60 = vld [vmem:[%s2824_s1 + $0x278] sm:$0xf0]  ;;  %v1418_v4 = vor.u32 %v1801_v56, %v1415_v57  ;;  %v1809_v57 = vld [vmem:[%s2824_s1 + $0x234] sm:$0xf] }
  0x4f   :  { %1066 = vmatpush.bf16.msra.mxu3 %v1338_v63  ;;  %v182_v63 = vunpack.c.l.b16 %v18_v49  ;;  %v1394_v49 = vor.u32 %v1795_v39, %v1391_v42  ;;  %v1881_v39 = vld [vmem:[%s2824_s1 + $0x474] sm:$0xf]  ;;  %v1819_v42 = vld [vmem:[%s2824_s1 + $0x284] sm:$0xf] }
  0x50   :  { %1028 = vmatpush.bf16.msra.mxu0 %v1710_v2  ;;  %v1543_v2 = vld [vmem:[%s2824_s1 + $0x2f8] sm:$0xf0] }
  0x51   :  { %1041 = vmatpush.bf16.msra.mxu1 %v1202_v5  ;;  %v1771_v5 = vld [vmem:[%s2824_s1 + $0x104] sm:$0xf]  ;;  %v2548_v17 = vpack.c.b16 %v182_v63, %v182_v63 }
  0x52   :  { %1054 = vmatpush.bf16.msra.mxu2 %v1266_v10  ;;  %v1482_v10 = vor.u32 %v1817_v58, %v1479_v60  ;;  %v1447_v58 = vld [vmem:[%s2824_s1 + $0x238] sm:$0xf0]  ;;  %v1791_v63 = vld [vmem:[%s2824_s1 + $0x1a4] sm:$0xf] }
  0x53   :  { %1067 = vmatpush.bf16.msra.mxu3 %v1330_v15  ;;  %v1849_v15 = vld [vmem:[%s2824_s1 + $0x374] sm:$0xf]  ;;  %v1511_v60 = vld [vmem:[%s2824_s1 + $0x2b8] sm:$0xf0] }
  0x54   :  { %1029 = vmatpush.bf16.msra.mxu0 %v1702_v18  ;;  %v1546_v18 = vor.u32 %v1833_v1, %v1543_v2  ;;  %v1610_v25 = vor.u32 %v1849_v15, %v1607_v16  ;;  %v1375_v1 = vld [vmem:[%s2824_s1 + $0x1a8] sm:$0xf0]  ;;  %v1841_v2 = vld [vmem:[%s2824_s1 + $0x334] sm:$0xf] }
  0x55   :  { %1042 = vmatpush.bf16.msra.mxu1 %v1194_v21  ;;  %v1298_v21 = vor.u32 %v1771_v5, %v1295_v6  ;;  %v1807_v5 = vld [vmem:[%s2824_s1 + $0x224] sm:$0xf]  ;;  %v1439_v6 = vld [vmem:[%s2824_s1 + $0x228] sm:$0xf0]  ;;  %v1789_v15 = vld [vmem:[%s2824_s1 + $0x194] sm:$0xf] }
  0x56   :  { %1055 = vmatpush.bf16.msra.mxu2 %v1258_v24  ;;  %v1410_v24 = vor.u32 %v1799_v9, %v1407_v14  ;;  %v1823_v9 = vld [vmem:[%s2824_s1 + $0x2a4] sm:$0xf]  ;;  %v1442_v16 = vor.u32 %v1807_v5, %v1439_v6  ;;  %v1703_v5 = vld [vmem:[%s2824_s1 + $0x438] sm:$0xf0] }
  0x57   :  { %1068 = vmatpush.bf16.msra.mxu3 %v1322_v27  ;;  %v1474_v27 = vor.u32 %v1815_v19, %v1471_v20  ;;  %v1839_v19 = vld [vmem:[%s2824_s1 + $0x324] sm:$0xf]  ;;  %v1567_v20 = vld [vmem:[%s2824_s1 + $0x328] sm:$0xf0] }
  0x58   :  { %1030 = vmatpush.bf16.msra.mxu0 %v1694_v30  ;;  %v1599_v30 = vld [vmem:[%s2824_s1 + $0x368] sm:$0xf0] }
  0x59   :  { %1043 = vmatpush.bf16.msra.mxu1 %v1186_v33  ;;  %v1463_v33 = vld [vmem:[%s2824_s1 + $0x258] sm:$0xf0]  ;;  %v1602_v37 = vor.u32 %v1847_v29, %v1599_v30  ;;  %v1359_v29 = vld [vmem:[%s2824_s1 + $0x188] sm:$0xf0]  ;;  %v1803_v30 = vld [vmem:[%s2824_s1 + $0x204] sm:$0xf] }
  0x5a   :  { %1056 = vmatpush.bf16.msra.mxu2 %v1250_v36  ;;  %v1402_v36 = vor.u32 %v1797_v26, %v1399_v28  ;;  %v1787_v28 = vld [vmem:[%s2824_s1 + $0x184] sm:$0xf] }
  0x5b   :  { %1069 = vmatpush.bf16.msra.mxu3 %v1314_v41  ;;  %v1466_v41 = vor.u32 %v1813_v32, %v1463_v33  ;;  %v1423_v32 = vld [vmem:[%s2824_s1 + $0x208] sm:$0xf0]  ;;  %v1837_v33 = vld [vmem:[%s2824_s1 + $0x314] sm:$0xf] }
  0x5c   :  { %1031 = vmatpush.bf16.msra.mxu0 %v1686_v46  ;;  %v1811_v46 = vld [vmem:[%s2824_s1 + $0x244] sm:$0xf] }
  0x5d   :  { %1044 = vmatpush.bf16.msra.mxu1 %v1178_v51  ;;  %v1458_v53 = vor.u32 %v1811_v46, %v1455_v47  ;;  %v1426_v46 = vor.u32 %v1803_v30, %v1423_v32 }
  0x5e   :  { %1057 = vmatpush.bf16.msra.mxu2 %v1242_v55  ;;  %v1583_v55 = vld [vmem:[%s2824_s1 + $0x348] sm:$0xf0] }
  0x5f   :  { %1070 = vmatpush.bf16.msra.mxu3 %v1306_v59  ;;  %v1825_v59 = vld [vmem:[%s2824_s1 + $0x2b4] sm:$0xf]  ;;  %v1586_v62 = vor.u32 %v1843_v54, %v1583_v55  ;;  %v1727_v54 = vld [vmem:[%s2824_s1 + $0x468] sm:$0xf0] }
  0x60   :  { %1032 = vmatpush.bf16.msra.mxu0 %v1678_v0  ;;  %v1450_v0 = vor.u32 %v1809_v57, %v1447_v58  ;;  %v1861_v58 = vld [vmem:[%s2824_s1 + $0x3d4] sm:$0xf] }
  0x61   :  { %1045 = vmatpush.bf16.msra.mxu1 %v1170_v3  ;;  %v1575_v3 = vld [vmem:[%s2824_s1 + $0x338] sm:$0xf0] }
  0x62   :  { %1058 = vmatpush.bf16.msra.mxu2 %v1234_v11  ;;  %v1378_v11 = vor.u32 %v1791_v63, %v1375_v1  ;;  %v1578_v14 = vor.u32 %v1841_v2, %v1575_v3  ;;  %v1857_v3 = vld [vmem:[%s2824_s1 + $0x3b4] sm:$0xf] }
  0x63   :  { %1033 = vmatmul.bf16.vlgmr.msra.gmra.mxu0 %v2548_v17  ;;  %1071 = vmatpush.bf16.msra.mxu3 %v1298_v21 }
  0x64   :  { %1077 = vmatpush.bf16.msrb.mxu0 %v1418_v4  ;;  %1046 = vmatmul.bf16.vlgmr.msra.gmra.mxu1 %v2183_v12  ;;  %v1591_v12 = vld [vmem:[%s2824_s1 + $0x358] sm:$0xf0]  ;;  %v1514_v4 = vor.u32 %v1825_v59, %v1511_v60  ;;  %v1877_v60 = vld [vmem:[%s2824_s1 + $0x454] sm:$0xf] }
  0x65   :  { %1090 = vmatpush.bf16.msrb.mxu1 %v1482_v10  ;;  %1059 = vmatmul.bf16.vlgmr.msra.gmra.mxu2 %v2185_v13  ;;  %v1519_v13 = vld [vmem:[%s2824_s1 + $0x2c8] sm:$0xf0]  ;;  %v1594_v51 = vor.u32 %v1845_v43, %v1591_v12  ;;  %v1362_v12 = vor.u32 %v1787_v28, %v1359_v29  ;;  %v1655_v59 = vld [vmem:[%s2824_s1 + $0x3d8] sm:$0xf0] }
  0x66   :  { %1103 = vmatpush.bf16.msrb.mxu2 %v1546_v18  ;;  %1072 = vmatmul.bf16.vlgmr.msra.gmra.mxu3 %v2173_v7  ;;  %v1383_v7 = vld [vmem:[%s2824_s1 + $0x1b8] sm:$0xf0]  ;;  %v1522_v56 = vor.u32 %v1827_v48, %v1519_v13  ;;  %v1503_v10 = vld [vmem:[%s2824_s1 + $0x2a8] sm:$0xf0]  ;;  %v1835_v48 = vld [vmem:[%s2824_s1 + $0x304] sm:$0xf] }
  0x67   :  { %1116 = vmatpush.bf16.msrb.mxu3 %v1610_v25  ;;  %v1386_v61 = vor.u32 %v1793_v52, %v1383_v7  ;;  %v1367_v18 = vld [vmem:[%s2824_s1 + $0x198] sm:$0xf0]  ;;  %v1506_v21 = vor.u32 %v1823_v9, %v1503_v10  ;;  %v1487_v43 = vld [vmem:[%s2824_s1 + $0x288] sm:$0xf0]  ;;  %v1863_v52 = vld [vmem:[%s2824_s1 + $0x3e4] sm:$0xf] }
  0x68   :  { %1078 = vmatpush.bf16.msrb.mxu0 %v1410_v24  ;;  %v1821_v24 = vld [vmem:[%s2824_s1 + $0x294] sm:$0xf]  ;;  %v1495_v25 = vld [vmem:[%s2824_s1 + $0x298] sm:$0xf0]  ;;  %v1370_v26 = vor.u32 %v1789_v15, %v1367_v18  ;;  %v1551_v13 = vld [vmem:[%s2824_s1 + $0x308] sm:$0xf0] }
  0x69   :  { %1091 = vmatpush.bf16.msrb.mxu1 %v1474_v27  ;;  %v1570_v27 = vor.u32 %v1839_v19, %v1567_v20  ;;  %v1498_v35 = vor.u32 %v1821_v24, %v1495_v25  ;;  %v1879_v7 = vld [vmem:[%s2824_s1 + $0x464] sm:$0xf]  ;;  %v1554_v55 = vor.u32 %v1835_v48, %v1551_v13  ;;  %v1695_v15 = vld [vmem:[%s2824_s1 + $0x428] sm:$0xf0]  ;;  %v1853_v19 = vld [vmem:[%s2824_s1 + $0x394] sm:$0xf] }
  0x6a   :  { %1104 = vmatpush.bf16.msrb.mxu2 %v1538_v31  ;;  %v1434_v31 = vor.u32 %v1805_v22, %v1431_v23  ;;  %v1730_v57 = vor.u32 %v1879_v7, %v1727_v54  ;;  %v1855_v10 = vld [vmem:[%s2824_s1 + $0x3a4] sm:$0xf]  ;;  %v1623_v20 = vld [vmem:[%s2824_s1 + $0x398] sm:$0xf0]  ;;  %v1679_v28 = vld [vmem:[%s2824_s1 + $0x408] sm:$0xf0] }
  0x6b   :  { %1117 = vmatpush.bf16.msrb.mxu3 %v1602_v37  ;;  %v1671_v37 = vld [vmem:[%s2824_s1 + $0x3f8] sm:$0xf0]  ;;  %v1626_v23 = vor.u32 %v1853_v19, %v1623_v20  ;;  %v1851_v25 = vld [vmem:[%s2824_s1 + $0x384] sm:$0xf] }
  0x6c   :  { %1079 = vmatpush.bf16.msrb.mxu0 %v1402_v36  ;;  %v1865_v36 = vld [vmem:[%s2824_s1 + $0x3f4] sm:$0xf]  ;;  %v1687_v22 = vld [vmem:[%s2824_s1 + $0x418] sm:$0xf0] }
  0x6d   :  { %1092 = vmatpush.bf16.msrb.mxu1 %v1466_v41  ;;  %v1735_v41 = vld [vmem:[%s2824_s1 + $0x478] sm:$0xf0]  ;;  %v1674_v47 = vor.u32 %v1865_v36, %v1671_v37 }
  0x6e   :  { %1105 = vmatpush.bf16.msrb.mxu2 %v1530_v45  ;;  %v1562_v45 = vor.u32 %v1837_v33, %v1559_v34 }
  0x6f   :  { %1118 = vmatpush.bf16.msrb.mxu3 %v1594_v51  ;;  %v1490_v51 = vor.u32 %v1819_v42, %v1487_v43 }
  0x70   :  { %1080 = vmatpush.bf16.msrb.mxu0 %v1394_v49  ;;  %v1738_v49 = vor.u32 %v1881_v39, %v1735_v41 }
  0x71   :  { %1093 = vmatpush.bf16.msrb.mxu1 %v1458_v53  ;;  %v1663_v53 = vld [vmem:[%s2824_s1 + $0x3e8] sm:$0xf0] }
  0x72   :  { %1106 = vmatpush.bf16.msrb.mxu2 %v1522_v56  ;;  %v1666_v56 = vor.u32 %v1863_v52, %v1663_v53 }
  0x73   :  { %1119 = vmatpush.bf16.msrb.mxu3 %v1586_v62  ;;  %v1658_v62 = vor.u32 %v1861_v58, %v1655_v59 }
  0x74   :  { %1081 = vmatpush.bf16.msrb.mxu0 %v1386_v61  ;;  %v1719_v61 = vld [vmem:[%s2824_s1 + $0x458] sm:$0xf0] }
  0x75   :  { %1094 = vmatpush.bf16.msrb.mxu1 %v1450_v0  ;;  %v1722_v63 = vor.u32 %v1877_v60, %v1719_v61  ;;  %v1647_v0 = vld [vmem:[%s2824_s1 + $0x3c8] sm:$0xf0] }
  0x76   :  { %1107 = vmatpush.bf16.msrb.mxu2 %v1514_v4  ;;  %v1873_v4 = vld [vmem:[%s2824_s1 + $0x434] sm:$0xf] }
  0x77   :  { %1120 = vmatpush.bf16.msrb.mxu3 %v1578_v14  ;;  %v1706_v9 = vor.u32 %v1873_v4, %v1703_v5  ;;  %v1871_v14 = vld [vmem:[%s2824_s1 + $0x424] sm:$0xf] }
  0x78   :  { %1082 = vmatpush.bf16.msrb.mxu0 %v1378_v11  ;;  %v1631_v11 = vld [vmem:[%s2824_s1 + $0x3a8] sm:$0xf0]  ;;  %v1698_v18 = vor.u32 %v1871_v14, %v1695_v15 }
  0x79   :  { %1095 = vmatpush.bf16.msrb.mxu1 %v1442_v16  ;;  %v1634_v16 = vor.u32 %v1855_v10, %v1631_v11 }
  0x7a   :  { %1108 = vmatpush.bf16.msrb.mxu2 %v1506_v21  ;;  %v1869_v21 = vld [vmem:[%s2824_s1 + $0x414] sm:$0xf] }
  0x7b   :  { %1121 = vmatpush.bf16.msrb.mxu3 %v1570_v27  ;;  %v1690_v24 = vor.u32 %v1869_v21, %v1687_v22  ;;  %v1867_v27 = vld [vmem:[%s2824_s1 + $0x404] sm:$0xf] }
  0x7c   :  { %1083 = vmatpush.bf16.msrb.mxu0 %v1370_v26  ;;  %v1615_v26 = vld [vmem:[%s2824_s1 + $0x388] sm:$0xf0]  ;;  %v1682_v30 = vor.u32 %v1867_v27, %v1679_v28 }
  0x7d   :  { %1096 = vmatpush.bf16.msrb.mxu1 %v1434_v31  ;;  %v1618_v29 = vor.u32 %v1851_v25, %v1615_v26  ;;  %v163_v31 = vld [vmem:[%s2826_s2] sm:$0x3] }
  0x7e   :  { %1109 = vmatpush.bf16.msrb.mxu2 %v1498_v35  ;;  %v165_v32 = vperm.slane %v163_v31, 0 }
  0x7f   :  { %1122 = vmatpush.bf16.msrb.mxu3 %v1562_v45 }
  0x80   :  { %1084 = vmatpush.bf16.msrb.mxu0 %v1362_v12 }
  0x81   :  { %1097 = vmatpush.bf16.msrb.mxu1 %v1426_v46 }
  0x82   :  { %1110 = vmatpush.bf16.msrb.mxu2 %v1490_v51 }
  0x83   :  { %1085 = vmatmul.bf16.vlgmr.msrb.gmra.mxu0 %v2175_v8  ;;  %1123 = vmatpush.bf16.msrb.mxu3 %v1554_v55  ;;  %v1859_v8 = vld [vmem:[%s2824_s1 + $0x3c4] sm:$0xf] }
  0x84   :  { %1129 = vmatpush.bf16.msra.mxu0 %v1674_v47  ;;  %1098 = vmatmul.bf16.vlgmr.msrb.gmra.mxu1 %v2353_v38  ;;  %v1875_v38 = vld [vmem:[%s2824_s1 + $0x444] sm:$0xf]  ;;  %v1650_v1 = vor.u32 %v1859_v8, %v1647_v0  ;;  %v166_v8 = vperm.slane %v163_v31, 1 }
  0x85   :  { %1142 = vmatpush.bf16.msra.mxu1 %v1738_v49  ;;  %1111 = vmatmul.bf16.vlgmr.msrb.gmra.mxu2 %v2377_v50  ;;  %v1711_v50 = vld [vmem:[%s2824_s1 + $0x448] sm:$0xf0] }
  0x86   :  { %1124 = vmatmul.bf16.vlgmr.msrb.gmra.mxu3 %v2355_v40  ;;  %v1714_v2 = vor.u32 %v1875_v38, %v1711_v50  ;;  %v1639_v40 = vld [vmem:[%s2824_s1 + $0x3b8] sm:$0xf0] }
  0x87   :  { %v1642_v6 = vor.u32 %v1857_v3, %v1639_v40 }
  0x88   :  { %1130 = vmatpush.bf16.msra.mxu0 %v1666_v56 }
  0x89   :  { %1143 = vmatpush.bf16.msra.mxu1 %v1730_v57 }
  0x8c   :  { %1131 = vmatpush.bf16.msra.mxu0 %v1658_v62 }
  0x8d   :  { %1144 = vmatpush.bf16.msra.mxu1 %v1722_v63 }
  0x90   :  { %1132 = vmatpush.bf16.msra.mxu0 %v1650_v1 }
  0x91   :  { %1145 = vmatpush.bf16.msra.mxu1 %v1714_v2 }
  0x94   :  { %1133 = vmatpush.bf16.msra.mxu0 %v1642_v6 }
  0x95   :  { %1146 = vmatpush.bf16.msra.mxu1 %v1706_v9 }
  0x98   :  { %1134 = vmatpush.bf16.msra.mxu0 %v1634_v16 }
  0x99   :  { %1147 = vmatpush.bf16.msra.mxu1 %v1698_v18 }
  0x9c   :  { %1135 = vmatpush.bf16.msra.mxu0 %v1626_v23 }
  0x9d   :  { %1148 = vmatpush.bf16.msra.mxu1 %v1690_v24 }
  0xa0   :  { %1136 = vmatpush.bf16.msra.mxu0 %v1618_v29  ;;  %v930_v34 = vpop.f32.mrf.mxu0 }
  0xa1   :  { %1149 = vmatpush.bf16.msra.mxu1 %v1682_v30  ;;  %v943_v33 = vpop.f32.mrf.mxu1  ;;  %v931_v35 = vadd.f32 %v930_v34, %v165_v32 }
  0xa3   :  { %1137 = vmatmul.bf16.vlgmr.msra.gmra.mxu0 %v2363_v44  ;;  %v944_v36 = vadd.f32 %v943_v33, %v931_v35 }
  0xa4   :  { %1150 = vmatmul.bf16.vlgmr.msra.gmra.mxu1 %v2548_v17 }
  0xa8   :  { %v956_v39 = vpop.f32.mrf.mxu2  ;;  %v932_v12 = vpop.f32.mrf.mxu0 }
  0xa9   :  { %v969_v37 = vpop.f32.mrf.mxu3  ;;  %v957_v41 = vadd.f32 %v956_v39, %v944_v36  ;;  %v945_v43 = vpop.f32.mrf.mxu1 }
  0xab   :  { %v970_v42 = vadd.f32 %v969_v37, %v957_v41 }
  0xb0   :  { %v958_v46 = vpop.f32.mrf.mxu2 }
  0xb1   :  { %v971_v45 = vpop.f32.mrf.mxu3 }
  0xc0   :  { %v982_v44 = vpop.f32.mrf.mxu0 }
  0xc1   :  { %v983_v47 = vadd.f32 %v982_v44, %v970_v42  ;;  %v995_v17 = vpop.f32.mrf.mxu1 }
  0xc3   :  { %v996_v48 = vadd.f32 %v995_v17, %v983_v47 }
  0xc8   :  { %v1008_v13 = vpop.f32.mrf.mxu2  ;;  %v984_v52 = vpop.f32.mrf.mxu0 }
  0xc9   :  { %v1009_v49 = vadd.f32 %v1008_v13, %v996_v48  ;;  %v1021_v51 = vpop.f32.mrf.mxu3  ;;  %v997_v7 = vpop.f32.mrf.mxu1 }
  0xcb   :  { %v1022_v53 = vadd.f32 %v1021_v51, %v1009_v49 }
  0xd0   :  { %v1010_v54 = vpop.f32.mrf.mxu2 }
  0xd1   :  { %v1023_v55 = vpop.f32.mrf.mxu3 }
  0xe0   :  { %v1034_v56 = vpop.f32.mrf.mxu0 }
  0xe1   :  { %v1047_v57 = vpop.f32.mrf.mxu1  ;;  %v1035_v18 = vadd.f32 %v1034_v56, %v1022_v53 }
  0xe2   :  { %v1048_v50 = vadd.f32 %v1047_v57, %v166_v8 }
  0xe3   :  { %v1155_v22 = vmax.f32 %v1035_v18, 0.0 }
  0xe8   :  { %v1036_v58 = vpop.f32.mrf.mxu0  ;;  %v1060_v59 = vpop.f32.mrf.mxu2 }
  0xe9   :  { %v1049_v60 = vpop.f32.mrf.mxu1  ;;  %v1073_v61 = vpop.f32.mrf.mxu3  ;;  %v1061_v1 = vadd.f32 %v1060_v59, %v1048_v50 }
  0xeb   :  { %v1074_v5 = vadd.f32 %v1073_v61, %v1061_v1 }
  0xf0   :  { %v1062_v62 = vpop.f32.mrf.mxu2 }
  0xf1   :  { %v1075_v63 = vpop.f32.mrf.mxu3 }
 0x100   :  { %v1086_v0 = vpop.f32.mrf.mxu0 }
 0x101   :  { %v1099_v38 = vpop.f32.mrf.mxu1  ;;  %v1087_v6 = vadd.f32 %v1086_v0, %v1074_v5 }
 0x103   :  { %v1100_v11 = vadd.f32 %v1099_v38, %v1087_v6 }
 0x108   :  { %v1112_v2 = vpop.f32.mrf.mxu2  ;;  %v1088_v3 = vpop.f32.mrf.mxu0 }
 0x109   :  { %v1101_v40 = vpop.f32.mrf.mxu1  ;;  %v1125_v4 = vpop.f32.mrf.mxu3  ;;  %v1113_v14 = vadd.f32 %v1112_v2, %v1100_v11 }
 0x10b   :  { %v1126_v15 = vadd.f32 %v1125_v4, %v1113_v14 }
 0x110   :  { %v1114_v9 = vpop.f32.mrf.mxu2 }
 0x111   :  { %v1127_v10 = vpop.f32.mrf.mxu3 }
 0x120   :  { %v1138_v16 = vpop.f32.mrf.mxu0 }
 0x121   :  { %v1139_v19 = vadd.f32 %v1138_v16, %v1126_v15  ;;  %v1151_v20 = vpop.f32.mrf.mxu1 }
 0x123   :  { %v1152_v21 = vadd.f32 %v1151_v20, %v1139_v19 }
 0x125   :  { %v1156_v23 = vmax.f32 %v1152_v21, 0.0 }
 0x127   :  { %v1157_v24 = vpack.c.bf16 %v1156_v23, %v1155_v22 }
 0x128   :  { %v1140_v25 = vpop.f32.mrf.mxu0 }
 0x129   :  { %1158 = vst [vmem:[%s2827_s3] sm:$0xff] %v1157_v24  ;;  %v1153_v26 = vpop.f32.mrf.mxu1 }

// kernel: one_head_strong_forward.13
= control target key start
LH: loop header
LB: loop body
LE: loop exit
PB: predicated region body
PF: predicated region fallthrough
CT: control target
= control target key end

     0   :  { %s2889_s9 = smov 0   ;;  %s2891_s10 = smov 0   ;;  %s3832_s0 = inlined_call_operand.vmem [shape: bf16[2,64,256], index: 0, kind: input, shape index: {}]   ;;  %s3833_s1 = inlined_call_operand.vmem [shape: bf16[256,4096], index: 1, kind: input, shape index: {}]   ;;  %s3834_s2 = inlined_call_operand.vmem [shape: f32[2,64,4096], index: 2, kind: output, shape index: {}]  }
   0x1   :  { %s2893_s11 = smov 0   ;;  %s2895_s12 = smov 0  }
   0x2   :  { %s2897_s13 = smov 0   ;;  %s2899_s14 = smov 0  }
   0x3   :  { %s2901_s15 = smov 0   ;;  %s2903_s16 = smov 0  }
   0x4   :  { %s2905_s17 = smov 0  }
   0x5 LB: > { %s21_s18 = sadd.s32 1, %s2864_s15  ;;  %s24_s19 = sadd.s32 1, %s2868_s16  ;;  %s2872_s17 = sphi %s2905_s17, %s12_s17   ;;  %s2868_s16 = sphi %s2903_s16, %s3844_s16   ;;  %s2864_s15 = sphi %s2901_s15, %s3843_s15   ;;  %s2860_s14 = sphi %s2899_s14, %s3842_s14   ;;  %s2856_s13 = sphi %s2897_s13, %s3841_s13   ;;  %s2852_s12 = sphi %s2895_s12, %s3840_s12   ;;  %s2848_s11 = sphi %s2893_s11, %s3839_s11   ;;  %s2844_s10 = sphi %s2891_s10, %s3838_s10   ;;  %s2840_s9 = sphi %s2889_s9, %s3837_s9  }
   0x6   : > { %p22_p0 = scmp.ge.s32.totalorder %s21_s18, 2  ;;  %p64_p1 = scmp.ne.s32.totalorder %s2852_s12, %s2848_s11 }
   0x7   : > { %s2030_s20 = sadd.s32 4294967295, %s2872_s17   ;;  %p65_p2 = scmp.eq.s32.totalorder %s2872_s17, 0 }
   0x8   : > { %s3846_s18 = smov (%p22_p0, %s21_s18), 0  ;;  %s3848_s19 = smov (!%p22_p0, %s24_s19), %s2868_s16 }
   0x9   : > { %p26_p3 = scmp.ge.s32.totalorder %s3848_s19, 4  ;;  %s80_s21 = ssub.s32 %s2864_s15, %s3846_s18 }
   0xa   : > { %p2945_p4 = por %p65_p2, %p64_p1  ;;  %p95_p5 = scmp.ne.s32.totalorder %s2844_s10, %s2840_s9 }
   0xb   : > { %s3850_s19 = smov (%p26_p3, %s3848_s19), 0  ;;  %s57_s23 = sadd.s32 1, %s2852_s12 }
   0xc   : > { %p96_p6 = scmp.eq.s32.totalorder %s2030_s20, 7  ;;  %s54_s24 = ssub.s32 %s2868_s16, %s3850_s19 }
   0xd   : > { %s85_s25 = sadd.s32 1, %s2844_s10  ;;  %p55_p7 = scmp.eq.s32.totalorder %s54_s24, 0 }
   0xe   : > { %s82_s26 = sor.u32 %s80_s21, %s54_s24  ;;  %p2957_p9 = por %p96_p6, %p95_p5 }
   0xf   : > { %p83_p8 = scmp.eq.s32.totalorder %s82_s26, 0  ;;  %p2033_p10 = scmp.ge.s32.totalorder %s2872_s17, 8 }
  0x10   : > { %s2962_s28 = scalar_select %p55_p7, %s2852_s12, %s57_s23  }
  0x11   : > { %s2965_s29 = scalar_select %p83_p8, %s2844_s10, %s85_s25  }
  0x12   : > { %118 = sbr.rel (%p2033_p10) target bundleno = 155 (0x9b), region = 16 }
  0x17   : > { %129 = sbr.rel (!%p2945_p4) target bundleno = 155 (0x9b), region = 24  ;;  %s131_s30 = sand.u32 (%p2945_p4), 1, %s2852_s12  }
  0x18   : > { %s2592_s3 = sshll.u32 (%p2945_p4), %s2868_s16, 5  ;;  %s2034_s4 = sshll.u32 (%p2945_p4), %s131_s30, 10 }
  0x19   : > { %s2975_s7 = scalar_lea.vmem (%p2945_p4), %s3833_s1, %s2592_s3  ;;  %s2980_s8 = scalar_lea.vmem (%p2945_p4), [#allocation2], %s2034_s4 }
  0x1a   : > { %v149_v0 = vld [vmem:[%s2975_s7] sm:$0xff] (%p2945_p4)  ;;  %v151_v1 = vld [vmem:[%s2975_s7 + $0x8] sm:$0xff] (%p2945_p4)  ;;  %v153_v2 = vld [vmem:[%s2975_s7 + $0x10] sm:$0xff] (%p2945_p4) }
  0x1b   : > { %150 = vst [vmem:[%s2980_s8] sm:$0xff] (%p2945_p4), %v149_v0  ;;  %v155_v3 = vld [vmem:[%s2975_s7 + $0x18] sm:$0xff] (%p2945_p4)  ;;  %v157_v4 = vld [vmem:[%s2975_s7 + $0x80] sm:$0xff] (%p2945_p4)  ;;  %v159_v5 = vld [vmem:[%s2975_s7 + $0x88] sm:$0xff] (%p2945_p4) }
  0x1c   : > { %152 = vst [vmem:[%s2980_s8 + $0x8] sm:$0xff] %v151_v1  ;;  %v161_v6 = vld [vmem:[%s2975_s7 + $0x90] sm:$0xff]  ;;  %v163_v7 = vld [vmem:[%s2975_s7 + $0x98] sm:$0xff]  ;;  %v165_v8 = vld [vmem:[%s2975_s7 + $0x100] sm:$0xff] }
  0x1d   : > { %154 = vst [vmem:[%s2980_s8 + $0x10] sm:$0xff] %v153_v2  ;;  %v167_v9 = vld [vmem:[%s2975_s7 + $0x108] sm:$0xff]  ;;  %v169_v10 = vld [vmem:[%s2975_s7 + $0x110] sm:$0xff]  ;;  %v171_v11 = vld [vmem:[%s2975_s7 + $0x118] sm:$0xff] }
  0x1e   : > { %156 = vst [vmem:[%s2980_s8 + $0x18] sm:$0xff] %v155_v3  ;;  %v173_v12 = vld [vmem:[%s2975_s7 + $0x180] sm:$0xff]  ;;  %v175_v13 = vld [vmem:[%s2975_s7 + $0x188] sm:$0xff]  ;;  %v177_v14 = vld [vmem:[%s2975_s7 + $0x190] sm:$0xff] }
  0x1f   : > { %158 = vst [vmem:[%s2980_s8 + $0x20] sm:$0xff] %v157_v4  ;;  %v179_v15 = vld [vmem:[%s2975_s7 + $0x198] sm:$0xff]  ;;  %v181_v16 = vld [vmem:[%s2975_s7 + $0x200] sm:$0xff]  ;;  %v183_v17 = vld [vmem:[%s2975_s7 + $0x208] sm:$0xff] }
  0x20   : > { %160 = vst [vmem:[%s2980_s8 + $0x28] sm:$0xff] %v159_v5  ;;  %v185_v18 = vld [vmem:[%s2975_s7 + $0x210] sm:$0xff]  ;;  %v187_v19 = vld [vmem:[%s2975_s7 + $0x218] sm:$0xff]  ;;  %v189_v20 = vld [vmem:[%s2975_s7 + $0x280] sm:$0xff] }
  0x21   : > { %162 = vst [vmem:[%s2980_s8 + $0x30] sm:$0xff] %v161_v6  ;;  %v191_v21 = vld [vmem:[%s2975_s7 + $0x288] sm:$0xff]  ;;  %v193_v22 = vld [vmem:[%s2975_s7 + $0x290] sm:$0xff]  ;;  %v195_v23 = vld [vmem:[%s2975_s7 + $0x298] sm:$0xff] }
  0x22   : > { %164 = vst [vmem:[%s2980_s8 + $0x38] sm:$0xff] %v163_v7  ;;  %v197_v24 = vld [vmem:[%s2975_s7 + $0x300] sm:$0xff]  ;;  %v199_v25 = vld [vmem:[%s2975_s7 + $0x308] sm:$0xff]  ;;  %v201_v26 = vld [vmem:[%s2975_s7 + $0x310] sm:$0xff] }
  0x23   : > { %166 = vst [vmem:[%s2980_s8 + $0x40] sm:$0xff] %v165_v8  ;;  %v203_v27 = vld [vmem:[%s2975_s7 + $0x318] sm:$0xff]  ;;  %v205_v28 = vld [vmem:[%s2975_s7 + $0x380] sm:$0xff]  ;;  %v207_v29 = vld [vmem:[%s2975_s7 + $0x388] sm:$0xff] }
  0x24   : > { %168 = vst [vmem:[%s2980_s8 + $0x48] sm:$0xff] %v167_v9  ;;  %v209_v30 = vld [vmem:[%s2975_s7 + $0x390] sm:$0xff]  ;;  %v211_v31 = vld [vmem:[%s2975_s7 + $0x398] sm:$0xff]  ;;  %v213_v32 = vld [vmem:[%s2975_s7 + $0x400] sm:$0xff] }
  0x25   : > { %170 = vst [vmem:[%s2980_s8 + $0x50] sm:$0xff] %v169_v10  ;;  %v215_v33 = vld [vmem:[%s2975_s7 + $0x408] sm:$0xff]  ;;  %v217_v34 = vld [vmem:[%s2975_s7 + $0x410] sm:$0xff]  ;;  %v219_v35 = vld [vmem:[%s2975_s7 + $0x418] sm:$0xff] }
  0x26   : > { %172 = vst [vmem:[%s2980_s8 + $0x58] sm:$0xff] %v171_v11  ;;  %v221_v36 = vld [vmem:[%s2975_s7 + $0x480] sm:$0xff]  ;;  %v223_v37 = vld [vmem:[%s2975_s7 + $0x488] sm:$0xff]  ;;  %v225_v38 = vld [vmem:[%s2975_s7 + $0x490] sm:$0xff] }
  0x27   : > { %174 = vst [vmem:[%s2980_s8 + $0x60] sm:$0xff] %v173_v12  ;;  %v227_v39 = vld [vmem:[%s2975_s7 + $0x498] sm:$0xff]  ;;  %v229_v40 = vld [vmem:[%s2975_s7 + $0x500] sm:$0xff]  ;;  %v231_v41 = vld [vmem:[%s2975_s7 + $0x508] sm:$0xff] }
  0x28   : > { %176 = vst [vmem:[%s2980_s8 + $0x68] sm:$0xff] %v175_v13  ;;  %v233_v42 = vld [vmem:[%s2975_s7 + $0x510] sm:$0xff]  ;;  %v235_v43 = vld [vmem:[%s2975_s7 + $0x518] sm:$0xff]  ;;  %v237_v44 = vld [vmem:[%s2975_s7 + $0x580] sm:$0xff] }
  0x29   : > { %178 = vst [vmem:[%s2980_s8 + $0x70] sm:$0xff] %v177_v14  ;;  %v239_v45 = vld [vmem:[%s2975_s7 + $0x588] sm:$0xff]  ;;  %v241_v46 = vld [vmem:[%s2975_s7 + $0x590] sm:$0xff]  ;;  %v243_v47 = vld [vmem:[%s2975_s7 + $0x598] sm:$0xff] }
  0x2a   : > { %180 = vst [vmem:[%s2980_s8 + $0x78] sm:$0xff] %v179_v15  ;;  %v245_v48 = vld [vmem:[%s2975_s7 + $0x600] sm:$0xff]  ;;  %v247_v49 = vld [vmem:[%s2975_s7 + $0x608] sm:$0xff]  ;;  %v249_v50 = vld [vmem:[%s2975_s7 + $0x610] sm:$0xff] }
  0x2b   : > { %182 = vst [vmem:[%s2980_s8 + $0x80] sm:$0xff] %v181_v16  ;;  %v251_v51 = vld [vmem:[%s2975_s7 + $0x618] sm:$0xff]  ;;  %v253_v52 = vld [vmem:[%s2975_s7 + $0x680] sm:$0xff]  ;;  %v255_v53 = vld [vmem:[%s2975_s7 + $0x688] sm:$0xff] }
  0x2c   : > { %184 = vst [vmem:[%s2980_s8 + $0x88] sm:$0xff] %v183_v17  ;;  %v257_v54 = vld [vmem:[%s2975_s7 + $0x690] sm:$0xff]  ;;  %v259_v55 = vld [vmem:[%s2975_s7 + $0x698] sm:$0xff]  ;;  %v261_v56 = vld [vmem:[%s2975_s7 + $0x700] sm:$0xff] }
  0x2d   : > { %186 = vst [vmem:[%s2980_s8 + $0x90] sm:$0xff] %v185_v18  ;;  %v263_v57 = vld [vmem:[%s2975_s7 + $0x708] sm:$0xff]  ;;  %v265_v58 = vld [vmem:[%s2975_s7 + $0x710] sm:$0xff]  ;;  %v267_v59 = vld [vmem:[%s2975_s7 + $0x718] sm:$0xff] }
  0x2e   : > { %188 = vst [vmem:[%s2980_s8 + $0x98] sm:$0xff] %v187_v19  ;;  %v269_v60 = vld [vmem:[%s2975_s7 + $0x780] sm:$0xff]  ;;  %v271_v61 = vld [vmem:[%s2975_s7 + $0x788] sm:$0xff]  ;;  %v273_v62 = vld [vmem:[%s2975_s7 + $0x790] sm:$0xff] }
  0x2f   : > { %190 = vst [vmem:[%s2980_s8 + $0xa0] sm:$0xff] %v189_v20  ;;  %v275_v63 = vld [vmem:[%s2975_s7 + $0x798] sm:$0xff]  ;;  %v277_v0 = vld [vmem:[%s2975_s7 + $0x800] sm:$0xff]  ;;  %v279_v1 = vld [vmem:[%s2975_s7 + $0x808] sm:$0xff] }
  0x30   : > { %192 = vst [vmem:[%s2980_s8 + $0xa8] sm:$0xff] %v191_v21  ;;  %v281_v2 = vld [vmem:[%s2975_s7 + $0x810] sm:$0xff]  ;;  %v283_v3 = vld [vmem:[%s2975_s7 + $0x818] sm:$0xff]  ;;  %v285_v4 = vld [vmem:[%s2975_s7 + $0x880] sm:$0xff] }
  0x31   : > { %194 = vst [vmem:[%s2980_s8 + $0xb0] sm:$0xff] %v193_v22  ;;  %v287_v5 = vld [vmem:[%s2975_s7 + $0x888] sm:$0xff]  ;;  %v289_v6 = vld [vmem:[%s2975_s7 + $0x890] sm:$0xff]  ;;  %v291_v7 = vld [vmem:[%s2975_s7 + $0x898] sm:$0xff] }
  0x32   : > { %196 = vst [vmem:[%s2980_s8 + $0xb8] sm:$0xff] %v195_v23  ;;  %v293_v8 = vld [vmem:[%s2975_s7 + $0x900] sm:$0xff]  ;;  %v295_v9 = vld [vmem:[%s2975_s7 + $0x908] sm:$0xff]  ;;  %v297_v10 = vld [vmem:[%s2975_s7 + $0x910] sm:$0xff] }
  0x33   : > { %198 = vst [vmem:[%s2980_s8 + $0xc0] sm:$0xff] %v197_v24  ;;  %v299_v11 = vld [vmem:[%s2975_s7 + $0x918] sm:$0xff]  ;;  %v301_v12 = vld [vmem:[%s2975_s7 + $0x980] sm:$0xff]  ;;  %v303_v13 = vld [vmem:[%s2975_s7 + $0x988] sm:$0xff] }
  0x34   : > { %200 = vst [vmem:[%s2980_s8 + $0xc8] sm:$0xff] %v199_v25  ;;  %v305_v14 = vld [vmem:[%s2975_s7 + $0x990] sm:$0xff]  ;;  %v307_v15 = vld [vmem:[%s2975_s7 + $0x998] sm:$0xff]  ;;  %v309_v16 = vld [vmem:[%s2975_s7 + $0xa00] sm:$0xff] }
  0x35   : > { %202 = vst [vmem:[%s2980_s8 + $0xd0] sm:$0xff] %v201_v26  ;;  %v311_v17 = vld [vmem:[%s2975_s7 + $0xa08] sm:$0xff]  ;;  %v313_v18 = vld [vmem:[%s2975_s7 + $0xa10] sm:$0xff]  ;;  %v315_v19 = vld [vmem:[%s2975_s7 + $0xa18] sm:$0xff] }
  0x36   : > { %204 = vst [vmem:[%s2980_s8 + $0xd8] sm:$0xff] %v203_v27  ;;  %v317_v20 = vld [vmem:[%s2975_s7 + $0xa80] sm:$0xff]  ;;  %v319_v21 = vld [vmem:[%s2975_s7 + $0xa88] sm:$0xff]  ;;  %v321_v22 = vld [vmem:[%s2975_s7 + $0xa90] sm:$0xff] }
  0x37   : > { %206 = vst [vmem:[%s2980_s8 + $0xe0] sm:$0xff] %v205_v28  ;;  %v323_v23 = vld [vmem:[%s2975_s7 + $0xa98] sm:$0xff]  ;;  %v325_v24 = vld [vmem:[%s2975_s7 + $0xb00] sm:$0xff]  ;;  %v327_v25 = vld [vmem:[%s2975_s7 + $0xb08] sm:$0xff] }
  0x38   : > { %208 = vst [vmem:[%s2980_s8 + $0xe8] sm:$0xff] %v207_v29  ;;  %v329_v26 = vld [vmem:[%s2975_s7 + $0xb10] sm:$0xff]  ;;  %v331_v27 = vld [vmem:[%s2975_s7 + $0xb18] sm:$0xff]  ;;  %v333_v28 = vld [vmem:[%s2975_s7 + $0xb80] sm:$0xff] }
  0x39   : > { %210 = vst [vmem:[%s2980_s8 + $0xf0] sm:$0xff] %v209_v30  ;;  %v335_v29 = vld [vmem:[%s2975_s7 + $0xb88] sm:$0xff]  ;;  %v337_v30 = vld [vmem:[%s2975_s7 + $0xb90] sm:$0xff] }
  0x3a   : > { %212 = vst [vmem:[%s2980_s8 + $0xf8] sm:$0xff] %v211_v31  ;;  %v339_v31 = vld [vmem:[%s2975_s7 + $0xb98] sm:$0xff] }
  0x3b   : > { %214 = vst [vmem:[%s2980_s8 + $0x100] sm:$0xff] %v213_v32  ;;  %v341_v32 = vld [vmem:[%s2975_s7 + $0xc00] sm:$0xff] }
  0x3c   : > { %216 = vst [vmem:[%s2980_s8 + $0x108] sm:$0xff] %v215_v33  ;;  %v343_v33 = vld [vmem:[%s2975_s7 + $0xc08] sm:$0xff] }
  0x3d   : > { %218 = vst [vmem:[%s2980_s8 + $0x110] sm:$0xff] %v217_v34  ;;  %v345_v34 = vld [vmem:[%s2975_s7 + $0xc10] sm:$0xff] }
  0x3e   : > { %220 = vst [vmem:[%s2980_s8 + $0x118] sm:$0xff] %v219_v35  ;;  %v347_v35 = vld [vmem:[%s2975_s7 + $0xc18] sm:$0xff] }
  0x3f   : > { %222 = vst [vmem:[%s2980_s8 + $0x120] sm:$0xff] %v221_v36  ;;  %v349_v36 = vld [vmem:[%s2975_s7 + $0xc80] sm:$0xff] }
  0x40   : > { %224 = vst [vmem:[%s2980_s8 + $0x128] sm:$0xff] %v223_v37  ;;  %v351_v37 = vld [vmem:[%s2975_s7 + $0xc88] sm:$0xff] }
  0x41   : > { %226 = vst [vmem:[%s2980_s8 + $0x130] sm:$0xff] %v225_v38  ;;  %v353_v38 = vld [vmem:[%s2975_s7 + $0xc90] sm:$0xff] }
  0x42   : > { %228 = vst [vmem:[%s2980_s8 + $0x138] sm:$0xff] %v227_v39  ;;  %v355_v39 = vld [vmem:[%s2975_s7 + $0xc98] sm:$0xff] }
  0x43   : > { %230 = vst [vmem:[%s2980_s8 + $0x140] sm:$0xff] %v229_v40  ;;  %v357_v40 = vld [vmem:[%s2975_s7 + $0xd00] sm:$0xff] }
  0x44   : > { %232 = vst [vmem:[%s2980_s8 + $0x148] sm:$0xff] %v231_v41  ;;  %v359_v41 = vld [vmem:[%s2975_s7 + $0xd08] sm:$0xff] }
  0x45   : > { %234 = vst [vmem:[%s2980_s8 + $0x150] sm:$0xff] %v233_v42  ;;  %v361_v42 = vld [vmem:[%s2975_s7 + $0xd10] sm:$0xff] }
  0x46   : > { %236 = vst [vmem:[%s2980_s8 + $0x158] sm:$0xff] %v235_v43  ;;  %v363_v43 = vld [vmem:[%s2975_s7 + $0xd18] sm:$0xff] }
  0x47   : > { %238 = vst [vmem:[%s2980_s8 + $0x160] sm:$0xff] %v237_v44  ;;  %v365_v44 = vld [vmem:[%s2975_s7 + $0xd80] sm:$0xff] }
  0x48   : > { %240 = vst [vmem:[%s2980_s8 + $0x168] sm:$0xff] %v239_v45  ;;  %v367_v45 = vld [vmem:[%s2975_s7 + $0xd88] sm:$0xff] }
  0x49   : > { %242 = vst [vmem:[%s2980_s8 + $0x170] sm:$0xff] %v241_v46  ;;  %v369_v46 = vld [vmem:[%s2975_s7 + $0xd90] sm:$0xff] }
  0x4a   : > { %244 = vst [vmem:[%s2980_s8 + $0x178] sm:$0xff] %v243_v47  ;;  %v371_v47 = vld [vmem:[%s2975_s7 + $0xd98] sm:$0xff] }
  0x4b   : > { %246 = vst [vmem:[%s2980_s8 + $0x180] sm:$0xff] %v245_v48  ;;  %v373_v48 = vld [vmem:[%s2975_s7 + $0xe00] sm:$0xff] }
  0x4c   : > { %248 = vst [vmem:[%s2980_s8 + $0x188] sm:$0xff] %v247_v49  ;;  %v375_v49 = vld [vmem:[%s2975_s7 + $0xe08] sm:$0xff] }
  0x4d   : > { %250 = vst [vmem:[%s2980_s8 + $0x190] sm:$0xff] %v249_v50  ;;  %v377_v50 = vld [vmem:[%s2975_s7 + $0xe10] sm:$0xff] }
  0x4e   : > { %252 = vst [vmem:[%s2980_s8 + $0x198] sm:$0xff] %v251_v51  ;;  %v379_v51 = vld [vmem:[%s2975_s7 + $0xe18] sm:$0xff] }
  0x4f   : > { %254 = vst [vmem:[%s2980_s8 + $0x1a0] sm:$0xff] %v253_v52  ;;  %v381_v52 = vld [vmem:[%s2975_s7 + $0xe80] sm:$0xff] }
  0x50   : > { %256 = vst [vmem:[%s2980_s8 + $0x1a8] sm:$0xff] %v255_v53  ;;  %v383_v53 = vld [vmem:[%s2975_s7 + $0xe88] sm:$0xff] }
  0x51   : > { %258 = vst [vmem:[%s2980_s8 + $0x1b0] sm:$0xff] %v257_v54  ;;  %v385_v54 = vld [vmem:[%s2975_s7 + $0xe90] sm:$0xff] }
  0x52   : > { %260 = vst [vmem:[%s2980_s8 + $0x1b8] sm:$0xff] %v259_v55  ;;  %v387_v55 = vld [vmem:[%s2975_s7 + $0xe98] sm:$0xff] }
  0x53   : > { %262 = vst [vmem:[%s2980_s8 + $0x1c0] sm:$0xff] %v261_v56  ;;  %v389_v56 = vld [vmem:[%s2975_s7 + $0xf00] sm:$0xff] }
  0x54   : > { %264 = vst [vmem:[%s2980_s8 + $0x1c8] sm:$0xff] %v263_v57  ;;  %v391_v57 = vld [vmem:[%s2975_s7 + $0xf08] sm:$0xff] }
  0x55   : > { %266 = vst [vmem:[%s2980_s8 + $0x1d0] sm:$0xff] %v265_v58  ;;  %v393_v58 = vld [vmem:[%s2975_s7 + $0xf10] sm:$0xff] }
  0x56   : > { %268 = vst [vmem:[%s2980_s8 + $0x1d8] sm:$0xff] %v267_v59  ;;  %v395_v59 = vld [vmem:[%s2975_s7 + $0xf18] sm:$0xff] }
  0x57   : > { %270 = vst [vmem:[%s2980_s8 + $0x1e0] sm:$0xff] %v269_v60  ;;  %v397_v60 = vld [vmem:[%s2975_s7 + $0xf80] sm:$0xff] }
  0x58   : > { %272 = vst [vmem:[%s2980_s8 + $0x1e8] sm:$0xff] %v271_v61  ;;  %v399_v61 = vld [vmem:[%s2975_s7 + $0xf88] sm:$0xff] }
  0x59   : > { %274 = vst [vmem:[%s2980_s8 + $0x1f0] sm:$0xff] %v273_v62  ;;  %v401_v62 = vld [vmem:[%s2975_s7 + $0xf90] sm:$0xff] }
  0x5a   : > { %276 = vst [vmem:[%s2980_s8 + $0x1f8] sm:$0xff] %v275_v63  ;;  %v403_v63 = vld [vmem:[%s2975_s7 + $0xf98] sm:$0xff] }
  0x5b   : > { %278 = vst [vmem:[%s2980_s8 + $0x200] sm:$0xff] %v277_v0 }
  0x5c   : > { %280 = vst [vmem:[%s2980_s8 + $0x208] sm:$0xff] %v279_v1 }
  0x5d   : > { %282 = vst [vmem:[%s2980_s8 + $0x210] sm:$0xff] %v281_v2 }
  0x5e   : > { %284 = vst [vmem:[%s2980_s8 + $0x218] sm:$0xff] %v283_v3 }
  0x5f   : > { %286 = vst [vmem:[%s2980_s8 + $0x220] sm:$0xff] %v285_v4 }
  0x60   : > { %288 = vst [vmem:[%s2980_s8 + $0x228] sm:$0xff] %v287_v5 }
  0x61   : > { %290 = vst [vmem:[%s2980_s8 + $0x230] sm:$0xff] %v289_v6 }
  0x62   : > { %292 = vst [vmem:[%s2980_s8 + $0x238] sm:$0xff] %v291_v7 }
  0x63   : > { %294 = vst [vmem:[%s2980_s8 + $0x240] sm:$0xff] %v293_v8 }
  0x64   : > { %296 = vst [vmem:[%s2980_s8 + $0x248] sm:$0xff] %v295_v9 }
  0x65   : > { %298 = vst [vmem:[%s2980_s8 + $0x250] sm:$0xff] %v297_v10 }
  0x66   : > { %300 = vst [vmem:[%s2980_s8 + $0x258] sm:$0xff] %v299_v11 }
  0x67   : > { %302 = vst [vmem:[%s2980_s8 + $0x260] sm:$0xff] %v301_v12 }
  0x68   : > { %304 = vst [vmem:[%s2980_s8 + $0x268] sm:$0xff] %v303_v13 }
  0x69   : > { %306 = vst [vmem:[%s2980_s8 + $0x270] sm:$0xff] %v305_v14 }
  0x6a   : > { %308 = vst [vmem:[%s2980_s8 + $0x278] sm:$0xff] %v307_v15 }
  0x6b   : > { %310 = vst [vmem:[%s2980_s8 + $0x280] sm:$0xff] %v309_v16 }
  0x6c   : > { %312 = vst [vmem:[%s2980_s8 + $0x288] sm:$0xff] %v311_v17 }
  0x6d   : > { %314 = vst [vmem:[%s2980_s8 + $0x290] sm:$0xff] %v313_v18 }
  0x6e   : > { %316 = vst [vmem:[%s2980_s8 + $0x298] sm:$0xff] %v315_v19 }
  0x6f   : > { %318 = vst [vmem:[%s2980_s8 + $0x2a0] sm:$0xff] %v317_v20 }
  0x70   : > { %320 = vst [vmem:[%s2980_s8 + $0x2a8] sm:$0xff] %v319_v21 }
  0x71   : > { %322 = vst [vmem:[%s2980_s8 + $0x2b0] sm:$0xff] %v321_v22 }
  0x72   : > { %324 = vst [vmem:[%s2980_s8 + $0x2b8] sm:$0xff] %v323_v23 }
  0x73   : > { %326 = vst [vmem:[%s2980_s8 + $0x2c0] sm:$0xff] %v325_v24 }
  0x74   : > { %328 = vst [vmem:[%s2980_s8 + $0x2c8] sm:$0xff] %v327_v25 }
  0x75   : > { %330 = vst [vmem:[%s2980_s8 + $0x2d0] sm:$0xff] %v329_v26 }
  0x76   : > { %332 = vst [vmem:[%s2980_s8 + $0x2d8] sm:$0xff] %v331_v27 }
  0x77   : > { %334 = vst [vmem:[%s2980_s8 + $0x2e0] sm:$0xff] %v333_v28 }
  0x78   : > { %336 = vst [vmem:[%s2980_s8 + $0x2e8] sm:$0xff] %v335_v29 }
  0x79   : > { %338 = vst [vmem:[%s2980_s8 + $0x2f0] sm:$0xff] %v337_v30 }
  0x7a   : > { %340 = vst [vmem:[%s2980_s8 + $0x2f8] sm:$0xff] %v339_v31 }
  0x7b   : > { %342 = vst [vmem:[%s2980_s8 + $0x300] sm:$0xff] %v341_v32 }
  0x7c   : > { %344 = vst [vmem:[%s2980_s8 + $0x308] sm:$0xff] %v343_v33 }
  0x7d   : > { %346 = vst [vmem:[%s2980_s8 + $0x310] sm:$0xff] %v345_v34 }
  0x7e   : > { %348 = vst [vmem:[%s2980_s8 + $0x318] sm:$0xff] %v347_v35 }
  0x7f   : > { %350 = vst [vmem:[%s2980_s8 + $0x320] sm:$0xff] %v349_v36 }
  0x80   : > { %352 = vst [vmem:[%s2980_s8 + $0x328] sm:$0xff] %v351_v37 }
  0x81   : > { %354 = vst [vmem:[%s2980_s8 + $0x330] sm:$0xff] %v353_v38 }
  0x82   : > { %356 = vst [vmem:[%s2980_s8 + $0x338] sm:$0xff] %v355_v39 }
  0x83   : > { %358 = vst [vmem:[%s2980_s8 + $0x340] sm:$0xff] %v357_v40 }
  0x84   : > { %360 = vst [vmem:[%s2980_s8 + $0x348] sm:$0xff] %v359_v41 }
  0x85   : > { %362 = vst [vmem:[%s2980_s8 + $0x350] sm:$0xff] %v361_v42 }
  0x86   : > { %364 = vst [vmem:[%s2980_s8 + $0x358] sm:$0xff] %v363_v43 }
  0x87   : > { %366 = vst [vmem:[%s2980_s8 + $0x360] sm:$0xff] %v365_v44 }
  0x88   : > { %368 = vst [vmem:[%s2980_s8 + $0x368] sm:$0xff] %v367_v45 }
  0x89   : > { %370 = vst [vmem:[%s2980_s8 + $0x370] sm:$0xff] %v369_v46 }
  0x8a   : > { %372 = vst [vmem:[%s2980_s8 + $0x378] sm:$0xff] %v371_v47 }
  0x8b   : > { %374 = vst [vmem:[%s2980_s8 + $0x380] sm:$0xff] %v373_v48 }
  0x8c   : > { %376 = vst [vmem:[%s2980_s8 + $0x388] sm:$0xff] %v375_v49 }
  0x8d   : > { %378 = vst [vmem:[%s2980_s8 + $0x390] sm:$0xff] %v377_v50 }
  0x8e   : > { %380 = vst [vmem:[%s2980_s8 + $0x398] sm:$0xff] %v379_v51 }
  0x8f   : > { %382 = vst [vmem:[%s2980_s8 + $0x3a0] sm:$0xff] %v381_v52 }
  0x90   : > { %384 = vst [vmem:[%s2980_s8 + $0x3a8] sm:$0xff] %v383_v53 }
  0x91   : > { %386 = vst [vmem:[%s2980_s8 + $0x3b0] sm:$0xff] %v385_v54 }
  0x92   : > { %388 = vst [vmem:[%s2980_s8 + $0x3b8] sm:$0xff] %v387_v55 }
  0x93   : > { %390 = vst [vmem:[%s2980_s8 + $0x3c0] sm:$0xff] %v389_v56 }
  0x94   : > { %392 = vst [vmem:[%s2980_s8 + $0x3c8] sm:$0xff] %v391_v57 }
  0x95   : > { %394 = vst [vmem:[%s2980_s8 + $0x3d0] sm:$0xff] %v393_v58 }
  0x96   : > { %396 = vst [vmem:[%s2980_s8 + $0x3d8] sm:$0xff] %v395_v59 }
  0x97   : > { %398 = vst [vmem:[%s2980_s8 + $0x3e0] sm:$0xff] %v397_v60 }
  0x98   : > { %400 = vst [vmem:[%s2980_s8 + $0x3e8] sm:$0xff] %v399_v61 }
  0x99   : > { %402 = vst [vmem:[%s2980_s8 + $0x3f0] sm:$0xff] %v401_v62 }
  0x9a   : > { %404 = vst [vmem:[%s2980_s8 + $0x3f8] sm:$0xff] %v403_v63 }
  0x9b PF: > { %p2037_p11 = scmp.ge.s32.totalorder %s2872_s17, 1  ;;  %p409_p12 = scmp.lt.s32.totalorder %s2872_s17, 9 }
  0x9d   : > { %p410_p13 = pnand %p2037_p11, %p409_p12 }
  0x9e   : > { %s416_s20 = sand.u32 (!%p410_p13), 1, %s2848_s11   ;;  %p441_p0 = scmp.lt.s32.totalorder (!%p410_p13), %s2856_s13, 1 }
  0x9f   : > { %413 = sbr.rel (%p410_p13) target bundleno = 592 (0x250), region = 47  ;;  %s2038_s21 = sshll.u32 (!%p410_p13), %s416_s20, 10 }
  0xa0   : > { %s3238_s22 = scalar_lea.vmem (!%p410_p13), [#allocation2], %s2038_s21  ;;  %s438_s30 = sand.u32 (!%p410_p13), 1, %s2840_s9  }
  0xa1   : > { %s2039_s3 = sshll.u32 (!%p410_p13), %s438_s30, 9 }
  0xa2   : > { %s3535_s9 = scalar_lea.vmem (!%p410_p13), [#allocation3], %s2039_s3 }
  0xa4   : > { %v2300_v0 = vld [vmem:[%s3238_s22 + $0x1c0] sm:$0xf]  ;;  %v2658_v5 = vld [vmem:[%s3238_s22 + $0x1c4] sm:$0xf]  ;;  %s442_s11 = scalar_select %p441_p0, %s2856_s13, 1 }
  0xa5   : > { %v2662_v1 = vld [vmem:[%s3238_s22 + $0x1dc] sm:$0xf0]  ;;  %v2302_v6 = vld [vmem:[%s3238_s22 + $0x1e0] sm:$0xf0]  ;;  %s2587_s4 = sshll.u32 (%p2957_p9), %s2860_s14, 3  ;;  %s2588_s5 = sshll.u32 (%p2957_p9), %s2856_s13, 8 }
  0xa6   : > { %v2556_v2 = vld [vmem:[%s3238_s22 + $0x3c0] sm:$0xf]  ;;  %v2301_v3 = vor.u32 %v2662_v1, %v2300_v0  ;;  %v2305_v8 = vor.u32 %v2658_v5, %v2302_v6  ;;  %v2722_v9 = vld [vmem:[%s3238_s22 + $0x3c4] sm:$0xf]  ;;  %s2593_s23 = sshll.u32 %s442_s11, 6  ;;  %s1801_s6 = sadd.s32 (%p2957_p9), %s2588_s5, %s2587_s4 }
  0xa7   : > { %v2726_v4 = vld [vmem:[%s3238_s22 + $0x3dc] sm:$0xf0]  ;;  %v2558_v10 = vld [vmem:[%s3238_s22 + $0x3e0] sm:$0xf0]  ;;  %s3308_s26 = scalar_lea.vmem %s3832_s0, %s2593_s23  ;;  %s2589_s7 = sshll.u32 (%p2957_p9), %s1801_s6, 3 }
  0xa8   : > { %v2557_v7 = vor.u32 %v2726_v4, %v2556_v2  ;;  %v2268_v11 = vld [vmem:[%s3238_s22 + $0x180] sm:$0xf]  ;;  %1264 = vmatpush.bf16.msra.mxu0 %v2301_v3  ;;  %v2561_v12 = vor.u32 %v2722_v9, %v2558_v10  ;;  %1322 = vmatpush.bf16.msra.mxu2 %v2305_v8  ;;  %v2650_v18 = vld [vmem:[%s3238_s22 + $0x184] sm:$0xf]  ;;  %s3677_s20 = scalar_lea.vmem (%p2957_p9), %s3834_s2, %s2589_s7 }
  0xa9   : > { %v2654_v13 = vld [vmem:[%s3238_s22 + $0x19c] sm:$0xf0]  ;;  %v2270_v19 = vld [vmem:[%s3238_s22 + $0x1a0] sm:$0xf0] }
  0xaa   : > { %v2524_v14 = vld [vmem:[%s3238_s22 + $0x380] sm:$0xf]  ;;  %1293 = vmatpush.bf16.msra.mxu1 %v2557_v7  ;;  %v2269_v16 = vor.u32 %v2654_v13, %v2268_v11  ;;  %v2714_v20 = vld [vmem:[%s3238_s22 + $0x384] sm:$0xf]  ;;  %1351 = vmatpush.bf16.msra.mxu3 %v2561_v12  ;;  %v2273_v21 = vor.u32 %v2650_v18, %v2270_v19 }
  0xab   : > { %v2718_v15 = vld [vmem:[%s3238_s22 + $0x39c] sm:$0xf0]  ;;  %v2526_v22 = vld [vmem:[%s3238_s22 + $0x3a0] sm:$0xf0] }
  0xac   : > { %v2525_v17 = vor.u32 %v2718_v15, %v2524_v14  ;;  %v2236_v23 = vld [vmem:[%s3238_s22 + $0x140] sm:$0xf]  ;;  %v2529_v25 = vor.u32 %v2714_v20, %v2526_v22  ;;  %v2642_v28 = vld [vmem:[%s3238_s22 + $0x144] sm:$0xf]  ;;  %1265 = vmatpush.bf16.msra.mxu0 %v2269_v16  ;;  %1323 = vmatpush.bf16.msra.mxu2 %v2273_v21 }
  0xad   : > { %v2646_v24 = vld [vmem:[%s3238_s22 + $0x15c] sm:$0xf0]  ;;  %v2238_v30 = vld [vmem:[%s3238_s22 + $0x160] sm:$0xf0] }
  0xae   : > { %v2492_v26 = vld [vmem:[%s3238_s22 + $0x340] sm:$0xf]  ;;  %v2237_v29 = vor.u32 %v2646_v24, %v2236_v23  ;;  %v2706_v31 = vld [vmem:[%s3238_s22 + $0x344] sm:$0xf]  ;;  %1294 = vmatpush.bf16.msra.mxu1 %v2525_v17  ;;  %v2241_v34 = vor.u32 %v2642_v28, %v2238_v30  ;;  %1352 = vmatpush.bf16.msra.mxu3 %v2529_v25  ;;  %v2659_v28 = vld [vmem:[%s3238_s22 + $0x1cc] sm:$0xf] }
  0xaf   : > { %v2710_v27 = vld [vmem:[%s3238_s22 + $0x35c] sm:$0xf0]  ;;  %v2494_v32 = vld [vmem:[%s3238_s22 + $0x360] sm:$0xf0]  ;;  %v2723_v30 = vld [vmem:[%s3238_s22 + $0x3cc] sm:$0xf] }
  0xb0   : > { %v2493_v33 = vor.u32 %v2710_v27, %v2492_v26  ;;  %v2204_v35 = vld [vmem:[%s3238_s22 + $0x100] sm:$0xf]  ;;  %v2497_v38 = vor.u32 %v2706_v31, %v2494_v32  ;;  %v2634_v40 = vld [vmem:[%s3238_s22 + $0x104] sm:$0xf]  ;;  %1266 = vmatpush.bf16.msra.mxu0 %v2237_v29  ;;  %1324 = vmatpush.bf16.msra.mxu2 %v2241_v34  ;;  %v2310_v29 = vld [vmem:[%s3238_s22 + $0x1e8] sm:$0xf0] }
  0xb1   : > { %v2638_v36 = vld [vmem:[%s3238_s22 + $0x11c] sm:$0xf0]  ;;  %v2206_v41 = vld [vmem:[%s3238_s22 + $0x120] sm:$0xf0]  ;;  %v2566_v34 = vld [vmem:[%s3238_s22 + $0x3e8] sm:$0xf0] }
  0xb2   : > { %v2460_v37 = vld [vmem:[%s3238_s22 + $0x300] sm:$0xf]  ;;  %v2698_v42 = vld [vmem:[%s3238_s22 + $0x304] sm:$0xf]  ;;  %v2205_v44 = vor.u32 %v2638_v36, %v2204_v35  ;;  %1295 = vmatpush.bf16.msra.mxu1 %v2493_v33  ;;  %v2209_v46 = vor.u32 %v2634_v40, %v2206_v41  ;;  %1353 = vmatpush.bf16.msra.mxu3 %v2497_v38  ;;  %v2595_v33 = vld [vmem:[%s3308_s26 + $0x4] sm:$0xf0]  ;;  %v2313_v40 = vor.u32 %v2659_v28, %v2310_v29 }
  0xb3   : > { %v2702_v39 = vld [vmem:[%s3238_s22 + $0x31c] sm:$0xf0]  ;;  %v2462_v43 = vld [vmem:[%s3238_s22 + $0x320] sm:$0xf0]  ;;  %v2046_v38 = vld [vmem:[%s3308_s26 + $0x8] sm:$0xf0] }
  0xb4   : > { %v2461_v45 = vor.u32 %v2702_v39, %v2460_v37  ;;  %v2172_v47 = vld [vmem:[%s3238_s22 + $0xc0] sm:$0xf]  ;;  %v2465_v50 = vor.u32 %v2698_v42, %v2462_v43  ;;  %v2626_v52 = vld [vmem:[%s3238_s22 + $0xc4] sm:$0xf]  ;;  %1267 = vmatpush.bf16.msra.mxu0 %v2205_v44  ;;  %1325 = vmatpush.bf16.msra.mxu2 %v2209_v46  ;;  %v2308_v41 = vld [vmem:[%s3238_s22 + $0x1c8] sm:$0xf] }
  0xb5   : > { %v2630_v48 = vld [vmem:[%s3238_s22 + $0xdc] sm:$0xf0]  ;;  %v2174_v53 = vld [vmem:[%s3238_s22 + $0xe0] sm:$0xf0]  ;;  %v2663_v42 = vld [vmem:[%s3238_s22 + $0x1e4] sm:$0xf0] }
  0xb6   : > { %v2428_v49 = vld [vmem:[%s3238_s22 + $0x2c0] sm:$0xf]  ;;  %v2690_v54 = vld [vmem:[%s3238_s22 + $0x2c4] sm:$0xf]  ;;  %v2173_v56 = vor.u32 %v2630_v48, %v2172_v47  ;;  %1296 = vmatpush.bf16.msra.mxu1 %v2461_v45  ;;  %v2177_v58 = vor.u32 %v2626_v52, %v2174_v53  ;;  %1354 = vmatpush.bf16.msra.mxu3 %v2465_v50  ;;  %v2564_v43 = vld [vmem:[%s3238_s22 + $0x3c8] sm:$0xf]  ;;  %v2569_v45 = vor.u32 %v2723_v30, %v2566_v34 }
  0xb7   : > { %v2694_v51 = vld [vmem:[%s3238_s22 + $0x2dc] sm:$0xf0]  ;;  %v2430_v55 = vld [vmem:[%s3238_s22 + $0x2e0] sm:$0xf0]  ;;  %v2727_v46 = vld [vmem:[%s3238_s22 + $0x3e4] sm:$0xf0]  ;;  %v2309_v52 = vor.u32 %v2663_v42, %v2308_v41 }
  0xb8   : > { %v2429_v57 = vor.u32 %v2694_v51, %v2428_v49  ;;  %v2140_v59 = vld [vmem:[%s3238_s22 + $0x80] sm:$0xf]  ;;  %v2433_v62 = vor.u32 %v2690_v54, %v2430_v55  ;;  %v2618_v0 = vld [vmem:[%s3238_s22 + $0x84] sm:$0xf]  ;;  %1268 = vmatpush.bf16.msra.mxu0 %v2173_v56  ;;  %1326 = vmatpush.bf16.msra.mxu2 %v2177_v58  ;;  %v2651_v47 = vld [vmem:[%s3238_s22 + $0x18c] sm:$0xf]  ;;  %v2565_v53 = vor.u32 %v2727_v46, %v2564_v43 }
  0xb9   : > { %v2622_v60 = vld [vmem:[%s3238_s22 + $0x9c] sm:$0xf0]  ;;  %v2142_v1 = vld [vmem:[%s3238_s22 + $0xa0] sm:$0xf0]  ;;  %v2278_v48 = vld [vmem:[%s3238_s22 + $0x1a8] sm:$0xf0] }
  0xba   : > { %v2396_v61 = vld [vmem:[%s3238_s22 + $0x280] sm:$0xf]  ;;  %v2682_v2 = vld [vmem:[%s3238_s22 + $0x284] sm:$0xf]  ;;  %v2141_v4 = vor.u32 %v2622_v60, %v2140_v59  ;;  %1297 = vmatpush.bf16.msra.mxu1 %v2429_v57  ;;  %v2145_v7 = vor.u32 %v2618_v0, %v2142_v1  ;;  %1355 = vmatpush.bf16.msra.mxu3 %v2433_v62  ;;  %v2715_v50 = vld [vmem:[%s3238_s22 + $0x38c] sm:$0xf]  ;;  %v2281_v54 = vor.u32 %v2651_v47, %v2278_v48 }
  0xbb   : > { %v2686_v63 = vld [vmem:[%s3238_s22 + $0x29c] sm:$0xf0]  ;;  %v2398_v3 = vld [vmem:[%s3238_s22 + $0x2a0] sm:$0xf0]  ;;  %v2534_v51 = vld [vmem:[%s3238_s22 + $0x3a8] sm:$0xf0] }
  0xbc   : > { %v2108_v5 = vld [vmem:[%s3238_s22 + $0x40] sm:$0xf]  ;;  %v2397_v6 = vor.u32 %v2686_v63, %v2396_v61  ;;  %v2401_v11 = vor.u32 %v2682_v2, %v2398_v3  ;;  %v2610_v12 = vld [vmem:[%s3238_s22 + $0x44] sm:$0xf]  ;;  %1269 = vmatpush.bf16.msra.mxu0 %v2141_v4  ;;  %1327 = vmatpush.bf16.msra.mxu2 %v2145_v7  ;;  %v2276_v55 = vld [vmem:[%s3238_s22 + $0x188] sm:$0xf]  ;;  %v2537_v58 = vor.u32 %v2715_v50, %v2534_v51 }
  0xbd   : > { %v2614_v8 = vld [vmem:[%s3238_s22 + $0x5c] sm:$0xf0]  ;;  %v2110_v13 = vld [vmem:[%s3238_s22 + $0x60] sm:$0xf0]  ;;  %v2655_v56 = vld [vmem:[%s3238_s22 + $0x1a4] sm:$0xf0] }
  0xbe   : > { %v2364_v9 = vld [vmem:[%s3238_s22 + $0x240] sm:$0xf]  ;;  %v2674_v14 = vld [vmem:[%s3238_s22 + $0x244] sm:$0xf]  ;;  %v2109_v16 = vor.u32 %v2614_v8, %v2108_v5  ;;  %1298 = vmatpush.bf16.msra.mxu1 %v2397_v6  ;;  %v2113_v20 = vor.u32 %v2610_v12, %v2110_v13  ;;  %1356 = vmatpush.bf16.msra.mxu3 %v2401_v11  ;;  %v2532_v57 = vld [vmem:[%s3238_s22 + $0x388] sm:$0xf]  ;;  %v2277_v0 = vor.u32 %v2655_v56, %v2276_v55 }
  0xbf   : > { %v2678_v10 = vld [vmem:[%s3238_s22 + $0x25c] sm:$0xf0]  ;;  %v2366_v15 = vld [vmem:[%s3238_s22 + $0x260] sm:$0xf0]  ;;  %v2719_v59 = vld [vmem:[%s3238_s22 + $0x3a4] sm:$0xf0] }
  0xc0   : > { %v2076_v17 = vld [vmem:[%s3238_s22] sm:$0xf]  ;;  %v2365_v19 = vor.u32 %v2678_v10, %v2364_v9  ;;  %v2602_v23 = vld [vmem:[%s3238_s22 + $0x4] sm:$0xf]  ;;  %v2369_v24 = vor.u32 %v2674_v14, %v2366_v15  ;;  %1270 = vmatpush.bf16.msra.mxu0 %v2109_v16  ;;  %1328 = vmatpush.bf16.msra.mxu2 %v2113_v20  ;;  %v2643_v60 = vld [vmem:[%s3238_s22 + $0x14c] sm:$0xf]  ;;  %v2533_v1 = vor.u32 %v2719_v59, %v2532_v57 }
  0xc1   : > { %v2606_v18 = vld [vmem:[%s3238_s22 + $0x1c] sm:$0xf0]  ;;  %v2078_v25 = vld [vmem:[%s3238_s22 + $0x20] sm:$0xf0]  ;;  %v2246_v61 = vld [vmem:[%s3238_s22 + $0x168] sm:$0xf0] }
  0xc2   : > { %v2332_v21 = vld [vmem:[%s3238_s22 + $0x200] sm:$0xf]  ;;  %v2666_v26 = vld [vmem:[%s3238_s22 + $0x204] sm:$0xf]  ;;  %v2077_v31 = vor.u32 %v2606_v18, %v2076_v17  ;;  %1299 = vmatpush.bf16.msra.mxu1 %v2365_v19  ;;  %v2081_v36 = vor.u32 %v2602_v23, %v2078_v25  ;;  %1357 = vmatpush.bf16.msra.mxu3 %v2369_v24  ;;  %v2707_v62 = vld [vmem:[%s3238_s22 + $0x34c] sm:$0xf]  ;;  %v2249_v2 = vor.u32 %v2643_v60, %v2246_v61 }
  0xc3   : > { %v2670_v22 = vld [vmem:[%s3238_s22 + $0x21c] sm:$0xf0]  ;;  %v2334_v27 = vld [vmem:[%s3238_s22 + $0x220] sm:$0xf0]  ;;  %v2502_v63 = vld [vmem:[%s3238_s22 + $0x368] sm:$0xf0] }
  0xc4   : > { %v2044_v32 = vld [vmem:[%s3308_s26] sm:$0xf]  ;;  %v2333_v35 = vor.u32 %v2670_v22, %v2332_v21  ;;  %v2594_v37 = vld [vmem:[%s3308_s26 + $0x4] sm:$0xf]  ;;  %v2337_v39 = vor.u32 %v2666_v26, %v2334_v27  ;;  %1271 = vmatpush.bf16.msra.mxu0 %v2077_v31  ;;  %1329 = vmatpush.bf16.msra.mxu2 %v2081_v36  ;;  %v2244_v3 = vld [vmem:[%s3238_s22 + $0x148] sm:$0xf]  ;;  %v2505_v6 = vor.u32 %v2707_v62, %v2502_v63 }
  0xc5   : > { %v3324_v44 = vor.u32 %v2595_v33, %v2044_v32  ;;  %v3329_v49 = vor.u32 %v2594_v37, %v2046_v38  ;;  %v2647_v4 = vld [vmem:[%s3238_s22 + $0x164] sm:$0xf0]  ;;  %v2635_v8 = vld [vmem:[%s3238_s22 + $0x10c] sm:$0xf]  ;;  %v2052_v13 = vld [vmem:[%s3308_s26 + $0x10] sm:$0xf] }
  0xc6   : > { %1300 = vmatpush.bf16.msra.mxu1 %v2333_v35  ;;  %1358 = vmatpush.bf16.msra.mxu3 %v2337_v39  ;;  %v2500_v5 = vld [vmem:[%s3238_s22 + $0x348] sm:$0xf]  ;;  %v2214_v9 = vld [vmem:[%s3238_s22 + $0x128] sm:$0xf0]  ;;  %v2245_v12 = vor.u32 %v2647_v4, %v2244_v3  ;;  %v2597_v23 = vld [vmem:[%s3308_s26 + $0x14] sm:$0xf0] }
  0xc7   : > { %1272 = vmatmul.bf16.vlgmr.msra.gmra.mxu0 %v3324_v44  ;;  %1330 = vmatmul.bf16.vlgmr.msra.gmra.mxu2 %v3324_v44  ;;  %v2711_v7 = vld [vmem:[%s3238_s22 + $0x364] sm:$0xf0]  ;;  %v2699_v10 = vld [vmem:[%s3238_s22 + $0x30c] sm:$0xf]  ;;  %v2217_v15 = vor.u32 %v2635_v8, %v2214_v9  ;;  %v2596_v26 = vld [vmem:[%s3308_s26 + $0x14] sm:$0xf]  ;;  %v3368_v34 = vor.u32 %v2597_v23, %v2052_v13 }
  0xc8   : > { %1438 = vmatpush.bf16.msrb.mxu2 %v2313_v40  ;;  %1380 = vmatpush.bf16.msrb.mxu0 %v2309_v52  ;;  %v2470_v11 = vld [vmem:[%s3238_s22 + $0x328] sm:$0xf0]  ;;  %v2501_v14 = vor.u32 %v2711_v7, %v2500_v5  ;;  %v2212_v16 = vld [vmem:[%s3238_s22 + $0x108] sm:$0xf]  ;;  %v2054_v27 = vld [vmem:[%s3308_s26 + $0x18] sm:$0xf0] }
  0xc9   : > { %1301 = vmatmul.bf16.vlgmr.msra.gmra.mxu1 %v3329_v49  ;;  %1359 = vmatmul.bf16.vlgmr.msra.gmra.mxu3 %v3329_v49  ;;  %v2639_v17 = vld [vmem:[%s3238_s22 + $0x124] sm:$0xf0]  ;;  %v2473_v19 = vor.u32 %v2699_v10, %v2470_v11  ;;  %v2627_v21 = vld [vmem:[%s3238_s22 + $0xcc] sm:$0xf]  ;;  %v3373_v39 = vor.u32 %v2596_v26, %v2054_v27  ;;  %v2664_v26 = vld [vmem:[%s3238_s22 + $0x1ec] sm:$0xf0] }
  0xca   : > { %1467 = vmatpush.bf16.msrb.mxu3 %v2569_v45  ;;  %1409 = vmatpush.bf16.msrb.mxu1 %v2565_v53  ;;  %v2468_v18 = vld [vmem:[%s3238_s22 + $0x308] sm:$0xf]  ;;  %v2182_v22 = vld [vmem:[%s3238_s22 + $0xe8] sm:$0xf0]  ;;  %v2213_v28 = vor.u32 %v2639_v17, %v2212_v16 }
  0xcb   : > { %v2703_v20 = vld [vmem:[%s3238_s22 + $0x324] sm:$0xf0]  ;;  %v2691_v24 = vld [vmem:[%s3238_s22 + $0x2cc] sm:$0xf]  ;;  %v2185_v30 = vor.u32 %v2627_v21, %v2182_v22  ;;  %v2318_v21 = vld [vmem:[%s3238_s22 + $0x1f0] sm:$0xf0] }
  0xcc   : > { %1439 = vmatpush.bf16.msrb.mxu2 %v2281_v54  ;;  %1381 = vmatpush.bf16.msrb.mxu0 %v2277_v0  ;;  %v2438_v25 = vld [vmem:[%s3238_s22 + $0x2e8] sm:$0xf0]  ;;  %v2469_v29 = vor.u32 %v2703_v20, %v2468_v18  ;;  %v2180_v31 = vld [vmem:[%s3238_s22 + $0xc8] sm:$0xf]  ;;  %v2660_v20 = vld [vmem:[%s3238_s22 + $0x1d4] sm:$0xf] }
  0xcd   : > { %v2631_v32 = vld [vmem:[%s3238_s22 + $0xe4] sm:$0xf0]  ;;  %v2441_v35 = vor.u32 %v2691_v24, %v2438_v25  ;;  %v2619_v37 = vld [vmem:[%s3238_s22 + $0x8c] sm:$0xf]  ;;  %v2724_v22 = vld [vmem:[%s3238_s22 + $0x3d4] sm:$0xf]  ;;  %v2321_v23 = vor.u32 %v2660_v20, %v2318_v21 }
  0xce   : > { %1468 = vmatpush.bf16.msrb.mxu3 %v2537_v58  ;;  %1410 = vmatpush.bf16.msrb.mxu1 %v2533_v1  ;;  %v2436_v33 = vld [vmem:[%s3238_s22 + $0x2c8] sm:$0xf]  ;;  %v2150_v38 = vld [vmem:[%s3238_s22 + $0xa8] sm:$0xf0]  ;;  %v2181_v42 = vor.u32 %v2631_v32, %v2180_v31  ;;  %v2574_v24 = vld [vmem:[%s3238_s22 + $0x3f0] sm:$0xf0] }
  0xcf   : > { %v2695_v36 = vld [vmem:[%s3238_s22 + $0x2e4] sm:$0xf0]  ;;  %v2683_v40 = vld [vmem:[%s3238_s22 + $0x28c] sm:$0xf]  ;;  %v2153_v45 = vor.u32 %v2619_v37, %v2150_v38  ;;  %v2316_v25 = vld [vmem:[%s3238_s22 + $0x1d0] sm:$0xf]  ;;  %v2577_v27 = vor.u32 %v2724_v22, %v2574_v24 }
  0xd0   : > { %1440 = vmatpush.bf16.msrb.mxu2 %v2249_v2  ;;  %1382 = vmatpush.bf16.msrb.mxu0 %v2245_v12  ;;  %v2406_v41 = vld [vmem:[%s3238_s22 + $0x2a8] sm:$0xf0]  ;;  %v2437_v43 = vor.u32 %v2695_v36, %v2436_v33  ;;  %v2148_v46 = vld [vmem:[%s3238_s22 + $0x88] sm:$0xf]  ;;  %v2060_v12 = vld [vmem:[%s3308_s26 + $0x20] sm:$0xf] }
  0xd1   : > { %v2623_v47 = vld [vmem:[%s3238_s22 + $0xa4] sm:$0xf0]  ;;  %v2409_v48 = vor.u32 %v2683_v40, %v2406_v41  ;;  %v2611_v53 = vld [vmem:[%s3238_s22 + $0x4c] sm:$0xf]  ;;  %v2652_v31 = vld [vmem:[%s3238_s22 + $0x194] sm:$0xf] }
  0xd2   : > { %1469 = vmatpush.bf16.msrb.mxu3 %v2505_v6  ;;  %1411 = vmatpush.bf16.msrb.mxu1 %v2501_v14  ;;  %v2404_v50 = vld [vmem:[%s3238_s22 + $0x288] sm:$0xf]  ;;  %v2149_v52 = vor.u32 %v2623_v47, %v2148_v46  ;;  %v2118_v54 = vld [vmem:[%s3238_s22 + $0x68] sm:$0xf0]  ;;  %v2598_v14 = vld [vmem:[%s3308_s26 + $0x24] sm:$0xf] }
  0xd3   : > { %v2687_v51 = vld [vmem:[%s3238_s22 + $0x2a4] sm:$0xf0]  ;;  %v2675_v55 = vld [vmem:[%s3238_s22 + $0x24c] sm:$0xf]  ;;  %v2121_v57 = vor.u32 %v2611_v53, %v2118_v54  ;;  %v2286_v33 = vld [vmem:[%s3238_s22 + $0x1b0] sm:$0xf0] }
  0xd4   : > { %1441 = vmatpush.bf16.msrb.mxu2 %v2217_v15  ;;  %1383 = vmatpush.bf16.msrb.mxu0 %v2213_v28  ;;  %v2405_v56 = vor.u32 %v2687_v51, %v2404_v50  ;;  %v2374_v58 = vld [vmem:[%s3238_s22 + $0x268] sm:$0xf0]  ;;  %v2116_v59 = vld [vmem:[%s3238_s22 + $0x48] sm:$0xf]  ;;  %v2317_v28 = vor.u32 %v2664_v26, %v2316_v25  ;;  %v2542_v36 = vld [vmem:[%s3238_s22 + $0x3b0] sm:$0xf0]  ;;  %v2289_v37 = vor.u32 %v2652_v31, %v2286_v33 }
  0xd5   : > { %v2615_v60 = vld [vmem:[%s3238_s22 + $0x64] sm:$0xf0]  ;;  %v2377_v61 = vor.u32 %v2675_v55, %v2374_v58  ;;  %v2603_v0 = vld [vmem:[%s3238_s22 + $0xc] sm:$0xf]  ;;  %v2284_v40 = vld [vmem:[%s3238_s22 + $0x190] sm:$0xf] }
  0xd6   : > { %1470 = vmatpush.bf16.msrb.mxu3 %v2473_v19  ;;  %1412 = vmatpush.bf16.msrb.mxu1 %v2469_v29  ;;  %v2372_v62 = vld [vmem:[%s3238_s22 + $0x248] sm:$0xf]  ;;  %v2086_v1 = vld [vmem:[%s3238_s22 + $0x28] sm:$0xf0]  ;;  %v2117_v4 = vor.u32 %v2615_v60, %v2116_v59  ;;  %v2572_v29 = vld [vmem:[%s3238_s22 + $0x3d0] sm:$0xf] }
  0xd7   : > { %1277 = vmatmul.bf16.gmra.mxu0 %v3368_v34  ;;  %1335 = vmatmul.bf16.gmra.mxu2 %v3368_v34  ;;  %v2679_v63 = vld [vmem:[%s3238_s22 + $0x264] sm:$0xf0]  ;;  %v2667_v2 = vld [vmem:[%s3238_s22 + $0x20c] sm:$0xf]  ;;  %v2089_v6 = vor.u32 %v2603_v0, %v2086_v1  ;;  %v2656_v41 = vld [vmem:[%s3238_s22 + $0x1ac] sm:$0xf0] }
  0xd8   : > { %1442 = vmatpush.bf16.msrb.mxu2 %v2185_v30  ;;  %1384 = vmatpush.bf16.msrb.mxu0 %v2181_v42  ;;  %v2342_v3 = vld [vmem:[%s3238_s22 + $0x228] sm:$0xf0]  ;;  %v2373_v5 = vor.u32 %v2679_v63, %v2372_v62  ;;  %v2084_v7 = vld [vmem:[%s3238_s22 + $0x8] sm:$0xf]  ;;  %v2728_v30 = vld [vmem:[%s3238_s22 + $0x3ec] sm:$0xf0] }
  0xd9   : > { %1306 = vmatmul.bf16.gmra.mxu1 %v3373_v39  ;;  %1364 = vmatmul.bf16.gmra.mxu3 %v3373_v39  ;;  %v2607_v8 = vld [vmem:[%s3238_s22 + $0x24] sm:$0xf0]  ;;  %v2345_v9 = vor.u32 %v2667_v2, %v2342_v3  ;;  %v2062_v15 = vld [vmem:[%s3308_s26 + $0x28] sm:$0xf0]  ;;  %v2573_v32 = vor.u32 %v2728_v30, %v2572_v29  ;;  %v2540_v42 = vld [vmem:[%s3238_s22 + $0x390] sm:$0xf] }
  0xda   : > { %1471 = vmatpush.bf16.msrb.mxu3 %v2441_v35  ;;  %1413 = vmatpush.bf16.msrb.mxu1 %v2437_v43  ;;  %v2340_v10 = vld [vmem:[%s3238_s22 + $0x208] sm:$0xf]  ;;  %v2085_v16 = vor.u32 %v2607_v8, %v2084_v7  ;;  %v3407_v19 = vor.u32 %v2598_v14, %v2062_v15  ;;  %v2716_v35 = vld [vmem:[%s3238_s22 + $0x394] sm:$0xf]  ;;  %v2285_v43 = vor.u32 %v2656_v41, %v2284_v40  ;;  %v2068_v47 = vld [vmem:[%s3308_s26 + $0x30] sm:$0xf] }
  0xdb   : > { %v2671_v11 = vld [vmem:[%s3238_s22 + $0x224] sm:$0xf0]  ;;  %v2545_v38 = vor.u32 %v2716_v35, %v2542_v36  ;;  %v2600_v50 = vld [vmem:[%s3308_s26 + $0x34] sm:$0xf]  ;;  %v2070_v51 = vld [vmem:[%s3308_s26 + $0x38] sm:$0xf0] }
  0xdc   : > { %1443 = vmatpush.bf16.msrb.mxu2 %v2153_v45  ;;  %1385 = vmatpush.bf16.msrb.mxu0 %v2149_v52  ;;  %v2599_v13 = vld [vmem:[%s3308_s26 + $0x24] sm:$0xf0]  ;;  %v2341_v17 = vor.u32 %v2671_v11, %v2340_v10  ;;  %v2720_v45 = vld [vmem:[%s3238_s22 + $0x3ac] sm:$0xf0]  ;;  %v3435_v53 = vor.u32 %v2600_v50, %v2070_v51  ;;  %v2644_v54 = vld [vmem:[%s3238_s22 + $0x154] sm:$0xf] }
  0xdd   : > { %v3405_v18 = vor.u32 %v2599_v13, %v2060_v12  ;;  %v2541_v46 = vor.u32 %v2720_v45, %v2540_v42  ;;  %v2254_v55 = vld [vmem:[%s3238_s22 + $0x170] sm:$0xf0]  ;;  %v2252_v59 = vld [vmem:[%s3238_s22 + $0x150] sm:$0xf] }
  0xde   : > { %1472 = vmatpush.bf16.msrb.mxu3 %v2409_v48  ;;  %1414 = vmatpush.bf16.msrb.mxu1 %v2405_v56  ;;  %v2601_v48 = vld [vmem:[%s3308_s26 + $0x34] sm:$0xf0]  ;;  %v2708_v56 = vld [vmem:[%s3238_s22 + $0x354] sm:$0xf]  ;;  %v2648_v60 = vld [vmem:[%s3238_s22 + $0x16c] sm:$0xf0] }
  0xdf   : > { %v3433_v52 = vor.u32 %v2601_v48, %v2068_v47  ;;  %v2510_v58 = vld [vmem:[%s3238_s22 + $0x370] sm:$0xf0]  ;;  %v2253_v62 = vor.u32 %v2648_v60, %v2252_v59  ;;  %v2508_v63 = vld [vmem:[%s3238_s22 + $0x350] sm:$0xf] }
  0xe0   : > { %1444 = vmatpush.bf16.msrb.mxu2 %v2121_v57  ;;  %1386 = vmatpush.bf16.msrb.mxu0 %v2117_v4  ;;  %v2257_v57 = vor.u32 %v2644_v54, %v2254_v55  ;;  %v2712_v0 = vld [vmem:[%s3238_s22 + $0x36c] sm:$0xf0]  ;;  %v2636_v1 = vld [vmem:[%s3238_s22 + $0x114] sm:$0xf] }
  0xe1   : > { %v2509_v2 = vor.u32 %v2712_v0, %v2508_v63  ;;  %v2222_v3 = vld [vmem:[%s3238_s22 + $0x130] sm:$0xf0]  ;;  %v2220_v8 = vld [vmem:[%s3238_s22 + $0x110] sm:$0xf] }
  0xe2   : > { %1473 = vmatpush.bf16.msrb.mxu3 %v2377_v61  ;;  %1415 = vmatpush.bf16.msrb.mxu1 %v2373_v5  ;;  %v2513_v61 = vor.u32 %v2708_v56, %v2510_v58  ;;  %v2700_v4 = vld [vmem:[%s3238_s22 + $0x314] sm:$0xf]  ;;  %v2476_v10 = vld [vmem:[%s3238_s22 + $0x310] sm:$0xf] }
  0xe3   : > { %v2478_v5 = vld [vmem:[%s3238_s22 + $0x330] sm:$0xf0]  ;;  %v2704_v12 = vld [vmem:[%s3238_s22 + $0x32c] sm:$0xf0] }
  0xe4   : > { %1445 = vmatpush.bf16.msrb.mxu2 %v2089_v6  ;;  %1387 = vmatpush.bf16.msrb.mxu0 %v2085_v16  ;;  %v2225_v6 = vor.u32 %v2636_v1, %v2222_v3  ;;  %v2481_v7 = vor.u32 %v2700_v4, %v2478_v5  ;;  %v2477_v13 = vor.u32 %v2704_v12, %v2476_v10  ;;  %v2628_v14 = vld [vmem:[%s3238_s22 + $0xd4] sm:$0xf]  ;;  %v2188_v21 = vld [vmem:[%s3238_s22 + $0xd0] sm:$0xf]  ;;  %v2582_v10 = vld [vmem:[%s3238_s22 + $0x3f8] sm:$0xf0] }
  0xe5   : > { %v2190_v15 = vld [vmem:[%s3238_s22 + $0xf0] sm:$0xf0]  ;;  %v2632_v22 = vld [vmem:[%s3238_s22 + $0xec] sm:$0xf0]  ;;  %v2324_v12 = vld [vmem:[%s3238_s22 + $0x1d8] sm:$0xf] }
  0xe6   : > { %1474 = vmatpush.bf16.msrb.mxu3 %v2345_v9  ;;  %1416 = vmatpush.bf16.msrb.mxu1 %v2341_v17  ;;  %v2640_v9 = vld [vmem:[%s3238_s22 + $0x12c] sm:$0xf0]  ;;  %v2692_v16 = vld [vmem:[%s3238_s22 + $0x2d4] sm:$0xf]  ;;  %v2193_v17 = vor.u32 %v2628_v14, %v2190_v15  ;;  %v2189_v24 = vor.u32 %v2632_v22, %v2188_v21  ;;  %v2580_v14 = vld [vmem:[%s3238_s22 + $0x3d8] sm:$0xf] }
  0xe7   : > { %1282 = vmatmul.bf16.gmra.mxu0 %v3405_v18  ;;  %1340 = vmatmul.bf16.gmra.mxu2 %v3405_v18  ;;  %v2221_v11 = vor.u32 %v2640_v9, %v2220_v8  ;;  %v2446_v20 = vld [vmem:[%s3238_s22 + $0x2f0] sm:$0xf0]  ;;  %v2444_v25 = vld [vmem:[%s3238_s22 + $0x2d0] sm:$0xf]  ;;  %v2725_v8 = vld [vmem:[%s3238_s22 + $0x3dc] sm:$0xf] }
  0xe8   : > { %1554 = vmatpush.bf16.msra.mxu2 %v2321_v23  ;;  %1496 = vmatpush.bf16.msra.mxu0 %v2317_v28  ;;  %v2449_v23 = vor.u32 %v2692_v16, %v2446_v20  ;;  %v2696_v26 = vld [vmem:[%s3238_s22 + $0x2ec] sm:$0xf0]  ;;  %v2158_v29 = vld [vmem:[%s3238_s22 + $0xb0] sm:$0xf0]  ;;  %v2729_v16 = vld [vmem:[%s3238_s22 + $0x3f4] sm:$0xf0] }
  0xe9   : > { %1311 = vmatmul.bf16.gmra.mxu1 %v3407_v19  ;;  %1369 = vmatmul.bf16.gmra.mxu3 %v3407_v19  ;;  %v2445_v28 = vor.u32 %v2696_v26, %v2444_v25  ;;  %v2684_v30 = vld [vmem:[%s3238_s22 + $0x294] sm:$0xf]  ;;  %v2156_v35 = vld [vmem:[%s3238_s22 + $0x90] sm:$0xf]  ;;  %v2294_v20 = vld [vmem:[%s3238_s22 + $0x1b8] sm:$0xf0]  ;;  %v2581_v21 = vor.u32 %v2729_v16, %v2580_v14 }
  0xea   : > { %1583 = vmatpush.bf16.msra.mxu3 %v2577_v27  ;;  %1525 = vmatpush.bf16.msra.mxu1 %v2573_v32  ;;  %v2620_v27 = vld [vmem:[%s3238_s22 + $0x94] sm:$0xf]  ;;  %v2624_v36 = vld [vmem:[%s3238_s22 + $0xac] sm:$0xf0]  ;;  %v2292_v26 = vld [vmem:[%s3238_s22 + $0x198] sm:$0xf] }
  0xeb   : > { %v2414_v31 = vld [vmem:[%s3238_s22 + $0x2b0] sm:$0xf0]  ;;  %v2161_v32 = vor.u32 %v2620_v27, %v2158_v29  ;;  %v2688_v40 = vld [vmem:[%s3238_s22 + $0x2ac] sm:$0xf0]  ;;  %v2657_v27 = vld [vmem:[%s3238_s22 + $0x1b4] sm:$0xf0] }
  0xec   : > { %1555 = vmatpush.bf16.msra.mxu2 %v2289_v37  ;;  %1497 = vmatpush.bf16.msra.mxu0 %v2285_v43  ;;  %v2417_v33 = vor.u32 %v2684_v30, %v2414_v31  ;;  %v2412_v37 = vld [vmem:[%s3238_s22 + $0x290] sm:$0xf]  ;;  %v2612_v42 = vld [vmem:[%s3238_s22 + $0x54] sm:$0xf]  ;;  %v2293_v29 = vor.u32 %v2657_v27, %v2292_v26  ;;  %v2721_v30 = vld [vmem:[%s3238_s22 + $0x3b4] sm:$0xf0] }
  0xed   : > { %v2413_v41 = vor.u32 %v2688_v40, %v2412_v37  ;;  %v2126_v43 = vld [vmem:[%s3238_s22 + $0x70] sm:$0xf0]  ;;  %v2124_v48 = vld [vmem:[%s3238_s22 + $0x50] sm:$0xf]  ;;  %v2645_v31 = vld [vmem:[%s3238_s22 + $0x15c] sm:$0xf] }
  0xee   : > { %1584 = vmatpush.bf16.msra.mxu3 %v2545_v38  ;;  %1526 = vmatpush.bf16.msra.mxu1 %v2541_v46  ;;  %v2157_v38 = vor.u32 %v2624_v36, %v2156_v35  ;;  %v2676_v45 = vld [vmem:[%s3238_s22 + $0x254] sm:$0xf]  ;;  %v2129_v46 = vor.u32 %v2612_v42, %v2126_v43  ;;  %v2616_v50 = vld [vmem:[%s3238_s22 + $0x6c] sm:$0xf0]  ;;  %v2709_v36 = vld [vmem:[%s3238_s22 + $0x35c] sm:$0xf] }
  0xef   : > { %v2382_v47 = vld [vmem:[%s3238_s22 + $0x270] sm:$0xf0]  ;;  %v2125_v54 = vor.u32 %v2616_v50, %v2124_v48  ;;  %v2380_v55 = vld [vmem:[%s3238_s22 + $0x250] sm:$0xf]  ;;  %v2518_v37 = vld [vmem:[%s3238_s22 + $0x378] sm:$0xf0] }
  0xf0   : > { %1556 = vmatpush.bf16.msra.mxu2 %v2257_v57  ;;  %1498 = vmatpush.bf16.msra.mxu0 %v2253_v62  ;;  %v2385_v51 = vor.u32 %v2676_v45, %v2382_v47  ;;  %v2680_v56 = vld [vmem:[%s3238_s22 + $0x26c] sm:$0xf0]  ;;  %v2604_v57 = vld [vmem:[%s3238_s22 + $0x14] sm:$0xf]  ;;  %v2260_v40 = vld [vmem:[%s3238_s22 + $0x158] sm:$0xf] }
  0xf1   : > { %v2381_v58 = vor.u32 %v2680_v56, %v2380_v55  ;;  %v2094_v59 = vld [vmem:[%s3238_s22 + $0x30] sm:$0xf0]  ;;  %v2092_v0 = vld [vmem:[%s3238_s22 + $0x10] sm:$0xf]  ;;  %v2516_v42 = vld [vmem:[%s3238_s22 + $0x358] sm:$0xf] }
  0xf2   : > { %1585 = vmatpush.bf16.msra.mxu3 %v2513_v61  ;;  %1527 = vmatpush.bf16.msra.mxu1 %v2509_v2  ;;  %v2668_v60 = vld [vmem:[%s3238_s22 + $0x214] sm:$0xf]  ;;  %v2097_v62 = vor.u32 %v2604_v57, %v2094_v59  ;;  %v2608_v1 = vld [vmem:[%s3238_s22 + $0x2c] sm:$0xf0]  ;;  %v2713_v45 = vld [vmem:[%s3238_s22 + $0x374] sm:$0xf0] }
  0xf3   : > { %v2350_v61 = vld [vmem:[%s3238_s22 + $0x230] sm:$0xf0]  ;;  %v2348_v2 = vld [vmem:[%s3238_s22 + $0x210] sm:$0xf]  ;;  %v2093_v3 = vor.u32 %v2608_v1, %v2092_v0  ;;  %v2230_v47 = vld [vmem:[%s3238_s22 + $0x138] sm:$0xf0]  ;;  %v2517_v48 = vor.u32 %v2713_v45, %v2516_v42 }
  0xf4   : > { %1557 = vmatpush.bf16.msra.mxu2 %v2225_v6  ;;  %1499 = vmatpush.bf16.msra.mxu0 %v2221_v11  ;;  %v2353_v63 = vor.u32 %v2668_v60, %v2350_v61  ;;  %v2672_v4 = vld [vmem:[%s3238_s22 + $0x22c] sm:$0xf0]  ;;  %v2661_v6 = vld [vmem:[%s3238_s22 + $0x1dc] sm:$0xf]  ;;  %v2585_v11 = vor.u32 %v2725_v8, %v2582_v10  ;;  %v2228_v59 = vld [vmem:[%s3238_s22 + $0x118] sm:$0xf] }
  0xf5   : > { %v2349_v5 = vor.u32 %v2672_v4, %v2348_v2  ;;  %v2641_v60 = vld [vmem:[%s3238_s22 + $0x134] sm:$0xf0]  ;;  %v2629_v0 = vld [vmem:[%s3238_s22 + $0xdc] sm:$0xf] }
  0xf6   : > { %1586 = vmatpush.bf16.msra.mxu3 %v2481_v7  ;;  %1528 = vmatpush.bf16.msra.mxu1 %v2477_v13  ;;  %v2326_v7 = vld [vmem:[%s3238_s22 + $0x1f8] sm:$0xf0]  ;;  %v2665_v13 = vld [vmem:[%s3238_s22 + $0x1f4] sm:$0xf0] }
  0xf7   : > { %1287 = vmatmul.bf16.gmra.mxu0 %v3433_v52  ;;  %1345 = vmatmul.bf16.gmra.mxu2 %v3433_v52  ;;  %v2329_v9 = vor.u32 %v2661_v6, %v2326_v7  ;;  %v2325_v15 = vor.u32 %v2665_v13, %v2324_v12  ;;  %v2484_v61 = vld [vmem:[%s3238_s22 + $0x318] sm:$0xf]  ;;  %v2198_v1 = vld [vmem:[%s3238_s22 + $0xf8] sm:$0xf0] }
  0xf8   : > { %1558 = vmatpush.bf16.msra.mxu2 %v2193_v17  ;;  %1500 = vmatpush.bf16.msra.mxu0 %v2189_v24  ;;  %v2653_v17 = vld [vmem:[%s3238_s22 + $0x19c] sm:$0xf]  ;;  %v2196_v13 = vld [vmem:[%s3238_s22 + $0xd8] sm:$0xf] }
  0xf9   : > { %1316 = vmatmul.bf16.gmra.mxu1 %v3435_v53  ;;  %1374 = vmatmul.bf16.gmra.mxu3 %v3435_v53  ;;  %v2297_v22 = vor.u32 %v2653_v17, %v2294_v20  ;;  %v2550_v24 = vld [vmem:[%s3238_s22 + $0x3b8] sm:$0xf0]  ;;  %v2633_v14 = vld [vmem:[%s3238_s22 + $0xf4] sm:$0xf0] }
  0xfa   : > { %1587 = vmatpush.bf16.msra.mxu3 %v2449_v23  ;;  %1529 = vmatpush.bf16.msra.mxu1 %v2445_v28  ;;  %v2717_v23 = vld [vmem:[%s3238_s22 + $0x39c] sm:$0xf]  ;;  %v2548_v28 = vld [vmem:[%s3238_s22 + $0x398] sm:$0xf] }
  0xfb   : > { %v2553_v25 = vor.u32 %v2717_v23, %v2550_v24  ;;  %v2693_v4 = vld [vmem:[%s3238_s22 + $0x2dc] sm:$0xf]  ;;  %v2452_v16 = vld [vmem:[%s3238_s22 + $0x2d8] sm:$0xf] }
  0xfc   : > { %1559 = vmatpush.bf16.msra.mxu2 %v2161_v32  ;;  %1501 = vmatpush.bf16.msra.mxu0 %v2157_v38  ;;  %v2262_v32 = vld [vmem:[%s3238_s22 + $0x178] sm:$0xf0]  ;;  %v2521_v38 = vor.u32 %v2709_v36, %v2518_v37  ;;  %v2697_v17 = vld [vmem:[%s3238_s22 + $0x2f4] sm:$0xf0] }
  0xfd   : > { %v2265_v35 = vor.u32 %v2645_v31, %v2262_v32  ;;  %v2621_v20 = vld [vmem:[%s3238_s22 + $0x9c] sm:$0xf]  ;;  %v2420_v37 = vld [vmem:[%s3238_s22 + $0x298] sm:$0xf] }
  0xfe   : > { %1588 = vmatpush.bf16.msra.mxu3 %v2417_v33  ;;  %1530 = vmatpush.bf16.msra.mxu1 %v2413_v41  ;;  %v2549_v33 = vor.u32 %v2721_v30, %v2548_v28  ;;  %v2649_v41 = vld [vmem:[%s3238_s22 + $0x174] sm:$0xf0]  ;;  %v2685_v23 = vld [vmem:[%s3238_s22 + $0x29c] sm:$0xf] }
  0xff   : > { %v2261_v43 = vor.u32 %v2649_v41, %v2260_v40  ;;  %v2422_v24 = vld [vmem:[%s3238_s22 + $0x2b8] sm:$0xf0] }
 0x100   : > { %1560 = vmatpush.bf16.msra.mxu2 %v2129_v46  ;;  %1502 = vmatpush.bf16.msra.mxu0 %v2125_v54  ;;  %v2637_v46 = vld [vmem:[%s3238_s22 + $0x11c] sm:$0xf]  ;;  %v2425_v27 = vor.u32 %v2685_v23, %v2422_v24 }
 0x101   : > { %v2233_v50 = vor.u32 %v2637_v46, %v2230_v47  ;;  %v2486_v54 = vld [vmem:[%s3238_s22 + $0x338] sm:$0xf0] }
 0x102   : > { %1589 = vmatpush.bf16.msra.mxu3 %v2385_v51  ;;  %1531 = vmatpush.bf16.msra.mxu1 %v2381_v58  ;;  %v2701_v51 = vld [vmem:[%s3238_s22 + $0x31c] sm:$0xf] }
 0x103   : > { %v2489_v55 = vor.u32 %v2701_v51, %v2486_v54  ;;  %v2613_v40 = vld [vmem:[%s3238_s22 + $0x5c] sm:$0xf] }
 0x104   : > { %1561 = vmatpush.bf16.msra.mxu2 %v2097_v62  ;;  %1503 = vmatpush.bf16.msra.mxu0 %v2093_v3  ;;  %v2229_v62 = vor.u32 %v2641_v60, %v2228_v59  ;;  %v2201_v3 = vor.u32 %v2629_v0, %v2198_v1  ;;  %v2134_v42 = vld [vmem:[%s3238_s22 + $0x78] sm:$0xf0]  ;;  %v2388_v60 = vld [vmem:[%s3238_s22 + $0x258] sm:$0xf] }
 0x105   : > { %v2390_v45 = vld [vmem:[%s3238_s22 + $0x278] sm:$0xf0]  ;;  %v2137_v47 = vor.u32 %v2613_v40, %v2134_v42 }
 0x106   : > { %1590 = vmatpush.bf16.msra.mxu3 %v2353_v63  ;;  %1532 = vmatpush.bf16.msra.mxu1 %v2349_v5  ;;  %v2705_v63 = vld [vmem:[%s3238_s22 + $0x334] sm:$0xf0]  ;;  %v2454_v5 = vld [vmem:[%s3238_s22 + $0x2f8] sm:$0xf0] }
 0x107   : > { %1388 = vmatmul.bf16.vlgmr.msrb.gmra.mxu0 %v3324_v44  ;;  %1446 = vmatmul.bf16.vlgmr.msrb.gmra.mxu2 %v3324_v44  ;;  %v2485_v2 = vor.u32 %v2705_v63, %v2484_v61  ;;  %v2457_v7 = vor.u32 %v2693_v4, %v2454_v5  ;;  %v2681_v61 = vld [vmem:[%s3238_s22 + $0x274] sm:$0xf0]  ;;  %v2605_v63 = vld [vmem:[%s3238_s22 + $0x1c] sm:$0xf] }
 0x108   : > { %1670 = vmatpush.bf16.msrb.mxu2 %v2329_v9  ;;  %1612 = vmatpush.bf16.msrb.mxu0 %v2325_v15  ;;  %v2197_v15 = vor.u32 %v2633_v14, %v2196_v13  ;;  %v2102_v0 = vld [vmem:[%s3238_s22 + $0x38] sm:$0xf0] }
 0x109   : > { %1417 = vmatmul.bf16.vlgmr.msrb.gmra.mxu1 %v3329_v49  ;;  %1475 = vmatmul.bf16.vlgmr.msrb.gmra.mxu3 %v3329_v49  ;;  %v2669_v1 = vld [vmem:[%s3238_s22 + $0x21c] sm:$0xf] }
 0x10a   : > { %1699 = vmatpush.bf16.msrb.mxu3 %v2585_v11  ;;  %1641 = vmatpush.bf16.msrb.mxu1 %v2581_v21  ;;  %v2453_v21 = vor.u32 %v2697_v17, %v2452_v16 }
 0x10c   : > { %1671 = vmatpush.bf16.msrb.mxu2 %v2297_v22  ;;  %1613 = vmatpush.bf16.msrb.mxu0 %v2293_v29  ;;  %v2166_v22 = vld [vmem:[%s3238_s22 + $0xb8] sm:$0xf0] }
 0x10d   : > { %v2169_v26 = vor.u32 %v2621_v20, %v2166_v22 }
 0x10e   : > { %1700 = vmatpush.bf16.msrb.mxu3 %v2553_v25  ;;  %1642 = vmatpush.bf16.msrb.mxu1 %v2549_v33  ;;  %v2164_v33 = vld [vmem:[%s3238_s22 + $0x98] sm:$0xf] }
 0x110   : > { %1672 = vmatpush.bf16.msrb.mxu2 %v2265_v35  ;;  %1614 = vmatpush.bf16.msrb.mxu0 %v2261_v43  ;;  %v2625_v35 = vld [vmem:[%s3238_s22 + $0xb4] sm:$0xf0]  ;;  %v2677_v43 = vld [vmem:[%s3238_s22 + $0x25c] sm:$0xf] }
 0x111   : > { %v2165_v36 = vor.u32 %v2625_v35, %v2164_v33 }
 0x112   : > { %1701 = vmatpush.bf16.msrb.mxu3 %v2521_v38  ;;  %1643 = vmatpush.bf16.msrb.mxu1 %v2517_v48  ;;  %v2689_v38 = vld [vmem:[%s3238_s22 + $0x2b4] sm:$0xf0]  ;;  %v2393_v48 = vor.u32 %v2677_v43, %v2390_v45 }
 0x113   : > { %v2421_v41 = vor.u32 %v2689_v38, %v2420_v37 }
 0x114   : > { %1673 = vmatpush.bf16.msrb.mxu2 %v2233_v50  ;;  %1615 = vmatpush.bf16.msrb.mxu0 %v2229_v62  ;;  %v2389_v62 = vor.u32 %v2681_v61, %v2388_v60 }
 0x116   : > { %1702 = vmatpush.bf16.msrb.mxu3 %v2489_v55  ;;  %1644 = vmatpush.bf16.msrb.mxu1 %v2485_v2  ;;  %v2105_v2 = vor.u32 %v2605_v63, %v2102_v0 }
 0x117   : > { %1393 = vmatmul.bf16.gmra.mxu0 %v3368_v34  ;;  %1451 = vmatmul.bf16.gmra.mxu2 %v3368_v34 }
 0x118   : > { %1674 = vmatpush.bf16.msrb.mxu2 %v2201_v3  ;;  %1616 = vmatpush.bf16.msrb.mxu0 %v2197_v15  ;;  %v2358_v3 = vld [vmem:[%s3238_s22 + $0x238] sm:$0xf0] }
 0x119   : > { %1422 = vmatmul.bf16.gmra.mxu1 %v3373_v39  ;;  %1480 = vmatmul.bf16.gmra.mxu3 %v3373_v39  ;;  %v2361_v5 = vor.u32 %v2669_v1, %v2358_v3 }
 0x11a   : > { %1703 = vmatpush.bf16.msrb.mxu3 %v2457_v7  ;;  %1645 = vmatpush.bf16.msrb.mxu1 %v2453_v21  ;;  %v2609_v7 = vld [vmem:[%s3238_s22 + $0x34] sm:$0xf0] }
 0x11c   : > { %1675 = vmatpush.bf16.msrb.mxu2 %v2169_v26  ;;  %1617 = vmatpush.bf16.msrb.mxu0 %v2165_v36 }
 0x11e   : > { %1704 = vmatpush.bf16.msrb.mxu3 %v2425_v27  ;;  %1646 = vmatpush.bf16.msrb.mxu1 %v2421_v41 }
 0x120   : > { %1676 = vmatpush.bf16.msrb.mxu2 %v2137_v47 }
 0x122   : > { %1705 = vmatpush.bf16.msrb.mxu3 %v2393_v48  ;;  %1647 = vmatpush.bf16.msrb.mxu1 %v2389_v62 }
 0x124   : > { %1677 = vmatpush.bf16.msrb.mxu2 %v2105_v2 }
 0x126   : > { %1706 = vmatpush.bf16.msrb.mxu3 %v2361_v5 }
 0x127   : > { %1398 = vmatmul.bf16.gmra.mxu0 %v3405_v18  ;;  %1456 = vmatmul.bf16.gmra.mxu2 %v3405_v18 }
 0x129   : > { %1427 = vmatmul.bf16.gmra.mxu1 %v3407_v19  ;;  %1485 = vmatmul.bf16.gmra.mxu3 %v3407_v19 }
 0x137   : > { %1403 = vmatmul.bf16.gmra.mxu0 %v3433_v52  ;;  %1461 = vmatmul.bf16.gmra.mxu2 %v3433_v52 }
 0x139   : > { %1432 = vmatmul.bf16.gmra.mxu1 %v3435_v53  ;;  %1490 = vmatmul.bf16.gmra.mxu3 %v3435_v53 }
 0x144   : > { %v1273_v56 = vpop.f32.mrf.mxu0 }
 0x146   : > { %v1302_v57 = vpop.f32.mrf.mxu1 }
 0x147   : > { %v1303_v58 = vadd.f32 %v1302_v57, %v1273_v56  ;;  %1504 = vmatmul.bf16.vlgmr.msra.gmra.mxu0 %v3324_v44  ;;  %1562 = vmatmul.bf16.vlgmr.msra.gmra.mxu2 %v3324_v44  ;;  %v2132_v57 = vld [vmem:[%s3238_s22 + $0x58] sm:$0xf] }
 0x149   : > { %1728 = vst [vmem:[%s3535_s9] sm:$0xff] %v1303_v58  ;;  %1533 = vmatmul.bf16.vlgmr.msra.gmra.mxu1 %v3329_v49  ;;  %1591 = vmatmul.bf16.vlgmr.msra.gmra.mxu3 %v3329_v49  ;;  %v2617_v58 = vld [vmem:[%s3238_s22 + $0x74] sm:$0xf0] }
 0x14a   : > { %v1331_v6 = vpop.f32.mrf.mxu2  ;;  %v2133_v59 = vor.u32 %v2617_v58, %v2132_v57 }
 0x14c   : > { %v1360_v8 = vpop.f32.mrf.mxu3  ;;  %v1275_v9 = vpop.f32.mrf.mxu0  ;;  %1618 = vmatpush.bf16.msrb.mxu0 %v2133_v59 }
 0x14d   : > { %v1361_v10 = vadd.f32 %v1360_v8, %v1331_v6  ;;  %v2100_v6 = vld [vmem:[%s3238_s22 + $0x18] sm:$0xf] }
 0x14e   : > { %v1304_v11 = vpop.f32.mrf.mxu1  ;;  %v2356_v8 = vld [vmem:[%s3238_s22 + $0x218] sm:$0xf] }
 0x14f   : > { %v1305_v12 = vadd.f32 %v1304_v11, %v1275_v9  ;;  %1729 = vst [vmem:[%s3535_s9 + $0x8] sm:$0xff] %v1361_v10  ;;  %v2101_v11 = vor.u32 %v2609_v7, %v2100_v6 }
 0x151   : > { %1736 = vst [vmem:[%s3535_s9 + $0x40] sm:$0xff] %v1305_v12  ;;  %v2673_v12 = vld [vmem:[%s3238_s22 + $0x234] sm:$0xf0]  ;;  %1619 = vmatpush.bf16.msrb.mxu0 %v2101_v11 }
 0x152   : > { %v1333_v25 = vpop.f32.mrf.mxu2  ;;  %v2357_v15 = vor.u32 %v2673_v12, %v2356_v8 }
 0x154   : > { %v1362_v28 = vpop.f32.mrf.mxu3  ;;  %v1278_v29 = vpop.f32.mrf.mxu0  ;;  %1648 = vmatpush.bf16.msrb.mxu1 %v2357_v15 }
 0x155   : > { %v1363_v30 = vadd.f32 %v1362_v28, %v1333_v25 }
 0x156   : > { %v1307_v31 = vpop.f32.mrf.mxu1 }
 0x157   : > { %v1308_v32 = vadd.f32 %v1307_v31, %v1278_v29  ;;  %1737 = vst [vmem:[%s3535_s9 + $0x48] sm:$0xff] %v1363_v30  ;;  %1509 = vmatmul.bf16.gmra.mxu0 %v3368_v34  ;;  %1567 = vmatmul.bf16.gmra.mxu2 %v3368_v34 }
 0x159   : > { %1744 = vst [vmem:[%s3535_s9 + $0x80] sm:$0xff] %v1308_v32  ;;  %1538 = vmatmul.bf16.gmra.mxu1 %v3373_v39  ;;  %1596 = vmatmul.bf16.gmra.mxu3 %v3373_v39 }
 0x15a   : > { %v1336_v46 = vpop.f32.mrf.mxu2 }
 0x15c   : > { %v1365_v50 = vpop.f32.mrf.mxu3  ;;  %v1280_v51 = vpop.f32.mrf.mxu0 }
 0x15d   : > { %v1366_v54 = vadd.f32 %v1365_v50, %v1336_v46 }
 0x15e   : > { %v1309_v55 = vpop.f32.mrf.mxu1 }
 0x15f   : > { %v1310_v56 = vadd.f32 %v1309_v55, %v1280_v51  ;;  %1745 = vst [vmem:[%s3535_s9 + $0x88] sm:$0xff] %v1366_v54 }
 0x161   : > { %1752 = vst [vmem:[%s3535_s9 + $0xc0] sm:$0xff] %v1310_v56 }
 0x162   : > { %v1338_v4 = vpop.f32.mrf.mxu2 }
 0x164   : > { %v1367_v9 = vpop.f32.mrf.mxu3  ;;  %v1283_v10 = vpop.f32.mrf.mxu0 }
 0x165   : > { %v1368_v13 = vadd.f32 %v1367_v9, %v1338_v4 }
 0x166   : > { %v1312_v14 = vpop.f32.mrf.mxu1 }
 0x167   : > { %v1313_v16 = vadd.f32 %v1312_v14, %v1283_v10  ;;  %1753 = vst [vmem:[%s3535_s9 + $0xc8] sm:$0xff] %v1368_v13  ;;  %1514 = vmatmul.bf16.gmra.mxu0 %v3405_v18  ;;  %1572 = vmatmul.bf16.gmra.mxu2 %v3405_v18 }
 0x169   : > { %1760 = vst [vmem:[%s3535_s9 + $0x100] sm:$0xff] %v1313_v16  ;;  %1543 = vmatmul.bf16.gmra.mxu1 %v3407_v19  ;;  %1601 = vmatmul.bf16.gmra.mxu3 %v3407_v19 }
 0x16a   : > { %v1341_v17 = vpop.f32.mrf.mxu2 }
 0x16c   : > { %v1370_v20 = vpop.f32.mrf.mxu3  ;;  %v1285_v21 = vpop.f32.mrf.mxu0 }
 0x16d   : > { %v1371_v22 = vadd.f32 %v1370_v20, %v1341_v17 }
 0x16e   : > { %v1314_v23 = vpop.f32.mrf.mxu1 }
 0x16f   : > { %v1315_v24 = vadd.f32 %v1314_v23, %v1285_v21  ;;  %1761 = vst [vmem:[%s3535_s9 + $0x108] sm:$0xff] %v1371_v22 }
 0x171   : > { %1768 = vst [vmem:[%s3535_s9 + $0x140] sm:$0xff] %v1315_v24 }
 0x172   : > { %v1343_v25 = vpop.f32.mrf.mxu2 }
 0x174   : > { %v1372_v26 = vpop.f32.mrf.mxu3  ;;  %v1288_v27 = vpop.f32.mrf.mxu0 }
 0x175   : > { %v1373_v28 = vadd.f32 %v1372_v26, %v1343_v25 }
 0x176   : > { %v1317_v29 = vpop.f32.mrf.mxu1 }
 0x177   : > { %v1318_v30 = vadd.f32 %v1317_v29, %v1288_v27  ;;  %1769 = vst [vmem:[%s3535_s9 + $0x148] sm:$0xff] %v1373_v28  ;;  %1519 = vmatmul.bf16.gmra.mxu0 %v3433_v52  ;;  %1577 = vmatmul.bf16.gmra.mxu2 %v3433_v52 }
 0x179   : > { %1776 = vst [vmem:[%s3535_s9 + $0x180] sm:$0xff] %v1318_v30  ;;  %1548 = vmatmul.bf16.gmra.mxu1 %v3435_v53  ;;  %1606 = vmatmul.bf16.gmra.mxu3 %v3435_v53 }
 0x17a   : > { %v1346_v31 = vpop.f32.mrf.mxu2 }
 0x17c   : > { %v1375_v32 = vpop.f32.mrf.mxu3  ;;  %v1290_v33 = vpop.f32.mrf.mxu0 }
 0x17d   : > { %v1376_v35 = vadd.f32 %v1375_v32, %v1346_v31 }
 0x17e   : > { %v1319_v36 = vpop.f32.mrf.mxu1 }
 0x17f   : > { %v1320_v37 = vadd.f32 %v1319_v36, %v1290_v33  ;;  %1777 = vst [vmem:[%s3535_s9 + $0x188] sm:$0xff] %v1376_v35 }
 0x181   : > { %1784 = vst [vmem:[%s3535_s9 + $0x1c0] sm:$0xff] %v1320_v37 }
 0x182   : > { %v1348_v38 = vpop.f32.mrf.mxu2 }
 0x184   : > { %v1377_v40 = vpop.f32.mrf.mxu3  ;;  %v1389_v41 = vpop.f32.mrf.mxu0 }
 0x185   : > { %v1378_v42 = vadd.f32 %v1377_v40, %v1348_v38 }
 0x186   : > { %v1418_v43 = vpop.f32.mrf.mxu1 }
 0x187   : > { %v1419_v45 = vadd.f32 %v1418_v43, %v1389_v41  ;;  %1785 = vst [vmem:[%s3535_s9 + $0x1c8] sm:$0xff] %v1378_v42  ;;  %1620 = vmatmul.bf16.vlgmr.msrb.gmra.mxu0 %v3324_v44  ;;  %1678 = vmatmul.bf16.vlgmr.msrb.gmra.mxu2 %v3324_v44 }
 0x189   : > { %1730 = vst [vmem:[%s3535_s9 + $0x10] sm:$0xff] %v1419_v45  ;;  %1649 = vmatmul.bf16.vlgmr.msrb.gmra.mxu1 %v3329_v49  ;;  %1707 = vmatmul.bf16.vlgmr.msrb.gmra.mxu3 %v3329_v49 }
 0x18a   : > { %v1447_v46 = vpop.f32.mrf.mxu2 }
 0x18c   : > { %v1476_v47 = vpop.f32.mrf.mxu3  ;;  %v1391_v48 = vpop.f32.mrf.mxu0 }
 0x18d   : > { %v1477_v50 = vadd.f32 %v1476_v47, %v1447_v46 }
 0x18e   : > { %v1420_v51 = vpop.f32.mrf.mxu1 }
 0x18f   : > { %v1421_v54 = vadd.f32 %v1420_v51, %v1391_v48  ;;  %1731 = vst [vmem:[%s3535_s9 + $0x18] sm:$0xff] %v1477_v50 }
 0x191   : > { %1738 = vst [vmem:[%s3535_s9 + $0x50] sm:$0xff] %v1421_v54 }
 0x192   : > { %v1449_v55 = vpop.f32.mrf.mxu2 }
 0x194   : > { %v1478_v56 = vpop.f32.mrf.mxu3  ;;  %v1394_v57 = vpop.f32.mrf.mxu0 }
 0x195   : > { %v1479_v58 = vadd.f32 %v1478_v56, %v1449_v55 }
 0x196   : > { %v1423_v59 = vpop.f32.mrf.mxu1 }
 0x197   : > { %v1424_v44 = vadd.f32 %v1423_v59, %v1394_v57  ;;  %1739 = vst [vmem:[%s3535_s9 + $0x58] sm:$0xff] %v1479_v58  ;;  %1625 = vmatmul.bf16.gmra.mxu0 %v3368_v34  ;;  %1683 = vmatmul.bf16.gmra.mxu2 %v3368_v34 }
 0x199   : > { %1746 = vst [vmem:[%s3535_s9 + $0x90] sm:$0xff] %v1424_v44  ;;  %1654 = vmatmul.bf16.gmra.mxu1 %v3373_v39  ;;  %1712 = vmatmul.bf16.gmra.mxu3 %v3373_v39 }
 0x19a   : > { %v1452_v49 = vpop.f32.mrf.mxu2 }
 0x19c   : > { %v1481_v60 = vpop.f32.mrf.mxu3  ;;  %v1396_v61 = vpop.f32.mrf.mxu0 }
 0x19d   : > { %v1482_v62 = vadd.f32 %v1481_v60, %v1452_v49 }
 0x19e   : > { %v1425_v63 = vpop.f32.mrf.mxu1 }
 0x19f   : > { %v1426_v0 = vadd.f32 %v1425_v63, %v1396_v61  ;;  %1747 = vst [vmem:[%s3535_s9 + $0x98] sm:$0xff] %v1482_v62 }
 0x1a1   : > { %1754 = vst [vmem:[%s3535_s9 + $0xd0] sm:$0xff] %v1426_v0 }
 0x1a2   : > { %v1454_v1 = vpop.f32.mrf.mxu2 }
 0x1a4   : > { %v1483_v2 = vpop.f32.mrf.mxu3  ;;  %v1399_v3 = vpop.f32.mrf.mxu0 }
 0x1a5   : > { %v1484_v4 = vadd.f32 %v1483_v2, %v1454_v1 }
 0x1a6   : > { %v1428_v5 = vpop.f32.mrf.mxu1 }
 0x1a7   : > { %v1429_v34 = vadd.f32 %v1428_v5, %v1399_v3  ;;  %1755 = vst [vmem:[%s3535_s9 + $0xd8] sm:$0xff] %v1484_v4  ;;  %1630 = vmatmul.bf16.gmra.mxu0 %v3405_v18  ;;  %1688 = vmatmul.bf16.gmra.mxu2 %v3405_v18 }
 0x1a9   : > { %1762 = vst [vmem:[%s3535_s9 + $0x110] sm:$0xff] %v1429_v34  ;;  %1659 = vmatmul.bf16.gmra.mxu1 %v3407_v19  ;;  %1717 = vmatmul.bf16.gmra.mxu3 %v3407_v19 }
 0x1aa   : > { %v1457_v39 = vpop.f32.mrf.mxu2 }
 0x1ac   : > { %v1486_v6 = vpop.f32.mrf.mxu3  ;;  %v1401_v7 = vpop.f32.mrf.mxu0 }
 0x1ad   : > { %v1487_v8 = vadd.f32 %v1486_v6, %v1457_v39 }
 0x1ae   : > { %v1430_v9 = vpop.f32.mrf.mxu1 }
 0x1af   : > { %v1431_v10 = vadd.f32 %v1430_v9, %v1401_v7  ;;  %1763 = vst [vmem:[%s3535_s9 + $0x118] sm:$0xff] %v1487_v8 }
 0x1b1   : > { %1770 = vst [vmem:[%s3535_s9 + $0x150] sm:$0xff] %v1431_v10 }
 0x1b2   : > { %v1459_v11 = vpop.f32.mrf.mxu2 }
 0x1b4   : > { %v1488_v12 = vpop.f32.mrf.mxu3  ;;  %v1404_v13 = vpop.f32.mrf.mxu0 }
 0x1b5   : > { %v1489_v14 = vadd.f32 %v1488_v12, %v1459_v11 }
 0x1b6   : > { %v1433_v15 = vpop.f32.mrf.mxu1 }
 0x1b7   : > { %v1434_v18 = vadd.f32 %v1433_v15, %v1404_v13  ;;  %1771 = vst [vmem:[%s3535_s9 + $0x158] sm:$0xff] %v1489_v14  ;;  %1635 = vmatmul.bf16.gmra.mxu0 %v3433_v52  ;;  %1693 = vmatmul.bf16.gmra.mxu2 %v3433_v52 }
 0x1b9   : > { %1778 = vst [vmem:[%s3535_s9 + $0x190] sm:$0xff] %v1434_v18  ;;  %1664 = vmatmul.bf16.gmra.mxu1 %v3435_v53  ;;  %1722 = vmatmul.bf16.gmra.mxu3 %v3435_v53 }
 0x1ba   : > { %v1462_v19 = vpop.f32.mrf.mxu2 }
 0x1bc   : > { %v1491_v16 = vpop.f32.mrf.mxu3  ;;  %v1406_v17 = vpop.f32.mrf.mxu0 }
 0x1bd   : > { %v1492_v20 = vadd.f32 %v1491_v16, %v1462_v19 }
 0x1be   : > { %v1435_v21 = vpop.f32.mrf.mxu1 }
 0x1bf   : > { %v1436_v22 = vadd.f32 %v1435_v21, %v1406_v17  ;;  %1779 = vst [vmem:[%s3535_s9 + $0x198] sm:$0xff] %v1492_v20 }
 0x1c1   : > { %1786 = vst [vmem:[%s3535_s9 + $0x1d0] sm:$0xff] %v1436_v22 }
 0x1c2   : > { %v1464_v23 = vpop.f32.mrf.mxu2 }
 0x1c4   : > { %v1493_v24 = vpop.f32.mrf.mxu3  ;;  %v1505_v25 = vpop.f32.mrf.mxu0 }
 0x1c5   : > { %v1494_v26 = vadd.f32 %v1493_v24, %v1464_v23 }
 0x1c6   : > { %v1534_v27 = vpop.f32.mrf.mxu1 }
 0x1c7   : > { %v1535_v52 = vadd.f32 %v1534_v27, %v1505_v25  ;;  %1787 = vst [vmem:[%s3535_s9 + $0x1d8] sm:$0xff] %v1494_v26 }
 0x1c9   : > { %1732 = vst [vmem:[%s3535_s9 + $0x20] sm:$0xff] %v1535_v52 }
 0x1ca   : > { %v1563_v53 = vpop.f32.mrf.mxu2 }
 0x1cc   : > { %v1592_v28 = vpop.f32.mrf.mxu3  ;;  %v1507_v29 = vpop.f32.mrf.mxu0 }
 0x1cd   : > { %v1593_v30 = vadd.f32 %v1592_v28, %v1563_v53 }
 0x1ce   : > { %v1536_v31 = vpop.f32.mrf.mxu1 }
 0x1cf   : > { %v1537_v32 = vadd.f32 %v1536_v31, %v1507_v29  ;;  %1733 = vst [vmem:[%s3535_s9 + $0x28] sm:$0xff] %v1593_v30 }
 0x1d1   : > { %1740 = vst [vmem:[%s3535_s9 + $0x60] sm:$0xff] %v1537_v32 }
 0x1d2   : > { %v1565_v33 = vpop.f32.mrf.mxu2 }
 0x1d4   : > { %v1594_v35 = vpop.f32.mrf.mxu3  ;;  %v1510_v36 = vpop.f32.mrf.mxu0 }
 0x1d5   : > { %v1595_v37 = vadd.f32 %v1594_v35, %v1565_v33 }
 0x1d6   : > { %v1539_v38 = vpop.f32.mrf.mxu1 }
 0x1d7   : > { %v1540_v40 = vadd.f32 %v1539_v38, %v1510_v36  ;;  %1741 = vst [vmem:[%s3535_s9 + $0x68] sm:$0xff] %v1595_v37 }
 0x1d9   : > { %1748 = vst [vmem:[%s3535_s9 + $0xa0] sm:$0xff] %v1540_v40 }
 0x1da   : > { %v1568_v41 = vpop.f32.mrf.mxu2 }
 0x1dc   : > { %v1597_v42 = vpop.f32.mrf.mxu3  ;;  %v1512_v43 = vpop.f32.mrf.mxu0 }
 0x1dd   : > { %v1598_v45 = vadd.f32 %v1597_v42, %v1568_v41 }
 0x1de   : > { %v1541_v46 = vpop.f32.mrf.mxu1 }
 0x1df   : > { %v1542_v47 = vadd.f32 %v1541_v46, %v1512_v43  ;;  %1749 = vst [vmem:[%s3535_s9 + $0xa8] sm:$0xff] %v1598_v45 }
 0x1e1   : > { %1756 = vst [vmem:[%s3535_s9 + $0xe0] sm:$0xff] %v1542_v47 }
 0x1e2   : > { %v1570_v48 = vpop.f32.mrf.mxu2 }
 0x1e4   : > { %v1599_v50 = vpop.f32.mrf.mxu3  ;;  %v1515_v51 = vpop.f32.mrf.mxu0 }
 0x1e5   : > { %v1600_v54 = vadd.f32 %v1599_v50, %v1570_v48 }
 0x1e6   : > { %v1544_v55 = vpop.f32.mrf.mxu1 }
 0x1e7   : > { %v1545_v56 = vadd.f32 %v1544_v55, %v1515_v51  ;;  %1757 = vst [vmem:[%s3535_s9 + $0xe8] sm:$0xff] %v1600_v54 }
 0x1e9   : > { %1764 = vst [vmem:[%s3535_s9 + $0x120] sm:$0xff] %v1545_v56 }
 0x1ea   : > { %v1573_v57 = vpop.f32.mrf.mxu2 }
 0x1ec   : > { %v1602_v58 = vpop.f32.mrf.mxu3  ;;  %v1517_v59 = vpop.f32.mrf.mxu0 }
 0x1ed   : > { %v1603_v44 = vadd.f32 %v1602_v58, %v1573_v57 }
 0x1ee   : > { %v1546_v49 = vpop.f32.mrf.mxu1 }
 0x1ef   : > { %v1547_v60 = vadd.f32 %v1546_v49, %v1517_v59  ;;  %1765 = vst [vmem:[%s3535_s9 + $0x128] sm:$0xff] %v1603_v44 }
 0x1f1   : > { %1772 = vst [vmem:[%s3535_s9 + $0x160] sm:$0xff] %v1547_v60  ;;  %v1816_v60 = vld [vmem:[%s3535_s9] sm:$0xff] (%p2957_p9) }
 0x1f2   : > { %v1575_v61 = vpop.f32.mrf.mxu2  ;;  %1817 = vst [vmem:[%s3677_s20] sm:$0xff] (%p2957_p9), %v1816_v60 }
 0x1f4   : > { %v1604_v62 = vpop.f32.mrf.mxu3  ;;  %v1520_v63 = vpop.f32.mrf.mxu0 }
 0x1f5   : > { %v1605_v0 = vadd.f32 %v1604_v62, %v1575_v61  ;;  %v1818_v61 = vld [vmem:[%s3535_s9 + $0x8] sm:$0xff] (%p2957_p9)  ;;  %v1820_v62 = vld [vmem:[%s3535_s9 + $0x10] sm:$0xff] (%p2957_p9) }
 0x1f6   : > { %v1549_v1 = vpop.f32.mrf.mxu1  ;;  %1819 = vst [vmem:[%s3677_s20 + $0x8] sm:$0xff] (%p2957_p9), %v1818_v61 }
 0x1f7   : > { %v1550_v2 = vadd.f32 %v1549_v1, %v1520_v63  ;;  %1773 = vst [vmem:[%s3535_s9 + $0x168] sm:$0xff] %v1605_v0  ;;  %v1822_v63 = vld [vmem:[%s3535_s9 + $0x18] sm:$0xff] (%p2957_p9)  ;;  %v1824_v0 = vld [vmem:[%s3535_s9 + $0x20] sm:$0xff] (%p2957_p9)  ;;  %v1826_v1 = vld [vmem:[%s3535_s9 + $0x28] sm:$0xff] (%p2957_p9) }
 0x1f8   : > { %1821 = vst [vmem:[%s3677_s20 + $0x10] sm:$0xff] (%p2957_p9), %v1820_v62 }
 0x1f9   : > { %1780 = vst [vmem:[%s3535_s9 + $0x1a0] sm:$0xff] %v1550_v2 }
 0x1fa   : > { %v1578_v3 = vpop.f32.mrf.mxu2  ;;  %1823 = vst [vmem:[%s3677_s20 + $0x18] sm:$0xff] (%p2957_p9), %v1822_v63 }
 0x1fb   : > { %1825 = vst [vmem:[%s3677_s20 + $0x20] sm:$0xff] (%p2957_p9), %v1824_v0 }
 0x1fc   : > { %v1607_v4 = vpop.f32.mrf.mxu3  ;;  %v1522_v5 = vpop.f32.mrf.mxu0  ;;  %1827 = vst [vmem:[%s3677_s20 + $0x28] sm:$0xff] (%p2957_p9), %v1826_v1 }
 0x1fd   : > { %v1608_v34 = vadd.f32 %v1607_v4, %v1578_v3  ;;  %v1832_v4 = vld [vmem:[%s3535_s9 + $0x40] sm:$0xff] (%p2957_p9) }
 0x1fe   : > { %v1551_v39 = vpop.f32.mrf.mxu1  ;;  %1833 = vst [vmem:[%s3677_s20 + $0x100] sm:$0xff] (%p2957_p9), %v1832_v4 }
 0x1ff   : > { %v1552_v6 = vadd.f32 %v1551_v39, %v1522_v5  ;;  %1781 = vst [vmem:[%s3535_s9 + $0x1a8] sm:$0xff] %v1608_v34  ;;  %v1834_v5 = vld [vmem:[%s3535_s9 + $0x48] sm:$0xff] (%p2957_p9)  ;;  %v1836_v34 = vld [vmem:[%s3535_s9 + $0x50] sm:$0xff] (%p2957_p9)  ;;  %v1838_v39 = vld [vmem:[%s3535_s9 + $0x58] sm:$0xff] (%p2957_p9) }
 0x200   : > { %1835 = vst [vmem:[%s3677_s20 + $0x108] sm:$0xff] (%p2957_p9), %v1834_v5 }
 0x201   : > { %1788 = vst [vmem:[%s3535_s9 + $0x1e0] sm:$0xff] %v1552_v6  ;;  %v1840_v6 = vld [vmem:[%s3535_s9 + $0x60] sm:$0xff] (%p2957_p9) }
 0x202   : > { %v1580_v7 = vpop.f32.mrf.mxu2  ;;  %1837 = vst [vmem:[%s3677_s20 + $0x110] sm:$0xff] (%p2957_p9), %v1836_v34 }
 0x203   : > { %1839 = vst [vmem:[%s3677_s20 + $0x118] sm:$0xff] (%p2957_p9), %v1838_v39 }
 0x204   : > { %v1609_v8 = vpop.f32.mrf.mxu3  ;;  %v1621_v9 = vpop.f32.mrf.mxu0  ;;  %1841 = vst [vmem:[%s3677_s20 + $0x120] sm:$0xff] (%p2957_p9), %v1840_v6 }
 0x205   : > { %v1610_v10 = vadd.f32 %v1609_v8, %v1580_v7  ;;  %v1842_v7 = vld [vmem:[%s3535_s9 + $0x68] sm:$0xff] (%p2957_p9) }
 0x206   : > { %v1650_v11 = vpop.f32.mrf.mxu1  ;;  %1843 = vst [vmem:[%s3677_s20 + $0x128] sm:$0xff] (%p2957_p9), %v1842_v7 }
 0x207   : > { %v1651_v12 = vadd.f32 %v1650_v11, %v1621_v9  ;;  %1789 = vst [vmem:[%s3535_s9 + $0x1e8] sm:$0xff] %v1610_v10  ;;  %v1848_v10 = vld [vmem:[%s3535_s9 + $0x80] sm:$0xff] (%p2957_p9)  ;;  %v1850_v11 = vld [vmem:[%s3535_s9 + $0x88] sm:$0xff] (%p2957_p9) }
 0x208   : > { %1849 = vst [vmem:[%s3677_s20 + $0x200] sm:$0xff] (%p2957_p9), %v1848_v10 }
 0x209   : > { %1734 = vst [vmem:[%s3535_s9 + $0x30] sm:$0xff] %v1651_v12  ;;  %v1852_v12 = vld [vmem:[%s3535_s9 + $0x90] sm:$0xff] (%p2957_p9) }
 0x20a   : > { %v1679_v13 = vpop.f32.mrf.mxu2  ;;  %1851 = vst [vmem:[%s3677_s20 + $0x208] sm:$0xff] (%p2957_p9), %v1850_v11 }
 0x20b   : > { %1853 = vst [vmem:[%s3677_s20 + $0x210] sm:$0xff] (%p2957_p9), %v1852_v12 }
 0x20c   : > { %v1708_v14 = vpop.f32.mrf.mxu3  ;;  %v1623_v15 = vpop.f32.mrf.mxu0 }
 0x20d   : > { %v1709_v18 = vadd.f32 %v1708_v14, %v1679_v13  ;;  %v1854_v13 = vld [vmem:[%s3535_s9 + $0x98] sm:$0xff] (%p2957_p9)  ;;  %v1856_v14 = vld [vmem:[%s3535_s9 + $0xa0] sm:$0xff] (%p2957_p9) }
 0x20e   : > { %v1652_v19 = vpop.f32.mrf.mxu1  ;;  %1855 = vst [vmem:[%s3677_s20 + $0x218] sm:$0xff] (%p2957_p9), %v1854_v13 }
 0x20f   : > { %v1653_v16 = vadd.f32 %v1652_v19, %v1623_v15  ;;  %1735 = vst [vmem:[%s3535_s9 + $0x38] sm:$0xff] %v1709_v18  ;;  %v1858_v15 = vld [vmem:[%s3535_s9 + $0xa8] sm:$0xff] (%p2957_p9) }
 0x210   : > { %v1828_v2 = vld [vmem:[%s3535_s9 + $0x30] sm:$0xff] (%p2957_p9)  ;;  %1857 = vst [vmem:[%s3677_s20 + $0x220] sm:$0xff] (%p2957_p9), %v1856_v14 }
 0x211   : > { %1742 = vst [vmem:[%s3535_s9 + $0x70] sm:$0xff] %v1653_v16  ;;  %v1864_v16 = vld [vmem:[%s3535_s9 + $0xc0] sm:$0xff] (%p2957_p9) }
 0x212   : > { %v1681_v17 = vpop.f32.mrf.mxu2  ;;  %1829 = vst [vmem:[%s3677_s20 + $0x30] sm:$0xff] (%p2957_p9), %v1828_v2 }
 0x213   : > { %1859 = vst [vmem:[%s3677_s20 + $0x228] sm:$0xff] (%p2957_p9), %v1858_v15 }
 0x214   : > { %v1710_v20 = vpop.f32.mrf.mxu3  ;;  %v1626_v21 = vpop.f32.mrf.mxu0  ;;  %1865 = vst [vmem:[%s3677_s20 + $0x300] sm:$0xff] (%p2957_p9), %v1864_v16 }
 0x215   : > { %v1711_v22 = vadd.f32 %v1710_v20, %v1681_v17  ;;  %v1866_v17 = vld [vmem:[%s3535_s9 + $0xc8] sm:$0xff] (%p2957_p9)  ;;  %v1868_v20 = vld [vmem:[%s3535_s9 + $0xd0] sm:$0xff] (%p2957_p9) }
 0x216   : > { %v1655_v23 = vpop.f32.mrf.mxu1  ;;  %v1830_v3 = vld [vmem:[%s3535_s9 + $0x38] sm:$0xff] (%p2957_p9)  ;;  %1867 = vst [vmem:[%s3677_s20 + $0x308] sm:$0xff] (%p2957_p9), %v1866_v17 }
 0x217   : > { %v1656_v24 = vadd.f32 %v1655_v23, %v1626_v21  ;;  %1743 = vst [vmem:[%s3535_s9 + $0x78] sm:$0xff] %v1711_v22  ;;  %v1870_v21 = vld [vmem:[%s3535_s9 + $0xd8] sm:$0xff] (%p2957_p9)  ;;  %v1872_v22 = vld [vmem:[%s3535_s9 + $0xe0] sm:$0xff] (%p2957_p9)  ;;  %v1874_v23 = vld [vmem:[%s3535_s9 + $0xe8] sm:$0xff] (%p2957_p9) }
 0x218   : > { %1831 = vst [vmem:[%s3677_s20 + $0x38] sm:$0xff] (%p2957_p9), %v1830_v3  ;;  %v1844_v8 = vld [vmem:[%s3535_s9 + $0x70] sm:$0xff] (%p2957_p9) }
 0x219   : > { %1750 = vst [vmem:[%s3535_s9 + $0xb0] sm:$0xff] %v1656_v24 }
 0x21a   : > { %v1684_v25 = vpop.f32.mrf.mxu2  ;;  %1845 = vst [vmem:[%s3677_s20 + $0x130] sm:$0xff] (%p2957_p9), %v1844_v8 }
 0x21b   : > { %1869 = vst [vmem:[%s3677_s20 + $0x310] sm:$0xff] (%p2957_p9), %v1868_v20 }
 0x21c   : > { %v1713_v26 = vpop.f32.mrf.mxu3  ;;  %v1628_v27 = vpop.f32.mrf.mxu0  ;;  %1871 = vst [vmem:[%s3677_s20 + $0x318] sm:$0xff] (%p2957_p9), %v1870_v21 }
 0x21d   : > { %v1714_v52 = vadd.f32 %v1713_v26, %v1684_v25  ;;  %1873 = vst [vmem:[%s3677_s20 + $0x320] sm:$0xff] (%p2957_p9), %v1872_v22  ;;  %v1880_v26 = vld [vmem:[%s3535_s9 + $0x100] sm:$0xff] (%p2957_p9) }
 0x21e   : > { %v1657_v53 = vpop.f32.mrf.mxu1  ;;  %v1846_v9 = vld [vmem:[%s3535_s9 + $0x78] sm:$0xff] (%p2957_p9)  ;;  %1875 = vst [vmem:[%s3677_s20 + $0x328] sm:$0xff] (%p2957_p9), %v1874_v23 }
 0x21f   : > { %v1658_v28 = vadd.f32 %v1657_v53, %v1628_v27  ;;  %1751 = vst [vmem:[%s3535_s9 + $0xb8] sm:$0xff] %v1714_v52  ;;  %v1882_v27 = vld [vmem:[%s3535_s9 + $0x108] sm:$0xff] (%p2957_p9)  ;;  %v1884_v52 = vld [vmem:[%s3535_s9 + $0x110] sm:$0xff] (%p2957_p9)  ;;  %v1886_v53 = vld [vmem:[%s3535_s9 + $0x118] sm:$0xff] (%p2957_p9) }
 0x220   : > { %1847 = vst [vmem:[%s3677_s20 + $0x138] sm:$0xff] (%p2957_p9), %v1846_v9  ;;  %v1860_v18 = vld [vmem:[%s3535_s9 + $0xb0] sm:$0xff] (%p2957_p9) }
 0x221   : > { %1758 = vst [vmem:[%s3535_s9 + $0xf0] sm:$0xff] %v1658_v28  ;;  %v1888_v28 = vld [vmem:[%s3535_s9 + $0x120] sm:$0xff] (%p2957_p9) }
 0x222   : > { %v1686_v29 = vpop.f32.mrf.mxu2  ;;  %1861 = vst [vmem:[%s3677_s20 + $0x230] sm:$0xff] (%p2957_p9), %v1860_v18 }
 0x223   : > { %1881 = vst [vmem:[%s3677_s20 + $0x400] sm:$0xff] (%p2957_p9), %v1880_v26 }
 0x224   : > { %v1715_v30 = vpop.f32.mrf.mxu3  ;;  %v1631_v31 = vpop.f32.mrf.mxu0  ;;  %1883 = vst [vmem:[%s3677_s20 + $0x408] sm:$0xff] (%p2957_p9), %v1882_v27 }
 0x225   : > { %v1716_v32 = vadd.f32 %v1715_v30, %v1686_v29  ;;  %1885 = vst [vmem:[%s3677_s20 + $0x410] sm:$0xff] (%p2957_p9), %v1884_v52  ;;  %v1890_v29 = vld [vmem:[%s3535_s9 + $0x128] sm:$0xff] (%p2957_p9) }
 0x226   : > { %v1660_v33 = vpop.f32.mrf.mxu1  ;;  %v1862_v19 = vld [vmem:[%s3535_s9 + $0xb8] sm:$0xff] (%p2957_p9)  ;;  %1887 = vst [vmem:[%s3677_s20 + $0x418] sm:$0xff] (%p2957_p9), %v1886_v53 }
 0x227   : > { %v1661_v35 = vadd.f32 %v1660_v33, %v1631_v31  ;;  %1759 = vst [vmem:[%s3535_s9 + $0xf8] sm:$0xff] %v1716_v32  ;;  %v1896_v32 = vld [vmem:[%s3535_s9 + $0x140] sm:$0xff] (%p2957_p9)  ;;  %v1898_v33 = vld [vmem:[%s3535_s9 + $0x148] sm:$0xff] (%p2957_p9) }
 0x228   : > { %1863 = vst [vmem:[%s3677_s20 + $0x238] sm:$0xff] (%p2957_p9), %v1862_v19  ;;  %v1876_v24 = vld [vmem:[%s3535_s9 + $0xf0] sm:$0xff] (%p2957_p9) }
 0x229   : > { %1766 = vst [vmem:[%s3535_s9 + $0x130] sm:$0xff] %v1661_v35  ;;  %v1900_v35 = vld [vmem:[%s3535_s9 + $0x150] sm:$0xff] (%p2957_p9) }
 0x22a   : > { %v1689_v36 = vpop.f32.mrf.mxu2  ;;  %1877 = vst [vmem:[%s3677_s20 + $0x330] sm:$0xff] (%p2957_p9), %v1876_v24 }
 0x22b   : > { %1889 = vst [vmem:[%s3677_s20 + $0x420] sm:$0xff] (%p2957_p9), %v1888_v28 }
 0x22c   : > { %v1718_v37 = vpop.f32.mrf.mxu3  ;;  %v1633_v38 = vpop.f32.mrf.mxu0  ;;  %1891 = vst [vmem:[%s3677_s20 + $0x428] sm:$0xff] (%p2957_p9), %v1890_v29 }
 0x22d   : > { %v1719_v40 = vadd.f32 %v1718_v37, %v1689_v36  ;;  %1897 = vst [vmem:[%s3677_s20 + $0x500] sm:$0xff] (%p2957_p9), %v1896_v32  ;;  %v1902_v36 = vld [vmem:[%s3535_s9 + $0x158] sm:$0xff] (%p2957_p9)  ;;  %v1904_v37 = vld [vmem:[%s3535_s9 + $0x160] sm:$0xff] (%p2957_p9) }
 0x22e   : > { %v1662_v41 = vpop.f32.mrf.mxu1  ;;  %v1878_v25 = vld [vmem:[%s3535_s9 + $0xf8] sm:$0xff] (%p2957_p9)  ;;  %1899 = vst [vmem:[%s3677_s20 + $0x508] sm:$0xff] (%p2957_p9), %v1898_v33 }
 0x22f   : > { %v1663_v42 = vadd.f32 %v1662_v41, %v1633_v38  ;;  %1767 = vst [vmem:[%s3535_s9 + $0x138] sm:$0xff] %v1719_v40  ;;  %v1906_v38 = vld [vmem:[%s3535_s9 + $0x168] sm:$0xff] (%p2957_p9) }
 0x230   : > { %1879 = vst [vmem:[%s3677_s20 + $0x338] sm:$0xff] (%p2957_p9), %v1878_v25  ;;  %v1892_v30 = vld [vmem:[%s3535_s9 + $0x130] sm:$0xff] (%p2957_p9) }
 0x231   : > { %1774 = vst [vmem:[%s3535_s9 + $0x170] sm:$0xff] %v1663_v42  ;;  %v1912_v42 = vld [vmem:[%s3535_s9 + $0x180] sm:$0xff] (%p2957_p9) }
 0x232   : > { %v1691_v43 = vpop.f32.mrf.mxu2  ;;  %1893 = vst [vmem:[%s3677_s20 + $0x430] sm:$0xff] (%p2957_p9), %v1892_v30 }
 0x233   : > { %1901 = vst [vmem:[%s3677_s20 + $0x510] sm:$0xff] (%p2957_p9), %v1900_v35 }
 0x234   : > { %v1720_v45 = vpop.f32.mrf.mxu3  ;;  %v1636_v46 = vpop.f32.mrf.mxu0  ;;  %1903 = vst [vmem:[%s3677_s20 + $0x518] sm:$0xff] (%p2957_p9), %v1902_v36 }
 0x235   : > { %v1721_v47 = vadd.f32 %v1720_v45, %v1691_v43  ;;  %1905 = vst [vmem:[%s3677_s20 + $0x520] sm:$0xff] (%p2957_p9), %v1904_v37  ;;  %v1914_v43 = vld [vmem:[%s3535_s9 + $0x188] sm:$0xff] (%p2957_p9)  ;;  %v1916_v45 = vld [vmem:[%s3535_s9 + $0x190] sm:$0xff] (%p2957_p9) }
 0x236   : > { %v1665_v48 = vpop.f32.mrf.mxu1  ;;  %v1894_v31 = vld [vmem:[%s3535_s9 + $0x138] sm:$0xff] (%p2957_p9)  ;;  %1907 = vst [vmem:[%s3677_s20 + $0x528] sm:$0xff] (%p2957_p9), %v1906_v38 }
 0x237   : > { %v1666_v50 = vadd.f32 %v1665_v48, %v1636_v46  ;;  %1775 = vst [vmem:[%s3535_s9 + $0x178] sm:$0xff] %v1721_v47  ;;  %v1918_v46 = vld [vmem:[%s3535_s9 + $0x198] sm:$0xff] (%p2957_p9)  ;;  %v1920_v47 = vld [vmem:[%s3535_s9 + $0x1a0] sm:$0xff] (%p2957_p9)  ;;  %v1922_v48 = vld [vmem:[%s3535_s9 + $0x1a8] sm:$0xff] (%p2957_p9) }
 0x238   : > { %1895 = vst [vmem:[%s3677_s20 + $0x438] sm:$0xff] (%p2957_p9), %v1894_v31  ;;  %v1908_v40 = vld [vmem:[%s3535_s9 + $0x170] sm:$0xff] (%p2957_p9) }
 0x239   : > { %1782 = vst [vmem:[%s3535_s9 + $0x1b0] sm:$0xff] %v1666_v50 }
 0x23a   : > { %v1694_v51 = vpop.f32.mrf.mxu2  ;;  %1909 = vst [vmem:[%s3677_s20 + $0x530] sm:$0xff] (%p2957_p9), %v1908_v40 }
 0x23b   : > { %1913 = vst [vmem:[%s3677_s20 + $0x600] sm:$0xff] (%p2957_p9), %v1912_v42 }
 0x23c   : > { %v1723_v54 = vpop.f32.mrf.mxu3  ;;  %v1638_v55 = vpop.f32.mrf.mxu0  ;;  %1915 = vst [vmem:[%s3677_s20 + $0x608] sm:$0xff] (%p2957_p9), %v1914_v43 }
 0x23d   : > { %v1724_v56 = vadd.f32 %v1723_v54, %v1694_v51  ;;  %1917 = vst [vmem:[%s3677_s20 + $0x610] sm:$0xff] (%p2957_p9), %v1916_v45  ;;  %v1928_v54 = vld [vmem:[%s3535_s9 + $0x1c0] sm:$0xff] (%p2957_p9) }
 0x23e   : > { %v1667_v57 = vpop.f32.mrf.mxu1  ;;  %v1910_v41 = vld [vmem:[%s3535_s9 + $0x178] sm:$0xff] (%p2957_p9)  ;;  %1919 = vst [vmem:[%s3677_s20 + $0x618] sm:$0xff] (%p2957_p9), %v1918_v46 }
 0x23f   : > { %v1668_v58 = vadd.f32 %v1667_v57, %v1638_v55  ;;  %1783 = vst [vmem:[%s3535_s9 + $0x1b8] sm:$0xff] %v1724_v56  ;;  %v1930_v55 = vld [vmem:[%s3535_s9 + $0x1c8] sm:$0xff] (%p2957_p9)  ;;  %v1932_v56 = vld [vmem:[%s3535_s9 + $0x1d0] sm:$0xff] (%p2957_p9)  ;;  %v1934_v57 = vld [vmem:[%s3535_s9 + $0x1d8] sm:$0xff] (%p2957_p9) }
 0x240   : > { %1911 = vst [vmem:[%s3677_s20 + $0x538] sm:$0xff] (%p2957_p9), %v1910_v41  ;;  %v1924_v50 = vld [vmem:[%s3535_s9 + $0x1b0] sm:$0xff] (%p2957_p9) }
 0x241   : > { %1790 = vst [vmem:[%s3535_s9 + $0x1f0] sm:$0xff] %v1668_v58  ;;  %v1936_v58 = vld [vmem:[%s3535_s9 + $0x1e0] sm:$0xff] (%p2957_p9) }
 0x242   : > { %v1696_v59 = vpop.f32.mrf.mxu2  ;;  %1921 = vst [vmem:[%s3677_s20 + $0x620] sm:$0xff] (%p2957_p9), %v1920_v47 }
 0x243   : > { %1798 = sbr.rel (!%p2957_p9) target bundleno = 592 (0x250), region = 55  ;;  %1923 = vst [vmem:[%s3677_s20 + $0x628] sm:$0xff] (%p2957_p9), %v1922_v48 }
 0x244   : > { %v1725_v44 = vpop.f32.mrf.mxu3  ;;  %1925 = vst [vmem:[%s3677_s20 + $0x630] sm:$0xff] (%p2957_p9), %v1924_v50 }
 0x245   : > { %v1726_v49 = vadd.f32 %v1725_v44, %v1696_v59  ;;  %1929 = vst [vmem:[%s3677_s20 + $0x700] sm:$0xff] (%p2957_p9), %v1928_v54  ;;  %v1938_v59 = vld [vmem:[%s3535_s9 + $0x1e8] sm:$0xff] (%p2957_p9) }
 0x246   : > { %v1926_v51 = vld [vmem:[%s3535_s9 + $0x1b8] sm:$0xff] (%p2957_p9)  ;;  %1931 = vst [vmem:[%s3677_s20 + $0x708] sm:$0xff] (%p2957_p9), %v1930_v55 }
 0x247   : > { %1791 = vst [vmem:[%s3535_s9 + $0x1f8] sm:$0xff] %v1726_v49 }
 0x248   : > { %1927 = vst [vmem:[%s3677_s20 + $0x638] sm:$0xff] %v1926_v51  ;;  %v1940_v44 = vld [vmem:[%s3535_s9 + $0x1f0] sm:$0xff] }
 0x249   : > { %1933 = vst [vmem:[%s3677_s20 + $0x710] sm:$0xff] %v1932_v56 }
 0x24a   : > { %1935 = vst [vmem:[%s3677_s20 + $0x718] sm:$0xff] %v1934_v57 }
 0x24b   : > { %1937 = vst [vmem:[%s3677_s20 + $0x720] sm:$0xff] %v1936_v58 }
 0x24c   : > { %1939 = vst [vmem:[%s3677_s20 + $0x728] sm:$0xff] %v1938_v59 }
 0x24d   : > { %1941 = vst [vmem:[%s3677_s20 + $0x730] sm:$0xff] %v1940_v44 }
 0x24e   : > { %v1942_v49 = vld [vmem:[%s3535_s9 + $0x1f8] sm:$0xff] }
 0x24f   : > { %1943 = vst [vmem:[%s3677_s20 + $0x738] sm:$0xff] %v1942_v49 }
 0x250 PF: > { %s12_s17 = sadd.s32 1, %s2872_s17   ;;  %s3837_s9 = smov %s2844_s10 }
 0x251   : > { %p9_p1 = scmp.ge.s32.totalorder %s12_s17, 10   ;;  %s3838_s10 = smov %s2965_s29 }
 0x252   : > { %s3839_s11 = smov %s2852_s12  ;;  %s3840_s12 = smov %s2962_s28 }
 0x253   : > { %s3841_s13 = smov %s2864_s15  ;;  %s3842_s14 = smov %s2868_s16 }
 0x254   : > { %s3843_s15 = smov %s3846_s18  ;;  %s3844_s16 = smov %s3850_s19 }
 0x255   :  { %11 = sbr.rel (!%p9_p1) target bundleno = 5 (0x5), region = 112 }

// kernel: one_head_strong_forward.12
= control target key start
LH: loop header
LB: loop body
LE: loop exit
PB: predicated region body
PF: predicated region fallthrough
CT: control target
= control target key end

     0   :  { %s2355_s18 = smov 0   ;;  %s2703_s0 = inlined_call_operand.vmem [shape: bf16[2,4,256], index: 0, kind: input, shape index: {}]   ;;  %s2704_s1 = inlined_call_operand.vmem [shape: bf16[2,16,128], index: 1, kind: input, shape index: {}]   ;;  %s2705_s2 = inlined_call_operand.vmem [shape: bf16[2,64,64], index: 2, kind: input, shape index: {}]   ;;  %s2706_s3 = inlined_call_operand.vmem [shape: bf16[2,256,32], index: 3, kind: input, shape index: {}]   ;;  %s2707_s4 = inlined_call_operand.vmem [shape: bf16[256,128], index: 4, kind: input, shape index: {}]   ;;  %s2708_s5 = inlined_call_operand.vmem [shape: f32[1,128], index: 5, kind: input, shape index: {}]   ;;  %s2709_s6 = inlined_call_operand.vmem [shape: bf16[128,128], index: 6, kind: input, shape index: {}]   ;;  %s2710_s7 = inlined_call_operand.vmem [shape: f32[1,128], index: 7, kind: input, shape index: {}]   ;;  %s2711_s8 = inlined_call_operand.vmem [shape: bf16[64,128], index: 8, kind: input, shape index: {}]   ;;  %s2712_s9 = inlined_call_operand.vmem [shape: f32[1,128], index: 9, kind: input, shape index: {}]   ;;  %s2713_s10 = inlined_call_operand.vmem [shape: bf16[32,128], index: 10, kind: input, shape index: {}]   ;;  %s2714_s11 = inlined_call_operand.vmem [shape: f32[1,128], index: 11, kind: input, shape index: {}]   ;;  %s2715_s12 = inlined_call_operand.vmem [shape: bf16[16,4], index: 12, kind: input, shape index: {}]   ;;  %s2716_s13 = inlined_call_operand.vmem [shape: bf16[64,16], index: 13, kind: input, shape index: {}]   ;;  %s2717_s14 = inlined_call_operand.vmem [shape: bf16[256,64], index: 14, kind: input, shape index: {}]   ;;  %s2718_s15 = inlined_call_operand.vmem [shape: bf16[2,64,256], index: 15, kind: output, shape index: {}]  }
   0x1 LB: > { %s1754_s19 = sadd.s32 4294967295, %s2273_s18   ;;  %p1758_p0 = scmp.ge.s32.totalorder %s2273_s18, 1  ;;  %s2273_s18 = sphi %s2355_s18, %s25_s18  }
   0x2   : > { %p467_p1 = scmp.lt.s32.totalorder %s2273_s18, 3 }
   0x4   : > { %p468_p2 = pnand %p1758_p0, %p467_p1 }
   0x5   : > { %p530_p3 = scmp.lt.s32.totalorder (!%p468_p2), %s1754_s19, 1 }
   0x6   : > { %471 = sbr.rel (%p468_p2) target bundleno = 921 (0x399), region = 80 }
   0xb   : > { %v2112_v0 = vld [vmem:[%s2707_s4 + $0x38] sm:$0xff]  ;;  %v2111_v2 = vld [vmem:[%s2707_s4 + $0x30] sm:$0xff]  ;;  %s2720_s19 = smov (!%p530_p3, %s1754_s19), 1  ;;  %v2110_v5 = vld [vmem:[%s2707_s4 + $0x28] sm:$0xff]  ;;  %vm823_vm0 = vcmask 1041408   ;;  %vm819_vm1 = vcmask 31744  }
   0xc   : > { %v2120_v1 = vld [vmem:[%s2707_s4 + $0x78] sm:$0xff]  ;;  %695 = vmatpush.bf16.msra.mxu0 %v2112_v0  ;;  %v2119_v3 = vld [vmem:[%s2707_s4 + $0x70] sm:$0xff]  ;;  %s2100_s28 = sshll.u32 %s2720_s19, 2  ;;  %v2118_v6 = vld [vmem:[%s2707_s4 + $0x68] sm:$0xff]  ;;  %vm907_vm2 = vcmask 523264   ;;  %vm978_vm3 = vcmask 130048  }
   0xd   : > { %708 = vmatpush.bf16.msra.mxu1 %v2120_v1  ;;  %s534_s16 = scalar_lea.vmem %s2703_s0, %s2100_s28  ;;  %v2129_v4 = vld [vmem:[%s2709_s6 + $0x38] sm:$0xff]  ;;  %v2128_v8 = vld [vmem:[%s2709_s6 + $0x30] sm:$0xff]  ;;  %v2109_v9 = vld [vmem:[%s2707_s4 + $0x20] sm:$0xff]  ;;  %vm1160_vm4 = vcmask 261120   ;;  %s2104_s17 = sshll.u32 %s2720_s19, 6 }
   0xe   : > { %v556_v7 = vld [vmem:[%s534_s16] sm:$0xf]  ;;  %797 = vmatpush.bf16.msra.mxu2 %v2129_v4  ;;  %v2127_v11 = vld [vmem:[%s2709_s6 + $0x28] sm:$0xff]  ;;  %v2108_v12 = vld [vmem:[%s2707_s4 + $0x18] sm:$0xff]  ;;  %s2101_s16 = sshll.u32 %s2720_s19, 3  ;;  %s2690_s21 = scalar_lea.vmem %s2718_s15, %s2104_s17 }
   0xf   : > { %594 = vst [vmem:[#allocation1] ss:$4 sm:$0xff] %v556_v7  ;;  %v2117_v10 = vld [vmem:[%s2707_s4 + $0x60] sm:$0xff]  ;;  %v2116_v13 = vld [vmem:[%s2707_s4 + $0x58] sm:$0xff]  ;;  %v2107_v15 = vld [vmem:[%s2707_s4 + $0x10] sm:$0xff]  ;;  %s539_s23 = scalar_lea.vmem %s2704_s1, %s2101_s16  ;;  %s2103_s16 = sshll.u32 %s2720_s19, 7 }
  0x10   : > { %696 = vmatpush.bf16.msra.mxu0 %v2111_v2  ;;  %v2126_v14 = vld [vmem:[%s2709_s6 + $0x20] sm:$0xff]  ;;  %v2115_v16 = vld [vmem:[%s2707_s4 + $0x50] sm:$0xff]  ;;  %v2125_v17 = vld [vmem:[%s2709_s6 + $0x18] sm:$0xff]  ;;  %s2489_s25 = scalar_lea.vmem %s2706_s3, %s2103_s16 }
  0x11   : > { %709 = vmatpush.bf16.msra.mxu1 %v2119_v3  ;;  %v2106_v18 = vld [vmem:[%s2707_s4 + $0x8] sm:$0xff]  ;;  %v2124_v20 = vld [vmem:[%s2709_s6 + $0x10] sm:$0xff]  ;;  %v2105_v21 = vld [vmem:[%s2707_s4] sm:$0xff] }
  0x12   : > { %798 = vmatpush.bf16.msra.mxu2 %v2128_v8  ;;  %v2114_v19 = vld [vmem:[%s2707_s4 + $0x48] sm:$0xff]  ;;  %v2113_v22 = vld [vmem:[%s2707_s4 + $0x40] sm:$0xff]  ;;  %v2138_v34 = vld [vmem:[%s2711_s8 + $0x18] sm:$0xff] }
  0x13   : > { %v2123_v23 = vld [vmem:[%s2709_s6 + $0x8] sm:$0xff]  ;;  %v2122_v26 = vld [vmem:[%s2709_s6] sm:$0xff]  ;;  %v2137_v39 = vld [vmem:[%s2711_s8 + $0x10] sm:$0xff] }
  0x14   : > { %697 = vmatpush.bf16.msra.mxu0 %v2110_v5  ;;  %v2121_v27 = vld [vmem:[%s539_s23] sm:$0xff]  ;;  %v2136_v40 = vld [vmem:[%s2711_s8 + $0x8] sm:$0xff]  ;;  %s2102_s23 = sshll.u32 %s2720_s19, 5  ;;  %v2141_v61 = vld [vmem:[%s2716_s13 + $0x10] sm:$0xff] }
  0x15   : > { %710 = vmatpush.bf16.msra.mxu1 %v2118_v6  ;;  %v2263_v28 = vld [vmem:[%s2708_s5] ss:$0 sm:$0xff]  ;;  %s544_s26 = scalar_lea.vmem %s2705_s2, %s2102_s23  ;;  %v2140_v57 = vld [vmem:[%s2716_s13 + $0x8] sm:$0xff]  ;;  %v2142_v62 = vld [vmem:[%s2716_s13 + $0x18] sm:$0xff] }
  0x16   : > { %799 = vmatpush.bf16.msra.mxu2 %v2127_v11  ;;  %v595_v24 = vld.sshfl [vmem:[#allocation1] sm:$0xff pattern:$0x73625140]  ;;  %v596_v25 = vld.sshfl [vmem:[#allocation1 + $0x8] sm:$0xff pattern:$0x73625140] }
  0x17   : > { %v2130_v36 = vld [vmem:[%s2715_s12] sm:$0xff]  ;;  %v2132_v43 = vld [vmem:[%s544_s26 + $0x8] sm:$0xff]  ;;  %v2133_v45 = vld [vmem:[%s544_s26 + $0x10] sm:$0xff] }
  0x18   : > { %698 = vmatpush.bf16.msra.mxu0 %v2109_v9  ;;  %v2135_v41 = vld [vmem:[%s2711_s8] sm:$0xff]  ;;  %v2134_v56 = vld [vmem:[%s544_s26 + $0x18] sm:$0xff]  ;;  %v2160_v58 = vld [vmem:[%s2713_s10 + $0x8] sm:$0xff] }
  0x19   : > { %711 = vmatpush.bf16.msra.mxu1 %v2117_v10  ;;  %v2131_v42 = vld [vmem:[%s544_s26] sm:$0xff]  ;;  %v2144_v63 = vld [vmem:[%s2489_s25 + $0x8] sm:$0xff]  ;;  %v2145_v0 = vld [vmem:[%s2489_s25 + $0x10] sm:$0xff] }
  0x1a   : > { %800 = vmatpush.bf16.msra.mxu2 %v2126_v14  ;;  %v2264_v47 = vld [vmem:[%s2710_s7] ss:$0 sm:$0xff]  ;;  %v2146_v2 = vld [vmem:[%s2489_s25 + $0x18] sm:$0xff]  ;;  %v2148_v14 = vld [vmem:[%s2489_s25 + $0x28] sm:$0xff] }
  0x1b   : > { %v2139_v55 = vld [vmem:[%s2716_s13] sm:$0xff] }
  0x1c   : > { %699 = vmatpush.bf16.msra.mxu0 %v2108_v12  ;;  %v2159_v59 = vld [vmem:[%s2713_s10] sm:$0xff] }
  0x1d   : > { %712 = vmatpush.bf16.msra.mxu1 %v2116_v13  ;;  %v2143_v60 = vld [vmem:[%s2489_s25] sm:$0xff] }
  0x1e   : > { %801 = vmatpush.bf16.msra.mxu2 %v2125_v17  ;;  %v2265_v4 = vld [vmem:[%s2712_s9] ss:$0 sm:$0xff] }
  0x1f   : > { %v2147_v9 = vld [vmem:[%s2489_s25 + $0x20] sm:$0xff] }
  0x20   : > { %700 = vmatpush.bf16.msra.mxu0 %v2107_v15 }
  0x21   : > { %713 = vmatpush.bf16.msra.mxu1 %v2115_v16 }
  0x22   : > { %802 = vmatpush.bf16.msra.mxu2 %v2124_v20 }
  0x24   : > { %701 = vmatpush.bf16.msra.mxu0 %v2106_v18  ;;  %v2149_v18 = vld [vmem:[%s2489_s25 + $0x30] sm:$0xff] }
  0x25   : > { %714 = vmatpush.bf16.msra.mxu1 %v2114_v19 }
  0x26   : > { %803 = vmatpush.bf16.msra.mxu2 %v2123_v23 }
  0x28   : > { %702 = vmatpush.bf16.msra.mxu0 %v2105_v21 }
  0x29   : > { %715 = vmatpush.bf16.msra.mxu1 %v2113_v22 }
  0x2a   : > { %804 = vmatpush.bf16.msra.mxu2 %v2122_v26 }
  0x2b   : > { %703 = vmatmul.bf16.vlgmr.msra.gmra.mxu0 %v595_v24  ;;  %v2150_v24 = vld [vmem:[%s2489_s25 + $0x38] sm:$0xff] }
  0x2c   : > { %716 = vmatmul.bf16.vlgmr.msra.gmra.mxu1 %v596_v25 }
  0x2d   : > { %805 = vmatmul.bf16.vlgmr.msra.gmra.mxu2 %v2121_v27  ;;  %1215 = vmatpush.bf16.msrb.mxu1 %v2160_v58 }
  0x31   : > { %1216 = vmatpush.bf16.msrb.mxu1 %v2159_v59 }
  0x3c   : > { %2002 = vmatmul.msk.bf16.vlgmr.msrb.gmra.mxu1 %vm1160_vm4, %v2143_v60  ;;  %v2170_v60 = vld [vmem:[%s2717_s14 + $0x48] sm:$0xff] }
  0x4c   : > { %2003 = vmatmul.msk.bf16.gmra.mxu1 %vm1160_vm4, %v2144_v63  ;;  %v2165_v63 = vld [vmem:[%s2717_s14 + $0x20] sm:$0xff] }
  0x5c   : > { %2004 = vmatmul.msk.bf16.gmra.mxu1 %vm1160_vm4, %v2145_v0  ;;  %v2171_v0 = vld [vmem:[%s2717_s14 + $0x50] sm:$0xff] }
  0x6c   : > { %2005 = vmatmul.msk.bf16.gmra.mxu1 %vm1160_vm4, %v2146_v2  ;;  %v2156_v2 = vld [vmem:[%s2489_s25 + $0x68] sm:$0xff] }
  0x7c   : > { %2006 = vmatmul.msk.bf16.gmra.mxu1 %vm1160_vm4, %v2147_v9 }
  0x8c   : > { %2007 = vmatmul.msk.bf16.gmra.mxu1 %vm1160_vm4, %v2148_v14 }
  0x9c   : > { %2008 = vmatmul.msk.bf16.gmra.mxu1 %vm1160_vm4, %v2149_v18 }
  0xa8   : > { %v704_v29 = vpop.f32.mrf.mxu0 }
  0xa9   : > { %v717_v30 = vpop.f32.mrf.mxu1  ;;  %v705_v31 = vadd.f32 %v2263_v28, %v704_v29 }
  0xab   : > { %v718_v32 = vadd.f32 %v717_v30, %v705_v31 }
  0xac   : > { %2009 = vmatmul.msk.bf16.gmra.mxu1 %vm1160_vm4, %v2150_v24 }
  0xad   : > { %v813_v33 = vpack.c.bf16 %v718_v32, %v718_v32 }
  0xaf   : > { %v825_v35 = vsel %vm823_vm0, %v813_v33, 0 }
  0xb0   : > { %v706_v37 = vpop.f32.mrf.mxu0  ;;  %834 = vmatpush.bf16.msra.mxu3 %v825_v35  ;;  %v806_v44 = vpop.f32.mrf.mxu2 }
  0xb1   : > { %v719_v38 = vpop.f32.mrf.mxu1  ;;  %v807_v49 = vadd.f32 %v2264_v47, %v806_v44 }
  0xb3   : > { %1873 = vmatmul.msk.bf16.vlgmr.msra.gmra.mxu3 %vm819_vm1, %v2130_v36 }
  0xb4   : > { %924 = vmatpush.bf16.msrb.mxu3 %v2138_v34 }
  0xb8   : > { %925 = vmatpush.bf16.msrb.mxu3 %v2137_v39  ;;  %v808_v48 = vpop.f32.mrf.mxu2 }
  0xb9   : > { %v809_v50 = vadd.f32 %v2264_v47, %v808_v48  ;;  %v2152_v48 = vld [vmem:[%s2489_s25 + $0x48] sm:$0xff] }
  0xbc   : > { %926 = vmatpush.bf16.msrb.mxu3 %v2136_v40 }
  0xc0   : > { %927 = vmatpush.bf16.msrb.mxu3 %v2135_v41 }
  0xc3   : > { %1906 = vmatmul.msk.bf16.vlgmr.msrb.gmra.mxu3 %vm907_vm2, %v2131_v42  ;;  %v2521_v42 = vpop.f32.mrf.mxu1 }
  0xc4   : > { %2177 = vmatpush.bf16.msra.mxu3 %v2160_v58 }
  0xc8   : > { %2178 = vmatpush.bf16.msra.mxu3 %v2159_v59  ;;  %v2164_v59 = vld [vmem:[%s2717_s14 + $0x18] sm:$0xff] }
  0xcb   : > { %v2533_v47 = vpop.f32.mrf.mxu1 }
  0xd3   : > { %1907 = vmatmul.msk.bf16.gmra.mxu3 %vm907_vm2, %v2132_v43  ;;  %v2151_v43 = vld [vmem:[%s2489_s25 + $0x40] sm:$0xff] }
  0xd4   : > { %2010 = vmatmul.msk.bf16.gmra.mxu1 %vm1160_vm4, %v2151_v43 }
  0xe3   : > { %1908 = vmatmul.msk.bf16.gmra.mxu3 %vm907_vm2, %v2133_v45  ;;  %v2161_v45 = vld [vmem:[%s2717_s14] sm:$0xff] }
  0xe4   : > { %2011 = vmatmul.msk.bf16.gmra.mxu1 %vm1160_vm4, %v2152_v48 }
  0xf3   : > { %1909 = vmatmul.msk.bf16.gmra.mxu3 %vm907_vm2, %v2134_v56  ;;  %v2154_v56 = vld [vmem:[%s2489_s25 + $0x58] sm:$0xff] }
 0x136   : > { %v836_v46 = vpop.f32.mrf.mxu3 }
 0x137   : > { %v841_v52 = vadd.f32 %v836_v46, %v807_v49  ;;  %v2167_v46 = vld [vmem:[%s2717_s14 + $0x30] sm:$0xff]  ;;  %v2162_v49 = vld [vmem:[%s2717_s14 + $0x8] sm:$0xff] }
 0x13e   : > { %v838_v51 = vpop.f32.mrf.mxu3 }
 0x13f   : > { %v842_v53 = vadd.f32 %v838_v51, %v809_v50  ;;  %v2168_v50 = vld [vmem:[%s2717_s14 + $0x38] sm:$0xff]  ;;  %v2543_v51 = vpop.f32.mrf.mxu1 }
 0x141   : > { %v957_v54 = vpack.c.bf16 %v842_v53, %v841_v52  ;;  %v2153_v52 = vld [vmem:[%s2489_s25 + $0x50] sm:$0xff] }
 0x142   : > { %2012 = vmatmul.msk.bf16.vlgmr.msra.gmra.mxu3 %vm1160_vm4, %v2153_v52 }
 0x143   : > { %998 = vmatpush.bf16.msrb.mxu0 %v957_v54  ;;  %v2163_v54 = vld [vmem:[%s2717_s14 + $0x10] sm:$0xff] }
 0x146   : > { %1926 = vmatmul.msk.bf16.vlgmr.msrb.gmra.mxu0 %vm978_vm3, %v2139_v55  ;;  %v929_v1 = vpop.f32.mrf.mxu3  ;;  %v2169_v55 = vld [vmem:[%s2717_s14 + $0x40] sm:$0xff] }
 0x147   : > { %v930_v5 = vadd.f32 %v2265_v4, %v929_v1  ;;  %v2549_v53 = vpop.f32.mrf.mxu1 }
 0x14e   : > { %v931_v3 = vpop.f32.mrf.mxu3 }
 0x14f   : > { %v932_v38 = vadd.f32 %v2265_v4, %v931_v3 }
 0x152   : > { %2013 = vmatmul.msk.bf16.gmra.mxu3 %vm1160_vm4, %v2154_v56 }
 0x156   : > { %1927 = vmatmul.msk.bf16.gmra.mxu0 %vm978_vm3, %v2140_v57  ;;  %v934_v8 = vpop.f32.mrf.mxu3  ;;  %v2560_v57 = vpop.f32.mrf.mxu1 }
 0x157   : > { %v935_v33 = vadd.f32 %v2265_v4, %v934_v8  ;;  %v2173_v8 = vld [vmem:[%s2717_s14 + $0x60] sm:$0xff] }
 0x15e   : > { %v936_v11 = vpop.f32.mrf.mxu3  ;;  %v2563_v58 = vpop.f32.mrf.mxu1 }
 0x15f   : > { %v937_v34 = vadd.f32 %v2265_v4, %v936_v11 }
 0x166   : > { %1928 = vmatmul.msk.bf16.gmra.mxu0 %vm978_vm3, %v2141_v61  ;;  %v939_v13 = vpop.f32.mrf.mxu3  ;;  %v2155_v61 = vld [vmem:[%s2489_s25 + $0x60] sm:$0xff] }
 0x167   : > { %v940_v27 = vadd.f32 %v2265_v4, %v939_v13  ;;  %2014 = vmatmul.msk.bf16.gmra.mxu3 %vm1160_vm4, %v2155_v61 }
 0x16e   : > { %v941_v16 = vpop.f32.mrf.mxu3 }
 0x16f   : > { %v942_v28 = vadd.f32 %v2265_v4, %v941_v16  ;;  %v2623_v16 = vld [vmem:[%s2714_s11] ss:$0 sm:$0xff] }
 0x170   : > { %v1224_v56 = vadd.f32 %v2623_v16, %v2543_v51 }
 0x176   : > { %1929 = vmatmul.msk.bf16.gmra.mxu0 %vm978_vm3, %v2142_v62  ;;  %v944_v20 = vpop.f32.mrf.mxu3  ;;  %v2575_v62 = vpop.f32.mrf.mxu1 }
 0x177   : > { %v945_v23 = vadd.f32 %v2265_v4, %v944_v20  ;;  %2015 = vmatmul.msk.bf16.gmra.mxu3 %vm1160_vm4, %v2156_v2 }
 0x17e   : > { %v946_v22 = vpop.f32.mrf.mxu3  ;;  %v2583_v1 = vpop.f32.mrf.mxu1 }
 0x17f   : > { %v947_v25 = vadd.f32 %v2265_v4, %v946_v22  ;;  %v2166_v4 = vld [vmem:[%s2717_s14 + $0x28] sm:$0xff] }
 0x186   : > { %v2589_v3 = vpop.f32.mrf.mxu1 }
 0x1c3   : > { %v1000_v6 = vpop.f32.mrf.mxu0 }
 0x1c4   : > { %v1020_v7 = vadd.f32 %v1000_v6, %v930_v5  ;;  %v2172_v5 = vld [vmem:[%s2717_s14 + $0x58] sm:$0xff]  ;;  %v2599_v6 = vpop.f32.mrf.mxu1 }
 0x1cb   : > { %v1002_v10 = vpop.f32.mrf.mxu0 }
 0x1cc   : > { %v1021_v40 = vadd.f32 %v1002_v10, %v932_v38  ;;  %v2606_v9 = vpop.f32.mrf.mxu1  ;;  %v2158_v10 = vld [vmem:[%s2489_s25 + $0x78] sm:$0xff] }
 0x1ce   : > { %v1330_v44 = vpack.c.bf16 %v1021_v40, %v1020_v7  ;;  %v2157_v7 = vld [vmem:[%s2489_s25 + $0x70] sm:$0xff] }
 0x1cf   : > { %2016 = vmatmul.msk.bf16.gmra.mxu3 %vm1160_vm4, %v2157_v7 }
 0x1d3   : > { %v1005_v12 = vpop.f32.mrf.mxu0 }
 0x1d4   : > { %v1022_v39 = vadd.f32 %v1005_v12, %v935_v33  ;;  %v2611_v11 = vpop.f32.mrf.mxu1  ;;  %v2174_v12 = vld [vmem:[%s2717_s14 + $0x68] sm:$0xff] }
 0x1db   : > { %v1007_v15 = vpop.f32.mrf.mxu0 }
 0x1dc   : > { %v1023_v36 = vadd.f32 %v1007_v15, %v937_v34  ;;  %v1248_v13 = vpop.f32.mrf.mxu1  ;;  %v2175_v15 = vld [vmem:[%s2717_s14 + $0x70] sm:$0xff] }
 0x1de   : > { %v1331_v41 = vpack.c.bf16 %v1023_v36, %v1022_v39 }
 0x1df   : > { %2017 = vmatmul.msk.bf16.gmra.mxu3 %vm1160_vm4, %v2158_v10 }
 0x1e3   : > { %v1010_v17 = vpop.f32.mrf.mxu0 }
 0x1e4   : > { %v1024_v35 = vadd.f32 %v1010_v17, %v940_v27  ;;  %v1250_v14 = vpop.f32.mrf.mxu1  ;;  %v1249_v17 = vadd.f32 %v2623_v16, %v1248_v13 }
 0x1e5   : > { %v1251_v22 = vadd.f32 %v2623_v16, %v1250_v14 }
 0x1eb   : > { %v1012_v19 = vpop.f32.mrf.mxu0 }
 0x1ec   : > { %v1025_v31 = vadd.f32 %v1012_v19, %v942_v28  ;;  %v1253_v20 = vpop.f32.mrf.mxu1 }
 0x1ed   : > { %v1254_v27 = vadd.f32 %v2623_v16, %v1253_v20 }
 0x1ee   : > { %v1332_v37 = vpack.c.bf16 %v1025_v31, %v1024_v35 }
 0x1f3   : > { %v1015_v21 = vpop.f32.mrf.mxu0 }
 0x1f4   : > { %v1026_v29 = vadd.f32 %v1015_v21, %v945_v23 }
 0x1fb   : > { %v1017_v26 = vpop.f32.mrf.mxu0 }
 0x1fc   : > { %v1027_v30 = vadd.f32 %v1017_v26, %v947_v25  ;;  %v2176_v25 = vld [vmem:[%s2717_s14 + $0x78] sm:$0xff]  ;;  %v1255_v26 = vpop.f32.mrf.mxu1 }
 0x1fe   : > { %v1333_v32 = vpack.c.bf16 %v1027_v30, %v1026_v29 }
 0x200   : > { %1466 = vmatpush.bf16.msra.mxu0 %v1333_v32  ;;  %2179 = vmatpush.bf16.msrb.mxu2 %v1333_v32  ;;  %v1256_v32 = vadd.f32 %v2623_v16, %v1255_v26 }
 0x204   : > { %1467 = vmatpush.bf16.msra.mxu0 %v1332_v37  ;;  %2180 = vmatpush.bf16.msrb.mxu2 %v1332_v37  ;;  %v1258_v31 = vpop.f32.mrf.mxu1  ;;  %v1219_v37 = vadd.f32 %v2623_v16, %v2521_v42 }
 0x205   : > { %v1259_v36 = vadd.f32 %v2623_v16, %v1258_v31 }
 0x208   : > { %1468 = vmatpush.bf16.msra.mxu0 %v1331_v41  ;;  %2181 = vmatpush.bf16.msrb.mxu2 %v1331_v41 }
 0x20c   : > { %1469 = vmatpush.bf16.msra.mxu0 %v1330_v44  ;;  %2182 = vmatpush.bf16.msrb.mxu2 %v1330_v44  ;;  %v1260_v39 = vpop.f32.mrf.mxu1 }
 0x20d   : > { %v1261_v48 = vadd.f32 %v2623_v16, %v1260_v39 }
 0x20f   : > { %2082 = vmatmul.msk.bf16.vlgmr.msra.gmra.mxu0 %vm907_vm2, %v2161_v45  ;;  %2088 = vmatmul.msk.bf16.vlgmr.msrb.gmra.mxu2 %vm907_vm2, %v2167_v46  ;;  %v1268_v45 = vpop.f32.mrf.mxu3  ;;  %v1221_v46 = vadd.f32 %v2623_v16, %v2533_v47 }
 0x210   : > { %v1269_v51 = vadd.f32 %v2623_v16, %v1268_v45 }
 0x217   : > { %v1270_v61 = vpop.f32.mrf.mxu3 }
 0x21f   : > { %2083 = vmatmul.msk.bf16.gmra.mxu0 %vm907_vm2, %v2162_v49  ;;  %2089 = vmatmul.msk.bf16.gmra.mxu2 %vm907_vm2, %v2168_v50  ;;  %v1273_v13 = vpop.f32.mrf.mxu3 }
 0x22f   : > { %2084 = vmatmul.msk.bf16.gmra.mxu0 %vm907_vm2, %v2163_v54  ;;  %2090 = vmatmul.msk.bf16.gmra.mxu2 %vm907_vm2, %v2169_v55  ;;  %v1263_v54 = vpop.f32.mrf.mxu1 }
 0x230   : > { %v1264_v42 = vadd.f32 %v2623_v16, %v1263_v54 }
 0x237   : > { %v1265_v47 = vpop.f32.mrf.mxu1 }
 0x23f   : > { %2085 = vmatmul.msk.bf16.gmra.mxu0 %vm907_vm2, %v2164_v59  ;;  %2091 = vmatmul.msk.bf16.gmra.mxu2 %vm907_vm2, %v2170_v60 }
 0x24f   : > { %2086 = vmatmul.msk.bf16.gmra.mxu0 %vm907_vm2, %v2165_v63  ;;  %2092 = vmatmul.msk.bf16.gmra.mxu2 %vm907_vm2, %v2171_v0 }
 0x25f   : > { %2087 = vmatmul.msk.bf16.gmra.mxu0 %vm907_vm2, %v2166_v4  ;;  %2093 = vmatmul.msk.bf16.gmra.mxu2 %vm907_vm2, %v2172_v5  ;;  %v1226_v4 = vadd.f32 %v2623_v16, %v2549_v53  ;;  %v1266_v5 = vadd.f32 %v2623_v16, %v1265_v47  ;;  %v1275_v53 = vpop.f32.mrf.mxu3  ;;  %v1244_v47 = vadd.f32 %v2623_v16, %v2606_v9 }
 0x26f   : > { %2094 = vmatmul.msk.bf16.gmra.mxu2 %vm907_vm2, %v2173_v8 }
 0x27f   : > { %2095 = vmatmul.msk.bf16.gmra.mxu2 %vm907_vm2, %v2174_v12 }
 0x28c   : > { %v1471_v21 = vpop.f32.mrf.mxu0 }
 0x28d   : > { %v1551_v40 = vadd.f32 %v1471_v21, %v1219_v37 }
 0x28f   : > { %2096 = vmatmul.msk.bf16.gmra.mxu2 %vm907_vm2, %v2175_v15  ;;  %v1229_v15 = vadd.f32 %v2623_v16, %v2560_v57  ;;  %v1274_v57 = vadd.f32 %v2623_v16, %v1273_v13 }
 0x292   : > { %v1501_v18 = vpop.f32.mrf.mxu2 }
 0x293   : > { %v2627_v19 = vadd.f32 %v1501_v18, %v1249_v17 }
 0x294   : > { %v1473_v29 = vpop.f32.mrf.mxu0 }
 0x295   : > { %v1552_v50 = vadd.f32 %v1473_v29, %v1221_v46 }
 0x29a   : > { %v1503_v23 = vpop.f32.mrf.mxu2 }
 0x29b   : > { %v2630_v24 = vadd.f32 %v1503_v23, %v1251_v22  ;;  %v1231_v23 = vadd.f32 %v2623_v16, %v2563_v58  ;;  %v1236_v58 = vadd.f32 %v2623_v16, %v2583_v1 }
 0x29c   : > { %v1476_v35 = vpop.f32.mrf.mxu0 }
 0x29d   : > { %v1553_v63 = vadd.f32 %v1476_v35, %v1224_v56 }
 0x29f   : > { %2097 = vmatmul.msk.bf16.gmra.mxu2 %vm907_vm2, %v2176_v25  ;;  %v1271_v25 = vadd.f32 %v2623_v16, %v1270_v61 }
 0x2a2   : > { %v1506_v28 = vpop.f32.mrf.mxu2 }
 0x2a3   : > { %v2637_v30 = vadd.f32 %v1506_v28, %v1254_v27 }
 0x2a4   : > { %v1478_v44 = vpop.f32.mrf.mxu0 }
 0x2a5   : > { %v1554_v8 = vadd.f32 %v1478_v44, %v1226_v4 }
 0x2aa   : > { %v1508_v33 = vpop.f32.mrf.mxu2 }
 0x2ab   : > { %v2640_v34 = vadd.f32 %v1508_v33, %v1256_v32  ;;  %v1278_v32 = vpop.f32.mrf.mxu3  ;;  %v1234_v33 = vadd.f32 %v2623_v16, %v2575_v62  ;;  %v1239_v62 = vadd.f32 %v2623_v16, %v2589_v3 }
 0x2ac   : > { %v1481_v59 = vpop.f32.mrf.mxu0 }
 0x2ad   : > { %v1555_v18 = vadd.f32 %v1481_v59, %v1229_v15 }
 0x2b2   : > { %v1511_v38 = vpop.f32.mrf.mxu2 }
 0x2b3   : > { %v1567_v41 = vadd.f32 %v1511_v38, %v1259_v36 }
 0x2b4   : > { %v1483_v10 = vpop.f32.mrf.mxu0 }
 0x2b5   : > { %v2191_v43 = vpack.i.bf16 %v1567_v41, %v1551_v40  ;;  %v1556_v27 = vadd.f32 %v1483_v10, %v1231_v23  ;;  %v1276_v40 = vadd.f32 %v2623_v16, %v1275_v53 }
 0x2b7   : > { %2192 = vxpose.xlu0.b32.start [1/16] (narrow) %v2191_v43, 64  ;;  %v1280_v43 = vpop.f32.mrf.mxu3 }
 0x2b8   : > { %v1281_v56 = vadd.f32 %v2623_v16, %v1280_v43 }
 0x2ba   : > { %v1513_v49 = vpop.f32.mrf.mxu2 }
 0x2bb   : > { %v1568_v52 = vadd.f32 %v1513_v49, %v1261_v48  ;;  %v1279_v48 = vadd.f32 %v2623_v16, %v1278_v32 }
 0x2bc   : > { %v1486_v21 = vpop.f32.mrf.mxu0 }
 0x2bd   : > { %v2193_v55 = vpack.i.bf16 %v1568_v52, %v1552_v50  ;;  %v1557_v36 = vadd.f32 %v1486_v21, %v1234_v33 }
 0x2bf   : > { %2194 = vxpose.xlu0.b32.cont [2/16] (narrow) %v2193_v55, 64  ;;  %v1283_v55 = vpop.f32.mrf.mxu3 }
 0x2c0   : > { %v1284_v3 = vadd.f32 %v2623_v16, %v1283_v55 }
 0x2c2   : > { %v1516_v60 = vpop.f32.mrf.mxu2 }
 0x2c3   : > { %v1569_v0 = vadd.f32 %v1516_v60, %v1264_v42  ;;  %v1241_v42 = vadd.f32 %v2623_v16, %v2599_v6 }
 0x2c4   : > { %v1488_v31 = vpop.f32.mrf.mxu0 }
 0x2c5   : > { %v2195_v2 = vpack.i.bf16 %v1569_v0, %v1553_v63  ;;  %v1558_v44 = vadd.f32 %v1488_v31, %v1236_v58 }
 0x2c7   : > { %2196 = vxpose.xlu0.b32.cont [3/16] (narrow) %v2195_v2, 64  ;;  %v1285_v2 = vpop.f32.mrf.mxu3 }
 0x2c8   : > { %v1286_v13 = vadd.f32 %v2623_v16, %v1285_v2 }
 0x2ca   : > { %v1518_v7 = vpop.f32.mrf.mxu2 }
 0x2cb   : > { %v1570_v12 = vadd.f32 %v1518_v7, %v1266_v5 }
 0x2cc   : > { %v1491_v39 = vpop.f32.mrf.mxu0 }
 0x2cd   : > { %v2197_v14 = vpack.i.bf16 %v1570_v12, %v1554_v8  ;;  %v1559_v50 = vadd.f32 %v1491_v39, %v1239_v62  ;;  %v1246_v12 = vadd.f32 %v2623_v16, %v2611_v11 }
 0x2cf   : > { %2198 = vxpose.xlu0.b32.cont [4/16] (narrow) %v2197_v14, 64  ;;  %v1288_v10 = vpop.f32.mrf.mxu3 }
 0x2d2   : > { %v1521_v17 = vpop.f32.mrf.mxu2 }
 0x2d3   : > { %v1571_v20 = vadd.f32 %v1521_v17, %v1269_v51 }
 0x2d4   : > { %v1493_v54 = vpop.f32.mrf.mxu0 }
 0x2d5   : > { %v2199_v22 = vpack.i.bf16 %v1571_v20, %v1555_v18  ;;  %v1560_v60 = vadd.f32 %v1493_v54, %v1241_v42  ;;  %v1289_v18 = vadd.f32 %v2623_v16, %v1288_v10 }
 0x2d7   : > { %2200 = vxpose.xlu0.b32.cont [5/16] (narrow) %v2199_v22, 64  ;;  %v1290_v20 = vpop.f32.mrf.mxu3 }
 0x2d8   : > { %v1291_v53 = vadd.f32 %v2623_v16, %v1290_v20 }
 0x2da   : > { %v1523_v26 = vpop.f32.mrf.mxu2 }
 0x2db   : > { %v1572_v28 = vadd.f32 %v1523_v26, %v1271_v25 }
 0x2dc   : > { %v1496_v0 = vpop.f32.mrf.mxu0 }
 0x2dd   : > { %v2201_v29 = vpack.i.bf16 %v1572_v28, %v1556_v27  ;;  %v1561_v5 = vadd.f32 %v1496_v0, %v1244_v47 }
 0x2df   : > { %2202 = vxpose.xlu0.b32.cont [6/16] (narrow) %v2201_v29, 64  ;;  %v1293_v25 = vpop.f32.mrf.mxu3 }
 0x2e0   : > { %v1294_v27 = vadd.f32 %v2623_v16, %v1293_v25 }
 0x2e2   : > { %v1526_v35 = vpop.f32.mrf.mxu2 }
 0x2e3   : > { %v1573_v37 = vadd.f32 %v1526_v35, %v1274_v57 }
 0x2e4   : > { %v1498_v6 = vpop.f32.mrf.mxu0 }
 0x2e5   : > { %v2203_v38 = vpack.i.bf16 %v1573_v37, %v1557_v36  ;;  %v1562_v51 = vadd.f32 %v1498_v6, %v1246_v12 }
 0x2e7   : > { %2204 = vxpose.xlu0.b32.cont [7/16] (narrow) %v2203_v38, 64  ;;  %v1295_v57 = vpop.f32.mrf.mxu3 }
 0x2ea   : > { %v1528_v41 = vpop.f32.mrf.mxu2 }
 0x2eb   : > { %v1574_v45 = vadd.f32 %v1528_v41, %v1276_v40 }
 0x2ed   : > { %v2205_v46 = vpack.i.bf16 %v1574_v45, %v1558_v44 }
 0x2ef   : > { %2206 = vxpose.xlu0.b32.cont [8/16] (narrow) %v2205_v46, 64 }
 0x2f2   : > { %v1531_v49 = vpop.f32.mrf.mxu2 }
 0x2f3   : > { %v1575_v52 = vadd.f32 %v1531_v49, %v1279_v48 }
 0x2f5   : > { %v2207_v1 = vpack.i.bf16 %v1575_v52, %v1559_v50 }
 0x2f7   : > { %2208 = vxpose.xlu0.b32.cont [9/16] (narrow) %v2207_v1, 64 }
 0x2fa   : > { %v1533_v59 = vpop.f32.mrf.mxu2 }
 0x2fb   : > { %v1576_v61 = vadd.f32 %v1533_v59, %v1281_v56 }
 0x2fd   : > { %v2209_v63 = vpack.i.bf16 %v1576_v61, %v1560_v60 }
 0x2ff   : > { %2210 = vxpose.xlu0.b32.cont [10/16] (narrow) %v2209_v63, 64 }
 0x302   : > { %v1536_v4 = vpop.f32.mrf.mxu2 }
 0x303   : > { %v1577_v7 = vadd.f32 %v1536_v4, %v1284_v3 }
 0x305   : > { %v2211_v8 = vpack.i.bf16 %v1577_v7, %v1561_v5 }
 0x307   : > { %2212 = vxpose.xlu0.b32.cont [11/16] (narrow) %v2211_v8, 64 }
 0x30a   : > { %v1538_v14 = vpop.f32.mrf.mxu2 }
 0x30b   : > { %v1578_v15 = vadd.f32 %v1538_v14, %v1286_v13 }
 0x30d   : > { %v2213_v17 = vpack.i.bf16 %v1578_v15, %v1562_v51 }
 0x30f   : > { %2214 = vxpose.xlu0.b32.cont [12/16] (narrow) %v2213_v17, 64 }
 0x312   : > { %v1541_v9 = vpop.f32.mrf.mxu2 }
 0x313   : > { %v1579_v21 = vadd.f32 %v1541_v9, %v1289_v18 }
 0x315   : > { %v2215_v22 = vpack.i.bf16 %v1579_v21, %v2627_v19  ;;  %v1296_v19 = vadd.f32 %v2623_v16, %v1295_v57 }
 0x317   : > { %2216 = vxpose.xlu0.b32.cont [13/16] (narrow) %v2215_v22, 64 }
 0x31a   : > { %v1543_v23 = vpop.f32.mrf.mxu2 }
 0x31b   : > { %v1580_v11 = vadd.f32 %v1543_v23, %v1291_v53 }
 0x31d   : > { %v2217_v26 = vpack.i.bf16 %v1580_v11, %v2630_v24 }
 0x31f   : > { %2218 = vxpose.xlu0.b32.cont [14/16] (narrow) %v2217_v26, 64 }
 0x322   : > { %v1546_v28 = vpop.f32.mrf.mxu2 }
 0x323   : > { %v1581_v29 = vadd.f32 %v1546_v28, %v1294_v27 }
 0x325   : > { %v2219_v31 = vpack.i.bf16 %v1581_v29, %v2637_v30 }
 0x327   : > { %2220 = vxpose.xlu0.b32.cont [15/16] (narrow) %v2219_v31, 64 }
 0x32a   : > { %v1548_v32 = vpop.f32.mrf.mxu2 }
 0x32b   : > { %v1582_v33 = vadd.f32 %v1548_v32, %v1296_v19 }
 0x32d   : > { %v2221_v35 = vpack.i.bf16 %v1582_v33, %v2640_v34 }
 0x32f   : > { %2222 = vxpose.xlu0.b32.end [16/16] (narrow) %v2221_v35, 64 }
 0x35b   : > { %v2223_v36 = vpop.trf.xlu0 }
 0x35c   : > { %v2227_v37 = vunpack.i.h.bf16 %v2223_v36  ;;  %v2224_v24 = vunpack.i.l.bf16 %v2223_v36 }
 0x35e   : > { %v1647_v30 = vpack.c.bf16 %v2227_v37, %v2224_v24 }
 0x360   : > { %1655 = vst [vmem:[%s2690_s21] sm:$0xff] %v1647_v30 }
 0x363   : > { %v2228_v16 = vpop.trf.xlu0 }
 0x364   : > { %v2232_v38 = vunpack.i.h.bf16 %v2228_v16  ;;  %v2229_v58 = vunpack.i.l.bf16 %v2228_v16 }
 0x366   : > { %v1648_v34 = vpack.c.bf16 %v2232_v38, %v2229_v58 }
 0x368   : > { %1656 = vst [vmem:[%s2690_s21 + $0x8] sm:$0xff] %v1648_v34 }
 0x36b   : > { %v2233_v39 = vpop.trf.xlu0 }
 0x36c   : > { %v2237_v40 = vunpack.i.h.bf16 %v2233_v39  ;;  %v2234_v41 = vunpack.i.l.bf16 %v2233_v39 }
 0x36e   : > { %v1649_v43 = vpack.c.bf16 %v2237_v40, %v2234_v41 }
 0x370   : > { %1657 = vst [vmem:[%s2690_s21 + $0x10] sm:$0xff] %v1649_v43 }
 0x373   : > { %v2238_v44 = vpop.trf.xlu0 }
 0x374   : > { %v2242_v45 = vunpack.i.h.bf16 %v2238_v44  ;;  %v2239_v46 = vunpack.i.l.bf16 %v2238_v44 }
 0x376   : > { %v1650_v48 = vpack.c.bf16 %v2242_v45, %v2239_v46 }
 0x378   : > { %1658 = vst [vmem:[%s2690_s21 + $0x18] sm:$0xff] %v1650_v48 }
 0x37b   : > { %v2243_v62 = vpop.trf.xlu0 }
 0x37c   : > { %v2247_v49 = vunpack.i.h.bf16 %v2243_v62  ;;  %v2244_v50 = vunpack.i.l.bf16 %v2243_v62 }
 0x37e   : > { %v1651_v52 = vpack.c.bf16 %v2247_v49, %v2244_v50 }
 0x380   : > { %1659 = vst [vmem:[%s2690_s21 + $0x20] sm:$0xff] %v1651_v52 }
 0x383   : > { %v2248_v54 = vpop.trf.xlu0 }
 0x384   : > { %v2252_v55 = vunpack.i.h.bf16 %v2248_v54  ;;  %v2249_v1 = vunpack.i.l.bf16 %v2248_v54 }
 0x386   : > { %v1652_v42 = vpack.c.bf16 %v2252_v55, %v2249_v1 }
 0x388   : > { %1660 = vst [vmem:[%s2690_s21 + $0x28] sm:$0xff] %v1652_v42 }
 0x38b   : > { %v2253_v56 = vpop.trf.xlu0 }
 0x38c   : > { %v2257_v59 = vunpack.i.h.bf16 %v2253_v56  ;;  %v2254_v60 = vunpack.i.l.bf16 %v2253_v56 }
 0x38e   : > { %v1653_v61 = vpack.c.bf16 %v2257_v59, %v2254_v60 }
 0x390   : > { %1661 = vst [vmem:[%s2690_s21 + $0x30] sm:$0xff] %v1653_v61 }
 0x393   : > { %v2258_v63 = vpop.trf.xlu0 }
 0x394   : > { %v2262_v0 = vunpack.i.h.bf16 %v2258_v63  ;;  %v2259_v2 = vunpack.i.l.bf16 %v2258_v63 }
 0x396   : > { %v1654_v3 = vpack.c.bf16 %v2262_v0, %v2259_v2 }
 0x398   : > { %1662 = vst [vmem:[%s2690_s21 + $0x38] sm:$0xff] %v1654_v3 }
 0x399 PF: > { %s25_s18 = sadd.s32 1, %s2273_s18  }
 0x39a   : > { %p22_p4 = scmp.ge.s32.totalorder %s25_s18, 4  }
 0x39c   :  { %24 = sbr.rel (!%p22_p4) target bundleno = 1 (0x1), region = 119 }

</bundles_post_ra>
